<compile_context>
chip_gen: v5e
topology: v5e:2x2
jax: 0.10.0
libtpu: 0.0.40
codegen_flags: <defaults>
</compile_context>

<pallas_src>
import jax
import jax.numpy as jnp
from jax.experimental import pallas as pl
from jax.experimental.pallas import tpu as pltpu


# ---------------------------------------------------------------------------
# In-kernel building blocks (traced inside the single fused kernel)
# ---------------------------------------------------------------------------
def _conv_relu(x_ref, w_ref, b_ref, o_ref, *, k):
    """Valid 2-D conv + bias + ReLU, one output row per fori_loop step.

    x_ref: (B, Hi, Wi, Cin_pad)  activations, channels (zero padded) in lanes
    w_ref: (k*k, Cin_pad, 128)   per-tap weights, output channels padded to 128
    b_ref: (1, 128)              bias, padded to 128
    o_ref: (B, Ho, Wo, Cout)     Cout (<=128) lanes kept for the next layer
    """
    B = x_ref.shape[0]
    _, Ho, Wo, Cout = o_ref.shape
    n_lanes = w_ref.shape[-1]
    bias = b_ref[...]                                             # (1, 128)

    for b in range(B):                                            # B is tiny/static
        def row(i, carry):
            acc = jnp.zeros((Wo, n_lanes), jnp.float32)
            for kh in range(k):
                for kw in range(k):
                    xs = x_ref[b, i + kh, pl.ds(kw, Wo), :]       # (Wo, Cin_pad)
                    acc = acc + jnp.dot(xs, w_ref[kh * k + kw],
                                        preferred_element_type=jnp.float32)
            acc = jnp.maximum(acc + bias, 0.0)
            o_ref[b, i, :, :] = acc[:, :Cout]
            return carry

        jax.lax.fori_loop(0, Ho, row, 0)


def _maxpool2x2(x_ref, o_ref):
    """2x2 / stride-2 max pool, fully in VMEM.

    Height pooling = elementwise max of the two source rows; width pooling is
    done with 0/1 selection matmuls (picks even / odd columns), which avoids
    strided value slices or sublane-splitting reshapes inside Mosaic.
    """
    B, _, Wi, _ = x_ref.shape
    _, Ho, Wo, _ = o_ref.shape

    r = jax.lax.broadcasted_iota(jnp.int32, (Wo, Wi), 0)
    c = jax.lax.broadcasted_iota(jnp.int32, (Wo, Wi), 1)
    sel_e = (c == 2 * r).astype(jnp.float32)                      # cols 0,2,4,...
    sel_o = (c == 2 * r + 1).astype(jnp.float32)                  # cols 1,3,5,...

    for b in range(B):
        def row(p, carry):
            m = jnp.maximum(x_ref[b, 2 * p, :, :],
                            x_ref[b, 2 * p + 1, :, :])            # (Wi, C)
            pooled = jnp.maximum(
                jnp.dot(sel_e, m, preferred_element_type=jnp.float32),
                jnp.dot(sel_o, m, preferred_element_type=jnp.float32))
            o_ref[b, p, :, :] = pooled
            return carry

        jax.lax.fori_loop(0, Ho, row, 0)


def _lenet5_kernel(x_ref, w1_ref, b1_ref, w3_ref, b3_ref, w5_ref, b5_ref,
                   w6_ref, b6_ref, wout_ref, bout_ref, out_ref,
                   a1, p1, a3, p3, a5):
    _conv_relu(x_ref, w1_ref, b1_ref, a1, k=5)     # (B,32,32,8)  -> (B,28,28,8)
    _maxpool2x2(a1, p1)                            #              -> (B,14,14,8)
    _conv_relu(p1, w3_ref, b3_ref, a3, k=5)        #              -> (B,10,10,16)
    _maxpool2x2(a3, p3)                            #              -> (B,5,5,16)
    _conv_relu(p3, w5_ref, b5_ref, a5, k=5)        #              -> (B,1,1,128)

    # Flatten (C5 output is 1x1 spatial, so NHWC/NCHW flatten orders coincide).
    feat = a5[:, 0, 0, :]                                         # (B, 128)
    h = jnp.maximum(
        jnp.dot(feat, w6_ref[...], preferred_element_type=jnp.float32)
        + b6_ref[...], 0.0)                                       # (B, 128)
    out_ref[...] = (jnp.dot(h, wout_ref[...], preferred_element_type=jnp.float32)
                    + bout_ref[...])                              # lane-dense store


# ---------------------------------------------------------------------------
# Host-side packing (done ONCE, outside the forward path)
# ---------------------------------------------------------------------------
_PACK_ORDER = ("w1", "b1", "w3", "b3", "w5", "b5", "w6", "b6", "wo", "bo")


def pack_params(params):
    """Reshape / transpose / zero-pad every weight once for the fused kernel."""
    def pack_conv(w, b):
        co, ci, k, _ = w.shape
        ci_p = ((ci + 7) // 8) * 8                                # 1->8, 6->8, 16->16
        wt = jnp.transpose(w, (2, 3, 1, 0)).reshape(k * k, ci, co)
        wp = jnp.zeros((k * k, ci_p, 128), jnp.float32).at[:, :ci, :co].set(wt)
        bp = jnp.zeros((1, 128), jnp.float32).at[0, :co].set(b)
        return wp, bp

    def pack_fc(w, b):                                            # w: (out, in)
        o, i = w.shape
        wp = jnp.zeros((128, 128), jnp.float32).at[:i, :o].set(w.T)
        bp = jnp.zeros((1, 128), jnp.float32).at[0, :o].set(b)
        return wp, bp

    w1, b1 = pack_conv(params["C1_w"], params["C1_b"])
    w3, b3 = pack_conv(params["C3_w"], params["C3_b"])
    w5, b5 = pack_conv(params["C5_w"], params["C5_b"])
    w6, b6 = pack_fc(params["F6_w"], params["F6_b"])
    wo, bo = pack_fc(params["Out_w"], params["Out_b"])
    return {"w1": w1, "b1": b1, "w3": w3, "b3": b3, "w5": w5, "b5": b5,
            "w6": w6, "b6": b6, "wo": wo, "bo": bo}


# ---------------------------------------------------------------------------
# Forward pass: one fused pallas_call
# ---------------------------------------------------------------------------
def _full_spec(a):
    zeros = (0,) * a.ndim
    return pl.BlockSpec(a.shape, lambda i: zeros)


def lenet5_forward(x_nchw, packed):
    B = x_nchw.shape[0]
    # layout glue on the input only: NCHW -> NHWC, spatial pad 2 (C1 padding),
    # channel pad 1 -> 8 lanes.
    x = jnp.transpose(x_nchw, (0, 2, 3, 1)).astype(jnp.float32)
    x = jnp.pad(x, ((0, 0), (2, 2), (2, 2), (0, 7)))              # (B, 32, 32, 8)

    operands = [x] + [packed[k] for k in _PACK_ORDER]

    out = pl.pallas_call(
        _lenet5_kernel,
        grid=(1,),
        out_shape=jax.ShapeDtypeStruct((B, 128), jnp.float32),
        in_specs=[_full_spec(a) for a in operands],
        out_specs=pl.BlockSpec((B, 128), lambda i: (0, 0)),
        scratch_shapes=[
            pltpu.VMEM((B, 28, 28, 8), jnp.float32),    # conv1 output
            pltpu.VMEM((B, 14, 14, 8), jnp.float32),    # pool1 output
            pltpu.VMEM((B, 10, 10, 16), jnp.float32),   # conv3 output
            pltpu.VMEM((B, 5, 5, 16), jnp.float32),     # pool2 output
            pltpu.VMEM((B, 1, 1, 128), jnp.float32),    # conv5 output
        ],
        compiler_params=pltpu.CompilerParams(
            dimension_semantics=("arbitrary",)),
    )(*operands)
    return out[:, :12]                                  # 12 classes per the spec


# ---------------------------------------------------------------------------
# Parameters + plain-JAX reference (for a correctness check only)
# ---------------------------------------------------------------------------
def init_params(key):
    ks = jax.random.split(key, 10)
    s = 0.1

    def n(k, shape):
        return jax.random.normal(k, shape, jnp.float32) * s

    return {
        "C1_w": n(ks[0], (6, 1, 5, 5)),
        "C1_b": n(ks[1], (6,)),
        "C3_w": n(ks[2], (16, 6, 5, 5)),
        "C3_b": n(ks[3], (16,)),
        "C5_w": n(ks[4], (120, 16, 5, 5)),
        "C5_b": n(ks[5], (120,)),
        "F6_w": n(ks[6], (84, 120)),   # PyTorch Linear: (out, in)
        "F6_b": n(ks[7], (84,)),
        "Out_w": n(ks[8], (12, 84)),
        "Out_b": n(ks[9], (12,)),
    }


def lenet5_reference(x_nchw, params):
    hi = jax.lax.Precision.HIGHEST
    x = jnp.transpose(x_nchw, (0, 2, 3, 1))

    def conv(x, w, b, pad):
        wt = jnp.transpose(w, (2, 3, 1, 0))            # HWIO
        y = jax.lax.conv_general_dilated(
            x, wt, window_strides=(1, 1), padding=[(pad, pad), (pad, pad)],
            dimension_numbers=("NHWC", "HWIO", "NHWC"), precision=hi)
        return jnp.maximum(y + b, 0.0)

    def pool(x):
        B, H, W, C = x.shape
        return jnp.max(x.reshape(B, H // 2, 2, W // 2, 2, C), axis=(2, 4))

    x = conv(x, params["C1_w"], params["C1_b"], 2)
    x = pool(x)
    x = conv(x, params["C3_w"], params["C3_b"], 0)
    x = pool(x)
    x = conv(x, params["C5_w"], params["C5_b"], 0)
    x = x.reshape(x.shape[0], -1)
    x = jnp.maximum(jnp.dot(x, params["F6_w"].T, precision=hi) + params["F6_b"], 0.0)
    x = jnp.dot(x, params["Out_w"].T, precision=hi) + params["Out_b"]
    return x


if __name__ == "__main__":
    key = jax.random.PRNGKey(0)
    k_x, k_p = jax.random.split(key)
    # C1 padding=2 and C5 5x5 -> 1x1 imply 28x28 single-channel input.
    x = jax.random.normal(k_x, (2, 1, 28, 28), jnp.float32)
    params = init_params(k_p)
    packed = pack_params(params)          # weight prep hoisted out of forward

    fwd = jax.jit(lenet5_forward)
    out = jax.block_until_ready(fwd(x, packed))
    assert out.shape == (2, 12), out.shape

    ref = lenet5_reference(x, params)
    err = float(jnp.max(jnp.abs(out - ref)))
    assert err < 3e-2, f"max abs err vs reference: {err}"
    print("KERNEL_OK")
</pallas_src>

<mosaic_0001>
module attributes {stable_mosaic.version = 11 : i64} {
  func.func @_lenet5_kernel(%arg0: i32, %arg1: memref<2x32x32x8xf32, #tpu.memory_space<vmem>>, %arg2: memref<25x8x128xf32, #tpu.memory_space<vmem>>, %arg3: memref<1x128xf32, #tpu.memory_space<vmem>>, %arg4: memref<25x8x128xf32, #tpu.memory_space<vmem>>, %arg5: memref<1x128xf32, #tpu.memory_space<vmem>>, %arg6: memref<25x16x128xf32, #tpu.memory_space<vmem>>, %arg7: memref<1x128xf32, #tpu.memory_space<vmem>>, %arg8: memref<128x128xf32, #tpu.memory_space<vmem>>, %arg9: memref<1x128xf32, #tpu.memory_space<vmem>>, %arg10: memref<128x128xf32, #tpu.memory_space<vmem>>, %arg11: memref<1x128xf32, #tpu.memory_space<vmem>>, %arg12: memref<2x128xf32, #tpu.memory_space<vmem>>, %arg13: memref<2x28x28x8xf32, #tpu.memory_space<vmem>>, %arg14: memref<2x14x14x8xf32, #tpu.memory_space<vmem>>, %arg15: memref<2x10x10x16xf32, #tpu.memory_space<vmem>>, %arg16: memref<2x5x5x16xf32, #tpu.memory_space<vmem>>, %arg17: memref<2x1x1x128xf32, #tpu.memory_space<vmem>>) attributes {dimension_semantics = [#tpu.dimension_semantics<arbitrary>], iteration_bounds = array<i64: 1>, scalar_prefetch = 0 : i64, scratch_operands = 5 : i64, tpu.core_type = #tpu.core_type<tc>, window_params = [{pipeline_mode = #tpu.pipeline_mode<synchronous>, transform_indices = @transform_0, window_bounds = array<i64: 2, 32, 32, 8>}, {pipeline_mode = #tpu.pipeline_mode<synchronous>, transform_indices = @transform_1, window_bounds = array<i64: 25, 8, 128>}, {pipeline_mode = #tpu.pipeline_mode<synchronous>, transform_indices = @transform_2, window_bounds = array<i64: 1, 128>}, {pipeline_mode = #tpu.pipeline_mode<synchronous>, transform_indices = @transform_3, window_bounds = array<i64: 25, 8, 128>}, {pipeline_mode = #tpu.pipeline_mode<synchronous>, transform_indices = @transform_4, window_bounds = array<i64: 1, 128>}, {pipeline_mode = #tpu.pipeline_mode<synchronous>, transform_indices = @transform_5, window_bounds = array<i64: 25, 16, 128>}, {pipeline_mode = #tpu.pipeline_mode<synchronous>, transform_indices = @transform_6, window_bounds = array<i64: 1, 128>}, {pipeline_mode = #tpu.pipeline_mode<synchronous>, transform_indices = @transform_7, window_bounds = array<i64: 128, 128>}, {pipeline_mode = #tpu.pipeline_mode<synchronous>, transform_indices = @transform_8, window_bounds = array<i64: 1, 128>}, {pipeline_mode = #tpu.pipeline_mode<synchronous>, transform_indices = @transform_9, window_bounds = array<i64: 128, 128>}, {pipeline_mode = #tpu.pipeline_mode<synchronous>, transform_indices = @transform_10, window_bounds = array<i64: 1, 128>}, {pipeline_mode = #tpu.pipeline_mode<synchronous>, transform_indices = @transform_11, window_bounds = array<i64: 2, 128>}]} {
    %c0 = arith.constant 0 : index
    %c0_0 = arith.constant 0 : index
    %0 = vector.load %arg3[%c0, %c0_0] : memref<1x128xf32, #tpu.memory_space<vmem>>, vector<1x128xf32>
    %c0_i32 = arith.constant 0 : i32
    %c28_i32 = arith.constant 28 : i32
    %1 = arith.addi %c0_i32, %c28_i32 : i32
    %c1_i32 = arith.constant 1 : i32
    scf.for %arg18 = %c0_i32 to %1 step %c1_i32  : i32 {
      %cst_440 = arith.constant 0.000000e+00 : f32
      %470 = vector.broadcast %cst_440 : f32 to vector<28x128xf32>
      %c0_i32_441 = arith.constant 0 : i32
      %471 = arith.addi %arg18, %c0_i32_441 : i32
      %c0_442 = arith.constant 0 : index
      %472 = arith.index_cast %471 : i32 to index
      %c0_443 = arith.constant 0 : index
      %c0_444 = arith.constant 0 : index
      %473 = vector.load %arg1[%c0_442, %472, %c0_443, %c0_444] : memref<2x32x32x8xf32, #tpu.memory_space<vmem>>, vector<1x1x28x8xf32>
      %474 = vector.shape_cast %473 : vector<1x1x28x8xf32> to vector<28x8xf32>
      %c0_445 = arith.constant 0 : index
      %c0_446 = arith.constant 0 : index
      %c0_447 = arith.constant 0 : index
      %475 = vector.load %arg2[%c0_445, %c0_446, %c0_447] : memref<25x8x128xf32, #tpu.memory_space<vmem>>, vector<1x8x128xf32>
      %476 = vector.shape_cast %475 : vector<1x8x128xf32> to vector<8x128xf32>
      %cst_448 = arith.constant dense<0.000000e+00> : vector<28x128xf32>
      %477 = tpu.matmul %474, %476, %cst_448 {dimension_numbers = #tpu.dot_dimension_numbers<[1], [0], [0], [1], [0, 0, 1, 1], [], []>} : vector<28x8xf32>, vector<8x128xf32>, vector<28x128xf32> -> vector<28x128xf32>
      %478 = arith.addf %470, %477 : vector<28x128xf32>
      %c0_i32_449 = arith.constant 0 : i32
      %479 = arith.addi %arg18, %c0_i32_449 : i32
      %c0_450 = arith.constant 0 : index
      %480 = arith.index_cast %479 : i32 to index
      %c1_451 = arith.constant 1 : index
      %c0_452 = arith.constant 0 : index
      %481 = vector.load %arg1[%c0_450, %480, %c1_451, %c0_452] : memref<2x32x32x8xf32, #tpu.memory_space<vmem>>, vector<1x1x28x8xf32>
      %482 = vector.shape_cast %481 : vector<1x1x28x8xf32> to vector<28x8xf32>
      %c1_453 = arith.constant 1 : index
      %c0_454 = arith.constant 0 : index
      %c0_455 = arith.constant 0 : index
      %483 = vector.load %arg2[%c1_453, %c0_454, %c0_455] : memref<25x8x128xf32, #tpu.memory_space<vmem>>, vector<1x8x128xf32>
      %484 = vector.shape_cast %483 : vector<1x8x128xf32> to vector<8x128xf32>
      %cst_456 = arith.constant dense<0.000000e+00> : vector<28x128xf32>
      %485 = tpu.matmul %482, %484, %cst_456 {dimension_numbers = #tpu.dot_dimension_numbers<[1], [0], [0], [1], [0, 0, 1, 1], [], []>} : vector<28x8xf32>, vector<8x128xf32>, vector<28x128xf32> -> vector<28x128xf32>
      %486 = arith.addf %478, %485 : vector<28x128xf32>
      %c0_i32_457 = arith.constant 0 : i32
      %487 = arith.addi %arg18, %c0_i32_457 : i32
      %c0_458 = arith.constant 0 : index
      %488 = arith.index_cast %487 : i32 to index
      %c2_459 = arith.constant 2 : index
      %c0_460 = arith.constant 0 : index
      %489 = vector.load %arg1[%c0_458, %488, %c2_459, %c0_460] : memref<2x32x32x8xf32, #tpu.memory_space<vmem>>, vector<1x1x28x8xf32>
      %490 = vector.shape_cast %489 : vector<1x1x28x8xf32> to vector<28x8xf32>
      %c2_461 = arith.constant 2 : index
      %c0_462 = arith.constant 0 : index
      %c0_463 = arith.constant 0 : index
      %491 = vector.load %arg2[%c2_461, %c0_462, %c0_463] : memref<25x8x128xf32, #tpu.memory_space<vmem>>, vector<1x8x128xf32>
      %492 = vector.shape_cast %491 : vector<1x8x128xf32> to vector<8x128xf32>
      %cst_464 = arith.constant dense<0.000000e+00> : vector<28x128xf32>
      %493 = tpu.matmul %490, %492, %cst_464 {dimension_numbers = #tpu.dot_dimension_numbers<[1], [0], [0], [1], [0, 0, 1, 1], [], []>} : vector<28x8xf32>, vector<8x128xf32>, vector<28x128xf32> -> vector<28x128xf32>
      %494 = arith.addf %486, %493 : vector<28x128xf32>
      %c0_i32_465 = arith.constant 0 : i32
      %495 = arith.addi %arg18, %c0_i32_465 : i32
      %c0_466 = arith.constant 0 : index
      %496 = arith.index_cast %495 : i32 to index
      %c3_467 = arith.constant 3 : index
      %c0_468 = arith.constant 0 : index
      %497 = vector.load %arg1[%c0_466, %496, %c3_467, %c0_468] : memref<2x32x32x8xf32, #tpu.memory_space<vmem>>, vector<1x1x28x8xf32>
      %498 = vector.shape_cast %497 : vector<1x1x28x8xf32> to vector<28x8xf32>
      %c3_469 = arith.constant 3 : index
      %c0_470 = arith.constant 0 : index
      %c0_471 = arith.constant 0 : index
      %499 = vector.load %arg2[%c3_469, %c0_470, %c0_471] : memref<25x8x128xf32, #tpu.memory_space<vmem>>, vector<1x8x128xf32>
      %500 = vector.shape_cast %499 : vector<1x8x128xf32> to vector<8x128xf32>
      %cst_472 = arith.constant dense<0.000000e+00> : vector<28x128xf32>
      %501 = tpu.matmul %498, %500, %cst_472 {dimension_numbers = #tpu.dot_dimension_numbers<[1], [0], [0], [1], [0, 0, 1, 1], [], []>} : vector<28x8xf32>, vector<8x128xf32>, vector<28x128xf32> -> vector<28x128xf32>
      %502 = arith.addf %494, %501 : vector<28x128xf32>
      %c0_i32_473 = arith.constant 0 : i32
      %503 = arith.addi %arg18, %c0_i32_473 : i32
      %c0_474 = arith.constant 0 : index
      %504 = arith.index_cast %503 : i32 to index
      %c4_475 = arith.constant 4 : index
      %c0_476 = arith.constant 0 : index
      %505 = vector.load %arg1[%c0_474, %504, %c4_475, %c0_476] : memref<2x32x32x8xf32, #tpu.memory_space<vmem>>, vector<1x1x28x8xf32>
      %506 = vector.shape_cast %505 : vector<1x1x28x8xf32> to vector<28x8xf32>
      %c4_477 = arith.constant 4 : index
      %c0_478 = arith.constant 0 : index
      %c0_479 = arith.constant 0 : index
      %507 = vector.load %arg2[%c4_477, %c0_478, %c0_479] : memref<25x8x128xf32, #tpu.memory_space<vmem>>, vector<1x8x128xf32>
      %508 = vector.shape_cast %507 : vector<1x8x128xf32> to vector<8x128xf32>
      %cst_480 = arith.constant dense<0.000000e+00> : vector<28x128xf32>
      %509 = tpu.matmul %506, %508, %cst_480 {dimension_numbers = #tpu.dot_dimension_numbers<[1], [0], [0], [1], [0, 0, 1, 1], [], []>} : vector<28x8xf32>, vector<8x128xf32>, vector<28x128xf32> -> vector<28x128xf32>
      %510 = arith.addf %502, %509 : vector<28x128xf32>
      %c1_i32_481 = arith.constant 1 : i32
      %511 = arith.addi %arg18, %c1_i32_481 : i32
      %c0_482 = arith.constant 0 : index
      %512 = arith.index_cast %511 : i32 to index
      %c0_483 = arith.constant 0 : index
      %c0_484 = arith.constant 0 : index
      %513 = vector.load %arg1[%c0_482, %512, %c0_483, %c0_484] : memref<2x32x32x8xf32, #tpu.memory_space<vmem>>, vector<1x1x28x8xf32>
      %514 = vector.shape_cast %513 : vector<1x1x28x8xf32> to vector<28x8xf32>
      %c5_485 = arith.constant 5 : index
      %c0_486 = arith.constant 0 : index
      %c0_487 = arith.constant 0 : index
      %515 = vector.load %arg2[%c5_485, %c0_486, %c0_487] : memref<25x8x128xf32, #tpu.memory_space<vmem>>, vector<1x8x128xf32>
      %516 = vector.shape_cast %515 : vector<1x8x128xf32> to vector<8x128xf32>
      %cst_488 = arith.constant dense<0.000000e+00> : vector<28x128xf32>
      %517 = tpu.matmul %514, %516, %cst_488 {dimension_numbers = #tpu.dot_dimension_numbers<[1], [0], [0], [1], [0, 0, 1, 1], [], []>} : vector<28x8xf32>, vector<8x128xf32>, vector<28x128xf32> -> vector<28x128xf32>
      %518 = arith.addf %510, %517 : vector<28x128xf32>
      %c1_i32_489 = arith.constant 1 : i32
      %519 = arith.addi %arg18, %c1_i32_489 : i32
      %c0_490 = arith.constant 0 : index
      %520 = arith.index_cast %519 : i32 to index
      %c1_491 = arith.constant 1 : index
      %c0_492 = arith.constant 0 : index
      %521 = vector.load %arg1[%c0_490, %520, %c1_491, %c0_492] : memref<2x32x32x8xf32, #tpu.memory_space<vmem>>, vector<1x1x28x8xf32>
      %522 = vector.shape_cast %521 : vector<1x1x28x8xf32> to vector<28x8xf32>
      %c6_493 = arith.constant 6 : index
      %c0_494 = arith.constant 0 : index
      %c0_495 = arith.constant 0 : index
      %523 = vector.load %arg2[%c6_493, %c0_494, %c0_495] : memref<25x8x128xf32, #tpu.memory_space<vmem>>, vector<1x8x128xf32>
      %524 = vector.shape_cast %523 : vector<1x8x128xf32> to vector<8x128xf32>
      %cst_496 = arith.constant dense<0.000000e+00> : vector<28x128xf32>
      %525 = tpu.matmul %522, %524, %cst_496 {dimension_numbers = #tpu.dot_dimension_numbers<[1], [0], [0], [1], [0, 0, 1, 1], [], []>} : vector<28x8xf32>, vector<8x128xf32>, vector<28x128xf32> -> vector<28x128xf32>
      %526 = arith.addf %518, %525 : vector<28x128xf32>
      %c1_i32_497 = arith.constant 1 : i32
      %527 = arith.addi %arg18, %c1_i32_497 : i32
      %c0_498 = arith.constant 0 : index
      %528 = arith.index_cast %527 : i32 to index
      %c2_499 = arith.constant 2 : index
      %c0_500 = arith.constant 0 : index
      %529 = vector.load %arg1[%c0_498, %528, %c2_499, %c0_500] : memref<2x32x32x8xf32, #tpu.memory_space<vmem>>, vector<1x1x28x8xf32>
      %530 = vector.shape_cast %529 : vector<1x1x28x8xf32> to vector<28x8xf32>
      %c7_501 = arith.constant 7 : index
      %c0_502 = arith.constant 0 : index
      %c0_503 = arith.constant 0 : index
      %531 = vector.load %arg2[%c7_501, %c0_502, %c0_503] : memref<25x8x128xf32, #tpu.memory_space<vmem>>, vector<1x8x128xf32>
      %532 = vector.shape_cast %531 : vector<1x8x128xf32> to vector<8x128xf32>
      %cst_504 = arith.constant dense<0.000000e+00> : vector<28x128xf32>
      %533 = tpu.matmul %530, %532, %cst_504 {dimension_numbers = #tpu.dot_dimension_numbers<[1], [0], [0], [1], [0, 0, 1, 1], [], []>} : vector<28x8xf32>, vector<8x128xf32>, vector<28x128xf32> -> vector<28x128xf32>
      %534 = arith.addf %526, %533 : vector<28x128xf32>
      %c1_i32_505 = arith.constant 1 : i32
      %535 = arith.addi %arg18, %c1_i32_505 : i32
      %c0_506 = arith.constant 0 : index
      %536 = arith.index_cast %535 : i32 to index
      %c3_507 = arith.constant 3 : index
      %c0_508 = arith.constant 0 : index
      %537 = vector.load %arg1[%c0_506, %536, %c3_507, %c0_508] : memref<2x32x32x8xf32, #tpu.memory_space<vmem>>, vector<1x1x28x8xf32>
      %538 = vector.shape_cast %537 : vector<1x1x28x8xf32> to vector<28x8xf32>
      %c8_509 = arith.constant 8 : index
      %c0_510 = arith.constant 0 : index
      %c0_511 = arith.constant 0 : index
      %539 = vector.load %arg2[%c8_509, %c0_510, %c0_511] : memref<25x8x128xf32, #tpu.memory_space<vmem>>, vector<1x8x128xf32>
      %540 = vector.shape_cast %539 : vector<1x8x128xf32> to vector<8x128xf32>
      %cst_512 = arith.constant dense<0.000000e+00> : vector<28x128xf32>
      %541 = tpu.matmul %538, %540, %cst_512 {dimension_numbers = #tpu.dot_dimension_numbers<[1], [0], [0], [1], [0, 0, 1, 1], [], []>} : vector<28x8xf32>, vector<8x128xf32>, vector<28x128xf32> -> vector<28x128xf32>
      %542 = arith.addf %534, %541 : vector<28x128xf32>
      %c1_i32_513 = arith.constant 1 : i32
      %543 = arith.addi %arg18, %c1_i32_513 : i32
      %c0_514 = arith.constant 0 : index
      %544 = arith.index_cast %543 : i32 to index
      %c4_515 = arith.constant 4 : index
      %c0_516 = arith.constant 0 : index
      %545 = vector.load %arg1[%c0_514, %544, %c4_515, %c0_516] : memref<2x32x32x8xf32, #tpu.memory_space<vmem>>, vector<1x1x28x8xf32>
      %546 = vector.shape_cast %545 : vector<1x1x28x8xf32> to vector<28x8xf32>
      %c9_517 = arith.constant 9 : index
      %c0_518 = arith.constant 0 : index
      %c0_519 = arith.constant 0 : index
      %547 = vector.load %arg2[%c9_517, %c0_518, %c0_519] : memref<25x8x128xf32, #tpu.memory_space<vmem>>, vector<1x8x128xf32>
      %548 = vector.shape_cast %547 : vector<1x8x128xf32> to vector<8x128xf32>
      %cst_520 = arith.constant dense<0.000000e+00> : vector<28x128xf32>
      %549 = tpu.matmul %546, %548, %cst_520 {dimension_numbers = #tpu.dot_dimension_numbers<[1], [0], [0], [1], [0, 0, 1, 1], [], []>} : vector<28x8xf32>, vector<8x128xf32>, vector<28x128xf32> -> vector<28x128xf32>
      %550 = arith.addf %542, %549 : vector<28x128xf32>
      %c2_i32_521 = arith.constant 2 : i32
      %551 = arith.addi %arg18, %c2_i32_521 : i32
      %c0_522 = arith.constant 0 : index
      %552 = arith.index_cast %551 : i32 to index
      %c0_523 = arith.constant 0 : index
      %c0_524 = arith.constant 0 : index
      %553 = vector.load %arg1[%c0_522, %552, %c0_523, %c0_524] : memref<2x32x32x8xf32, #tpu.memory_space<vmem>>, vector<1x1x28x8xf32>
      %554 = vector.shape_cast %553 : vector<1x1x28x8xf32> to vector<28x8xf32>
      %c10_525 = arith.constant 10 : index
      %c0_526 = arith.constant 0 : index
      %c0_527 = arith.constant 0 : index
      %555 = vector.load %arg2[%c10_525, %c0_526, %c0_527] : memref<25x8x128xf32, #tpu.memory_space<vmem>>, vector<1x8x128xf32>
      %556 = vector.shape_cast %555 : vector<1x8x128xf32> to vector<8x128xf32>
      %cst_528 = arith.constant dense<0.000000e+00> : vector<28x128xf32>
      %557 = tpu.matmul %554, %556, %cst_528 {dimension_numbers = #tpu.dot_dimension_numbers<[1], [0], [0], [1], [0, 0, 1, 1], [], []>} : vector<28x8xf32>, vector<8x128xf32>, vector<28x128xf32> -> vector<28x128xf32>
      %558 = arith.addf %550, %557 : vector<28x128xf32>
      %c2_i32_529 = arith.constant 2 : i32
      %559 = arith.addi %arg18, %c2_i32_529 : i32
      %c0_530 = arith.constant 0 : index
      %560 = arith.index_cast %559 : i32 to index
      %c1_531 = arith.constant 1 : index
      %c0_532 = arith.constant 0 : index
      %561 = vector.load %arg1[%c0_530, %560, %c1_531, %c0_532] : memref<2x32x32x8xf32, #tpu.memory_space<vmem>>, vector<1x1x28x8xf32>
      %562 = vector.shape_cast %561 : vector<1x1x28x8xf32> to vector<28x8xf32>
      %c11_533 = arith.constant 11 : index
      %c0_534 = arith.constant 0 : index
      %c0_535 = arith.constant 0 : index
      %563 = vector.load %arg2[%c11_533, %c0_534, %c0_535] : memref<25x8x128xf32, #tpu.memory_space<vmem>>, vector<1x8x128xf32>
      %564 = vector.shape_cast %563 : vector<1x8x128xf32> to vector<8x128xf32>
      %cst_536 = arith.constant dense<0.000000e+00> : vector<28x128xf32>
      %565 = tpu.matmul %562, %564, %cst_536 {dimension_numbers = #tpu.dot_dimension_numbers<[1], [0], [0], [1], [0, 0, 1, 1], [], []>} : vector<28x8xf32>, vector<8x128xf32>, vector<28x128xf32> -> vector<28x128xf32>
      %566 = arith.addf %558, %565 : vector<28x128xf32>
      %c2_i32_537 = arith.constant 2 : i32
      %567 = arith.addi %arg18, %c2_i32_537 : i32
      %c0_538 = arith.constant 0 : index
      %568 = arith.index_cast %567 : i32 to index
      %c2_539 = arith.constant 2 : index
      %c0_540 = arith.constant 0 : index
      %569 = vector.load %arg1[%c0_538, %568, %c2_539, %c0_540] : memref<2x32x32x8xf32, #tpu.memory_space<vmem>>, vector<1x1x28x8xf32>
      %570 = vector.shape_cast %569 : vector<1x1x28x8xf32> to vector<28x8xf32>
      %c12_541 = arith.constant 12 : index
      %c0_542 = arith.constant 0 : index
      %c0_543 = arith.constant 0 : index
      %571 = vector.load %arg2[%c12_541, %c0_542, %c0_543] : memref<25x8x128xf32, #tpu.memory_space<vmem>>, vector<1x8x128xf32>
      %572 = vector.shape_cast %571 : vector<1x8x128xf32> to vector<8x128xf32>
      %cst_544 = arith.constant dense<0.000000e+00> : vector<28x128xf32>
      %573 = tpu.matmul %570, %572, %cst_544 {dimension_numbers = #tpu.dot_dimension_numbers<[1], [0], [0], [1], [0, 0, 1, 1], [], []>} : vector<28x8xf32>, vector<8x128xf32>, vector<28x128xf32> -> vector<28x128xf32>
      %574 = arith.addf %566, %573 : vector<28x128xf32>
      %c2_i32_545 = arith.constant 2 : i32
      %575 = arith.addi %arg18, %c2_i32_545 : i32
      %c0_546 = arith.constant 0 : index
      %576 = arith.index_cast %575 : i32 to index
      %c3_547 = arith.constant 3 : index
      %c0_548 = arith.constant 0 : index
      %577 = vector.load %arg1[%c0_546, %576, %c3_547, %c0_548] : memref<2x32x32x8xf32, #tpu.memory_space<vmem>>, vector<1x1x28x8xf32>
      %578 = vector.shape_cast %577 : vector<1x1x28x8xf32> to vector<28x8xf32>
      %c13_549 = arith.constant 13 : index
      %c0_550 = arith.constant 0 : index
      %c0_551 = arith.constant 0 : index
      %579 = vector.load %arg2[%c13_549, %c0_550, %c0_551] : memref<25x8x128xf32, #tpu.memory_space<vmem>>, vector<1x8x128xf32>
      %580 = vector.shape_cast %579 : vector<1x8x128xf32> to vector<8x128xf32>
      %cst_552 = arith.constant dense<0.000000e+00> : vector<28x128xf32>
      %581 = tpu.matmul %578, %580, %cst_552 {dimension_numbers = #tpu.dot_dimension_numbers<[1], [0], [0], [1], [0, 0, 1, 1], [], []>} : vector<28x8xf32>, vector<8x128xf32>, vector<28x128xf32> -> vector<28x128xf32>
      %582 = arith.addf %574, %581 : vector<28x128xf32>
      %c2_i32_553 = arith.constant 2 : i32
      %583 = arith.addi %arg18, %c2_i32_553 : i32
      %c0_554 = arith.constant 0 : index
      %584 = arith.index_cast %583 : i32 to index
      %c4_555 = arith.constant 4 : index
      %c0_556 = arith.constant 0 : index
      %585 = vector.load %arg1[%c0_554, %584, %c4_555, %c0_556] : memref<2x32x32x8xf32, #tpu.memory_space<vmem>>, vector<1x1x28x8xf32>
      %586 = vector.shape_cast %585 : vector<1x1x28x8xf32> to vector<28x8xf32>
      %c14_557 = arith.constant 14 : index
      %c0_558 = arith.constant 0 : index
      %c0_559 = arith.constant 0 : index
      %587 = vector.load %arg2[%c14_557, %c0_558, %c0_559] : memref<25x8x128xf32, #tpu.memory_space<vmem>>, vector<1x8x128xf32>
      %588 = vector.shape_cast %587 : vector<1x8x128xf32> to vector<8x128xf32>
      %cst_560 = arith.constant dense<0.000000e+00> : vector<28x128xf32>
      %589 = tpu.matmul %586, %588, %cst_560 {dimension_numbers = #tpu.dot_dimension_numbers<[1], [0], [0], [1], [0, 0, 1, 1], [], []>} : vector<28x8xf32>, vector<8x128xf32>, vector<28x128xf32> -> vector<28x128xf32>
      %590 = arith.addf %582, %589 : vector<28x128xf32>
      %c3_i32_561 = arith.constant 3 : i32
      %591 = arith.addi %arg18, %c3_i32_561 : i32
      %c0_562 = arith.constant 0 : index
      %592 = arith.index_cast %591 : i32 to index
      %c0_563 = arith.constant 0 : index
      %c0_564 = arith.constant 0 : index
      %593 = vector.load %arg1[%c0_562, %592, %c0_563, %c0_564] : memref<2x32x32x8xf32, #tpu.memory_space<vmem>>, vector<1x1x28x8xf32>
      %594 = vector.shape_cast %593 : vector<1x1x28x8xf32> to vector<28x8xf32>
      %c15_565 = arith.constant 15 : index
      %c0_566 = arith.constant 0 : index
      %c0_567 = arith.constant 0 : index
      %595 = vector.load %arg2[%c15_565, %c0_566, %c0_567] : memref<25x8x128xf32, #tpu.memory_space<vmem>>, vector<1x8x128xf32>
      %596 = vector.shape_cast %595 : vector<1x8x128xf32> to vector<8x128xf32>
      %cst_568 = arith.constant dense<0.000000e+00> : vector<28x128xf32>
      %597 = tpu.matmul %594, %596, %cst_568 {dimension_numbers = #tpu.dot_dimension_numbers<[1], [0], [0], [1], [0, 0, 1, 1], [], []>} : vector<28x8xf32>, vector<8x128xf32>, vector<28x128xf32> -> vector<28x128xf32>
      %598 = arith.addf %590, %597 : vector<28x128xf32>
      %c3_i32_569 = arith.constant 3 : i32
      %599 = arith.addi %arg18, %c3_i32_569 : i32
      %c0_570 = arith.constant 0 : index
      %600 = arith.index_cast %599 : i32 to index
      %c1_571 = arith.constant 1 : index
      %c0_572 = arith.constant 0 : index
      %601 = vector.load %arg1[%c0_570, %600, %c1_571, %c0_572] : memref<2x32x32x8xf32, #tpu.memory_space<vmem>>, vector<1x1x28x8xf32>
      %602 = vector.shape_cast %601 : vector<1x1x28x8xf32> to vector<28x8xf32>
      %c16_573 = arith.constant 16 : index
      %c0_574 = arith.constant 0 : index
      %c0_575 = arith.constant 0 : index
      %603 = vector.load %arg2[%c16_573, %c0_574, %c0_575] : memref<25x8x128xf32, #tpu.memory_space<vmem>>, vector<1x8x128xf32>
      %604 = vector.shape_cast %603 : vector<1x8x128xf32> to vector<8x128xf32>
      %cst_576 = arith.constant dense<0.000000e+00> : vector<28x128xf32>
      %605 = tpu.matmul %602, %604, %cst_576 {dimension_numbers = #tpu.dot_dimension_numbers<[1], [0], [0], [1], [0, 0, 1, 1], [], []>} : vector<28x8xf32>, vector<8x128xf32>, vector<28x128xf32> -> vector<28x128xf32>
      %606 = arith.addf %598, %605 : vector<28x128xf32>
      %c3_i32_577 = arith.constant 3 : i32
      %607 = arith.addi %arg18, %c3_i32_577 : i32
      %c0_578 = arith.constant 0 : index
      %608 = arith.index_cast %607 : i32 to index
      %c2_579 = arith.constant 2 : index
      %c0_580 = arith.constant 0 : index
      %609 = vector.load %arg1[%c0_578, %608, %c2_579, %c0_580] : memref<2x32x32x8xf32, #tpu.memory_space<vmem>>, vector<1x1x28x8xf32>
      %610 = vector.shape_cast %609 : vector<1x1x28x8xf32> to vector<28x8xf32>
      %c17_581 = arith.constant 17 : index
      %c0_582 = arith.constant 0 : index
      %c0_583 = arith.constant 0 : index
      %611 = vector.load %arg2[%c17_581, %c0_582, %c0_583] : memref<25x8x128xf32, #tpu.memory_space<vmem>>, vector<1x8x128xf32>
      %612 = vector.shape_cast %611 : vector<1x8x128xf32> to vector<8x128xf32>
      %cst_584 = arith.constant dense<0.000000e+00> : vector<28x128xf32>
      %613 = tpu.matmul %610, %612, %cst_584 {dimension_numbers = #tpu.dot_dimension_numbers<[1], [0], [0], [1], [0, 0, 1, 1], [], []>} : vector<28x8xf32>, vector<8x128xf32>, vector<28x128xf32> -> vector<28x128xf32>
      %614 = arith.addf %606, %613 : vector<28x128xf32>
      %c3_i32_585 = arith.constant 3 : i32
      %615 = arith.addi %arg18, %c3_i32_585 : i32
      %c0_586 = arith.constant 0 : index
      %616 = arith.index_cast %615 : i32 to index
      %c3_587 = arith.constant 3 : index
      %c0_588 = arith.constant 0 : index
      %617 = vector.load %arg1[%c0_586, %616, %c3_587, %c0_588] : memref<2x32x32x8xf32, #tpu.memory_space<vmem>>, vector<1x1x28x8xf32>
      %618 = vector.shape_cast %617 : vector<1x1x28x8xf32> to vector<28x8xf32>
      %c18_589 = arith.constant 18 : index
      %c0_590 = arith.constant 0 : index
      %c0_591 = arith.constant 0 : index
      %619 = vector.load %arg2[%c18_589, %c0_590, %c0_591] : memref<25x8x128xf32, #tpu.memory_space<vmem>>, vector<1x8x128xf32>
      %620 = vector.shape_cast %619 : vector<1x8x128xf32> to vector<8x128xf32>
      %cst_592 = arith.constant dense<0.000000e+00> : vector<28x128xf32>
      %621 = tpu.matmul %618, %620, %cst_592 {dimension_numbers = #tpu.dot_dimension_numbers<[1], [0], [0], [1], [0, 0, 1, 1], [], []>} : vector<28x8xf32>, vector<8x128xf32>, vector<28x128xf32> -> vector<28x128xf32>
      %622 = arith.addf %614, %621 : vector<28x128xf32>
      %c3_i32_593 = arith.constant 3 : i32
      %623 = arith.addi %arg18, %c3_i32_593 : i32
      %c0_594 = arith.constant 0 : index
      %624 = arith.index_cast %623 : i32 to index
      %c4_595 = arith.constant 4 : index
      %c0_596 = arith.constant 0 : index
      %625 = vector.load %arg1[%c0_594, %624, %c4_595, %c0_596] : memref<2x32x32x8xf32, #tpu.memory_space<vmem>>, vector<1x1x28x8xf32>
      %626 = vector.shape_cast %625 : vector<1x1x28x8xf32> to vector<28x8xf32>
      %c19_597 = arith.constant 19 : index
      %c0_598 = arith.constant 0 : index
      %c0_599 = arith.constant 0 : index
      %627 = vector.load %arg2[%c19_597, %c0_598, %c0_599] : memref<25x8x128xf32, #tpu.memory_space<vmem>>, vector<1x8x128xf32>
      %628 = vector.shape_cast %627 : vector<1x8x128xf32> to vector<8x128xf32>
      %cst_600 = arith.constant dense<0.000000e+00> : vector<28x128xf32>
      %629 = tpu.matmul %626, %628, %cst_600 {dimension_numbers = #tpu.dot_dimension_numbers<[1], [0], [0], [1], [0, 0, 1, 1], [], []>} : vector<28x8xf32>, vector<8x128xf32>, vector<28x128xf32> -> vector<28x128xf32>
      %630 = arith.addf %622, %629 : vector<28x128xf32>
      %c4_i32_601 = arith.constant 4 : i32
      %631 = arith.addi %arg18, %c4_i32_601 : i32
      %c0_602 = arith.constant 0 : index
      %632 = arith.index_cast %631 : i32 to index
      %c0_603 = arith.constant 0 : index
      %c0_604 = arith.constant 0 : index
      %633 = vector.load %arg1[%c0_602, %632, %c0_603, %c0_604] : memref<2x32x32x8xf32, #tpu.memory_space<vmem>>, vector<1x1x28x8xf32>
      %634 = vector.shape_cast %633 : vector<1x1x28x8xf32> to vector<28x8xf32>
      %c20_605 = arith.constant 20 : index
      %c0_606 = arith.constant 0 : index
      %c0_607 = arith.constant 0 : index
      %635 = vector.load %arg2[%c20_605, %c0_606, %c0_607] : memref<25x8x128xf32, #tpu.memory_space<vmem>>, vector<1x8x128xf32>
      %636 = vector.shape_cast %635 : vector<1x8x128xf32> to vector<8x128xf32>
      %cst_608 = arith.constant dense<0.000000e+00> : vector<28x128xf32>
      %637 = tpu.matmul %634, %636, %cst_608 {dimension_numbers = #tpu.dot_dimension_numbers<[1], [0], [0], [1], [0, 0, 1, 1], [], []>} : vector<28x8xf32>, vector<8x128xf32>, vector<28x128xf32> -> vector<28x128xf32>
      %638 = arith.addf %630, %637 : vector<28x128xf32>
      %c4_i32_609 = arith.constant 4 : i32
      %639 = arith.addi %arg18, %c4_i32_609 : i32
      %c0_610 = arith.constant 0 : index
      %640 = arith.index_cast %639 : i32 to index
      %c1_611 = arith.constant 1 : index
      %c0_612 = arith.constant 0 : index
      %641 = vector.load %arg1[%c0_610, %640, %c1_611, %c0_612] : memref<2x32x32x8xf32, #tpu.memory_space<vmem>>, vector<1x1x28x8xf32>
      %642 = vector.shape_cast %641 : vector<1x1x28x8xf32> to vector<28x8xf32>
      %c21_613 = arith.constant 21 : index
      %c0_614 = arith.constant 0 : index
      %c0_615 = arith.constant 0 : index
      %643 = vector.load %arg2[%c21_613, %c0_614, %c0_615] : memref<25x8x128xf32, #tpu.memory_space<vmem>>, vector<1x8x128xf32>
      %644 = vector.shape_cast %643 : vector<1x8x128xf32> to vector<8x128xf32>
      %cst_616 = arith.constant dense<0.000000e+00> : vector<28x128xf32>
      %645 = tpu.matmul %642, %644, %cst_616 {dimension_numbers = #tpu.dot_dimension_numbers<[1], [0], [0], [1], [0, 0, 1, 1], [], []>} : vector<28x8xf32>, vector<8x128xf32>, vector<28x128xf32> -> vector<28x128xf32>
      %646 = arith.addf %638, %645 : vector<28x128xf32>
      %c4_i32_617 = arith.constant 4 : i32
      %647 = arith.addi %arg18, %c4_i32_617 : i32
      %c0_618 = arith.constant 0 : index
      %648 = arith.index_cast %647 : i32 to index
      %c2_619 = arith.constant 2 : index
      %c0_620 = arith.constant 0 : index
      %649 = vector.load %arg1[%c0_618, %648, %c2_619, %c0_620] : memref<2x32x32x8xf32, #tpu.memory_space<vmem>>, vector<1x1x28x8xf32>
      %650 = vector.shape_cast %649 : vector<1x1x28x8xf32> to vector<28x8xf32>
      %c22_621 = arith.constant 22 : index
      %c0_622 = arith.constant 0 : index
      %c0_623 = arith.constant 0 : index
      %651 = vector.load %arg2[%c22_621, %c0_622, %c0_623] : memref<25x8x128xf32, #tpu.memory_space<vmem>>, vector<1x8x128xf32>
      %652 = vector.shape_cast %651 : vector<1x8x128xf32> to vector<8x128xf32>
      %cst_624 = arith.constant dense<0.000000e+00> : vector<28x128xf32>
      %653 = tpu.matmul %650, %652, %cst_624 {dimension_numbers = #tpu.dot_dimension_numbers<[1], [0], [0], [1], [0, 0, 1, 1], [], []>} : vector<28x8xf32>, vector<8x128xf32>, vector<28x128xf32> -> vector<28x128xf32>
      %654 = arith.addf %646, %653 : vector<28x128xf32>
      %c4_i32_625 = arith.constant 4 : i32
      %655 = arith.addi %arg18, %c4_i32_625 : i32
      %c0_626 = arith.constant 0 : index
      %656 = arith.index_cast %655 : i32 to index
      %c3_627 = arith.constant 3 : index
      %c0_628 = arith.constant 0 : index
      %657 = vector.load %arg1[%c0_626, %656, %c3_627, %c0_628] : memref<2x32x32x8xf32, #tpu.memory_space<vmem>>, vector<1x1x28x8xf32>
      %658 = vector.shape_cast %657 : vector<1x1x28x8xf32> to vector<28x8xf32>
      %c23_629 = arith.constant 23 : index
      %c0_630 = arith.constant 0 : index
      %c0_631 = arith.constant 0 : index
      %659 = vector.load %arg2[%c23_629, %c0_630, %c0_631] : memref<25x8x128xf32, #tpu.memory_space<vmem>>, vector<1x8x128xf32>
      %660 = vector.shape_cast %659 : vector<1x8x128xf32> to vector<8x128xf32>
      %cst_632 = arith.constant dense<0.000000e+00> : vector<28x128xf32>
      %661 = tpu.matmul %658, %660, %cst_632 {dimension_numbers = #tpu.dot_dimension_numbers<[1], [0], [0], [1], [0, 0, 1, 1], [], []>} : vector<28x8xf32>, vector<8x128xf32>, vector<28x128xf32> -> vector<28x128xf32>
      %662 = arith.addf %654, %661 : vector<28x128xf32>
      %c4_i32_633 = arith.constant 4 : i32
      %663 = arith.addi %arg18, %c4_i32_633 : i32
      %c0_634 = arith.constant 0 : index
      %664 = arith.index_cast %663 : i32 to index
      %c4_635 = arith.constant 4 : index
      %c0_636 = arith.constant 0 : index
      %665 = vector.load %arg1[%c0_634, %664, %c4_635, %c0_636] : memref<2x32x32x8xf32, #tpu.memory_space<vmem>>, vector<1x1x28x8xf32>
      %666 = vector.shape_cast %665 : vector<1x1x28x8xf32> to vector<28x8xf32>
      %c24_637 = arith.constant 24 : index
      %c0_638 = arith.constant 0 : index
      %c0_639 = arith.constant 0 : index
      %667 = vector.load %arg2[%c24_637, %c0_638, %c0_639] : memref<25x8x128xf32, #tpu.memory_space<vmem>>, vector<1x8x128xf32>
      %668 = vector.shape_cast %667 : vector<1x8x128xf32> to vector<8x128xf32>
      %cst_640 = arith.constant dense<0.000000e+00> : vector<28x128xf32>
      %669 = tpu.matmul %666, %668, %cst_640 {dimension_numbers = #tpu.dot_dimension_numbers<[1], [0], [0], [1], [0, 0, 1, 1], [], []>} : vector<28x8xf32>, vector<8x128xf32>, vector<28x128xf32> -> vector<28x128xf32>
      %670 = arith.addf %662, %669 : vector<28x128xf32>
      %671 = vector.broadcast %0 : vector<1x128xf32> to vector<28x128xf32>
      %672 = arith.addf %670, %671 : vector<28x128xf32>
      %cst_641 = arith.constant 0.000000e+00 : f32
      %673 = vector.broadcast %cst_641 : f32 to vector<28x128xf32>
      %674 = arith.maximumf %672, %673 : vector<28x128xf32>
      %675 = vector.extract_strided_slice %674 {offsets = [0, 0], sizes = [28, 8], strides = [1, 1]} : vector<28x128xf32> to vector<28x8xf32>
      %c0_642 = arith.constant 0 : index
      %676 = arith.index_cast %arg18 : i32 to index
      %c0_643 = arith.constant 0 : index
      %c0_644 = arith.constant 0 : index
      %677 = vector.load %arg13[%c0_642, %676, %c0_643, %c0_644] : memref<2x28x28x8xf32, #tpu.memory_space<vmem>>, vector<1x1x28x8xf32>
      %678 = vector.shape_cast %677 : vector<1x1x28x8xf32> to vector<28x8xf32>
      %679 = vector.shape_cast %675 : vector<28x8xf32> to vector<1x1x28x8xf32>
      tpu.vector_store %arg13[%c0_642, %676, %c0_643, %c0_644], %679 {strides = array<i32>} : memref<2x28x28x8xf32, #tpu.memory_space<vmem>>, vector<1x1x28x8xf32>,
    }
    %c28_i32_1 = arith.constant 28 : i32
    %c0_i32_2 = arith.constant 0 : i32
    %c28_i32_3 = arith.constant 28 : i32
    %2 = arith.addi %c0_i32_2, %c28_i32_3 : i32
    %c1_i32_4 = arith.constant 1 : i32
    scf.for %arg18 = %c0_i32_2 to %2 step %c1_i32_4  : i32 {
      %cst_440 = arith.constant 0.000000e+00 : f32
      %470 = vector.broadcast %cst_440 : f32 to vector<28x128xf32>
      %c0_i32_441 = arith.constant 0 : i32
      %471 = arith.addi %arg18, %c0_i32_441 : i32
      %c1_442 = arith.constant 1 : index
      %472 = arith.index_cast %471 : i32 to index
      %c0_443 = arith.constant 0 : index
      %c0_444 = arith.constant 0 : index
      %473 = vector.load %arg1[%c1_442, %472, %c0_443, %c0_444] : memref<2x32x32x8xf32, #tpu.memory_space<vmem>>, vector<1x1x28x8xf32>
      %474 = vector.shape_cast %473 : vector<1x1x28x8xf32> to vector<28x8xf32>
      %c0_445 = arith.constant 0 : index
      %c0_446 = arith.constant 0 : index
      %c0_447 = arith.constant 0 : index
      %475 = vector.load %arg2[%c0_445, %c0_446, %c0_447] : memref<25x8x128xf32, #tpu.memory_space<vmem>>, vector<1x8x128xf32>
      %476 = vector.shape_cast %475 : vector<1x8x128xf32> to vector<8x128xf32>
      %cst_448 = arith.constant dense<0.000000e+00> : vector<28x128xf32>
      %477 = tpu.matmul %474, %476, %cst_448 {dimension_numbers = #tpu.dot_dimension_numbers<[1], [0], [0], [1], [0, 0, 1, 1], [], []>} : vector<28x8xf32>, vector<8x128xf32>, vector<28x128xf32> -> vector<28x128xf32>
      %478 = arith.addf %470, %477 : vector<28x128xf32>
      %c0_i32_449 = arith.constant 0 : i32
      %479 = arith.addi %arg18, %c0_i32_449 : i32
      %c1_450 = arith.constant 1 : index
      %480 = arith.index_cast %479 : i32 to index
      %c1_451 = arith.constant 1 : index
      %c0_452 = arith.constant 0 : index
      %481 = vector.load %arg1[%c1_450, %480, %c1_451, %c0_452] : memref<2x32x32x8xf32, #tpu.memory_space<vmem>>, vector<1x1x28x8xf32>
      %482 = vector.shape_cast %481 : vector<1x1x28x8xf32> to vector<28x8xf32>
      %c1_453 = arith.constant 1 : index
      %c0_454 = arith.constant 0 : index
      %c0_455 = arith.constant 0 : index
      %483 = vector.load %arg2[%c1_453, %c0_454, %c0_455] : memref<25x8x128xf32, #tpu.memory_space<vmem>>, vector<1x8x128xf32>
      %484 = vector.shape_cast %483 : vector<1x8x128xf32> to vector<8x128xf32>
      %cst_456 = arith.constant dense<0.000000e+00> : vector<28x128xf32>
      %485 = tpu.matmul %482, %484, %cst_456 {dimension_numbers = #tpu.dot_dimension_numbers<[1], [0], [0], [1], [0, 0, 1, 1], [], []>} : vector<28x8xf32>, vector<8x128xf32>, vector<28x128xf32> -> vector<28x128xf32>
      %486 = arith.addf %478, %485 : vector<28x128xf32>
      %c0_i32_457 = arith.constant 0 : i32
      %487 = arith.addi %arg18, %c0_i32_457 : i32
      %c1_458 = arith.constant 1 : index
      %488 = arith.index_cast %487 : i32 to index
      %c2_459 = arith.constant 2 : index
      %c0_460 = arith.constant 0 : index
      %489 = vector.load %arg1[%c1_458, %488, %c2_459, %c0_460] : memref<2x32x32x8xf32, #tpu.memory_space<vmem>>, vector<1x1x28x8xf32>
      %490 = vector.shape_cast %489 : vector<1x1x28x8xf32> to vector<28x8xf32>
      %c2_461 = arith.constant 2 : index
      %c0_462 = arith.constant 0 : index
      %c0_463 = arith.constant 0 : index
      %491 = vector.load %arg2[%c2_461, %c0_462, %c0_463] : memref<25x8x128xf32, #tpu.memory_space<vmem>>, vector<1x8x128xf32>
      %492 = vector.shape_cast %491 : vector<1x8x128xf32> to vector<8x128xf32>
      %cst_464 = arith.constant dense<0.000000e+00> : vector<28x128xf32>
      %493 = tpu.matmul %490, %492, %cst_464 {dimension_numbers = #tpu.dot_dimension_numbers<[1], [0], [0], [1], [0, 0, 1, 1], [], []>} : vector<28x8xf32>, vector<8x128xf32>, vector<28x128xf32> -> vector<28x128xf32>
      %494 = arith.addf %486, %493 : vector<28x128xf32>
      %c0_i32_465 = arith.constant 0 : i32
      %495 = arith.addi %arg18, %c0_i32_465 : i32
      %c1_466 = arith.constant 1 : index
      %496 = arith.index_cast %495 : i32 to index
      %c3_467 = arith.constant 3 : index
      %c0_468 = arith.constant 0 : index
      %497 = vector.load %arg1[%c1_466, %496, %c3_467, %c0_468] : memref<2x32x32x8xf32, #tpu.memory_space<vmem>>, vector<1x1x28x8xf32>
      %498 = vector.shape_cast %497 : vector<1x1x28x8xf32> to vector<28x8xf32>
      %c3_469 = arith.constant 3 : index
      %c0_470 = arith.constant 0 : index
      %c0_471 = arith.constant 0 : index
      %499 = vector.load %arg2[%c3_469, %c0_470, %c0_471] : memref<25x8x128xf32, #tpu.memory_space<vmem>>, vector<1x8x128xf32>
      %500 = vector.shape_cast %499 : vector<1x8x128xf32> to vector<8x128xf32>
      %cst_472 = arith.constant dense<0.000000e+00> : vector<28x128xf32>
      %501 = tpu.matmul %498, %500, %cst_472 {dimension_numbers = #tpu.dot_dimension_numbers<[1], [0], [0], [1], [0, 0, 1, 1], [], []>} : vector<28x8xf32>, vector<8x128xf32>, vector<28x128xf32> -> vector<28x128xf32>
      %502 = arith.addf %494, %501 : vector<28x128xf32>
      %c0_i32_473 = arith.constant 0 : i32
      %503 = arith.addi %arg18, %c0_i32_473 : i32
      %c1_474 = arith.constant 1 : index
      %504 = arith.index_cast %503 : i32 to index
      %c4_475 = arith.constant 4 : index
      %c0_476 = arith.constant 0 : index
      %505 = vector.load %arg1[%c1_474, %504, %c4_475, %c0_476] : memref<2x32x32x8xf32, #tpu.memory_space<vmem>>, vector<1x1x28x8xf32>
      %506 = vector.shape_cast %505 : vector<1x1x28x8xf32> to vector<28x8xf32>
      %c4_477 = arith.constant 4 : index
      %c0_478 = arith.constant 0 : index
      %c0_479 = arith.constant 0 : index
      %507 = vector.load %arg2[%c4_477, %c0_478, %c0_479] : memref<25x8x128xf32, #tpu.memory_space<vmem>>, vector<1x8x128xf32>
      %508 = vector.shape_cast %507 : vector<1x8x128xf32> to vector<8x128xf32>
      %cst_480 = arith.constant dense<0.000000e+00> : vector<28x128xf32>
      %509 = tpu.matmul %506, %508, %cst_480 {dimension_numbers = #tpu.dot_dimension_numbers<[1], [0], [0], [1], [0, 0, 1, 1], [], []>} : vector<28x8xf32>, vector<8x128xf32>, vector<28x128xf32> -> vector<28x128xf32>
      %510 = arith.addf %502, %509 : vector<28x128xf32>
      %c1_i32_481 = arith.constant 1 : i32
      %511 = arith.addi %arg18, %c1_i32_481 : i32
      %c1_482 = arith.constant 1 : index
      %512 = arith.index_cast %511 : i32 to index
      %c0_483 = arith.constant 0 : index
      %c0_484 = arith.constant 0 : index
      %513 = vector.load %arg1[%c1_482, %512, %c0_483, %c0_484] : memref<2x32x32x8xf32, #tpu.memory_space<vmem>>, vector<1x1x28x8xf32>
      %514 = vector.shape_cast %513 : vector<1x1x28x8xf32> to vector<28x8xf32>
      %c5_485 = arith.constant 5 : index
      %c0_486 = arith.constant 0 : index
      %c0_487 = arith.constant 0 : index
      %515 = vector.load %arg2[%c5_485, %c0_486, %c0_487] : memref<25x8x128xf32, #tpu.memory_space<vmem>>, vector<1x8x128xf32>
      %516 = vector.shape_cast %515 : vector<1x8x128xf32> to vector<8x128xf32>
      %cst_488 = arith.constant dense<0.000000e+00> : vector<28x128xf32>
      %517 = tpu.matmul %514, %516, %cst_488 {dimension_numbers = #tpu.dot_dimension_numbers<[1], [0], [0], [1], [0, 0, 1, 1], [], []>} : vector<28x8xf32>, vector<8x128xf32>, vector<28x128xf32> -> vector<28x128xf32>
      %518 = arith.addf %510, %517 : vector<28x128xf32>
      %c1_i32_489 = arith.constant 1 : i32
      %519 = arith.addi %arg18, %c1_i32_489 : i32
      %c1_490 = arith.constant 1 : index
      %520 = arith.index_cast %519 : i32 to index
      %c1_491 = arith.constant 1 : index
      %c0_492 = arith.constant 0 : index
      %521 = vector.load %arg1[%c1_490, %520, %c1_491, %c0_492] : memref<2x32x32x8xf32, #tpu.memory_space<vmem>>, vector<1x1x28x8xf32>
      %522 = vector.shape_cast %521 : vector<1x1x28x8xf32> to vector<28x8xf32>
      %c6_493 = arith.constant 6 : index
      %c0_494 = arith.constant 0 : index
      %c0_495 = arith.constant 0 : index
      %523 = vector.load %arg2[%c6_493, %c0_494, %c0_495] : memref<25x8x128xf32, #tpu.memory_space<vmem>>, vector<1x8x128xf32>
      %524 = vector.shape_cast %523 : vector<1x8x128xf32> to vector<8x128xf32>
      %cst_496 = arith.constant dense<0.000000e+00> : vector<28x128xf32>
      %525 = tpu.matmul %522, %524, %cst_496 {dimension_numbers = #tpu.dot_dimension_numbers<[1], [0], [0], [1], [0, 0, 1, 1], [], []>} : vector<28x8xf32>, vector<8x128xf32>, vector<28x128xf32> -> vector<28x128xf32>
      %526 = arith.addf %518, %525 : vector<28x128xf32>
      %c1_i32_497 = arith.constant 1 : i32
      %527 = arith.addi %arg18, %c1_i32_497 : i32
      %c1_498 = arith.constant 1 : index
      %528 = arith.index_cast %527 : i32 to index
      %c2_499 = arith.constant 2 : index
      %c0_500 = arith.constant 0 : index
      %529 = vector.load %arg1[%c1_498, %528, %c2_499, %c0_500] : memref<2x32x32x8xf32, #tpu.memory_space<vmem>>, vector<1x1x28x8xf32>
      %530 = vector.shape_cast %529 : vector<1x1x28x8xf32> to vector<28x8xf32>
      %c7_501 = arith.constant 7 : index
      %c0_502 = arith.constant 0 : index
      %c0_503 = arith.constant 0 : index
      %531 = vector.load %arg2[%c7_501, %c0_502, %c0_503] : memref<25x8x128xf32, #tpu.memory_space<vmem>>, vector<1x8x128xf32>
      %532 = vector.shape_cast %531 : vector<1x8x128xf32> to vector<8x128xf32>
      %cst_504 = arith.constant dense<0.000000e+00> : vector<28x128xf32>
      %533 = tpu.matmul %530, %532, %cst_504 {dimension_numbers = #tpu.dot_dimension_numbers<[1], [0], [0], [1], [0, 0, 1, 1], [], []>} : vector<28x8xf32>, vector<8x128xf32>, vector<28x128xf32> -> vector<28x128xf32>
      %534 = arith.addf %526, %533 : vector<28x128xf32>
      %c1_i32_505 = arith.constant 1 : i32
      %535 = arith.addi %arg18, %c1_i32_505 : i32
      %c1_506 = arith.constant 1 : index
      %536 = arith.index_cast %535 : i32 to index
      %c3_507 = arith.constant 3 : index
      %c0_508 = arith.constant 0 : index
      %537 = vector.load %arg1[%c1_506, %536, %c3_507, %c0_508] : memref<2x32x32x8xf32, #tpu.memory_space<vmem>>, vector<1x1x28x8xf32>
      %538 = vector.shape_cast %537 : vector<1x1x28x8xf32> to vector<28x8xf32>
      %c8_509 = arith.constant 8 : index
      %c0_510 = arith.constant 0 : index
      %c0_511 = arith.constant 0 : index
      %539 = vector.load %arg2[%c8_509, %c0_510, %c0_511] : memref<25x8x128xf32, #tpu.memory_space<vmem>>, vector<1x8x128xf32>
      %540 = vector.shape_cast %539 : vector<1x8x128xf32> to vector<8x128xf32>
      %cst_512 = arith.constant dense<0.000000e+00> : vector<28x128xf32>
      %541 = tpu.matmul %538, %540, %cst_512 {dimension_numbers = #tpu.dot_dimension_numbers<[1], [0], [0], [1], [0, 0, 1, 1], [], []>} : vector<28x8xf32>, vector<8x128xf32>, vector<28x128xf32> -> vector<28x128xf32>
      %542 = arith.addf %534, %541 : vector<28x128xf32>
      %c1_i32_513 = arith.constant 1 : i32
      %543 = arith.addi %arg18, %c1_i32_513 : i32
      %c1_514 = arith.constant 1 : index
      %544 = arith.index_cast %543 : i32 to index
      %c4_515 = arith.constant 4 : index
      %c0_516 = arith.constant 0 : index
      %545 = vector.load %arg1[%c1_514, %544, %c4_515, %c0_516] : memref<2x32x32x8xf32, #tpu.memory_space<vmem>>, vector<1x1x28x8xf32>
      %546 = vector.shape_cast %545 : vector<1x1x28x8xf32> to vector<28x8xf32>
      %c9_517 = arith.constant 9 : index
      %c0_518 = arith.constant 0 : index
      %c0_519 = arith.constant 0 : index
      %547 = vector.load %arg2[%c9_517, %c0_518, %c0_519] : memref<25x8x128xf32, #tpu.memory_space<vmem>>, vector<1x8x128xf32>
      %548 = vector.shape_cast %547 : vector<1x8x128xf32> to vector<8x128xf32>
      %cst_520 = arith.constant dense<0.000000e+00> : vector<28x128xf32>
      %549 = tpu.matmul %546, %548, %cst_520 {dimension_numbers = #tpu.dot_dimension_numbers<[1], [0], [0], [1], [0, 0, 1, 1], [], []>} : vector<28x8xf32>, vector<8x128xf32>, vector<28x128xf32> -> vector<28x128xf32>
      %550 = arith.addf %542, %549 : vector<28x128xf32>
      %c2_i32_521 = arith.constant 2 : i32
      %551 = arith.addi %arg18, %c2_i32_521 : i32
      %c1_522 = arith.constant 1 : index
      %552 = arith.index_cast %551 : i32 to index
      %c0_523 = arith.constant 0 : index
      %c0_524 = arith.constant 0 : index
      %553 = vector.load %arg1[%c1_522, %552, %c0_523, %c0_524] : memref<2x32x32x8xf32, #tpu.memory_space<vmem>>, vector<1x1x28x8xf32>
      %554 = vector.shape_cast %553 : vector<1x1x28x8xf32> to vector<28x8xf32>
      %c10_525 = arith.constant 10 : index
      %c0_526 = arith.constant 0 : index
      %c0_527 = arith.constant 0 : index
      %555 = vector.load %arg2[%c10_525, %c0_526, %c0_527] : memref<25x8x128xf32, #tpu.memory_space<vmem>>, vector<1x8x128xf32>
      %556 = vector.shape_cast %555 : vector<1x8x128xf32> to vector<8x128xf32>
      %cst_528 = arith.constant dense<0.000000e+00> : vector<28x128xf32>
      %557 = tpu.matmul %554, %556, %cst_528 {dimension_numbers = #tpu.dot_dimension_numbers<[1], [0], [0], [1], [0, 0, 1, 1], [], []>} : vector<28x8xf32>, vector<8x128xf32>, vector<28x128xf32> -> vector<28x128xf32>
      %558 = arith.addf %550, %557 : vector<28x128xf32>
      %c2_i32_529 = arith.constant 2 : i32
      %559 = arith.addi %arg18, %c2_i32_529 : i32
      %c1_530 = arith.constant 1 : index
      %560 = arith.index_cast %559 : i32 to index
      %c1_531 = arith.constant 1 : index
      %c0_532 = arith.constant 0 : index
      %561 = vector.load %arg1[%c1_530, %560, %c1_531, %c0_532] : memref<2x32x32x8xf32, #tpu.memory_space<vmem>>, vector<1x1x28x8xf32>
      %562 = vector.shape_cast %561 : vector<1x1x28x8xf32> to vector<28x8xf32>
      %c11_533 = arith.constant 11 : index
      %c0_534 = arith.constant 0 : index
      %c0_535 = arith.constant 0 : index
      %563 = vector.load %arg2[%c11_533, %c0_534, %c0_535] : memref<25x8x128xf32, #tpu.memory_space<vmem>>, vector<1x8x128xf32>
      %564 = vector.shape_cast %563 : vector<1x8x128xf32> to vector<8x128xf32>
      %cst_536 = arith.constant dense<0.000000e+00> : vector<28x128xf32>
      %565 = tpu.matmul %562, %564, %cst_536 {dimension_numbers = #tpu.dot_dimension_numbers<[1], [0], [0], [1], [0, 0, 1, 1], [], []>} : vector<28x8xf32>, vector<8x128xf32>, vector<28x128xf32> -> vector<28x128xf32>
      %566 = arith.addf %558, %565 : vector<28x128xf32>
      %c2_i32_537 = arith.constant 2 : i32
      %567 = arith.addi %arg18, %c2_i32_537 : i32
      %c1_538 = arith.constant 1 : index
      %568 = arith.index_cast %567 : i32 to index
      %c2_539 = arith.constant 2 : index
      %c0_540 = arith.constant 0 : index
      %569 = vector.load %arg1[%c1_538, %568, %c2_539, %c0_540] : memref<2x32x32x8xf32, #tpu.memory_space<vmem>>, vector<1x1x28x8xf32>
      %570 = vector.shape_cast %569 : vector<1x1x28x8xf32> to vector<28x8xf32>
      %c12_541 = arith.constant 12 : index
      %c0_542 = arith.constant 0 : index
      %c0_543 = arith.constant 0 : index
      %571 = vector.load %arg2[%c12_541, %c0_542, %c0_543] : memref<25x8x128xf32, #tpu.memory_space<vmem>>, vector<1x8x128xf32>
      %572 = vector.shape_cast %571 : vector<1x8x128xf32> to vector<8x128xf32>
      %cst_544 = arith.constant dense<0.000000e+00> : vector<28x128xf32>
      %573 = tpu.matmul %570, %572, %cst_544 {dimension_numbers = #tpu.dot_dimension_numbers<[1], [0], [0], [1], [0, 0, 1, 1], [], []>} : vector<28x8xf32>, vector<8x128xf32>, vector<28x128xf32> -> vector<28x128xf32>
      %574 = arith.addf %566, %573 : vector<28x128xf32>
      %c2_i32_545 = arith.constant 2 : i32
      %575 = arith.addi %arg18, %c2_i32_545 : i32
      %c1_546 = arith.constant 1 : index
      %576 = arith.index_cast %575 : i32 to index
      %c3_547 = arith.constant 3 : index
      %c0_548 = arith.constant 0 : index
      %577 = vector.load %arg1[%c1_546, %576, %c3_547, %c0_548] : memref<2x32x32x8xf32, #tpu.memory_space<vmem>>, vector<1x1x28x8xf32>
      %578 = vector.shape_cast %577 : vector<1x1x28x8xf32> to vector<28x8xf32>
      %c13_549 = arith.constant 13 : index
      %c0_550 = arith.constant 0 : index
      %c0_551 = arith.constant 0 : index
      %579 = vector.load %arg2[%c13_549, %c0_550, %c0_551] : memref<25x8x128xf32, #tpu.memory_space<vmem>>, vector<1x8x128xf32>
      %580 = vector.shape_cast %579 : vector<1x8x128xf32> to vector<8x128xf32>
      %cst_552 = arith.constant dense<0.000000e+00> : vector<28x128xf32>
      %581 = tpu.matmul %578, %580, %cst_552 {dimension_numbers = #tpu.dot_dimension_numbers<[1], [0], [0], [1], [0, 0, 1, 1], [], []>} : vector<28x8xf32>, vector<8x128xf32>, vector<28x128xf32> -> vector<28x128xf32>
      %582 = arith.addf %574, %581 : vector<28x128xf32>
      %c2_i32_553 = arith.constant 2 : i32
      %583 = arith.addi %arg18, %c2_i32_553 : i32
      %c1_554 = arith.constant 1 : index
      %584 = arith.index_cast %583 : i32 to index
      %c4_555 = arith.constant 4 : index
      %c0_556 = arith.constant 0 : index
      %585 = vector.load %arg1[%c1_554, %584, %c4_555, %c0_556] : memref<2x32x32x8xf32, #tpu.memory_space<vmem>>, vector<1x1x28x8xf32>
      %586 = vector.shape_cast %585 : vector<1x1x28x8xf32> to vector<28x8xf32>
      %c14_557 = arith.constant 14 : index
      %c0_558 = arith.constant 0 : index
      %c0_559 = arith.constant 0 : index
      %587 = vector.load %arg2[%c14_557, %c0_558, %c0_559] : memref<25x8x128xf32, #tpu.memory_space<vmem>>, vector<1x8x128xf32>
      %588 = vector.shape_cast %587 : vector<1x8x128xf32> to vector<8x128xf32>
      %cst_560 = arith.constant dense<0.000000e+00> : vector<28x128xf32>
      %589 = tpu.matmul %586, %588, %cst_560 {dimension_numbers = #tpu.dot_dimension_numbers<[1], [0], [0], [1], [0, 0, 1, 1], [], []>} : vector<28x8xf32>, vector<8x128xf32>, vector<28x128xf32> -> vector<28x128xf32>
      %590 = arith.addf %582, %589 : vector<28x128xf32>
      %c3_i32_561 = arith.constant 3 : i32
      %591 = arith.addi %arg18, %c3_i32_561 : i32
      %c1_562 = arith.constant 1 : index
      %592 = arith.index_cast %591 : i32 to index
      %c0_563 = arith.constant 0 : index
      %c0_564 = arith.constant 0 : index
      %593 = vector.load %arg1[%c1_562, %592, %c0_563, %c0_564] : memref<2x32x32x8xf32, #tpu.memory_space<vmem>>, vector<1x1x28x8xf32>
      %594 = vector.shape_cast %593 : vector<1x1x28x8xf32> to vector<28x8xf32>
      %c15_565 = arith.constant 15 : index
      %c0_566 = arith.constant 0 : index
      %c0_567 = arith.constant 0 : index
      %595 = vector.load %arg2[%c15_565, %c0_566, %c0_567] : memref<25x8x128xf32, #tpu.memory_space<vmem>>, vector<1x8x128xf32>
      %596 = vector.shape_cast %595 : vector<1x8x128xf32> to vector<8x128xf32>
      %cst_568 = arith.constant dense<0.000000e+00> : vector<28x128xf32>
      %597 = tpu.matmul %594, %596, %cst_568 {dimension_numbers = #tpu.dot_dimension_numbers<[1], [0], [0], [1], [0, 0, 1, 1], [], []>} : vector<28x8xf32>, vector<8x128xf32>, vector<28x128xf32> -> vector<28x128xf32>
      %598 = arith.addf %590, %597 : vector<28x128xf32>
      %c3_i32_569 = arith.constant 3 : i32
      %599 = arith.addi %arg18, %c3_i32_569 : i32
      %c1_570 = arith.constant 1 : index
      %600 = arith.index_cast %599 : i32 to index
      %c1_571 = arith.constant 1 : index
      %c0_572 = arith.constant 0 : index
      %601 = vector.load %arg1[%c1_570, %600, %c1_571, %c0_572] : memref<2x32x32x8xf32, #tpu.memory_space<vmem>>, vector<1x1x28x8xf32>
      %602 = vector.shape_cast %601 : vector<1x1x28x8xf32> to vector<28x8xf32>
      %c16_573 = arith.constant 16 : index
      %c0_574 = arith.constant 0 : index
      %c0_575 = arith.constant 0 : index
      %603 = vector.load %arg2[%c16_573, %c0_574, %c0_575] : memref<25x8x128xf32, #tpu.memory_space<vmem>>, vector<1x8x128xf32>
      %604 = vector.shape_cast %603 : vector<1x8x128xf32> to vector<8x128xf32>
      %cst_576 = arith.constant dense<0.000000e+00> : vector<28x128xf32>
      %605 = tpu.matmul %602, %604, %cst_576 {dimension_numbers = #tpu.dot_dimension_numbers<[1], [0], [0], [1], [0, 0, 1, 1], [], []>} : vector<28x8xf32>, vector<8x128xf32>, vector<28x128xf32> -> vector<28x128xf32>
      %606 = arith.addf %598, %605 : vector<28x128xf32>
      %c3_i32_577 = arith.constant 3 : i32
      %607 = arith.addi %arg18, %c3_i32_577 : i32
      %c1_578 = arith.constant 1 : index
      %608 = arith.index_cast %607 : i32 to index
      %c2_579 = arith.constant 2 : index
      %c0_580 = arith.constant 0 : index
      %609 = vector.load %arg1[%c1_578, %608, %c2_579, %c0_580] : memref<2x32x32x8xf32, #tpu.memory_space<vmem>>, vector<1x1x28x8xf32>
      %610 = vector.shape_cast %609 : vector<1x1x28x8xf32> to vector<28x8xf32>
      %c17_581 = arith.constant 17 : index
      %c0_582 = arith.constant 0 : index
      %c0_583 = arith.constant 0 : index
      %611 = vector.load %arg2[%c17_581, %c0_582, %c0_583] : memref<25x8x128xf32, #tpu.memory_space<vmem>>, vector<1x8x128xf32>
      %612 = vector.shape_cast %611 : vector<1x8x128xf32> to vector<8x128xf32>
      %cst_584 = arith.constant dense<0.000000e+00> : vector<28x128xf32>
      %613 = tpu.matmul %610, %612, %cst_584 {dimension_numbers = #tpu.dot_dimension_numbers<[1], [0], [0], [1], [0, 0, 1, 1], [], []>} : vector<28x8xf32>, vector<8x128xf32>, vector<28x128xf32> -> vector<28x128xf32>
      %614 = arith.addf %606, %613 : vector<28x128xf32>
      %c3_i32_585 = arith.constant 3 : i32
      %615 = arith.addi %arg18, %c3_i32_585 : i32
      %c1_586 = arith.constant 1 : index
      %616 = arith.index_cast %615 : i32 to index
      %c3_587 = arith.constant 3 : index
      %c0_588 = arith.constant 0 : index
      %617 = vector.load %arg1[%c1_586, %616, %c3_587, %c0_588] : memref<2x32x32x8xf32, #tpu.memory_space<vmem>>, vector<1x1x28x8xf32>
      %618 = vector.shape_cast %617 : vector<1x1x28x8xf32> to vector<28x8xf32>
      %c18_589 = arith.constant 18 : index
      %c0_590 = arith.constant 0 : index
      %c0_591 = arith.constant 0 : index
      %619 = vector.load %arg2[%c18_589, %c0_590, %c0_591] : memref<25x8x128xf32, #tpu.memory_space<vmem>>, vector<1x8x128xf32>
      %620 = vector.shape_cast %619 : vector<1x8x128xf32> to vector<8x128xf32>
      %cst_592 = arith.constant dense<0.000000e+00> : vector<28x128xf32>
      %621 = tpu.matmul %618, %620, %cst_592 {dimension_numbers = #tpu.dot_dimension_numbers<[1], [0], [0], [1], [0, 0, 1, 1], [], []>} : vector<28x8xf32>, vector<8x128xf32>, vector<28x128xf32> -> vector<28x128xf32>
      %622 = arith.addf %614, %621 : vector<28x128xf32>
      %c3_i32_593 = arith.constant 3 : i32
      %623 = arith.addi %arg18, %c3_i32_593 : i32
      %c1_594 = arith.constant 1 : index
      %624 = arith.index_cast %623 : i32 to index
      %c4_595 = arith.constant 4 : index
      %c0_596 = arith.constant 0 : index
      %625 = vector.load %arg1[%c1_594, %624, %c4_595, %c0_596] : memref<2x32x32x8xf32, #tpu.memory_space<vmem>>, vector<1x1x28x8xf32>
      %626 = vector.shape_cast %625 : vector<1x1x28x8xf32> to vector<28x8xf32>
      %c19_597 = arith.constant 19 : index
      %c0_598 = arith.constant 0 : index
      %c0_599 = arith.constant 0 : index
      %627 = vector.load %arg2[%c19_597, %c0_598, %c0_599] : memref<25x8x128xf32, #tpu.memory_space<vmem>>, vector<1x8x128xf32>
      %628 = vector.shape_cast %627 : vector<1x8x128xf32> to vector<8x128xf32>
      %cst_600 = arith.constant dense<0.000000e+00> : vector<28x128xf32>
      %629 = tpu.matmul %626, %628, %cst_600 {dimension_numbers = #tpu.dot_dimension_numbers<[1], [0], [0], [1], [0, 0, 1, 1], [], []>} : vector<28x8xf32>, vector<8x128xf32>, vector<28x128xf32> -> vector<28x128xf32>
      %630 = arith.addf %622, %629 : vector<28x128xf32>
      %c4_i32_601 = arith.constant 4 : i32
      %631 = arith.addi %arg18, %c4_i32_601 : i32
      %c1_602 = arith.constant 1 : index
      %632 = arith.index_cast %631 : i32 to index
      %c0_603 = arith.constant 0 : index
      %c0_604 = arith.constant 0 : index
      %633 = vector.load %arg1[%c1_602, %632, %c0_603, %c0_604] : memref<2x32x32x8xf32, #tpu.memory_space<vmem>>, vector<1x1x28x8xf32>
      %634 = vector.shape_cast %633 : vector<1x1x28x8xf32> to vector<28x8xf32>
      %c20_605 = arith.constant 20 : index
      %c0_606 = arith.constant 0 : index
      %c0_607 = arith.constant 0 : index
      %635 = vector.load %arg2[%c20_605, %c0_606, %c0_607] : memref<25x8x128xf32, #tpu.memory_space<vmem>>, vector<1x8x128xf32>
      %636 = vector.shape_cast %635 : vector<1x8x128xf32> to vector<8x128xf32>
      %cst_608 = arith.constant dense<0.000000e+00> : vector<28x128xf32>
      %637 = tpu.matmul %634, %636, %cst_608 {dimension_numbers = #tpu.dot_dimension_numbers<[1], [0], [0], [1], [0, 0, 1, 1], [], []>} : vector<28x8xf32>, vector<8x128xf32>, vector<28x128xf32> -> vector<28x128xf32>
      %638 = arith.addf %630, %637 : vector<28x128xf32>
      %c4_i32_609 = arith.constant 4 : i32
      %639 = arith.addi %arg18, %c4_i32_609 : i32
      %c1_610 = arith.constant 1 : index
      %640 = arith.index_cast %639 : i32 to index
      %c1_611 = arith.constant 1 : index
      %c0_612 = arith.constant 0 : index
      %641 = vector.load %arg1[%c1_610, %640, %c1_611, %c0_612] : memref<2x32x32x8xf32, #tpu.memory_space<vmem>>, vector<1x1x28x8xf32>
      %642 = vector.shape_cast %641 : vector<1x1x28x8xf32> to vector<28x8xf32>
      %c21_613 = arith.constant 21 : index
      %c0_614 = arith.constant 0 : index
      %c0_615 = arith.constant 0 : index
      %643 = vector.load %arg2[%c21_613, %c0_614, %c0_615] : memref<25x8x128xf32, #tpu.memory_space<vmem>>, vector<1x8x128xf32>
      %644 = vector.shape_cast %643 : vector<1x8x128xf32> to vector<8x128xf32>
      %cst_616 = arith.constant dense<0.000000e+00> : vector<28x128xf32>
      %645 = tpu.matmul %642, %644, %cst_616 {dimension_numbers = #tpu.dot_dimension_numbers<[1], [0], [0], [1], [0, 0, 1, 1], [], []>} : vector<28x8xf32>, vector<8x128xf32>, vector<28x128xf32> -> vector<28x128xf32>
      %646 = arith.addf %638, %645 : vector<28x128xf32>
      %c4_i32_617 = arith.constant 4 : i32
      %647 = arith.addi %arg18, %c4_i32_617 : i32
      %c1_618 = arith.constant 1 : index
      %648 = arith.index_cast %647 : i32 to index
      %c2_619 = arith.constant 2 : index
      %c0_620 = arith.constant 0 : index
      %649 = vector.load %arg1[%c1_618, %648, %c2_619, %c0_620] : memref<2x32x32x8xf32, #tpu.memory_space<vmem>>, vector<1x1x28x8xf32>
      %650 = vector.shape_cast %649 : vector<1x1x28x8xf32> to vector<28x8xf32>
      %c22_621 = arith.constant 22 : index
      %c0_622 = arith.constant 0 : index
      %c0_623 = arith.constant 0 : index
      %651 = vector.load %arg2[%c22_621, %c0_622, %c0_623] : memref<25x8x128xf32, #tpu.memory_space<vmem>>, vector<1x8x128xf32>
      %652 = vector.shape_cast %651 : vector<1x8x128xf32> to vector<8x128xf32>
      %cst_624 = arith.constant dense<0.000000e+00> : vector<28x128xf32>
      %653 = tpu.matmul %650, %652, %cst_624 {dimension_numbers = #tpu.dot_dimension_numbers<[1], [0], [0], [1], [0, 0, 1, 1], [], []>} : vector<28x8xf32>, vector<8x128xf32>, vector<28x128xf32> -> vector<28x128xf32>
      %654 = arith.addf %646, %653 : vector<28x128xf32>
      %c4_i32_625 = arith.constant 4 : i32
      %655 = arith.addi %arg18, %c4_i32_625 : i32
      %c1_626 = arith.constant 1 : index
      %656 = arith.index_cast %655 : i32 to index
      %c3_627 = arith.constant 3 : index
      %c0_628 = arith.constant 0 : index
      %657 = vector.load %arg1[%c1_626, %656, %c3_627, %c0_628] : memref<2x32x32x8xf32, #tpu.memory_space<vmem>>, vector<1x1x28x8xf32>
      %658 = vector.shape_cast %657 : vector<1x1x28x8xf32> to vector<28x8xf32>
      %c23_629 = arith.constant 23 : index
      %c0_630 = arith.constant 0 : index
      %c0_631 = arith.constant 0 : index
      %659 = vector.load %arg2[%c23_629, %c0_630, %c0_631] : memref<25x8x128xf32, #tpu.memory_space<vmem>>, vector<1x8x128xf32>
      %660 = vector.shape_cast %659 : vector<1x8x128xf32> to vector<8x128xf32>
      %cst_632 = arith.constant dense<0.000000e+00> : vector<28x128xf32>
      %661 = tpu.matmul %658, %660, %cst_632 {dimension_numbers = #tpu.dot_dimension_numbers<[1], [0], [0], [1], [0, 0, 1, 1], [], []>} : vector<28x8xf32>, vector<8x128xf32>, vector<28x128xf32> -> vector<28x128xf32>
      %662 = arith.addf %654, %661 : vector<28x128xf32>
      %c4_i32_633 = arith.constant 4 : i32
      %663 = arith.addi %arg18, %c4_i32_633 : i32
      %c1_634 = arith.constant 1 : index
      %664 = arith.index_cast %663 : i32 to index
      %c4_635 = arith.constant 4 : index
      %c0_636 = arith.constant 0 : index
      %665 = vector.load %arg1[%c1_634, %664, %c4_635, %c0_636] : memref<2x32x32x8xf32, #tpu.memory_space<vmem>>, vector<1x1x28x8xf32>
      %666 = vector.shape_cast %665 : vector<1x1x28x8xf32> to vector<28x8xf32>
      %c24_637 = arith.constant 24 : index
      %c0_638 = arith.constant 0 : index
      %c0_639 = arith.constant 0 : index
      %667 = vector.load %arg2[%c24_637, %c0_638, %c0_639] : memref<25x8x128xf32, #tpu.memory_space<vmem>>, vector<1x8x128xf32>
      %668 = vector.shape_cast %667 : vector<1x8x128xf32> to vector<8x128xf32>
      %cst_640 = arith.constant dense<0.000000e+00> : vector<28x128xf32>
      %669 = tpu.matmul %666, %668, %cst_640 {dimension_numbers = #tpu.dot_dimension_numbers<[1], [0], [0], [1], [0, 0, 1, 1], [], []>} : vector<28x8xf32>, vector<8x128xf32>, vector<28x128xf32> -> vector<28x128xf32>
      %670 = arith.addf %662, %669 : vector<28x128xf32>
      %671 = vector.broadcast %0 : vector<1x128xf32> to vector<28x128xf32>
      %672 = arith.addf %670, %671 : vector<28x128xf32>
      %cst_641 = arith.constant 0.000000e+00 : f32
      %673 = vector.broadcast %cst_641 : f32 to vector<28x128xf32>
      %674 = arith.maximumf %672, %673 : vector<28x128xf32>
      %675 = vector.extract_strided_slice %674 {offsets = [0, 0], sizes = [28, 8], strides = [1, 1]} : vector<28x128xf32> to vector<28x8xf32>
      %c1_642 = arith.constant 1 : index
      %676 = arith.index_cast %arg18 : i32 to index
      %c0_643 = arith.constant 0 : index
      %c0_644 = arith.constant 0 : index
      %677 = vector.load %arg13[%c1_642, %676, %c0_643, %c0_644] : memref<2x28x28x8xf32, #tpu.memory_space<vmem>>, vector<1x1x28x8xf32>
      %678 = vector.shape_cast %677 : vector<1x1x28x8xf32> to vector<28x8xf32>
      %679 = vector.shape_cast %675 : vector<28x8xf32> to vector<1x1x28x8xf32>
      tpu.vector_store %arg13[%c1_642, %676, %c0_643, %c0_644], %679 {strides = array<i32>} : memref<2x28x28x8xf32, #tpu.memory_space<vmem>>, vector<1x1x28x8xf32>,
    }
    %c28_i32_5 = arith.constant 28 : i32
    %3 = tpu.iota {dimensions = array<i32: 0>} : vector<14x28xi32>
    %4 = tpu.iota {dimensions = array<i32: 1>} : vector<14x28xi32>
    %c2_i32 = arith.constant 2 : i32
    %5 = vector.broadcast %c2_i32 : i32 to vector<14x28xi32>
    %6 = arith.muli %5, %3 : vector<14x28xi32>
    %7 = arith.cmpi eq, %4, %6 : vector<14x28xi32>
    %8 = arith.extui %7 : vector<14x28xi1> to vector<14x28xi32>
    %9 = arith.sitofp %8 : vector<14x28xi32> to vector<14x28xf32>
    %c2_i32_6 = arith.constant 2 : i32
    %10 = vector.broadcast %c2_i32_6 : i32 to vector<14x28xi32>
    %11 = arith.muli %10, %3 : vector<14x28xi32>
    %c1_i32_7 = arith.constant 1 : i32
    %12 = vector.broadcast %c1_i32_7 : i32 to vector<14x28xi32>
    %13 = arith.addi %11, %12 : vector<14x28xi32>
    %14 = arith.cmpi eq, %4, %13 : vector<14x28xi32>
    %15 = arith.extui %14 : vector<14x28xi1> to vector<14x28xi32>
    %16 = arith.sitofp %15 : vector<14x28xi32> to vector<14x28xf32>
    %c0_i32_8 = arith.constant 0 : i32
    %c14_i32 = arith.constant 14 : i32
    %17 = arith.addi %c0_i32_8, %c14_i32 : i32
    %c1_i32_9 = arith.constant 1 : i32
    scf.for %arg18 = %c0_i32_8 to %17 step %c1_i32_9  : i32 {
      %c2_i32_440 = arith.constant 2 : i32
      %470 = arith.muli %c2_i32_440, %arg18 : i32
      %c0_441 = arith.constant 0 : index
      %471 = arith.index_cast %470 : i32 to index
      %c0_442 = arith.constant 0 : index
      %c0_443 = arith.constant 0 : index
      %472 = vector.load %arg13[%c0_441, %471, %c0_442, %c0_443] : memref<2x28x28x8xf32, #tpu.memory_space<vmem>>, vector<1x1x28x8xf32>
      %473 = vector.shape_cast %472 : vector<1x1x28x8xf32> to vector<28x8xf32>
      %c2_i32_444 = arith.constant 2 : i32
      %474 = arith.muli %c2_i32_444, %arg18 : i32
      %c1_i32_445 = arith.constant 1 : i32
      %475 = arith.addi %474, %c1_i32_445 : i32
      %c0_446 = arith.constant 0 : index
      %476 = arith.index_cast %475 : i32 to index
      %c0_447 = arith.constant 0 : index
      %c0_448 = arith.constant 0 : index
      %477 = vector.load %arg13[%c0_446, %476, %c0_447, %c0_448] : memref<2x28x28x8xf32, #tpu.memory_space<vmem>>, vector<1x1x28x8xf32>
      %478 = vector.shape_cast %477 : vector<1x1x28x8xf32> to vector<28x8xf32>
      %479 = arith.maximumf %473, %478 : vector<28x8xf32>
      %cst_449 = arith.constant dense<0.000000e+00> : vector<14x8xf32>
      %480 = tpu.matmul %9, %479, %cst_449 {dimension_numbers = #tpu.dot_dimension_numbers<[1], [0], [0], [1], [0, 0, 1, 1], [], []>} : vector<14x28xf32>, vector<28x8xf32>, vector<14x8xf32> -> vector<14x8xf32>
      %cst_450 = arith.constant dense<0.000000e+00> : vector<14x8xf32>
      %481 = tpu.matmul %16, %479, %cst_450 {dimension_numbers = #tpu.dot_dimension_numbers<[1], [0], [0], [1], [0, 0, 1, 1], [], []>} : vector<14x28xf32>, vector<28x8xf32>, vector<14x8xf32> -> vector<14x8xf32>
      %482 = arith.maximumf %480, %481 : vector<14x8xf32>
      %c0_451 = arith.constant 0 : index
      %483 = arith.index_cast %arg18 : i32 to index
      %c0_452 = arith.constant 0 : index
      %c0_453 = arith.constant 0 : index
      %484 = vector.load %arg14[%c0_451, %483, %c0_452, %c0_453] : memref<2x14x14x8xf32, #tpu.memory_space<vmem>>, vector<1x1x14x8xf32>
      %485 = vector.shape_cast %484 : vector<1x1x14x8xf32> to vector<14x8xf32>
      %486 = vector.shape_cast %482 : vector<14x8xf32> to vector<1x1x14x8xf32>
      tpu.vector_store %arg14[%c0_451, %483, %c0_452, %c0_453], %486 {strides = array<i32>} : memref<2x14x14x8xf32, #tpu.memory_space<vmem>>, vector<1x1x14x8xf32>,
    }
    %c14_i32_10 = arith.constant 14 : i32
    %c0_i32_11 = arith.constant 0 : i32
    %c14_i32_12 = arith.constant 14 : i32
    %18 = arith.addi %c0_i32_11, %c14_i32_12 : i32
    %c1_i32_13 = arith.constant 1 : i32
    scf.for %arg18 = %c0_i32_11 to %18 step %c1_i32_13  : i32 {
      %c2_i32_440 = arith.constant 2 : i32
      %470 = arith.muli %c2_i32_440, %arg18 : i32
      %c1_441 = arith.constant 1 : index
      %471 = arith.index_cast %470 : i32 to index
      %c0_442 = arith.constant 0 : index
      %c0_443 = arith.constant 0 : index
      %472 = vector.load %arg13[%c1_441, %471, %c0_442, %c0_443] : memref<2x28x28x8xf32, #tpu.memory_space<vmem>>, vector<1x1x28x8xf32>
      %473 = vector.shape_cast %472 : vector<1x1x28x8xf32> to vector<28x8xf32>
      %c2_i32_444 = arith.constant 2 : i32
      %474 = arith.muli %c2_i32_444, %arg18 : i32
      %c1_i32_445 = arith.constant 1 : i32
      %475 = arith.addi %474, %c1_i32_445 : i32
      %c1_446 = arith.constant 1 : index
      %476 = arith.index_cast %475 : i32 to index
      %c0_447 = arith.constant 0 : index
      %c0_448 = arith.constant 0 : index
      %477 = vector.load %arg13[%c1_446, %476, %c0_447, %c0_448] : memref<2x28x28x8xf32, #tpu.memory_space<vmem>>, vector<1x1x28x8xf32>
      %478 = vector.shape_cast %477 : vector<1x1x28x8xf32> to vector<28x8xf32>
      %479 = arith.maximumf %473, %478 : vector<28x8xf32>
      %cst_449 = arith.constant dense<0.000000e+00> : vector<14x8xf32>
      %480 = tpu.matmul %9, %479, %cst_449 {dimension_numbers = #tpu.dot_dimension_numbers<[1], [0], [0], [1], [0, 0, 1, 1], [], []>} : vector<14x28xf32>, vector<28x8xf32>, vector<14x8xf32> -> vector<14x8xf32>
      %cst_450 = arith.constant dense<0.000000e+00> : vector<14x8xf32>
      %481 = tpu.matmul %16, %479, %cst_450 {dimension_numbers = #tpu.dot_dimension_numbers<[1], [0], [0], [1], [0, 0, 1, 1], [], []>} : vector<14x28xf32>, vector<28x8xf32>, vector<14x8xf32> -> vector<14x8xf32>
      %482 = arith.maximumf %480, %481 : vector<14x8xf32>
      %c1_451 = arith.constant 1 : index
      %483 = arith.index_cast %arg18 : i32 to index
      %c0_452 = arith.constant 0 : index
      %c0_453 = arith.constant 0 : index
      %484 = vector.load %arg14[%c1_451, %483, %c0_452, %c0_453] : memref<2x14x14x8xf32, #tpu.memory_space<vmem>>, vector<1x1x14x8xf32>
      %485 = vector.shape_cast %484 : vector<1x1x14x8xf32> to vector<14x8xf32>
      %486 = vector.shape_cast %482 : vector<14x8xf32> to vector<1x1x14x8xf32>
      tpu.vector_store %arg14[%c1_451, %483, %c0_452, %c0_453], %486 {strides = array<i32>} : memref<2x14x14x8xf32, #tpu.memory_space<vmem>>, vector<1x1x14x8xf32>,
    }
    %c14_i32_14 = arith.constant 14 : i32
    %c0_15 = arith.constant 0 : index
    %c0_16 = arith.constant 0 : index
    %19 = vector.load %arg5[%c0_15, %c0_16] : memref<1x128xf32, #tpu.memory_space<vmem>>, vector<1x128xf32>
    %c0_i32_17 = arith.constant 0 : i32
    %c10_i32 = arith.constant 10 : i32
    %20 = arith.addi %c0_i32_17, %c10_i32 : i32
    %c1_i32_18 = arith.constant 1 : i32
    scf.for %arg18 = %c0_i32_17 to %20 step %c1_i32_18  : i32 {
      %cst_440 = arith.constant 0.000000e+00 : f32
      %470 = vector.broadcast %cst_440 : f32 to vector<10x128xf32>
      %c0_i32_441 = arith.constant 0 : i32
      %471 = arith.addi %arg18, %c0_i32_441 : i32
      %c0_442 = arith.constant 0 : index
      %472 = arith.index_cast %471 : i32 to index
      %c0_443 = arith.constant 0 : index
      %c0_444 = arith.constant 0 : index
      %473 = vector.load %arg14[%c0_442, %472, %c0_443, %c0_444] : memref<2x14x14x8xf32, #tpu.memory_space<vmem>>, vector<1x1x10x8xf32>
      %474 = vector.shape_cast %473 : vector<1x1x10x8xf32> to vector<10x8xf32>
      %c0_445 = arith.constant 0 : index
      %c0_446 = arith.constant 0 : index
      %c0_447 = arith.constant 0 : index
      %475 = vector.load %arg4[%c0_445, %c0_446, %c0_447] : memref<25x8x128xf32, #tpu.memory_space<vmem>>, vector<1x8x128xf32>
      %476 = vector.shape_cast %475 : vector<1x8x128xf32> to vector<8x128xf32>
      %cst_448 = arith.constant dense<0.000000e+00> : vector<10x128xf32>
      %477 = tpu.matmul %474, %476, %cst_448 {dimension_numbers = #tpu.dot_dimension_numbers<[1], [0], [0], [1], [0, 0, 1, 1], [], []>} : vector<10x8xf32>, vector<8x128xf32>, vector<10x128xf32> -> vector<10x128xf32>
      %478 = arith.addf %470, %477 : vector<10x128xf32>
      %c0_i32_449 = arith.constant 0 : i32
      %479 = arith.addi %arg18, %c0_i32_449 : i32
      %c0_450 = arith.constant 0 : index
      %480 = arith.index_cast %479 : i32 to index
      %c1_451 = arith.constant 1 : index
      %c0_452 = arith.constant 0 : index
      %481 = vector.load %arg14[%c0_450, %480, %c1_451, %c0_452] : memref<2x14x14x8xf32, #tpu.memory_space<vmem>>, vector<1x1x10x8xf32>
      %482 = vector.shape_cast %481 : vector<1x1x10x8xf32> to vector<10x8xf32>
      %c1_453 = arith.constant 1 : index
      %c0_454 = arith.constant 0 : index
      %c0_455 = arith.constant 0 : index
      %483 = vector.load %arg4[%c1_453, %c0_454, %c0_455] : memref<25x8x128xf32, #tpu.memory_space<vmem>>, vector<1x8x128xf32>
      %484 = vector.shape_cast %483 : vector<1x8x128xf32> to vector<8x128xf32>
      %cst_456 = arith.constant dense<0.000000e+00> : vector<10x128xf32>
      %485 = tpu.matmul %482, %484, %cst_456 {dimension_numbers = #tpu.dot_dimension_numbers<[1], [0], [0], [1], [0, 0, 1, 1], [], []>} : vector<10x8xf32>, vector<8x128xf32>, vector<10x128xf32> -> vector<10x128xf32>
      %486 = arith.addf %478, %485 : vector<10x128xf32>
      %c0_i32_457 = arith.constant 0 : i32
      %487 = arith.addi %arg18, %c0_i32_457 : i32
      %c0_458 = arith.constant 0 : index
      %488 = arith.index_cast %487 : i32 to index
      %c2_459 = arith.constant 2 : index
      %c0_460 = arith.constant 0 : index
      %489 = vector.load %arg14[%c0_458, %488, %c2_459, %c0_460] : memref<2x14x14x8xf32, #tpu.memory_space<vmem>>, vector<1x1x10x8xf32>
      %490 = vector.shape_cast %489 : vector<1x1x10x8xf32> to vector<10x8xf32>
      %c2_461 = arith.constant 2 : index
      %c0_462 = arith.constant 0 : index
      %c0_463 = arith.constant 0 : index
      %491 = vector.load %arg4[%c2_461, %c0_462, %c0_463] : memref<25x8x128xf32, #tpu.memory_space<vmem>>, vector<1x8x128xf32>
      %492 = vector.shape_cast %491 : vector<1x8x128xf32> to vector<8x128xf32>
      %cst_464 = arith.constant dense<0.000000e+00> : vector<10x128xf32>
      %493 = tpu.matmul %490, %492, %cst_464 {dimension_numbers = #tpu.dot_dimension_numbers<[1], [0], [0], [1], [0, 0, 1, 1], [], []>} : vector<10x8xf32>, vector<8x128xf32>, vector<10x128xf32> -> vector<10x128xf32>
      %494 = arith.addf %486, %493 : vector<10x128xf32>
      %c0_i32_465 = arith.constant 0 : i32
      %495 = arith.addi %arg18, %c0_i32_465 : i32
      %c0_466 = arith.constant 0 : index
      %496 = arith.index_cast %495 : i32 to index
      %c3_467 = arith.constant 3 : index
      %c0_468 = arith.constant 0 : index
      %497 = vector.load %arg14[%c0_466, %496, %c3_467, %c0_468] : memref<2x14x14x8xf32, #tpu.memory_space<vmem>>, vector<1x1x10x8xf32>
      %498 = vector.shape_cast %497 : vector<1x1x10x8xf32> to vector<10x8xf32>
      %c3_469 = arith.constant 3 : index
      %c0_470 = arith.constant 0 : index
      %c0_471 = arith.constant 0 : index
      %499 = vector.load %arg4[%c3_469, %c0_470, %c0_471] : memref<25x8x128xf32, #tpu.memory_space<vmem>>, vector<1x8x128xf32>
      %500 = vector.shape_cast %499 : vector<1x8x128xf32> to vector<8x128xf32>
      %cst_472 = arith.constant dense<0.000000e+00> : vector<10x128xf32>
      %501 = tpu.matmul %498, %500, %cst_472 {dimension_numbers = #tpu.dot_dimension_numbers<[1], [0], [0], [1], [0, 0, 1, 1], [], []>} : vector<10x8xf32>, vector<8x128xf32>, vector<10x128xf32> -> vector<10x128xf32>
      %502 = arith.addf %494, %501 : vector<10x128xf32>
      %c0_i32_473 = arith.constant 0 : i32
      %503 = arith.addi %arg18, %c0_i32_473 : i32
      %c0_474 = arith.constant 0 : index
      %504 = arith.index_cast %503 : i32 to index
      %c4_475 = arith.constant 4 : index
      %c0_476 = arith.constant 0 : index
      %505 = vector.load %arg14[%c0_474, %504, %c4_475, %c0_476] : memref<2x14x14x8xf32, #tpu.memory_space<vmem>>, vector<1x1x10x8xf32>
      %506 = vector.shape_cast %505 : vector<1x1x10x8xf32> to vector<10x8xf32>
      %c4_477 = arith.constant 4 : index
      %c0_478 = arith.constant 0 : index
      %c0_479 = arith.constant 0 : index
      %507 = vector.load %arg4[%c4_477, %c0_478, %c0_479] : memref<25x8x128xf32, #tpu.memory_space<vmem>>, vector<1x8x128xf32>
      %508 = vector.shape_cast %507 : vector<1x8x128xf32> to vector<8x128xf32>
      %cst_480 = arith.constant dense<0.000000e+00> : vector<10x128xf32>
      %509 = tpu.matmul %506, %508, %cst_480 {dimension_numbers = #tpu.dot_dimension_numbers<[1], [0], [0], [1], [0, 0, 1, 1], [], []>} : vector<10x8xf32>, vector<8x128xf32>, vector<10x128xf32> -> vector<10x128xf32>
      %510 = arith.addf %502, %509 : vector<10x128xf32>
      %c1_i32_481 = arith.constant 1 : i32
      %511 = arith.addi %arg18, %c1_i32_481 : i32
      %c0_482 = arith.constant 0 : index
      %512 = arith.index_cast %511 : i32 to index
      %c0_483 = arith.constant 0 : index
      %c0_484 = arith.constant 0 : index
      %513 = vector.load %arg14[%c0_482, %512, %c0_483, %c0_484] : memref<2x14x14x8xf32, #tpu.memory_space<vmem>>, vector<1x1x10x8xf32>
      %514 = vector.shape_cast %513 : vector<1x1x10x8xf32> to vector<10x8xf32>
      %c5_485 = arith.constant 5 : index
      %c0_486 = arith.constant 0 : index
      %c0_487 = arith.constant 0 : index
      %515 = vector.load %arg4[%c5_485, %c0_486, %c0_487] : memref<25x8x128xf32, #tpu.memory_space<vmem>>, vector<1x8x128xf32>
      %516 = vector.shape_cast %515 : vector<1x8x128xf32> to vector<8x128xf32>
      %cst_488 = arith.constant dense<0.000000e+00> : vector<10x128xf32>
      %517 = tpu.matmul %514, %516, %cst_488 {dimension_numbers = #tpu.dot_dimension_numbers<[1], [0], [0], [1], [0, 0, 1, 1], [], []>} : vector<10x8xf32>, vector<8x128xf32>, vector<10x128xf32> -> vector<10x128xf32>
      %518 = arith.addf %510, %517 : vector<10x128xf32>
      %c1_i32_489 = arith.constant 1 : i32
      %519 = arith.addi %arg18, %c1_i32_489 : i32
      %c0_490 = arith.constant 0 : index
      %520 = arith.index_cast %519 : i32 to index
      %c1_491 = arith.constant 1 : index
      %c0_492 = arith.constant 0 : index
      %521 = vector.load %arg14[%c0_490, %520, %c1_491, %c0_492] : memref<2x14x14x8xf32, #tpu.memory_space<vmem>>, vector<1x1x10x8xf32>
      %522 = vector.shape_cast %521 : vector<1x1x10x8xf32> to vector<10x8xf32>
      %c6_493 = arith.constant 6 : index
      %c0_494 = arith.constant 0 : index
      %c0_495 = arith.constant 0 : index
      %523 = vector.load %arg4[%c6_493, %c0_494, %c0_495] : memref<25x8x128xf32, #tpu.memory_space<vmem>>, vector<1x8x128xf32>
      %524 = vector.shape_cast %523 : vector<1x8x128xf32> to vector<8x128xf32>
      %cst_496 = arith.constant dense<0.000000e+00> : vector<10x128xf32>
      %525 = tpu.matmul %522, %524, %cst_496 {dimension_numbers = #tpu.dot_dimension_numbers<[1], [0], [0], [1], [0, 0, 1, 1], [], []>} : vector<10x8xf32>, vector<8x128xf32>, vector<10x128xf32> -> vector<10x128xf32>
      %526 = arith.addf %518, %525 : vector<10x128xf32>
      %c1_i32_497 = arith.constant 1 : i32
      %527 = arith.addi %arg18, %c1_i32_497 : i32
      %c0_498 = arith.constant 0 : index
      %528 = arith.index_cast %527 : i32 to index
      %c2_499 = arith.constant 2 : index
      %c0_500 = arith.constant 0 : index
      %529 = vector.load %arg14[%c0_498, %528, %c2_499, %c0_500] : memref<2x14x14x8xf32, #tpu.memory_space<vmem>>, vector<1x1x10x8xf32>
      %530 = vector.shape_cast %529 : vector<1x1x10x8xf32> to vector<10x8xf32>
      %c7_501 = arith.constant 7 : index
      %c0_502 = arith.constant 0 : index
      %c0_503 = arith.constant 0 : index
      %531 = vector.load %arg4[%c7_501, %c0_502, %c0_503] : memref<25x8x128xf32, #tpu.memory_space<vmem>>, vector<1x8x128xf32>
      %532 = vector.shape_cast %531 : vector<1x8x128xf32> to vector<8x128xf32>
      %cst_504 = arith.constant dense<0.000000e+00> : vector<10x128xf32>
      %533 = tpu.matmul %530, %532, %cst_504 {dimension_numbers = #tpu.dot_dimension_numbers<[1], [0], [0], [1], [0, 0, 1, 1], [], []>} : vector<10x8xf32>, vector<8x128xf32>, vector<10x128xf32> -> vector<10x128xf32>
      %534 = arith.addf %526, %533 : vector<10x128xf32>
      %c1_i32_505 = arith.constant 1 : i32
      %535 = arith.addi %arg18, %c1_i32_505 : i32
      %c0_506 = arith.constant 0 : index
      %536 = arith.index_cast %535 : i32 to index
      %c3_507 = arith.constant 3 : index
      %c0_508 = arith.constant 0 : index
      %537 = vector.load %arg14[%c0_506, %536, %c3_507, %c0_508] : memref<2x14x14x8xf32, #tpu.memory_space<vmem>>, vector<1x1x10x8xf32>
      %538 = vector.shape_cast %537 : vector<1x1x10x8xf32> to vector<10x8xf32>
      %c8_509 = arith.constant 8 : index
      %c0_510 = arith.constant 0 : index
      %c0_511 = arith.constant 0 : index
      %539 = vector.load %arg4[%c8_509, %c0_510, %c0_511] : memref<25x8x128xf32, #tpu.memory_space<vmem>>, vector<1x8x128xf32>
      %540 = vector.shape_cast %539 : vector<1x8x128xf32> to vector<8x128xf32>
      %cst_512 = arith.constant dense<0.000000e+00> : vector<10x128xf32>
      %541 = tpu.matmul %538, %540, %cst_512 {dimension_numbers = #tpu.dot_dimension_numbers<[1], [0], [0], [1], [0, 0, 1, 1], [], []>} : vector<10x8xf32>, vector<8x128xf32>, vector<10x128xf32> -> vector<10x128xf32>
      %542 = arith.addf %534, %541 : vector<10x128xf32>
      %c1_i32_513 = arith.constant 1 : i32
      %543 = arith.addi %arg18, %c1_i32_513 : i32
      %c0_514 = arith.constant 0 : index
      %544 = arith.index_cast %543 : i32 to index
      %c4_515 = arith.constant 4 : index
      %c0_516 = arith.constant 0 : index
      %545 = vector.load %arg14[%c0_514, %544, %c4_515, %c0_516] : memref<2x14x14x8xf32, #tpu.memory_space<vmem>>, vector<1x1x10x8xf32>
      %546 = vector.shape_cast %545 : vector<1x1x10x8xf32> to vector<10x8xf32>
      %c9_517 = arith.constant 9 : index
      %c0_518 = arith.constant 0 : index
      %c0_519 = arith.constant 0 : index
      %547 = vector.load %arg4[%c9_517, %c0_518, %c0_519] : memref<25x8x128xf32, #tpu.memory_space<vmem>>, vector<1x8x128xf32>
      %548 = vector.shape_cast %547 : vector<1x8x128xf32> to vector<8x128xf32>
      %cst_520 = arith.constant dense<0.000000e+00> : vector<10x128xf32>
      %549 = tpu.matmul %546, %548, %cst_520 {dimension_numbers = #tpu.dot_dimension_numbers<[1], [0], [0], [1], [0, 0, 1, 1], [], []>} : vector<10x8xf32>, vector<8x128xf32>, vector<10x128xf32> -> vector<10x128xf32>
      %550 = arith.addf %542, %549 : vector<10x128xf32>
      %c2_i32_521 = arith.constant 2 : i32
      %551 = arith.addi %arg18, %c2_i32_521 : i32
      %c0_522 = arith.constant 0 : index
      %552 = arith.index_cast %551 : i32 to index
      %c0_523 = arith.constant 0 : index
      %c0_524 = arith.constant 0 : index
      %553 = vector.load %arg14[%c0_522, %552, %c0_523, %c0_524] : memref<2x14x14x8xf32, #tpu.memory_space<vmem>>, vector<1x1x10x8xf32>
      %554 = vector.shape_cast %553 : vector<1x1x10x8xf32> to vector<10x8xf32>
      %c10_525 = arith.constant 10 : index
      %c0_526 = arith.constant 0 : index
      %c0_527 = arith.constant 0 : index
      %555 = vector.load %arg4[%c10_525, %c0_526, %c0_527] : memref<25x8x128xf32, #tpu.memory_space<vmem>>, vector<1x8x128xf32>
      %556 = vector.shape_cast %555 : vector<1x8x128xf32> to vector<8x128xf32>
      %cst_528 = arith.constant dense<0.000000e+00> : vector<10x128xf32>
      %557 = tpu.matmul %554, %556, %cst_528 {dimension_numbers = #tpu.dot_dimension_numbers<[1], [0], [0], [1], [0, 0, 1, 1], [], []>} : vector<10x8xf32>, vector<8x128xf32>, vector<10x128xf32> -> vector<10x128xf32>
      %558 = arith.addf %550, %557 : vector<10x128xf32>
      %c2_i32_529 = arith.constant 2 : i32
      %559 = arith.addi %arg18, %c2_i32_529 : i32
      %c0_530 = arith.constant 0 : index
      %560 = arith.index_cast %559 : i32 to index
      %c1_531 = arith.constant 1 : index
      %c0_532 = arith.constant 0 : index
      %561 = vector.load %arg14[%c0_530, %560, %c1_531, %c0_532] : memref<2x14x14x8xf32, #tpu.memory_space<vmem>>, vector<1x1x10x8xf32>
      %562 = vector.shape_cast %561 : vector<1x1x10x8xf32> to vector<10x8xf32>
      %c11_533 = arith.constant 11 : index
      %c0_534 = arith.constant 0 : index
      %c0_535 = arith.constant 0 : index
      %563 = vector.load %arg4[%c11_533, %c0_534, %c0_535] : memref<25x8x128xf32, #tpu.memory_space<vmem>>, vector<1x8x128xf32>
      %564 = vector.shape_cast %563 : vector<1x8x128xf32> to vector<8x128xf32>
      %cst_536 = arith.constant dense<0.000000e+00> : vector<10x128xf32>
      %565 = tpu.matmul %562, %564, %cst_536 {dimension_numbers = #tpu.dot_dimension_numbers<[1], [0], [0], [1], [0, 0, 1, 1], [], []>} : vector<10x8xf32>, vector<8x128xf32>, vector<10x128xf32> -> vector<10x128xf32>
      %566 = arith.addf %558, %565 : vector<10x128xf32>
      %c2_i32_537 = arith.constant 2 : i32
      %567 = arith.addi %arg18, %c2_i32_537 : i32
      %c0_538 = arith.constant 0 : index
      %568 = arith.index_cast %567 : i32 to index
      %c2_539 = arith.constant 2 : index
      %c0_540 = arith.constant 0 : index
      %569 = vector.load %arg14[%c0_538, %568, %c2_539, %c0_540] : memref<2x14x14x8xf32, #tpu.memory_space<vmem>>, vector<1x1x10x8xf32>
      %570 = vector.shape_cast %569 : vector<1x1x10x8xf32> to vector<10x8xf32>
      %c12_541 = arith.constant 12 : index
      %c0_542 = arith.constant 0 : index
      %c0_543 = arith.constant 0 : index
      %571 = vector.load %arg4[%c12_541, %c0_542, %c0_543] : memref<25x8x128xf32, #tpu.memory_space<vmem>>, vector<1x8x128xf32>
      %572 = vector.shape_cast %571 : vector<1x8x128xf32> to vector<8x128xf32>
      %cst_544 = arith.constant dense<0.000000e+00> : vector<10x128xf32>
      %573 = tpu.matmul %570, %572, %cst_544 {dimension_numbers = #tpu.dot_dimension_numbers<[1], [0], [0], [1], [0, 0, 1, 1], [], []>} : vector<10x8xf32>, vector<8x128xf32>, vector<10x128xf32> -> vector<10x128xf32>
      %574 = arith.addf %566, %573 : vector<10x128xf32>
      %c2_i32_545 = arith.constant 2 : i32
      %575 = arith.addi %arg18, %c2_i32_545 : i32
      %c0_546 = arith.constant 0 : index
      %576 = arith.index_cast %575 : i32 to index
      %c3_547 = arith.constant 3 : index
      %c0_548 = arith.constant 0 : index
      %577 = vector.load %arg14[%c0_546, %576, %c3_547, %c0_548] : memref<2x14x14x8xf32, #tpu.memory_space<vmem>>, vector<1x1x10x8xf32>
      %578 = vector.shape_cast %577 : vector<1x1x10x8xf32> to vector<10x8xf32>
      %c13_549 = arith.constant 13 : index
      %c0_550 = arith.constant 0 : index
      %c0_551 = arith.constant 0 : index
      %579 = vector.load %arg4[%c13_549, %c0_550, %c0_551] : memref<25x8x128xf32, #tpu.memory_space<vmem>>, vector<1x8x128xf32>
      %580 = vector.shape_cast %579 : vector<1x8x128xf32> to vector<8x128xf32>
      %cst_552 = arith.constant dense<0.000000e+00> : vector<10x128xf32>
      %581 = tpu.matmul %578, %580, %cst_552 {dimension_numbers = #tpu.dot_dimension_numbers<[1], [0], [0], [1], [0, 0, 1, 1], [], []>} : vector<10x8xf32>, vector<8x128xf32>, vector<10x128xf32> -> vector<10x128xf32>
      %582 = arith.addf %574, %581 : vector<10x128xf32>
      %c2_i32_553 = arith.constant 2 : i32
      %583 = arith.addi %arg18, %c2_i32_553 : i32
      %c0_554 = arith.constant 0 : index
      %584 = arith.index_cast %583 : i32 to index
      %c4_555 = arith.constant 4 : index
      %c0_556 = arith.constant 0 : index
      %585 = vector.load %arg14[%c0_554, %584, %c4_555, %c0_556] : memref<2x14x14x8xf32, #tpu.memory_space<vmem>>, vector<1x1x10x8xf32>
      %586 = vector.shape_cast %585 : vector<1x1x10x8xf32> to vector<10x8xf32>
      %c14_557 = arith.constant 14 : index
      %c0_558 = arith.constant 0 : index
      %c0_559 = arith.constant 0 : index
      %587 = vector.load %arg4[%c14_557, %c0_558, %c0_559] : memref<25x8x128xf32, #tpu.memory_space<vmem>>, vector<1x8x128xf32>
      %588 = vector.shape_cast %587 : vector<1x8x128xf32> to vector<8x128xf32>
      %cst_560 = arith.constant dense<0.000000e+00> : vector<10x128xf32>
      %589 = tpu.matmul %586, %588, %cst_560 {dimension_numbers = #tpu.dot_dimension_numbers<[1], [0], [0], [1], [0, 0, 1, 1], [], []>} : vector<10x8xf32>, vector<8x128xf32>, vector<10x128xf32> -> vector<10x128xf32>
      %590 = arith.addf %582, %589 : vector<10x128xf32>
      %c3_i32_561 = arith.constant 3 : i32
      %591 = arith.addi %arg18, %c3_i32_561 : i32
      %c0_562 = arith.constant 0 : index
      %592 = arith.index_cast %591 : i32 to index
      %c0_563 = arith.constant 0 : index
      %c0_564 = arith.constant 0 : index
      %593 = vector.load %arg14[%c0_562, %592, %c0_563, %c0_564] : memref<2x14x14x8xf32, #tpu.memory_space<vmem>>, vector<1x1x10x8xf32>
      %594 = vector.shape_cast %593 : vector<1x1x10x8xf32> to vector<10x8xf32>
      %c15_565 = arith.constant 15 : index
      %c0_566 = arith.constant 0 : index
      %c0_567 = arith.constant 0 : index
      %595 = vector.load %arg4[%c15_565, %c0_566, %c0_567] : memref<25x8x128xf32, #tpu.memory_space<vmem>>, vector<1x8x128xf32>
      %596 = vector.shape_cast %595 : vector<1x8x128xf32> to vector<8x128xf32>
      %cst_568 = arith.constant dense<0.000000e+00> : vector<10x128xf32>
      %597 = tpu.matmul %594, %596, %cst_568 {dimension_numbers = #tpu.dot_dimension_numbers<[1], [0], [0], [1], [0, 0, 1, 1], [], []>} : vector<10x8xf32>, vector<8x128xf32>, vector<10x128xf32> -> vector<10x128xf32>
      %598 = arith.addf %590, %597 : vector<10x128xf32>
      %c3_i32_569 = arith.constant 3 : i32
      %599 = arith.addi %arg18, %c3_i32_569 : i32
      %c0_570 = arith.constant 0 : index
      %600 = arith.index_cast %599 : i32 to index
      %c1_571 = arith.constant 1 : index
      %c0_572 = arith.constant 0 : index
      %601 = vector.load %arg14[%c0_570, %600, %c1_571, %c0_572] : memref<2x14x14x8xf32, #tpu.memory_space<vmem>>, vector<1x1x10x8xf32>
      %602 = vector.shape_cast %601 : vector<1x1x10x8xf32> to vector<10x8xf32>
      %c16_573 = arith.constant 16 : index
      %c0_574 = arith.constant 0 : index
      %c0_575 = arith.constant 0 : index
      %603 = vector.load %arg4[%c16_573, %c0_574, %c0_575] : memref<25x8x128xf32, #tpu.memory_space<vmem>>, vector<1x8x128xf32>
      %604 = vector.shape_cast %603 : vector<1x8x128xf32> to vector<8x128xf32>
      %cst_576 = arith.constant dense<0.000000e+00> : vector<10x128xf32>
      %605 = tpu.matmul %602, %604, %cst_576 {dimension_numbers = #tpu.dot_dimension_numbers<[1], [0], [0], [1], [0, 0, 1, 1], [], []>} : vector<10x8xf32>, vector<8x128xf32>, vector<10x128xf32> -> vector<10x128xf32>
      %606 = arith.addf %598, %605 : vector<10x128xf32>
      %c3_i32_577 = arith.constant 3 : i32
      %607 = arith.addi %arg18, %c3_i32_577 : i32
      %c0_578 = arith.constant 0 : index
      %608 = arith.index_cast %607 : i32 to index
      %c2_579 = arith.constant 2 : index
      %c0_580 = arith.constant 0 : index
      %609 = vector.load %arg14[%c0_578, %608, %c2_579, %c0_580] : memref<2x14x14x8xf32, #tpu.memory_space<vmem>>, vector<1x1x10x8xf32>
      %610 = vector.shape_cast %609 : vector<1x1x10x8xf32> to vector<10x8xf32>
      %c17_581 = arith.constant 17 : index
      %c0_582 = arith.constant 0 : index
      %c0_583 = arith.constant 0 : index
      %611 = vector.load %arg4[%c17_581, %c0_582, %c0_583] : memref<25x8x128xf32, #tpu.memory_space<vmem>>, vector<1x8x128xf32>
      %612 = vector.shape_cast %611 : vector<1x8x128xf32> to vector<8x128xf32>
      %cst_584 = arith.constant dense<0.000000e+00> : vector<10x128xf32>
      %613 = tpu.matmul %610, %612, %cst_584 {dimension_numbers = #tpu.dot_dimension_numbers<[1], [0], [0], [1], [0, 0, 1, 1], [], []>} : vector<10x8xf32>, vector<8x128xf32>, vector<10x128xf32> -> vector<10x128xf32>
      %614 = arith.addf %606, %613 : vector<10x128xf32>
      %c3_i32_585 = arith.constant 3 : i32
      %615 = arith.addi %arg18, %c3_i32_585 : i32
      %c0_586 = arith.constant 0 : index
      %616 = arith.index_cast %615 : i32 to index
      %c3_587 = arith.constant 3 : index
      %c0_588 = arith.constant 0 : index
      %617 = vector.load %arg14[%c0_586, %616, %c3_587, %c0_588] : memref<2x14x14x8xf32, #tpu.memory_space<vmem>>, vector<1x1x10x8xf32>
      %618 = vector.shape_cast %617 : vector<1x1x10x8xf32> to vector<10x8xf32>
      %c18_589 = arith.constant 18 : index
      %c0_590 = arith.constant 0 : index
      %c0_591 = arith.constant 0 : index
      %619 = vector.load %arg4[%c18_589, %c0_590, %c0_591] : memref<25x8x128xf32, #tpu.memory_space<vmem>>, vector<1x8x128xf32>
      %620 = vector.shape_cast %619 : vector<1x8x128xf32> to vector<8x128xf32>
      %cst_592 = arith.constant dense<0.000000e+00> : vector<10x128xf32>
      %621 = tpu.matmul %618, %620, %cst_592 {dimension_numbers = #tpu.dot_dimension_numbers<[1], [0], [0], [1], [0, 0, 1, 1], [], []>} : vector<10x8xf32>, vector<8x128xf32>, vector<10x128xf32> -> vector<10x128xf32>
      %622 = arith.addf %614, %621 : vector<10x128xf32>
      %c3_i32_593 = arith.constant 3 : i32
      %623 = arith.addi %arg18, %c3_i32_593 : i32
      %c0_594 = arith.constant 0 : index
      %624 = arith.index_cast %623 : i32 to index
      %c4_595 = arith.constant 4 : index
      %c0_596 = arith.constant 0 : index
      %625 = vector.load %arg14[%c0_594, %624, %c4_595, %c0_596] : memref<2x14x14x8xf32, #tpu.memory_space<vmem>>, vector<1x1x10x8xf32>
      %626 = vector.shape_cast %625 : vector<1x1x10x8xf32> to vector<10x8xf32>
      %c19_597 = arith.constant 19 : index
      %c0_598 = arith.constant 0 : index
      %c0_599 = arith.constant 0 : index
      %627 = vector.load %arg4[%c19_597, %c0_598, %c0_599] : memref<25x8x128xf32, #tpu.memory_space<vmem>>, vector<1x8x128xf32>
      %628 = vector.shape_cast %627 : vector<1x8x128xf32> to vector<8x128xf32>
      %cst_600 = arith.constant dense<0.000000e+00> : vector<10x128xf32>
      %629 = tpu.matmul %626, %628, %cst_600 {dimension_numbers = #tpu.dot_dimension_numbers<[1], [0], [0], [1], [0, 0, 1, 1], [], []>} : vector<10x8xf32>, vector<8x128xf32>, vector<10x128xf32> -> vector<10x128xf32>
      %630 = arith.addf %622, %629 : vector<10x128xf32>
      %c4_i32_601 = arith.constant 4 : i32
      %631 = arith.addi %arg18, %c4_i32_601 : i32
      %c0_602 = arith.constant 0 : index
      %632 = arith.index_cast %631 : i32 to index
      %c0_603 = arith.constant 0 : index
      %c0_604 = arith.constant 0 : index
      %633 = vector.load %arg14[%c0_602, %632, %c0_603, %c0_604] : memref<2x14x14x8xf32, #tpu.memory_space<vmem>>, vector<1x1x10x8xf32>
      %634 = vector.shape_cast %633 : vector<1x1x10x8xf32> to vector<10x8xf32>
      %c20_605 = arith.constant 20 : index
      %c0_606 = arith.constant 0 : index
      %c0_607 = arith.constant 0 : index
      %635 = vector.load %arg4[%c20_605, %c0_606, %c0_607] : memref<25x8x128xf32, #tpu.memory_space<vmem>>, vector<1x8x128xf32>
      %636 = vector.shape_cast %635 : vector<1x8x128xf32> to vector<8x128xf32>
      %cst_608 = arith.constant dense<0.000000e+00> : vector<10x128xf32>
      %637 = tpu.matmul %634, %636, %cst_608 {dimension_numbers = #tpu.dot_dimension_numbers<[1], [0], [0], [1], [0, 0, 1, 1], [], []>} : vector<10x8xf32>, vector<8x128xf32>, vector<10x128xf32> -> vector<10x128xf32>
      %638 = arith.addf %630, %637 : vector<10x128xf32>
      %c4_i32_609 = arith.constant 4 : i32
      %639 = arith.addi %arg18, %c4_i32_609 : i32
      %c0_610 = arith.constant 0 : index
      %640 = arith.index_cast %639 : i32 to index
      %c1_611 = arith.constant 1 : index
      %c0_612 = arith.constant 0 : index
      %641 = vector.load %arg14[%c0_610, %640, %c1_611, %c0_612] : memref<2x14x14x8xf32, #tpu.memory_space<vmem>>, vector<1x1x10x8xf32>
      %642 = vector.shape_cast %641 : vector<1x1x10x8xf32> to vector<10x8xf32>
      %c21_613 = arith.constant 21 : index
      %c0_614 = arith.constant 0 : index
      %c0_615 = arith.constant 0 : index
      %643 = vector.load %arg4[%c21_613, %c0_614, %c0_615] : memref<25x8x128xf32, #tpu.memory_space<vmem>>, vector<1x8x128xf32>
      %644 = vector.shape_cast %643 : vector<1x8x128xf32> to vector<8x128xf32>
      %cst_616 = arith.constant dense<0.000000e+00> : vector<10x128xf32>
      %645 = tpu.matmul %642, %644, %cst_616 {dimension_numbers = #tpu.dot_dimension_numbers<[1], [0], [0], [1], [0, 0, 1, 1], [], []>} : vector<10x8xf32>, vector<8x128xf32>, vector<10x128xf32> -> vector<10x128xf32>
      %646 = arith.addf %638, %645 : vector<10x128xf32>
      %c4_i32_617 = arith.constant 4 : i32
      %647 = arith.addi %arg18, %c4_i32_617 : i32
      %c0_618 = arith.constant 0 : index
      %648 = arith.index_cast %647 : i32 to index
      %c2_619 = arith.constant 2 : index
      %c0_620 = arith.constant 0 : index
      %649 = vector.load %arg14[%c0_618, %648, %c2_619, %c0_620] : memref<2x14x14x8xf32, #tpu.memory_space<vmem>>, vector<1x1x10x8xf32>
      %650 = vector.shape_cast %649 : vector<1x1x10x8xf32> to vector<10x8xf32>
      %c22_621 = arith.constant 22 : index
      %c0_622 = arith.constant 0 : index
      %c0_623 = arith.constant 0 : index
      %651 = vector.load %arg4[%c22_621, %c0_622, %c0_623] : memref<25x8x128xf32, #tpu.memory_space<vmem>>, vector<1x8x128xf32>
      %652 = vector.shape_cast %651 : vector<1x8x128xf32> to vector<8x128xf32>
      %cst_624 = arith.constant dense<0.000000e+00> : vector<10x128xf32>
      %653 = tpu.matmul %650, %652, %cst_624 {dimension_numbers = #tpu.dot_dimension_numbers<[1], [0], [0], [1], [0, 0, 1, 1], [], []>} : vector<10x8xf32>, vector<8x128xf32>, vector<10x128xf32> -> vector<10x128xf32>
      %654 = arith.addf %646, %653 : vector<10x128xf32>
      %c4_i32_625 = arith.constant 4 : i32
      %655 = arith.addi %arg18, %c4_i32_625 : i32
      %c0_626 = arith.constant 0 : index
      %656 = arith.index_cast %655 : i32 to index
      %c3_627 = arith.constant 3 : index
      %c0_628 = arith.constant 0 : index
      %657 = vector.load %arg14[%c0_626, %656, %c3_627, %c0_628] : memref<2x14x14x8xf32, #tpu.memory_space<vmem>>, vector<1x1x10x8xf32>
      %658 = vector.shape_cast %657 : vector<1x1x10x8xf32> to vector<10x8xf32>
      %c23_629 = arith.constant 23 : index
      %c0_630 = arith.constant 0 : index
      %c0_631 = arith.constant 0 : index
      %659 = vector.load %arg4[%c23_629, %c0_630, %c0_631] : memref<25x8x128xf32, #tpu.memory_space<vmem>>, vector<1x8x128xf32>
      %660 = vector.shape_cast %659 : vector<1x8x128xf32> to vector<8x128xf32>
      %cst_632 = arith.constant dense<0.000000e+00> : vector<10x128xf32>
      %661 = tpu.matmul %658, %660, %cst_632 {dimension_numbers = #tpu.dot_dimension_numbers<[1], [0], [0], [1], [0, 0, 1, 1], [], []>} : vector<10x8xf32>, vector<8x128xf32>, vector<10x128xf32> -> vector<10x128xf32>
      %662 = arith.addf %654, %661 : vector<10x128xf32>
      %c4_i32_633 = arith.constant 4 : i32
      %663 = arith.addi %arg18, %c4_i32_633 : i32
      %c0_634 = arith.constant 0 : index
      %664 = arith.index_cast %663 : i32 to index
      %c4_635 = arith.constant 4 : index
      %c0_636 = arith.constant 0 : index
      %665 = vector.load %arg14[%c0_634, %664, %c4_635, %c0_636] : memref<2x14x14x8xf32, #tpu.memory_space<vmem>>, vector<1x1x10x8xf32>
      %666 = vector.shape_cast %665 : vector<1x1x10x8xf32> to vector<10x8xf32>
      %c24_637 = arith.constant 24 : index
      %c0_638 = arith.constant 0 : index
      %c0_639 = arith.constant 0 : index
      %667 = vector.load %arg4[%c24_637, %c0_638, %c0_639] : memref<25x8x128xf32, #tpu.memory_space<vmem>>, vector<1x8x128xf32>
      %668 = vector.shape_cast %667 : vector<1x8x128xf32> to vector<8x128xf32>
      %cst_640 = arith.constant dense<0.000000e+00> : vector<10x128xf32>
      %669 = tpu.matmul %666, %668, %cst_640 {dimension_numbers = #tpu.dot_dimension_numbers<[1], [0], [0], [1], [0, 0, 1, 1], [], []>} : vector<10x8xf32>, vector<8x128xf32>, vector<10x128xf32> -> vector<10x128xf32>
      %670 = arith.addf %662, %669 : vector<10x128xf32>
      %671 = vector.broadcast %19 : vector<1x128xf32> to vector<10x128xf32>
      %672 = arith.addf %670, %671 : vector<10x128xf32>
      %cst_641 = arith.constant 0.000000e+00 : f32
      %673 = vector.broadcast %cst_641 : f32 to vector<10x128xf32>
      %674 = arith.maximumf %672, %673 : vector<10x128xf32>
      %675 = vector.extract_strided_slice %674 {offsets = [0, 0], sizes = [10, 16], strides = [1, 1]} : vector<10x128xf32> to vector<10x16xf32>
      %c0_642 = arith.constant 0 : index
      %676 = arith.index_cast %arg18 : i32 to index
      %c0_643 = arith.constant 0 : index
      %c0_644 = arith.constant 0 : index
      %677 = vector.load %arg15[%c0_642, %676, %c0_643, %c0_644] : memref<2x10x10x16xf32, #tpu.memory_space<vmem>>, vector<1x1x10x16xf32>
      %678 = vector.shape_cast %677 : vector<1x1x10x16xf32> to vector<10x16xf32>
      %679 = vector.shape_cast %675 : vector<10x16xf32> to vector<1x1x10x16xf32>
      tpu.vector_store %arg15[%c0_642, %676, %c0_643, %c0_644], %679 {strides = array<i32>} : memref<2x10x10x16xf32, #tpu.memory_space<vmem>>, vector<1x1x10x16xf32>,
    }
    %c10_i32_19 = arith.constant 10 : i32
    %c0_i32_20 = arith.constant 0 : i32
    %c10_i32_21 = arith.constant 10 : i32
    %21 = arith.addi %c0_i32_20, %c10_i32_21 : i32
    %c1_i32_22 = arith.constant 1 : i32
    scf.for %arg18 = %c0_i32_20 to %21 step %c1_i32_22  : i32 {
      %cst_440 = arith.constant 0.000000e+00 : f32
      %470 = vector.broadcast %cst_440 : f32 to vector<10x128xf32>
      %c0_i32_441 = arith.constant 0 : i32
      %471 = arith.addi %arg18, %c0_i32_441 : i32
      %c1_442 = arith.constant 1 : index
      %472 = arith.index_cast %471 : i32 to index
      %c0_443 = arith.constant 0 : index
      %c0_444 = arith.constant 0 : index
      %473 = vector.load %arg14[%c1_442, %472, %c0_443, %c0_444] : memref<2x14x14x8xf32, #tpu.memory_space<vmem>>, vector<1x1x10x8xf32>
      %474 = vector.shape_cast %473 : vector<1x1x10x8xf32> to vector<10x8xf32>
      %c0_445 = arith.constant 0 : index
      %c0_446 = arith.constant 0 : index
      %c0_447 = arith.constant 0 : index
      %475 = vector.load %arg4[%c0_445, %c0_446, %c0_447] : memref<25x8x128xf32, #tpu.memory_space<vmem>>, vector<1x8x128xf32>
      %476 = vector.shape_cast %475 : vector<1x8x128xf32> to vector<8x128xf32>
      %cst_448 = arith.constant dense<0.000000e+00> : vector<10x128xf32>
      %477 = tpu.matmul %474, %476, %cst_448 {dimension_numbers = #tpu.dot_dimension_numbers<[1], [0], [0], [1], [0, 0, 1, 1], [], []>} : vector<10x8xf32>, vector<8x128xf32>, vector<10x128xf32> -> vector<10x128xf32>
      %478 = arith.addf %470, %477 : vector<10x128xf32>
      %c0_i32_449 = arith.constant 0 : i32
      %479 = arith.addi %arg18, %c0_i32_449 : i32
      %c1_450 = arith.constant 1 : index
      %480 = arith.index_cast %479 : i32 to index
      %c1_451 = arith.constant 1 : index
      %c0_452 = arith.constant 0 : index
      %481 = vector.load %arg14[%c1_450, %480, %c1_451, %c0_452] : memref<2x14x14x8xf32, #tpu.memory_space<vmem>>, vector<1x1x10x8xf32>
      %482 = vector.shape_cast %481 : vector<1x1x10x8xf32> to vector<10x8xf32>
      %c1_453 = arith.constant 1 : index
      %c0_454 = arith.constant 0 : index
      %c0_455 = arith.constant 0 : index
      %483 = vector.load %arg4[%c1_453, %c0_454, %c0_455] : memref<25x8x128xf32, #tpu.memory_space<vmem>>, vector<1x8x128xf32>
      %484 = vector.shape_cast %483 : vector<1x8x128xf32> to vector<8x128xf32>
      %cst_456 = arith.constant dense<0.000000e+00> : vector<10x128xf32>
      %485 = tpu.matmul %482, %484, %cst_456 {dimension_numbers = #tpu.dot_dimension_numbers<[1], [0], [0], [1], [0, 0, 1, 1], [], []>} : vector<10x8xf32>, vector<8x128xf32>, vector<10x128xf32> -> vector<10x128xf32>
      %486 = arith.addf %478, %485 : vector<10x128xf32>
      %c0_i32_457 = arith.constant 0 : i32
      %487 = arith.addi %arg18, %c0_i32_457 : i32
      %c1_458 = arith.constant 1 : index
      %488 = arith.index_cast %487 : i32 to index
      %c2_459 = arith.constant 2 : index
      %c0_460 = arith.constant 0 : index
      %489 = vector.load %arg14[%c1_458, %488, %c2_459, %c0_460] : memref<2x14x14x8xf32, #tpu.memory_space<vmem>>, vector<1x1x10x8xf32>
      %490 = vector.shape_cast %489 : vector<1x1x10x8xf32> to vector<10x8xf32>
      %c2_461 = arith.constant 2 : index
      %c0_462 = arith.constant 0 : index
      %c0_463 = arith.constant 0 : index
      %491 = vector.load %arg4[%c2_461, %c0_462, %c0_463] : memref<25x8x128xf32, #tpu.memory_space<vmem>>, vector<1x8x128xf32>
      %492 = vector.shape_cast %491 : vector<1x8x128xf32> to vector<8x128xf32>
      %cst_464 = arith.constant dense<0.000000e+00> : vector<10x128xf32>
      %493 = tpu.matmul %490, %492, %cst_464 {dimension_numbers = #tpu.dot_dimension_numbers<[1], [0], [0], [1], [0, 0, 1, 1], [], []>} : vector<10x8xf32>, vector<8x128xf32>, vector<10x128xf32> -> vector<10x128xf32>
      %494 = arith.addf %486, %493 : vector<10x128xf32>
      %c0_i32_465 = arith.constant 0 : i32
      %495 = arith.addi %arg18, %c0_i32_465 : i32
      %c1_466 = arith.constant 1 : index
      %496 = arith.index_cast %495 : i32 to index
      %c3_467 = arith.constant 3 : index
      %c0_468 = arith.constant 0 : index
      %497 = vector.load %arg14[%c1_466, %496, %c3_467, %c0_468] : memref<2x14x14x8xf32, #tpu.memory_space<vmem>>, vector<1x1x10x8xf32>
      %498 = vector.shape_cast %497 : vector<1x1x10x8xf32> to vector<10x8xf32>
      %c3_469 = arith.constant 3 : index
      %c0_470 = arith.constant 0 : index
      %c0_471 = arith.constant 0 : index
      %499 = vector.load %arg4[%c3_469, %c0_470, %c0_471] : memref<25x8x128xf32, #tpu.memory_space<vmem>>, vector<1x8x128xf32>
      %500 = vector.shape_cast %499 : vector<1x8x128xf32> to vector<8x128xf32>
      %cst_472 = arith.constant dense<0.000000e+00> : vector<10x128xf32>
      %501 = tpu.matmul %498, %500, %cst_472 {dimension_numbers = #tpu.dot_dimension_numbers<[1], [0], [0], [1], [0, 0, 1, 1], [], []>} : vector<10x8xf32>, vector<8x128xf32>, vector<10x128xf32> -> vector<10x128xf32>
      %502 = arith.addf %494, %501 : vector<10x128xf32>
      %c0_i32_473 = arith.constant 0 : i32
      %503 = arith.addi %arg18, %c0_i32_473 : i32
      %c1_474 = arith.constant 1 : index
      %504 = arith.index_cast %503 : i32 to index
      %c4_475 = arith.constant 4 : index
      %c0_476 = arith.constant 0 : index
      %505 = vector.load %arg14[%c1_474, %504, %c4_475, %c0_476] : memref<2x14x14x8xf32, #tpu.memory_space<vmem>>, vector<1x1x10x8xf32>
      %506 = vector.shape_cast %505 : vector<1x1x10x8xf32> to vector<10x8xf32>
      %c4_477 = arith.constant 4 : index
      %c0_478 = arith.constant 0 : index
      %c0_479 = arith.constant 0 : index
      %507 = vector.load %arg4[%c4_477, %c0_478, %c0_479] : memref<25x8x128xf32, #tpu.memory_space<vmem>>, vector<1x8x128xf32>
      %508 = vector.shape_cast %507 : vector<1x8x128xf32> to vector<8x128xf32>
      %cst_480 = arith.constant dense<0.000000e+00> : vector<10x128xf32>
      %509 = tpu.matmul %506, %508, %cst_480 {dimension_numbers = #tpu.dot_dimension_numbers<[1], [0], [0], [1], [0, 0, 1, 1], [], []>} : vector<10x8xf32>, vector<8x128xf32>, vector<10x128xf32> -> vector<10x128xf32>
      %510 = arith.addf %502, %509 : vector<10x128xf32>
      %c1_i32_481 = arith.constant 1 : i32
      %511 = arith.addi %arg18, %c1_i32_481 : i32
      %c1_482 = arith.constant 1 : index
      %512 = arith.index_cast %511 : i32 to index
      %c0_483 = arith.constant 0 : index
      %c0_484 = arith.constant 0 : index
      %513 = vector.load %arg14[%c1_482, %512, %c0_483, %c0_484] : memref<2x14x14x8xf32, #tpu.memory_space<vmem>>, vector<1x1x10x8xf32>
      %514 = vector.shape_cast %513 : vector<1x1x10x8xf32> to vector<10x8xf32>
      %c5_485 = arith.constant 5 : index
      %c0_486 = arith.constant 0 : index
      %c0_487 = arith.constant 0 : index
      %515 = vector.load %arg4[%c5_485, %c0_486, %c0_487] : memref<25x8x128xf32, #tpu.memory_space<vmem>>, vector<1x8x128xf32>
      %516 = vector.shape_cast %515 : vector<1x8x128xf32> to vector<8x128xf32>
      %cst_488 = arith.constant dense<0.000000e+00> : vector<10x128xf32>
      %517 = tpu.matmul %514, %516, %cst_488 {dimension_numbers = #tpu.dot_dimension_numbers<[1], [0], [0], [1], [0, 0, 1, 1], [], []>} : vector<10x8xf32>, vector<8x128xf32>, vector<10x128xf32> -> vector<10x128xf32>
      %518 = arith.addf %510, %517 : vector<10x128xf32>
      %c1_i32_489 = arith.constant 1 : i32
      %519 = arith.addi %arg18, %c1_i32_489 : i32
      %c1_490 = arith.constant 1 : index
      %520 = arith.index_cast %519 : i32 to index
      %c1_491 = arith.constant 1 : index
      %c0_492 = arith.constant 0 : index
      %521 = vector.load %arg14[%c1_490, %520, %c1_491, %c0_492] : memref<2x14x14x8xf32, #tpu.memory_space<vmem>>, vector<1x1x10x8xf32>
      %522 = vector.shape_cast %521 : vector<1x1x10x8xf32> to vector<10x8xf32>
      %c6_493 = arith.constant 6 : index
      %c0_494 = arith.constant 0 : index
      %c0_495 = arith.constant 0 : index
      %523 = vector.load %arg4[%c6_493, %c0_494, %c0_495] : memref<25x8x128xf32, #tpu.memory_space<vmem>>, vector<1x8x128xf32>
      %524 = vector.shape_cast %523 : vector<1x8x128xf32> to vector<8x128xf32>
      %cst_496 = arith.constant dense<0.000000e+00> : vector<10x128xf32>
      %525 = tpu.matmul %522, %524, %cst_496 {dimension_numbers = #tpu.dot_dimension_numbers<[1], [0], [0], [1], [0, 0, 1, 1], [], []>} : vector<10x8xf32>, vector<8x128xf32>, vector<10x128xf32> -> vector<10x128xf32>
      %526 = arith.addf %518, %525 : vector<10x128xf32>
      %c1_i32_497 = arith.constant 1 : i32
      %527 = arith.addi %arg18, %c1_i32_497 : i32
      %c1_498 = arith.constant 1 : index
      %528 = arith.index_cast %527 : i32 to index
      %c2_499 = arith.constant 2 : index
      %c0_500 = arith.constant 0 : index
      %529 = vector.load %arg14[%c1_498, %528, %c2_499, %c0_500] : memref<2x14x14x8xf32, #tpu.memory_space<vmem>>, vector<1x1x10x8xf32>
      %530 = vector.shape_cast %529 : vector<1x1x10x8xf32> to vector<10x8xf32>
      %c7_501 = arith.constant 7 : index
      %c0_502 = arith.constant 0 : index
      %c0_503 = arith.constant 0 : index
      %531 = vector.load %arg4[%c7_501, %c0_502, %c0_503] : memref<25x8x128xf32, #tpu.memory_space<vmem>>, vector<1x8x128xf32>
      %532 = vector.shape_cast %531 : vector<1x8x128xf32> to vector<8x128xf32>
      %cst_504 = arith.constant dense<0.000000e+00> : vector<10x128xf32>
      %533 = tpu.matmul %530, %532, %cst_504 {dimension_numbers = #tpu.dot_dimension_numbers<[1], [0], [0], [1], [0, 0, 1, 1], [], []>} : vector<10x8xf32>, vector<8x128xf32>, vector<10x128xf32> -> vector<10x128xf32>
      %534 = arith.addf %526, %533 : vector<10x128xf32>
      %c1_i32_505 = arith.constant 1 : i32
      %535 = arith.addi %arg18, %c1_i32_505 : i32
      %c1_506 = arith.constant 1 : index
      %536 = arith.index_cast %535 : i32 to index
      %c3_507 = arith.constant 3 : index
      %c0_508 = arith.constant 0 : index
      %537 = vector.load %arg14[%c1_506, %536, %c3_507, %c0_508] : memref<2x14x14x8xf32, #tpu.memory_space<vmem>>, vector<1x1x10x8xf32>
      %538 = vector.shape_cast %537 : vector<1x1x10x8xf32> to vector<10x8xf32>
      %c8_509 = arith.constant 8 : index
      %c0_510 = arith.constant 0 : index
      %c0_511 = arith.constant 0 : index
      %539 = vector.load %arg4[%c8_509, %c0_510, %c0_511] : memref<25x8x128xf32, #tpu.memory_space<vmem>>, vector<1x8x128xf32>
      %540 = vector.shape_cast %539 : vector<1x8x128xf32> to vector<8x128xf32>
      %cst_512 = arith.constant dense<0.000000e+00> : vector<10x128xf32>
      %541 = tpu.matmul %538, %540, %cst_512 {dimension_numbers = #tpu.dot_dimension_numbers<[1], [0], [0], [1], [0, 0, 1, 1], [], []>} : vector<10x8xf32>, vector<8x128xf32>, vector<10x128xf32> -> vector<10x128xf32>
      %542 = arith.addf %534, %541 : vector<10x128xf32>
      %c1_i32_513 = arith.constant 1 : i32
      %543 = arith.addi %arg18, %c1_i32_513 : i32
      %c1_514 = arith.constant 1 : index
      %544 = arith.index_cast %543 : i32 to index
      %c4_515 = arith.constant 4 : index
      %c0_516 = arith.constant 0 : index
      %545 = vector.load %arg14[%c1_514, %544, %c4_515, %c0_516] : memref<2x14x14x8xf32, #tpu.memory_space<vmem>>, vector<1x1x10x8xf32>
      %546 = vector.shape_cast %545 : vector<1x1x10x8xf32> to vector<10x8xf32>
      %c9_517 = arith.constant 9 : index
      %c0_518 = arith.constant 0 : index
      %c0_519 = arith.constant 0 : index
      %547 = vector.load %arg4[%c9_517, %c0_518, %c0_519] : memref<25x8x128xf32, #tpu.memory_space<vmem>>, vector<1x8x128xf32>
      %548 = vector.shape_cast %547 : vector<1x8x128xf32> to vector<8x128xf32>
      %cst_520 = arith.constant dense<0.000000e+00> : vector<10x128xf32>
      %549 = tpu.matmul %546, %548, %cst_520 {dimension_numbers = #tpu.dot_dimension_numbers<[1], [0], [0], [1], [0, 0, 1, 1], [], []>} : vector<10x8xf32>, vector<8x128xf32>, vector<10x128xf32> -> vector<10x128xf32>
      %550 = arith.addf %542, %549 : vector<10x128xf32>
      %c2_i32_521 = arith.constant 2 : i32
      %551 = arith.addi %arg18, %c2_i32_521 : i32
      %c1_522 = arith.constant 1 : index
      %552 = arith.index_cast %551 : i32 to index
      %c0_523 = arith.constant 0 : index
      %c0_524 = arith.constant 0 : index
      %553 = vector.load %arg14[%c1_522, %552, %c0_523, %c0_524] : memref<2x14x14x8xf32, #tpu.memory_space<vmem>>, vector<1x1x10x8xf32>
      %554 = vector.shape_cast %553 : vector<1x1x10x8xf32> to vector<10x8xf32>
      %c10_525 = arith.constant 10 : index
      %c0_526 = arith.constant 0 : index
      %c0_527 = arith.constant 0 : index
      %555 = vector.load %arg4[%c10_525, %c0_526, %c0_527] : memref<25x8x128xf32, #tpu.memory_space<vmem>>, vector<1x8x128xf32>
      %556 = vector.shape_cast %555 : vector<1x8x128xf32> to vector<8x128xf32>
      %cst_528 = arith.constant dense<0.000000e+00> : vector<10x128xf32>
      %557 = tpu.matmul %554, %556, %cst_528 {dimension_numbers = #tpu.dot_dimension_numbers<[1], [0], [0], [1], [0, 0, 1, 1], [], []>} : vector<10x8xf32>, vector<8x128xf32>, vector<10x128xf32> -> vector<10x128xf32>
      %558 = arith.addf %550, %557 : vector<10x128xf32>
      %c2_i32_529 = arith.constant 2 : i32
      %559 = arith.addi %arg18, %c2_i32_529 : i32
      %c1_530 = arith.constant 1 : index
      %560 = arith.index_cast %559 : i32 to index
      %c1_531 = arith.constant 1 : index
      %c0_532 = arith.constant 0 : index
      %561 = vector.load %arg14[%c1_530, %560, %c1_531, %c0_532] : memref<2x14x14x8xf32, #tpu.memory_space<vmem>>, vector<1x1x10x8xf32>
      %562 = vector.shape_cast %561 : vector<1x1x10x8xf32> to vector<10x8xf32>
      %c11_533 = arith.constant 11 : index
      %c0_534 = arith.constant 0 : index
      %c0_535 = arith.constant 0 : index
      %563 = vector.load %arg4[%c11_533, %c0_534, %c0_535] : memref<25x8x128xf32, #tpu.memory_space<vmem>>, vector<1x8x128xf32>
      %564 = vector.shape_cast %563 : vector<1x8x128xf32> to vector<8x128xf32>
      %cst_536 = arith.constant dense<0.000000e+00> : vector<10x128xf32>
      %565 = tpu.matmul %562, %564, %cst_536 {dimension_numbers = #tpu.dot_dimension_numbers<[1], [0], [0], [1], [0, 0, 1, 1], [], []>} : vector<10x8xf32>, vector<8x128xf32>, vector<10x128xf32> -> vector<10x128xf32>
      %566 = arith.addf %558, %565 : vector<10x128xf32>
      %c2_i32_537 = arith.constant 2 : i32
      %567 = arith.addi %arg18, %c2_i32_537 : i32
      %c1_538 = arith.constant 1 : index
      %568 = arith.index_cast %567 : i32 to index
      %c2_539 = arith.constant 2 : index
      %c0_540 = arith.constant 0 : index
      %569 = vector.load %arg14[%c1_538, %568, %c2_539, %c0_540] : memref<2x14x14x8xf32, #tpu.memory_space<vmem>>, vector<1x1x10x8xf32>
      %570 = vector.shape_cast %569 : vector<1x1x10x8xf32> to vector<10x8xf32>
      %c12_541 = arith.constant 12 : index
      %c0_542 = arith.constant 0 : index
      %c0_543 = arith.constant 0 : index
      %571 = vector.load %arg4[%c12_541, %c0_542, %c0_543] : memref<25x8x128xf32, #tpu.memory_space<vmem>>, vector<1x8x128xf32>
      %572 = vector.shape_cast %571 : vector<1x8x128xf32> to vector<8x128xf32>
      %cst_544 = arith.constant dense<0.000000e+00> : vector<10x128xf32>
      %573 = tpu.matmul %570, %572, %cst_544 {dimension_numbers = #tpu.dot_dimension_numbers<[1], [0], [0], [1], [0, 0, 1, 1], [], []>} : vector<10x8xf32>, vector<8x128xf32>, vector<10x128xf32> -> vector<10x128xf32>
      %574 = arith.addf %566, %573 : vector<10x128xf32>
      %c2_i32_545 = arith.constant 2 : i32
      %575 = arith.addi %arg18, %c2_i32_545 : i32
      %c1_546 = arith.constant 1 : index
      %576 = arith.index_cast %575 : i32 to index
      %c3_547 = arith.constant 3 : index
      %c0_548 = arith.constant 0 : index
      %577 = vector.load %arg14[%c1_546, %576, %c3_547, %c0_548] : memref<2x14x14x8xf32, #tpu.memory_space<vmem>>, vector<1x1x10x8xf32>
      %578 = vector.shape_cast %577 : vector<1x1x10x8xf32> to vector<10x8xf32>
      %c13_549 = arith.constant 13 : index
      %c0_550 = arith.constant 0 : index
      %c0_551 = arith.constant 0 : index
      %579 = vector.load %arg4[%c13_549, %c0_550, %c0_551] : memref<25x8x128xf32, #tpu.memory_space<vmem>>, vector<1x8x128xf32>
      %580 = vector.shape_cast %579 : vector<1x8x128xf32> to vector<8x128xf32>
      %cst_552 = arith.constant dense<0.000000e+00> : vector<10x128xf32>
      %581 = tpu.matmul %578, %580, %cst_552 {dimension_numbers = #tpu.dot_dimension_numbers<[1], [0], [0], [1], [0, 0, 1, 1], [], []>} : vector<10x8xf32>, vector<8x128xf32>, vector<10x128xf32> -> vector<10x128xf32>
      %582 = arith.addf %574, %581 : vector<10x128xf32>
      %c2_i32_553 = arith.constant 2 : i32
      %583 = arith.addi %arg18, %c2_i32_553 : i32
      %c1_554 = arith.constant 1 : index
      %584 = arith.index_cast %583 : i32 to index
      %c4_555 = arith.constant 4 : index
      %c0_556 = arith.constant 0 : index
      %585 = vector.load %arg14[%c1_554, %584, %c4_555, %c0_556] : memref<2x14x14x8xf32, #tpu.memory_space<vmem>>, vector<1x1x10x8xf32>
      %586 = vector.shape_cast %585 : vector<1x1x10x8xf32> to vector<10x8xf32>
      %c14_557 = arith.constant 14 : index
      %c0_558 = arith.constant 0 : index
      %c0_559 = arith.constant 0 : index
      %587 = vector.load %arg4[%c14_557, %c0_558, %c0_559] : memref<25x8x128xf32, #tpu.memory_space<vmem>>, vector<1x8x128xf32>
      %588 = vector.shape_cast %587 : vector<1x8x128xf32> to vector<8x128xf32>
      %cst_560 = arith.constant dense<0.000000e+00> : vector<10x128xf32>
      %589 = tpu.matmul %586, %588, %cst_560 {dimension_numbers = #tpu.dot_dimension_numbers<[1], [0], [0], [1], [0, 0, 1, 1], [], []>} : vector<10x8xf32>, vector<8x128xf32>, vector<10x128xf32> -> vector<10x128xf32>
      %590 = arith.addf %582, %589 : vector<10x128xf32>
      %c3_i32_561 = arith.constant 3 : i32
      %591 = arith.addi %arg18, %c3_i32_561 : i32
      %c1_562 = arith.constant 1 : index
      %592 = arith.index_cast %591 : i32 to index
      %c0_563 = arith.constant 0 : index
      %c0_564 = arith.constant 0 : index
      %593 = vector.load %arg14[%c1_562, %592, %c0_563, %c0_564] : memref<2x14x14x8xf32, #tpu.memory_space<vmem>>, vector<1x1x10x8xf32>
      %594 = vector.shape_cast %593 : vector<1x1x10x8xf32> to vector<10x8xf32>
      %c15_565 = arith.constant 15 : index
      %c0_566 = arith.constant 0 : index
      %c0_567 = arith.constant 0 : index
      %595 = vector.load %arg4[%c15_565, %c0_566, %c0_567] : memref<25x8x128xf32, #tpu.memory_space<vmem>>, vector<1x8x128xf32>
      %596 = vector.shape_cast %595 : vector<1x8x128xf32> to vector<8x128xf32>
      %cst_568 = arith.constant dense<0.000000e+00> : vector<10x128xf32>
      %597 = tpu.matmul %594, %596, %cst_568 {dimension_numbers = #tpu.dot_dimension_numbers<[1], [0], [0], [1], [0, 0, 1, 1], [], []>} : vector<10x8xf32>, vector<8x128xf32>, vector<10x128xf32> -> vector<10x128xf32>
      %598 = arith.addf %590, %597 : vector<10x128xf32>
      %c3_i32_569 = arith.constant 3 : i32
      %599 = arith.addi %arg18, %c3_i32_569 : i32
      %c1_570 = arith.constant 1 : index
      %600 = arith.index_cast %599 : i32 to index
      %c1_571 = arith.constant 1 : index
      %c0_572 = arith.constant 0 : index
      %601 = vector.load %arg14[%c1_570, %600, %c1_571, %c0_572] : memref<2x14x14x8xf32, #tpu.memory_space<vmem>>, vector<1x1x10x8xf32>
      %602 = vector.shape_cast %601 : vector<1x1x10x8xf32> to vector<10x8xf32>
      %c16_573 = arith.constant 16 : index
      %c0_574 = arith.constant 0 : index
      %c0_575 = arith.constant 0 : index
      %603 = vector.load %arg4[%c16_573, %c0_574, %c0_575] : memref<25x8x128xf32, #tpu.memory_space<vmem>>, vector<1x8x128xf32>
      %604 = vector.shape_cast %603 : vector<1x8x128xf32> to vector<8x128xf32>
      %cst_576 = arith.constant dense<0.000000e+00> : vector<10x128xf32>
      %605 = tpu.matmul %602, %604, %cst_576 {dimension_numbers = #tpu.dot_dimension_numbers<[1], [0], [0], [1], [0, 0, 1, 1], [], []>} : vector<10x8xf32>, vector<8x128xf32>, vector<10x128xf32> -> vector<10x128xf32>
      %606 = arith.addf %598, %605 : vector<10x128xf32>
      %c3_i32_577 = arith.constant 3 : i32
      %607 = arith.addi %arg18, %c3_i32_577 : i32
      %c1_578 = arith.constant 1 : index
      %608 = arith.index_cast %607 : i32 to index
      %c2_579 = arith.constant 2 : index
      %c0_580 = arith.constant 0 : index
      %609 = vector.load %arg14[%c1_578, %608, %c2_579, %c0_580] : memref<2x14x14x8xf32, #tpu.memory_space<vmem>>, vector<1x1x10x8xf32>
      %610 = vector.shape_cast %609 : vector<1x1x10x8xf32> to vector<10x8xf32>
      %c17_581 = arith.constant 17 : index
      %c0_582 = arith.constant 0 : index
      %c0_583 = arith.constant 0 : index
      %611 = vector.load %arg4[%c17_581, %c0_582, %c0_583] : memref<25x8x128xf32, #tpu.memory_space<vmem>>, vector<1x8x128xf32>
      %612 = vector.shape_cast %611 : vector<1x8x128xf32> to vector<8x128xf32>
      %cst_584 = arith.constant dense<0.000000e+00> : vector<10x128xf32>
      %613 = tpu.matmul %610, %612, %cst_584 {dimension_numbers = #tpu.dot_dimension_numbers<[1], [0], [0], [1], [0, 0, 1, 1], [], []>} : vector<10x8xf32>, vector<8x128xf32>, vector<10x128xf32> -> vector<10x128xf32>
      %614 = arith.addf %606, %613 : vector<10x128xf32>
      %c3_i32_585 = arith.constant 3 : i32
      %615 = arith.addi %arg18, %c3_i32_585 : i32
      %c1_586 = arith.constant 1 : index
      %616 = arith.index_cast %615 : i32 to index
      %c3_587 = arith.constant 3 : index
      %c0_588 = arith.constant 0 : index
      %617 = vector.load %arg14[%c1_586, %616, %c3_587, %c0_588] : memref<2x14x14x8xf32, #tpu.memory_space<vmem>>, vector<1x1x10x8xf32>
      %618 = vector.shape_cast %617 : vector<1x1x10x8xf32> to vector<10x8xf32>
      %c18_589 = arith.constant 18 : index
      %c0_590 = arith.constant 0 : index
      %c0_591 = arith.constant 0 : index
      %619 = vector.load %arg4[%c18_589, %c0_590, %c0_591] : memref<25x8x128xf32, #tpu.memory_space<vmem>>, vector<1x8x128xf32>
      %620 = vector.shape_cast %619 : vector<1x8x128xf32> to vector<8x128xf32>
      %cst_592 = arith.constant dense<0.000000e+00> : vector<10x128xf32>
      %621 = tpu.matmul %618, %620, %cst_592 {dimension_numbers = #tpu.dot_dimension_numbers<[1], [0], [0], [1], [0, 0, 1, 1], [], []>} : vector<10x8xf32>, vector<8x128xf32>, vector<10x128xf32> -> vector<10x128xf32>
      %622 = arith.addf %614, %621 : vector<10x128xf32>
      %c3_i32_593 = arith.constant 3 : i32
      %623 = arith.addi %arg18, %c3_i32_593 : i32
      %c1_594 = arith.constant 1 : index
      %624 = arith.index_cast %623 : i32 to index
      %c4_595 = arith.constant 4 : index
      %c0_596 = arith.constant 0 : index
      %625 = vector.load %arg14[%c1_594, %624, %c4_595, %c0_596] : memref<2x14x14x8xf32, #tpu.memory_space<vmem>>, vector<1x1x10x8xf32>
      %626 = vector.shape_cast %625 : vector<1x1x10x8xf32> to vector<10x8xf32>
      %c19_597 = arith.constant 19 : index
      %c0_598 = arith.constant 0 : index
      %c0_599 = arith.constant 0 : index
      %627 = vector.load %arg4[%c19_597, %c0_598, %c0_599] : memref<25x8x128xf32, #tpu.memory_space<vmem>>, vector<1x8x128xf32>
      %628 = vector.shape_cast %627 : vector<1x8x128xf32> to vector<8x128xf32>
      %cst_600 = arith.constant dense<0.000000e+00> : vector<10x128xf32>
      %629 = tpu.matmul %626, %628, %cst_600 {dimension_numbers = #tpu.dot_dimension_numbers<[1], [0], [0], [1], [0, 0, 1, 1], [], []>} : vector<10x8xf32>, vector<8x128xf32>, vector<10x128xf32> -> vector<10x128xf32>
      %630 = arith.addf %622, %629 : vector<10x128xf32>
      %c4_i32_601 = arith.constant 4 : i32
      %631 = arith.addi %arg18, %c4_i32_601 : i32
      %c1_602 = arith.constant 1 : index
      %632 = arith.index_cast %631 : i32 to index
      %c0_603 = arith.constant 0 : index
      %c0_604 = arith.constant 0 : index
      %633 = vector.load %arg14[%c1_602, %632, %c0_603, %c0_604] : memref<2x14x14x8xf32, #tpu.memory_space<vmem>>, vector<1x1x10x8xf32>
      %634 = vector.shape_cast %633 : vector<1x1x10x8xf32> to vector<10x8xf32>
      %c20_605 = arith.constant 20 : index
      %c0_606 = arith.constant 0 : index
      %c0_607 = arith.constant 0 : index
      %635 = vector.load %arg4[%c20_605, %c0_606, %c0_607] : memref<25x8x128xf32, #tpu.memory_space<vmem>>, vector<1x8x128xf32>
      %636 = vector.shape_cast %635 : vector<1x8x128xf32> to vector<8x128xf32>
      %cst_608 = arith.constant dense<0.000000e+00> : vector<10x128xf32>
      %637 = tpu.matmul %634, %636, %cst_608 {dimension_numbers = #tpu.dot_dimension_numbers<[1], [0], [0], [1], [0, 0, 1, 1], [], []>} : vector<10x8xf32>, vector<8x128xf32>, vector<10x128xf32> -> vector<10x128xf32>
      %638 = arith.addf %630, %637 : vector<10x128xf32>
      %c4_i32_609 = arith.constant 4 : i32
      %639 = arith.addi %arg18, %c4_i32_609 : i32
      %c1_610 = arith.constant 1 : index
      %640 = arith.index_cast %639 : i32 to index
      %c1_611 = arith.constant 1 : index
      %c0_612 = arith.constant 0 : index
      %641 = vector.load %arg14[%c1_610, %640, %c1_611, %c0_612] : memref<2x14x14x8xf32, #tpu.memory_space<vmem>>, vector<1x1x10x8xf32>
      %642 = vector.shape_cast %641 : vector<1x1x10x8xf32> to vector<10x8xf32>
      %c21_613 = arith.constant 21 : index
      %c0_614 = arith.constant 0 : index
      %c0_615 = arith.constant 0 : index
      %643 = vector.load %arg4[%c21_613, %c0_614, %c0_615] : memref<25x8x128xf32, #tpu.memory_space<vmem>>, vector<1x8x128xf32>
      %644 = vector.shape_cast %643 : vector<1x8x128xf32> to vector<8x128xf32>
      %cst_616 = arith.constant dense<0.000000e+00> : vector<10x128xf32>
      %645 = tpu.matmul %642, %644, %cst_616 {dimension_numbers = #tpu.dot_dimension_numbers<[1], [0], [0], [1], [0, 0, 1, 1], [], []>} : vector<10x8xf32>, vector<8x128xf32>, vector<10x128xf32> -> vector<10x128xf32>
      %646 = arith.addf %638, %645 : vector<10x128xf32>
      %c4_i32_617 = arith.constant 4 : i32
      %647 = arith.addi %arg18, %c4_i32_617 : i32
      %c1_618 = arith.constant 1 : index
      %648 = arith.index_cast %647 : i32 to index
      %c2_619 = arith.constant 2 : index
      %c0_620 = arith.constant 0 : index
      %649 = vector.load %arg14[%c1_618, %648, %c2_619, %c0_620] : memref<2x14x14x8xf32, #tpu.memory_space<vmem>>, vector<1x1x10x8xf32>
      %650 = vector.shape_cast %649 : vector<1x1x10x8xf32> to vector<10x8xf32>
      %c22_621 = arith.constant 22 : index
      %c0_622 = arith.constant 0 : index
      %c0_623 = arith.constant 0 : index
      %651 = vector.load %arg4[%c22_621, %c0_622, %c0_623] : memref<25x8x128xf32, #tpu.memory_space<vmem>>, vector<1x8x128xf32>
      %652 = vector.shape_cast %651 : vector<1x8x128xf32> to vector<8x128xf32>
      %cst_624 = arith.constant dense<0.000000e+00> : vector<10x128xf32>
      %653 = tpu.matmul %650, %652, %cst_624 {dimension_numbers = #tpu.dot_dimension_numbers<[1], [0], [0], [1], [0, 0, 1, 1], [], []>} : vector<10x8xf32>, vector<8x128xf32>, vector<10x128xf32> -> vector<10x128xf32>
      %654 = arith.addf %646, %653 : vector<10x128xf32>
      %c4_i32_625 = arith.constant 4 : i32
      %655 = arith.addi %arg18, %c4_i32_625 : i32
      %c1_626 = arith.constant 1 : index
      %656 = arith.index_cast %655 : i32 to index
      %c3_627 = arith.constant 3 : index
      %c0_628 = arith.constant 0 : index
      %657 = vector.load %arg14[%c1_626, %656, %c3_627, %c0_628] : memref<2x14x14x8xf32, #tpu.memory_space<vmem>>, vector<1x1x10x8xf32>
      %658 = vector.shape_cast %657 : vector<1x1x10x8xf32> to vector<10x8xf32>
      %c23_629 = arith.constant 23 : index
      %c0_630 = arith.constant 0 : index
      %c0_631 = arith.constant 0 : index
      %659 = vector.load %arg4[%c23_629, %c0_630, %c0_631] : memref<25x8x128xf32, #tpu.memory_space<vmem>>, vector<1x8x128xf32>
      %660 = vector.shape_cast %659 : vector<1x8x128xf32> to vector<8x128xf32>
      %cst_632 = arith.constant dense<0.000000e+00> : vector<10x128xf32>
      %661 = tpu.matmul %658, %660, %cst_632 {dimension_numbers = #tpu.dot_dimension_numbers<[1], [0], [0], [1], [0, 0, 1, 1], [], []>} : vector<10x8xf32>, vector<8x128xf32>, vector<10x128xf32> -> vector<10x128xf32>
      %662 = arith.addf %654, %661 : vector<10x128xf32>
      %c4_i32_633 = arith.constant 4 : i32
      %663 = arith.addi %arg18, %c4_i32_633 : i32
      %c1_634 = arith.constant 1 : index
      %664 = arith.index_cast %663 : i32 to index
      %c4_635 = arith.constant 4 : index
      %c0_636 = arith.constant 0 : index
      %665 = vector.load %arg14[%c1_634, %664, %c4_635, %c0_636] : memref<2x14x14x8xf32, #tpu.memory_space<vmem>>, vector<1x1x10x8xf32>
      %666 = vector.shape_cast %665 : vector<1x1x10x8xf32> to vector<10x8xf32>
      %c24_637 = arith.constant 24 : index
      %c0_638 = arith.constant 0 : index
      %c0_639 = arith.constant 0 : index
      %667 = vector.load %arg4[%c24_637, %c0_638, %c0_639] : memref<25x8x128xf32, #tpu.memory_space<vmem>>, vector<1x8x128xf32>
      %668 = vector.shape_cast %667 : vector<1x8x128xf32> to vector<8x128xf32>
      %cst_640 = arith.constant dense<0.000000e+00> : vector<10x128xf32>
      %669 = tpu.matmul %666, %668, %cst_640 {dimension_numbers = #tpu.dot_dimension_numbers<[1], [0], [0], [1], [0, 0, 1, 1], [], []>} : vector<10x8xf32>, vector<8x128xf32>, vector<10x128xf32> -> vector<10x128xf32>
      %670 = arith.addf %662, %669 : vector<10x128xf32>
      %671 = vector.broadcast %19 : vector<1x128xf32> to vector<10x128xf32>
      %672 = arith.addf %670, %671 : vector<10x128xf32>
      %cst_641 = arith.constant 0.000000e+00 : f32
      %673 = vector.broadcast %cst_641 : f32 to vector<10x128xf32>
      %674 = arith.maximumf %672, %673 : vector<10x128xf32>
      %675 = vector.extract_strided_slice %674 {offsets = [0, 0], sizes = [10, 16], strides = [1, 1]} : vector<10x128xf32> to vector<10x16xf32>
      %c1_642 = arith.constant 1 : index
      %676 = arith.index_cast %arg18 : i32 to index
      %c0_643 = arith.constant 0 : index
      %c0_644 = arith.constant 0 : index
      %677 = vector.load %arg15[%c1_642, %676, %c0_643, %c0_644] : memref<2x10x10x16xf32, #tpu.memory_space<vmem>>, vector<1x1x10x16xf32>
      %678 = vector.shape_cast %677 : vector<1x1x10x16xf32> to vector<10x16xf32>
      %679 = vector.shape_cast %675 : vector<10x16xf32> to vector<1x1x10x16xf32>
      tpu.vector_store %arg15[%c1_642, %676, %c0_643, %c0_644], %679 {strides = array<i32>} : memref<2x10x10x16xf32, #tpu.memory_space<vmem>>, vector<1x1x10x16xf32>,
    }
    %c10_i32_23 = arith.constant 10 : i32
    %22 = tpu.iota {dimensions = array<i32: 0>} : vector<5x10xi32>
    %23 = tpu.iota {dimensions = array<i32: 1>} : vector<5x10xi32>
    %c2_i32_24 = arith.constant 2 : i32
    %24 = vector.broadcast %c2_i32_24 : i32 to vector<5x10xi32>
    %25 = arith.muli %24, %22 : vector<5x10xi32>
    %26 = arith.cmpi eq, %23, %25 : vector<5x10xi32>
    %27 = arith.extui %26 : vector<5x10xi1> to vector<5x10xi32>
    %28 = arith.sitofp %27 : vector<5x10xi32> to vector<5x10xf32>
    %c2_i32_25 = arith.constant 2 : i32
    %29 = vector.broadcast %c2_i32_25 : i32 to vector<5x10xi32>
    %30 = arith.muli %29, %22 : vector<5x10xi32>
    %c1_i32_26 = arith.constant 1 : i32
    %31 = vector.broadcast %c1_i32_26 : i32 to vector<5x10xi32>
    %32 = arith.addi %30, %31 : vector<5x10xi32>
    %33 = arith.cmpi eq, %23, %32 : vector<5x10xi32>
    %34 = arith.extui %33 : vector<5x10xi1> to vector<5x10xi32>
    %35 = arith.sitofp %34 : vector<5x10xi32> to vector<5x10xf32>
    %c0_i32_27 = arith.constant 0 : i32
    %c5_i32 = arith.constant 5 : i32
    %36 = arith.addi %c0_i32_27, %c5_i32 : i32
    %c1_i32_28 = arith.constant 1 : i32
    scf.for %arg18 = %c0_i32_27 to %36 step %c1_i32_28  : i32 {
      %c2_i32_440 = arith.constant 2 : i32
      %470 = arith.muli %c2_i32_440, %arg18 : i32
      %c0_441 = arith.constant 0 : index
      %471 = arith.index_cast %470 : i32 to index
      %c0_442 = arith.constant 0 : index
      %c0_443 = arith.constant 0 : index
      %472 = vector.load %arg15[%c0_441, %471, %c0_442, %c0_443] : memref<2x10x10x16xf32, #tpu.memory_space<vmem>>, vector<1x1x10x16xf32>
      %473 = vector.shape_cast %472 : vector<1x1x10x16xf32> to vector<10x16xf32>
      %c2_i32_444 = arith.constant 2 : i32
      %474 = arith.muli %c2_i32_444, %arg18 : i32
      %c1_i32_445 = arith.constant 1 : i32
      %475 = arith.addi %474, %c1_i32_445 : i32
      %c0_446 = arith.constant 0 : index
      %476 = arith.index_cast %475 : i32 to index
      %c0_447 = arith.constant 0 : index
      %c0_448 = arith.constant 0 : index
      %477 = vector.load %arg15[%c0_446, %476, %c0_447, %c0_448] : memref<2x10x10x16xf32, #tpu.memory_space<vmem>>, vector<1x1x10x16xf32>
      %478 = vector.shape_cast %477 : vector<1x1x10x16xf32> to vector<10x16xf32>
      %479 = arith.maximumf %473, %478 : vector<10x16xf32>
      %cst_449 = arith.constant dense<0.000000e+00> : vector<5x16xf32>
      %480 = tpu.matmul %28, %479, %cst_449 {dimension_numbers = #tpu.dot_dimension_numbers<[1], [0], [0], [1], [0, 0, 1, 1], [], []>} : vector<5x10xf32>, vector<10x16xf32>, vector<5x16xf32> -> vector<5x16xf32>
      %cst_450 = arith.constant dense<0.000000e+00> : vector<5x16xf32>
      %481 = tpu.matmul %35, %479, %cst_450 {dimension_numbers = #tpu.dot_dimension_numbers<[1], [0], [0], [1], [0, 0, 1, 1], [], []>} : vector<5x10xf32>, vector<10x16xf32>, vector<5x16xf32> -> vector<5x16xf32>
      %482 = arith.maximumf %480, %481 : vector<5x16xf32>
      %c0_451 = arith.constant 0 : index
      %483 = arith.index_cast %arg18 : i32 to index
      %c0_452 = arith.constant 0 : index
      %c0_453 = arith.constant 0 : index
      %484 = vector.load %arg16[%c0_451, %483, %c0_452, %c0_453] : memref<2x5x5x16xf32, #tpu.memory_space<vmem>>, vector<1x1x5x16xf32>
      %485 = vector.shape_cast %484 : vector<1x1x5x16xf32> to vector<5x16xf32>
      %486 = vector.shape_cast %482 : vector<5x16xf32> to vector<1x1x5x16xf32>
      tpu.vector_store %arg16[%c0_451, %483, %c0_452, %c0_453], %486 {strides = array<i32>} : memref<2x5x5x16xf32, #tpu.memory_space<vmem>>, vector<1x1x5x16xf32>,
    }
    %c5_i32_29 = arith.constant 5 : i32
    %c0_i32_30 = arith.constant 0 : i32
    %c5_i32_31 = arith.constant 5 : i32
    %37 = arith.addi %c0_i32_30, %c5_i32_31 : i32
    %c1_i32_32 = arith.constant 1 : i32
    scf.for %arg18 = %c0_i32_30 to %37 step %c1_i32_32  : i32 {
      %c2_i32_440 = arith.constant 2 : i32
      %470 = arith.muli %c2_i32_440, %arg18 : i32
      %c1_441 = arith.constant 1 : index
      %471 = arith.index_cast %470 : i32 to index
      %c0_442 = arith.constant 0 : index
      %c0_443 = arith.constant 0 : index
      %472 = vector.load %arg15[%c1_441, %471, %c0_442, %c0_443] : memref<2x10x10x16xf32, #tpu.memory_space<vmem>>, vector<1x1x10x16xf32>
      %473 = vector.shape_cast %472 : vector<1x1x10x16xf32> to vector<10x16xf32>
      %c2_i32_444 = arith.constant 2 : i32
      %474 = arith.muli %c2_i32_444, %arg18 : i32
      %c1_i32_445 = arith.constant 1 : i32
      %475 = arith.addi %474, %c1_i32_445 : i32
      %c1_446 = arith.constant 1 : index
      %476 = arith.index_cast %475 : i32 to index
      %c0_447 = arith.constant 0 : index
      %c0_448 = arith.constant 0 : index
      %477 = vector.load %arg15[%c1_446, %476, %c0_447, %c0_448] : memref<2x10x10x16xf32, #tpu.memory_space<vmem>>, vector<1x1x10x16xf32>
      %478 = vector.shape_cast %477 : vector<1x1x10x16xf32> to vector<10x16xf32>
      %479 = arith.maximumf %473, %478 : vector<10x16xf32>
      %cst_449 = arith.constant dense<0.000000e+00> : vector<5x16xf32>
      %480 = tpu.matmul %28, %479, %cst_449 {dimension_numbers = #tpu.dot_dimension_numbers<[1], [0], [0], [1], [0, 0, 1, 1], [], []>} : vector<5x10xf32>, vector<10x16xf32>, vector<5x16xf32> -> vector<5x16xf32>
      %cst_450 = arith.constant dense<0.000000e+00> : vector<5x16xf32>
      %481 = tpu.matmul %35, %479, %cst_450 {dimension_numbers = #tpu.dot_dimension_numbers<[1], [0], [0], [1], [0, 0, 1, 1], [], []>} : vector<5x10xf32>, vector<10x16xf32>, vector<5x16xf32> -> vector<5x16xf32>
      %482 = arith.maximumf %480, %481 : vector<5x16xf32>
      %c1_451 = arith.constant 1 : index
      %483 = arith.index_cast %arg18 : i32 to index
      %c0_452 = arith.constant 0 : index
      %c0_453 = arith.constant 0 : index
      %484 = vector.load %arg16[%c1_451, %483, %c0_452, %c0_453] : memref<2x5x5x16xf32, #tpu.memory_space<vmem>>, vector<1x1x5x16xf32>
      %485 = vector.shape_cast %484 : vector<1x1x5x16xf32> to vector<5x16xf32>
      %486 = vector.shape_cast %482 : vector<5x16xf32> to vector<1x1x5x16xf32>
      tpu.vector_store %arg16[%c1_451, %483, %c0_452, %c0_453], %486 {strides = array<i32>} : memref<2x5x5x16xf32, #tpu.memory_space<vmem>>, vector<1x1x5x16xf32>,
    }
    %c5_i32_33 = arith.constant 5 : i32
    %c0_34 = arith.constant 0 : index
    %c0_35 = arith.constant 0 : index
    %38 = vector.load %arg7[%c0_34, %c0_35] : memref<1x128xf32, #tpu.memory_space<vmem>>, vector<1x128xf32>
    %c0_i32_36 = arith.constant 0 : i32
    %cst = arith.constant 0.000000e+00 : f32
    %39 = vector.broadcast %cst : f32 to vector<1x128xf32>
    %c0_i32_37 = arith.constant 0 : i32
    %40 = arith.addi %c0_i32_36, %c0_i32_37 : i32
    %c0_38 = arith.constant 0 : index
    %41 = arith.index_cast %40 : i32 to index
    %c0_39 = arith.constant 0 : index
    %c0_40 = arith.constant 0 : index
    %42 = vector.load %arg16[%c0_38, %41, %c0_39, %c0_40] : memref<2x5x5x16xf32, #tpu.memory_space<vmem>>, vector<1x1x1x16xf32>
    %43 = vector.shape_cast %42 : vector<1x1x1x16xf32> to vector<1x16xf32>
    %c0_41 = arith.constant 0 : index
    %c0_42 = arith.constant 0 : index
    %c0_43 = arith.constant 0 : index
    %44 = vector.load %arg6[%c0_41, %c0_42, %c0_43] : memref<25x16x128xf32, #tpu.memory_space<vmem>>, vector<1x16x128xf32>
    %45 = vector.shape_cast %44 : vector<1x16x128xf32> to vector<16x128xf32>
    %cst_44 = arith.constant dense<0.000000e+00> : vector<1x128xf32>
    %46 = tpu.matmul %43, %45, %cst_44 {dimension_numbers = #tpu.dot_dimension_numbers<[1], [0], [0], [1], [0, 0, 1, 1], [], []>} : vector<1x16xf32>, vector<16x128xf32>, vector<1x128xf32> -> vector<1x128xf32>
    %47 = arith.addf %39, %46 : vector<1x128xf32>
    %c0_i32_45 = arith.constant 0 : i32
    %48 = arith.addi %c0_i32_36, %c0_i32_45 : i32
    %c0_46 = arith.constant 0 : index
    %49 = arith.index_cast %48 : i32 to index
    %c1 = arith.constant 1 : index
    %c0_47 = arith.constant 0 : index
    %50 = vector.load %arg16[%c0_46, %49, %c1, %c0_47] : memref<2x5x5x16xf32, #tpu.memory_space<vmem>>, vector<1x1x1x16xf32>
    %51 = vector.shape_cast %50 : vector<1x1x1x16xf32> to vector<1x16xf32>
    %c1_48 = arith.constant 1 : index
    %c0_49 = arith.constant 0 : index
    %c0_50 = arith.constant 0 : index
    %52 = vector.load %arg6[%c1_48, %c0_49, %c0_50] : memref<25x16x128xf32, #tpu.memory_space<vmem>>, vector<1x16x128xf32>
    %53 = vector.shape_cast %52 : vector<1x16x128xf32> to vector<16x128xf32>
    %cst_51 = arith.constant dense<0.000000e+00> : vector<1x128xf32>
    %54 = tpu.matmul %51, %53, %cst_51 {dimension_numbers = #tpu.dot_dimension_numbers<[1], [0], [0], [1], [0, 0, 1, 1], [], []>} : vector<1x16xf32>, vector<16x128xf32>, vector<1x128xf32> -> vector<1x128xf32>
    %55 = arith.addf %47, %54 : vector<1x128xf32>
    %c0_i32_52 = arith.constant 0 : i32
    %56 = arith.addi %c0_i32_36, %c0_i32_52 : i32
    %c0_53 = arith.constant 0 : index
    %57 = arith.index_cast %56 : i32 to index
    %c2 = arith.constant 2 : index
    %c0_54 = arith.constant 0 : index
    %58 = vector.load %arg16[%c0_53, %57, %c2, %c0_54] : memref<2x5x5x16xf32, #tpu.memory_space<vmem>>, vector<1x1x1x16xf32>
    %59 = vector.shape_cast %58 : vector<1x1x1x16xf32> to vector<1x16xf32>
    %c2_55 = arith.constant 2 : index
    %c0_56 = arith.constant 0 : index
    %c0_57 = arith.constant 0 : index
    %60 = vector.load %arg6[%c2_55, %c0_56, %c0_57] : memref<25x16x128xf32, #tpu.memory_space<vmem>>, vector<1x16x128xf32>
    %61 = vector.shape_cast %60 : vector<1x16x128xf32> to vector<16x128xf32>
    %cst_58 = arith.constant dense<0.000000e+00> : vector<1x128xf32>
    %62 = tpu.matmul %59, %61, %cst_58 {dimension_numbers = #tpu.dot_dimension_numbers<[1], [0], [0], [1], [0, 0, 1, 1], [], []>} : vector<1x16xf32>, vector<16x128xf32>, vector<1x128xf32> -> vector<1x128xf32>
    %63 = arith.addf %55, %62 : vector<1x128xf32>
    %c0_i32_59 = arith.constant 0 : i32
    %64 = arith.addi %c0_i32_36, %c0_i32_59 : i32
    %c0_60 = arith.constant 0 : index
    %65 = arith.index_cast %64 : i32 to index
    %c3 = arith.constant 3 : index
    %c0_61 = arith.constant 0 : index
    %66 = vector.load %arg16[%c0_60, %65, %c3, %c0_61] : memref<2x5x5x16xf32, #tpu.memory_space<vmem>>, vector<1x1x1x16xf32>
    %67 = vector.shape_cast %66 : vector<1x1x1x16xf32> to vector<1x16xf32>
    %c3_62 = arith.constant 3 : index
    %c0_63 = arith.constant 0 : index
    %c0_64 = arith.constant 0 : index
    %68 = vector.load %arg6[%c3_62, %c0_63, %c0_64] : memref<25x16x128xf32, #tpu.memory_space<vmem>>, vector<1x16x128xf32>
    %69 = vector.shape_cast %68 : vector<1x16x128xf32> to vector<16x128xf32>
    %cst_65 = arith.constant dense<0.000000e+00> : vector<1x128xf32>
    %70 = tpu.matmul %67, %69, %cst_65 {dimension_numbers = #tpu.dot_dimension_numbers<[1], [0], [0], [1], [0, 0, 1, 1], [], []>} : vector<1x16xf32>, vector<16x128xf32>, vector<1x128xf32> -> vector<1x128xf32>
    %71 = arith.addf %63, %70 : vector<1x128xf32>
    %c0_i32_66 = arith.constant 0 : i32
    %72 = arith.addi %c0_i32_36, %c0_i32_66 : i32
    %c0_67 = arith.constant 0 : index
    %73 = arith.index_cast %72 : i32 to index
    %c4 = arith.constant 4 : index
    %c0_68 = arith.constant 0 : index
    %74 = vector.load %arg16[%c0_67, %73, %c4, %c0_68] : memref<2x5x5x16xf32, #tpu.memory_space<vmem>>, vector<1x1x1x16xf32>
    %75 = vector.shape_cast %74 : vector<1x1x1x16xf32> to vector<1x16xf32>
    %c4_69 = arith.constant 4 : index
    %c0_70 = arith.constant 0 : index
    %c0_71 = arith.constant 0 : index
    %76 = vector.load %arg6[%c4_69, %c0_70, %c0_71] : memref<25x16x128xf32, #tpu.memory_space<vmem>>, vector<1x16x128xf32>
    %77 = vector.shape_cast %76 : vector<1x16x128xf32> to vector<16x128xf32>
    %cst_72 = arith.constant dense<0.000000e+00> : vector<1x128xf32>
    %78 = tpu.matmul %75, %77, %cst_72 {dimension_numbers = #tpu.dot_dimension_numbers<[1], [0], [0], [1], [0, 0, 1, 1], [], []>} : vector<1x16xf32>, vector<16x128xf32>, vector<1x128xf32> -> vector<1x128xf32>
    %79 = arith.addf %71, %78 : vector<1x128xf32>
    %c1_i32_73 = arith.constant 1 : i32
    %80 = arith.addi %c0_i32_36, %c1_i32_73 : i32
    %c0_74 = arith.constant 0 : index
    %81 = arith.index_cast %80 : i32 to index
    %c0_75 = arith.constant 0 : index
    %c0_76 = arith.constant 0 : index
    %82 = vector.load %arg16[%c0_74, %81, %c0_75, %c0_76] : memref<2x5x5x16xf32, #tpu.memory_space<vmem>>, vector<1x1x1x16xf32>
    %83 = vector.shape_cast %82 : vector<1x1x1x16xf32> to vector<1x16xf32>
    %c5 = arith.constant 5 : index
    %c0_77 = arith.constant 0 : index
    %c0_78 = arith.constant 0 : index
    %84 = vector.load %arg6[%c5, %c0_77, %c0_78] : memref<25x16x128xf32, #tpu.memory_space<vmem>>, vector<1x16x128xf32>
    %85 = vector.shape_cast %84 : vector<1x16x128xf32> to vector<16x128xf32>
    %cst_79 = arith.constant dense<0.000000e+00> : vector<1x128xf32>
    %86 = tpu.matmul %83, %85, %cst_79 {dimension_numbers = #tpu.dot_dimension_numbers<[1], [0], [0], [1], [0, 0, 1, 1], [], []>} : vector<1x16xf32>, vector<16x128xf32>, vector<1x128xf32> -> vector<1x128xf32>
    %87 = arith.addf %79, %86 : vector<1x128xf32>
    %c1_i32_80 = arith.constant 1 : i32
    %88 = arith.addi %c0_i32_36, %c1_i32_80 : i32
    %c0_81 = arith.constant 0 : index
    %89 = arith.index_cast %88 : i32 to index
    %c1_82 = arith.constant 1 : index
    %c0_83 = arith.constant 0 : index
    %90 = vector.load %arg16[%c0_81, %89, %c1_82, %c0_83] : memref<2x5x5x16xf32, #tpu.memory_space<vmem>>, vector<1x1x1x16xf32>
    %91 = vector.shape_cast %90 : vector<1x1x1x16xf32> to vector<1x16xf32>
    %c6 = arith.constant 6 : index
    %c0_84 = arith.constant 0 : index
    %c0_85 = arith.constant 0 : index
    %92 = vector.load %arg6[%c6, %c0_84, %c0_85] : memref<25x16x128xf32, #tpu.memory_space<vmem>>, vector<1x16x128xf32>
    %93 = vector.shape_cast %92 : vector<1x16x128xf32> to vector<16x128xf32>
    %cst_86 = arith.constant dense<0.000000e+00> : vector<1x128xf32>
    %94 = tpu.matmul %91, %93, %cst_86 {dimension_numbers = #tpu.dot_dimension_numbers<[1], [0], [0], [1], [0, 0, 1, 1], [], []>} : vector<1x16xf32>, vector<16x128xf32>, vector<1x128xf32> -> vector<1x128xf32>
    %95 = arith.addf %87, %94 : vector<1x128xf32>
    %c1_i32_87 = arith.constant 1 : i32
    %96 = arith.addi %c0_i32_36, %c1_i32_87 : i32
    %c0_88 = arith.constant 0 : index
    %97 = arith.index_cast %96 : i32 to index
    %c2_89 = arith.constant 2 : index
    %c0_90 = arith.constant 0 : index
    %98 = vector.load %arg16[%c0_88, %97, %c2_89, %c0_90] : memref<2x5x5x16xf32, #tpu.memory_space<vmem>>, vector<1x1x1x16xf32>
    %99 = vector.shape_cast %98 : vector<1x1x1x16xf32> to vector<1x16xf32>
    %c7 = arith.constant 7 : index
    %c0_91 = arith.constant 0 : index
    %c0_92 = arith.constant 0 : index
    %100 = vector.load %arg6[%c7, %c0_91, %c0_92] : memref<25x16x128xf32, #tpu.memory_space<vmem>>, vector<1x16x128xf32>
    %101 = vector.shape_cast %100 : vector<1x16x128xf32> to vector<16x128xf32>
    %cst_93 = arith.constant dense<0.000000e+00> : vector<1x128xf32>
    %102 = tpu.matmul %99, %101, %cst_93 {dimension_numbers = #tpu.dot_dimension_numbers<[1], [0], [0], [1], [0, 0, 1, 1], [], []>} : vector<1x16xf32>, vector<16x128xf32>, vector<1x128xf32> -> vector<1x128xf32>
    %103 = arith.addf %95, %102 : vector<1x128xf32>
    %c1_i32_94 = arith.constant 1 : i32
    %104 = arith.addi %c0_i32_36, %c1_i32_94 : i32
    %c0_95 = arith.constant 0 : index
    %105 = arith.index_cast %104 : i32 to index
    %c3_96 = arith.constant 3 : index
    %c0_97 = arith.constant 0 : index
    %106 = vector.load %arg16[%c0_95, %105, %c3_96, %c0_97] : memref<2x5x5x16xf32, #tpu.memory_space<vmem>>, vector<1x1x1x16xf32>
    %107 = vector.shape_cast %106 : vector<1x1x1x16xf32> to vector<1x16xf32>
    %c8 = arith.constant 8 : index
    %c0_98 = arith.constant 0 : index
    %c0_99 = arith.constant 0 : index
    %108 = vector.load %arg6[%c8, %c0_98, %c0_99] : memref<25x16x128xf32, #tpu.memory_space<vmem>>, vector<1x16x128xf32>
    %109 = vector.shape_cast %108 : vector<1x16x128xf32> to vector<16x128xf32>
    %cst_100 = arith.constant dense<0.000000e+00> : vector<1x128xf32>
    %110 = tpu.matmul %107, %109, %cst_100 {dimension_numbers = #tpu.dot_dimension_numbers<[1], [0], [0], [1], [0, 0, 1, 1], [], []>} : vector<1x16xf32>, vector<16x128xf32>, vector<1x128xf32> -> vector<1x128xf32>
    %111 = arith.addf %103, %110 : vector<1x128xf32>
    %c1_i32_101 = arith.constant 1 : i32
    %112 = arith.addi %c0_i32_36, %c1_i32_101 : i32
    %c0_102 = arith.constant 0 : index
    %113 = arith.index_cast %112 : i32 to index
    %c4_103 = arith.constant 4 : index
    %c0_104 = arith.constant 0 : index
    %114 = vector.load %arg16[%c0_102, %113, %c4_103, %c0_104] : memref<2x5x5x16xf32, #tpu.memory_space<vmem>>, vector<1x1x1x16xf32>
    %115 = vector.shape_cast %114 : vector<1x1x1x16xf32> to vector<1x16xf32>
    %c9 = arith.constant 9 : index
    %c0_105 = arith.constant 0 : index
    %c0_106 = arith.constant 0 : index
    %116 = vector.load %arg6[%c9, %c0_105, %c0_106] : memref<25x16x128xf32, #tpu.memory_space<vmem>>, vector<1x16x128xf32>
    %117 = vector.shape_cast %116 : vector<1x16x128xf32> to vector<16x128xf32>
    %cst_107 = arith.constant dense<0.000000e+00> : vector<1x128xf32>
    %118 = tpu.matmul %115, %117, %cst_107 {dimension_numbers = #tpu.dot_dimension_numbers<[1], [0], [0], [1], [0, 0, 1, 1], [], []>} : vector<1x16xf32>, vector<16x128xf32>, vector<1x128xf32> -> vector<1x128xf32>
    %119 = arith.addf %111, %118 : vector<1x128xf32>
    %c2_i32_108 = arith.constant 2 : i32
    %120 = arith.addi %c0_i32_36, %c2_i32_108 : i32
    %c0_109 = arith.constant 0 : index
    %121 = arith.index_cast %120 : i32 to index
    %c0_110 = arith.constant 0 : index
    %c0_111 = arith.constant 0 : index
    %122 = vector.load %arg16[%c0_109, %121, %c0_110, %c0_111] : memref<2x5x5x16xf32, #tpu.memory_space<vmem>>, vector<1x1x1x16xf32>
    %123 = vector.shape_cast %122 : vector<1x1x1x16xf32> to vector<1x16xf32>
    %c10 = arith.constant 10 : index
    %c0_112 = arith.constant 0 : index
    %c0_113 = arith.constant 0 : index
    %124 = vector.load %arg6[%c10, %c0_112, %c0_113] : memref<25x16x128xf32, #tpu.memory_space<vmem>>, vector<1x16x128xf32>
    %125 = vector.shape_cast %124 : vector<1x16x128xf32> to vector<16x128xf32>
    %cst_114 = arith.constant dense<0.000000e+00> : vector<1x128xf32>
    %126 = tpu.matmul %123, %125, %cst_114 {dimension_numbers = #tpu.dot_dimension_numbers<[1], [0], [0], [1], [0, 0, 1, 1], [], []>} : vector<1x16xf32>, vector<16x128xf32>, vector<1x128xf32> -> vector<1x128xf32>
    %127 = arith.addf %119, %126 : vector<1x128xf32>
    %c2_i32_115 = arith.constant 2 : i32
    %128 = arith.addi %c0_i32_36, %c2_i32_115 : i32
    %c0_116 = arith.constant 0 : index
    %129 = arith.index_cast %128 : i32 to index
    %c1_117 = arith.constant 1 : index
    %c0_118 = arith.constant 0 : index
    %130 = vector.load %arg16[%c0_116, %129, %c1_117, %c0_118] : memref<2x5x5x16xf32, #tpu.memory_space<vmem>>, vector<1x1x1x16xf32>
    %131 = vector.shape_cast %130 : vector<1x1x1x16xf32> to vector<1x16xf32>
    %c11 = arith.constant 11 : index
    %c0_119 = arith.constant 0 : index
    %c0_120 = arith.constant 0 : index
    %132 = vector.load %arg6[%c11, %c0_119, %c0_120] : memref<25x16x128xf32, #tpu.memory_space<vmem>>, vector<1x16x128xf32>
    %133 = vector.shape_cast %132 : vector<1x16x128xf32> to vector<16x128xf32>
    %cst_121 = arith.constant dense<0.000000e+00> : vector<1x128xf32>
    %134 = tpu.matmul %131, %133, %cst_121 {dimension_numbers = #tpu.dot_dimension_numbers<[1], [0], [0], [1], [0, 0, 1, 1], [], []>} : vector<1x16xf32>, vector<16x128xf32>, vector<1x128xf32> -> vector<1x128xf32>
    %135 = arith.addf %127, %134 : vector<1x128xf32>
    %c2_i32_122 = arith.constant 2 : i32
    %136 = arith.addi %c0_i32_36, %c2_i32_122 : i32
    %c0_123 = arith.constant 0 : index
    %137 = arith.index_cast %136 : i32 to index
    %c2_124 = arith.constant 2 : index
    %c0_125 = arith.constant 0 : index
    %138 = vector.load %arg16[%c0_123, %137, %c2_124, %c0_125] : memref<2x5x5x16xf32, #tpu.memory_space<vmem>>, vector<1x1x1x16xf32>
    %139 = vector.shape_cast %138 : vector<1x1x1x16xf32> to vector<1x16xf32>
    %c12 = arith.constant 12 : index
    %c0_126 = arith.constant 0 : index
    %c0_127 = arith.constant 0 : index
    %140 = vector.load %arg6[%c12, %c0_126, %c0_127] : memref<25x16x128xf32, #tpu.memory_space<vmem>>, vector<1x16x128xf32>
    %141 = vector.shape_cast %140 : vector<1x16x128xf32> to vector<16x128xf32>
    %cst_128 = arith.constant dense<0.000000e+00> : vector<1x128xf32>
    %142 = tpu.matmul %139, %141, %cst_128 {dimension_numbers = #tpu.dot_dimension_numbers<[1], [0], [0], [1], [0, 0, 1, 1], [], []>} : vector<1x16xf32>, vector<16x128xf32>, vector<1x128xf32> -> vector<1x128xf32>
    %143 = arith.addf %135, %142 : vector<1x128xf32>
    %c2_i32_129 = arith.constant 2 : i32
    %144 = arith.addi %c0_i32_36, %c2_i32_129 : i32
    %c0_130 = arith.constant 0 : index
    %145 = arith.index_cast %144 : i32 to index
    %c3_131 = arith.constant 3 : index
    %c0_132 = arith.constant 0 : index
    %146 = vector.load %arg16[%c0_130, %145, %c3_131, %c0_132] : memref<2x5x5x16xf32, #tpu.memory_space<vmem>>, vector<1x1x1x16xf32>
    %147 = vector.shape_cast %146 : vector<1x1x1x16xf32> to vector<1x16xf32>
    %c13 = arith.constant 13 : index
    %c0_133 = arith.constant 0 : index
    %c0_134 = arith.constant 0 : index
    %148 = vector.load %arg6[%c13, %c0_133, %c0_134] : memref<25x16x128xf32, #tpu.memory_space<vmem>>, vector<1x16x128xf32>
    %149 = vector.shape_cast %148 : vector<1x16x128xf32> to vector<16x128xf32>
    %cst_135 = arith.constant dense<0.000000e+00> : vector<1x128xf32>
    %150 = tpu.matmul %147, %149, %cst_135 {dimension_numbers = #tpu.dot_dimension_numbers<[1], [0], [0], [1], [0, 0, 1, 1], [], []>} : vector<1x16xf32>, vector<16x128xf32>, vector<1x128xf32> -> vector<1x128xf32>
    %151 = arith.addf %143, %150 : vector<1x128xf32>
    %c2_i32_136 = arith.constant 2 : i32
    %152 = arith.addi %c0_i32_36, %c2_i32_136 : i32
    %c0_137 = arith.constant 0 : index
    %153 = arith.index_cast %152 : i32 to index
    %c4_138 = arith.constant 4 : index
    %c0_139 = arith.constant 0 : index
    %154 = vector.load %arg16[%c0_137, %153, %c4_138, %c0_139] : memref<2x5x5x16xf32, #tpu.memory_space<vmem>>, vector<1x1x1x16xf32>
    %155 = vector.shape_cast %154 : vector<1x1x1x16xf32> to vector<1x16xf32>
    %c14 = arith.constant 14 : index
    %c0_140 = arith.constant 0 : index
    %c0_141 = arith.constant 0 : index
    %156 = vector.load %arg6[%c14, %c0_140, %c0_141] : memref<25x16x128xf32, #tpu.memory_space<vmem>>, vector<1x16x128xf32>
    %157 = vector.shape_cast %156 : vector<1x16x128xf32> to vector<16x128xf32>
    %cst_142 = arith.constant dense<0.000000e+00> : vector<1x128xf32>
    %158 = tpu.matmul %155, %157, %cst_142 {dimension_numbers = #tpu.dot_dimension_numbers<[1], [0], [0], [1], [0, 0, 1, 1], [], []>} : vector<1x16xf32>, vector<16x128xf32>, vector<1x128xf32> -> vector<1x128xf32>
    %159 = arith.addf %151, %158 : vector<1x128xf32>
    %c3_i32 = arith.constant 3 : i32
    %160 = arith.addi %c0_i32_36, %c3_i32 : i32
    %c0_143 = arith.constant 0 : index
    %161 = arith.index_cast %160 : i32 to index
    %c0_144 = arith.constant 0 : index
    %c0_145 = arith.constant 0 : index
    %162 = vector.load %arg16[%c0_143, %161, %c0_144, %c0_145] : memref<2x5x5x16xf32, #tpu.memory_space<vmem>>, vector<1x1x1x16xf32>
    %163 = vector.shape_cast %162 : vector<1x1x1x16xf32> to vector<1x16xf32>
    %c15 = arith.constant 15 : index
    %c0_146 = arith.constant 0 : index
    %c0_147 = arith.constant 0 : index
    %164 = vector.load %arg6[%c15, %c0_146, %c0_147] : memref<25x16x128xf32, #tpu.memory_space<vmem>>, vector<1x16x128xf32>
    %165 = vector.shape_cast %164 : vector<1x16x128xf32> to vector<16x128xf32>
    %cst_148 = arith.constant dense<0.000000e+00> : vector<1x128xf32>
    %166 = tpu.matmul %163, %165, %cst_148 {dimension_numbers = #tpu.dot_dimension_numbers<[1], [0], [0], [1], [0, 0, 1, 1], [], []>} : vector<1x16xf32>, vector<16x128xf32>, vector<1x128xf32> -> vector<1x128xf32>
    %167 = arith.addf %159, %166 : vector<1x128xf32>
    %c3_i32_149 = arith.constant 3 : i32
    %168 = arith.addi %c0_i32_36, %c3_i32_149 : i32
    %c0_150 = arith.constant 0 : index
    %169 = arith.index_cast %168 : i32 to index
    %c1_151 = arith.constant 1 : index
    %c0_152 = arith.constant 0 : index
    %170 = vector.load %arg16[%c0_150, %169, %c1_151, %c0_152] : memref<2x5x5x16xf32, #tpu.memory_space<vmem>>, vector<1x1x1x16xf32>
    %171 = vector.shape_cast %170 : vector<1x1x1x16xf32> to vector<1x16xf32>
    %c16 = arith.constant 16 : index
    %c0_153 = arith.constant 0 : index
    %c0_154 = arith.constant 0 : index
    %172 = vector.load %arg6[%c16, %c0_153, %c0_154] : memref<25x16x128xf32, #tpu.memory_space<vmem>>, vector<1x16x128xf32>
    %173 = vector.shape_cast %172 : vector<1x16x128xf32> to vector<16x128xf32>
    %cst_155 = arith.constant dense<0.000000e+00> : vector<1x128xf32>
    %174 = tpu.matmul %171, %173, %cst_155 {dimension_numbers = #tpu.dot_dimension_numbers<[1], [0], [0], [1], [0, 0, 1, 1], [], []>} : vector<1x16xf32>, vector<16x128xf32>, vector<1x128xf32> -> vector<1x128xf32>
    %175 = arith.addf %167, %174 : vector<1x128xf32>
    %c3_i32_156 = arith.constant 3 : i32
    %176 = arith.addi %c0_i32_36, %c3_i32_156 : i32
    %c0_157 = arith.constant 0 : index
    %177 = arith.index_cast %176 : i32 to index
    %c2_158 = arith.constant 2 : index
    %c0_159 = arith.constant 0 : index
    %178 = vector.load %arg16[%c0_157, %177, %c2_158, %c0_159] : memref<2x5x5x16xf32, #tpu.memory_space<vmem>>, vector<1x1x1x16xf32>
    %179 = vector.shape_cast %178 : vector<1x1x1x16xf32> to vector<1x16xf32>
    %c17 = arith.constant 17 : index
    %c0_160 = arith.constant 0 : index
    %c0_161 = arith.constant 0 : index
    %180 = vector.load %arg6[%c17, %c0_160, %c0_161] : memref<25x16x128xf32, #tpu.memory_space<vmem>>, vector<1x16x128xf32>
    %181 = vector.shape_cast %180 : vector<1x16x128xf32> to vector<16x128xf32>
    %cst_162 = arith.constant dense<0.000000e+00> : vector<1x128xf32>
    %182 = tpu.matmul %179, %181, %cst_162 {dimension_numbers = #tpu.dot_dimension_numbers<[1], [0], [0], [1], [0, 0, 1, 1], [], []>} : vector<1x16xf32>, vector<16x128xf32>, vector<1x128xf32> -> vector<1x128xf32>
    %183 = arith.addf %175, %182 : vector<1x128xf32>
    %c3_i32_163 = arith.constant 3 : i32
    %184 = arith.addi %c0_i32_36, %c3_i32_163 : i32
    %c0_164 = arith.constant 0 : index
    %185 = arith.index_cast %184 : i32 to index
    %c3_165 = arith.constant 3 : index
    %c0_166 = arith.constant 0 : index
    %186 = vector.load %arg16[%c0_164, %185, %c3_165, %c0_166] : memref<2x5x5x16xf32, #tpu.memory_space<vmem>>, vector<1x1x1x16xf32>
    %187 = vector.shape_cast %186 : vector<1x1x1x16xf32> to vector<1x16xf32>
    %c18 = arith.constant 18 : index
    %c0_167 = arith.constant 0 : index
    %c0_168 = arith.constant 0 : index
    %188 = vector.load %arg6[%c18, %c0_167, %c0_168] : memref<25x16x128xf32, #tpu.memory_space<vmem>>, vector<1x16x128xf32>
    %189 = vector.shape_cast %188 : vector<1x16x128xf32> to vector<16x128xf32>
    %cst_169 = arith.constant dense<0.000000e+00> : vector<1x128xf32>
    %190 = tpu.matmul %187, %189, %cst_169 {dimension_numbers = #tpu.dot_dimension_numbers<[1], [0], [0], [1], [0, 0, 1, 1], [], []>} : vector<1x16xf32>, vector<16x128xf32>, vector<1x128xf32> -> vector<1x128xf32>
    %191 = arith.addf %183, %190 : vector<1x128xf32>
    %c3_i32_170 = arith.constant 3 : i32
    %192 = arith.addi %c0_i32_36, %c3_i32_170 : i32
    %c0_171 = arith.constant 0 : index
    %193 = arith.index_cast %192 : i32 to index
    %c4_172 = arith.constant 4 : index
    %c0_173 = arith.constant 0 : index
    %194 = vector.load %arg16[%c0_171, %193, %c4_172, %c0_173] : memref<2x5x5x16xf32, #tpu.memory_space<vmem>>, vector<1x1x1x16xf32>
    %195 = vector.shape_cast %194 : vector<1x1x1x16xf32> to vector<1x16xf32>
    %c19 = arith.constant 19 : index
    %c0_174 = arith.constant 0 : index
    %c0_175 = arith.constant 0 : index
    %196 = vector.load %arg6[%c19, %c0_174, %c0_175] : memref<25x16x128xf32, #tpu.memory_space<vmem>>, vector<1x16x128xf32>
    %197 = vector.shape_cast %196 : vector<1x16x128xf32> to vector<16x128xf32>
    %cst_176 = arith.constant dense<0.000000e+00> : vector<1x128xf32>
    %198 = tpu.matmul %195, %197, %cst_176 {dimension_numbers = #tpu.dot_dimension_numbers<[1], [0], [0], [1], [0, 0, 1, 1], [], []>} : vector<1x16xf32>, vector<16x128xf32>, vector<1x128xf32> -> vector<1x128xf32>
    %199 = arith.addf %191, %198 : vector<1x128xf32>
    %c4_i32 = arith.constant 4 : i32
    %200 = arith.addi %c0_i32_36, %c4_i32 : i32
    %c0_177 = arith.constant 0 : index
    %201 = arith.index_cast %200 : i32 to index
    %c0_178 = arith.constant 0 : index
    %c0_179 = arith.constant 0 : index
    %202 = vector.load %arg16[%c0_177, %201, %c0_178, %c0_179] : memref<2x5x5x16xf32, #tpu.memory_space<vmem>>, vector<1x1x1x16xf32>
    %203 = vector.shape_cast %202 : vector<1x1x1x16xf32> to vector<1x16xf32>
    %c20 = arith.constant 20 : index
    %c0_180 = arith.constant 0 : index
    %c0_181 = arith.constant 0 : index
    %204 = vector.load %arg6[%c20, %c0_180, %c0_181] : memref<25x16x128xf32, #tpu.memory_space<vmem>>, vector<1x16x128xf32>
    %205 = vector.shape_cast %204 : vector<1x16x128xf32> to vector<16x128xf32>
    %cst_182 = arith.constant dense<0.000000e+00> : vector<1x128xf32>
    %206 = tpu.matmul %203, %205, %cst_182 {dimension_numbers = #tpu.dot_dimension_numbers<[1], [0], [0], [1], [0, 0, 1, 1], [], []>} : vector<1x16xf32>, vector<16x128xf32>, vector<1x128xf32> -> vector<1x128xf32>
    %207 = arith.addf %199, %206 : vector<1x128xf32>
    %c4_i32_183 = arith.constant 4 : i32
    %208 = arith.addi %c0_i32_36, %c4_i32_183 : i32
    %c0_184 = arith.constant 0 : index
    %209 = arith.index_cast %208 : i32 to index
    %c1_185 = arith.constant 1 : index
    %c0_186 = arith.constant 0 : index
    %210 = vector.load %arg16[%c0_184, %209, %c1_185, %c0_186] : memref<2x5x5x16xf32, #tpu.memory_space<vmem>>, vector<1x1x1x16xf32>
    %211 = vector.shape_cast %210 : vector<1x1x1x16xf32> to vector<1x16xf32>
    %c21 = arith.constant 21 : index
    %c0_187 = arith.constant 0 : index
    %c0_188 = arith.constant 0 : index
    %212 = vector.load %arg6[%c21, %c0_187, %c0_188] : memref<25x16x128xf32, #tpu.memory_space<vmem>>, vector<1x16x128xf32>
    %213 = vector.shape_cast %212 : vector<1x16x128xf32> to vector<16x128xf32>
    %cst_189 = arith.constant dense<0.000000e+00> : vector<1x128xf32>
    %214 = tpu.matmul %211, %213, %cst_189 {dimension_numbers = #tpu.dot_dimension_numbers<[1], [0], [0], [1], [0, 0, 1, 1], [], []>} : vector<1x16xf32>, vector<16x128xf32>, vector<1x128xf32> -> vector<1x128xf32>
    %215 = arith.addf %207, %214 : vector<1x128xf32>
    %c4_i32_190 = arith.constant 4 : i32
    %216 = arith.addi %c0_i32_36, %c4_i32_190 : i32
    %c0_191 = arith.constant 0 : index
    %217 = arith.index_cast %216 : i32 to index
    %c2_192 = arith.constant 2 : index
    %c0_193 = arith.constant 0 : index
    %218 = vector.load %arg16[%c0_191, %217, %c2_192, %c0_193] : memref<2x5x5x16xf32, #tpu.memory_space<vmem>>, vector<1x1x1x16xf32>
    %219 = vector.shape_cast %218 : vector<1x1x1x16xf32> to vector<1x16xf32>
    %c22 = arith.constant 22 : index
    %c0_194 = arith.constant 0 : index
    %c0_195 = arith.constant 0 : index
    %220 = vector.load %arg6[%c22, %c0_194, %c0_195] : memref<25x16x128xf32, #tpu.memory_space<vmem>>, vector<1x16x128xf32>
    %221 = vector.shape_cast %220 : vector<1x16x128xf32> to vector<16x128xf32>
    %cst_196 = arith.constant dense<0.000000e+00> : vector<1x128xf32>
    %222 = tpu.matmul %219, %221, %cst_196 {dimension_numbers = #tpu.dot_dimension_numbers<[1], [0], [0], [1], [0, 0, 1, 1], [], []>} : vector<1x16xf32>, vector<16x128xf32>, vector<1x128xf32> -> vector<1x128xf32>
    %223 = arith.addf %215, %222 : vector<1x128xf32>
    %c4_i32_197 = arith.constant 4 : i32
    %224 = arith.addi %c0_i32_36, %c4_i32_197 : i32
    %c0_198 = arith.constant 0 : index
    %225 = arith.index_cast %224 : i32 to index
    %c3_199 = arith.constant 3 : index
    %c0_200 = arith.constant 0 : index
    %226 = vector.load %arg16[%c0_198, %225, %c3_199, %c0_200] : memref<2x5x5x16xf32, #tpu.memory_space<vmem>>, vector<1x1x1x16xf32>
    %227 = vector.shape_cast %226 : vector<1x1x1x16xf32> to vector<1x16xf32>
    %c23 = arith.constant 23 : index
    %c0_201 = arith.constant 0 : index
    %c0_202 = arith.constant 0 : index
    %228 = vector.load %arg6[%c23, %c0_201, %c0_202] : memref<25x16x128xf32, #tpu.memory_space<vmem>>, vector<1x16x128xf32>
    %229 = vector.shape_cast %228 : vector<1x16x128xf32> to vector<16x128xf32>
    %cst_203 = arith.constant dense<0.000000e+00> : vector<1x128xf32>
    %230 = tpu.matmul %227, %229, %cst_203 {dimension_numbers = #tpu.dot_dimension_numbers<[1], [0], [0], [1], [0, 0, 1, 1], [], []>} : vector<1x16xf32>, vector<16x128xf32>, vector<1x128xf32> -> vector<1x128xf32>
    %231 = arith.addf %223, %230 : vector<1x128xf32>
    %c4_i32_204 = arith.constant 4 : i32
    %232 = arith.addi %c0_i32_36, %c4_i32_204 : i32
    %c0_205 = arith.constant 0 : index
    %233 = arith.index_cast %232 : i32 to index
    %c4_206 = arith.constant 4 : index
    %c0_207 = arith.constant 0 : index
    %234 = vector.load %arg16[%c0_205, %233, %c4_206, %c0_207] : memref<2x5x5x16xf32, #tpu.memory_space<vmem>>, vector<1x1x1x16xf32>
    %235 = vector.shape_cast %234 : vector<1x1x1x16xf32> to vector<1x16xf32>
    %c24 = arith.constant 24 : index
    %c0_208 = arith.constant 0 : index
    %c0_209 = arith.constant 0 : index
    %236 = vector.load %arg6[%c24, %c0_208, %c0_209] : memref<25x16x128xf32, #tpu.memory_space<vmem>>, vector<1x16x128xf32>
    %237 = vector.shape_cast %236 : vector<1x16x128xf32> to vector<16x128xf32>
    %cst_210 = arith.constant dense<0.000000e+00> : vector<1x128xf32>
    %238 = tpu.matmul %235, %237, %cst_210 {dimension_numbers = #tpu.dot_dimension_numbers<[1], [0], [0], [1], [0, 0, 1, 1], [], []>} : vector<1x16xf32>, vector<16x128xf32>, vector<1x128xf32> -> vector<1x128xf32>
    %239 = arith.addf %231, %238 : vector<1x128xf32>
    %240 = arith.addf %239, %38 : vector<1x128xf32>
    %cst_211 = arith.constant 0.000000e+00 : f32
    %241 = vector.broadcast %cst_211 : f32 to vector<1x128xf32>
    %242 = arith.maximumf %240, %241 : vector<1x128xf32>
    %c0_212 = arith.constant 0 : index
    %243 = arith.index_cast %c0_i32_36 : i32 to index
    %c0_213 = arith.constant 0 : index
    %c0_214 = arith.constant 0 : index
    %244 = vector.load %arg17[%c0_212, %243, %c0_213, %c0_214] : memref<2x1x1x128xf32, #tpu.memory_space<vmem>>, vector<1x1x1x128xf32>
    %245 = vector.shape_cast %244 : vector<1x1x1x128xf32> to vector<1x128xf32>
    %246 = vector.shape_cast %242 : vector<1x128xf32> to vector<1x1x1x128xf32>
    tpu.vector_store %arg17[%c0_212, %243, %c0_213, %c0_214], %246 {strides = array<i32>} : memref<2x1x1x128xf32, #tpu.memory_space<vmem>>, vector<1x1x1x128xf32>,
    %c1_i32_215 = arith.constant 1 : i32
    %c0_i32_216 = arith.constant 0 : i32
    %cst_217 = arith.constant 0.000000e+00 : f32
    %247 = vector.broadcast %cst_217 : f32 to vector<1x128xf32>
    %c0_i32_218 = arith.constant 0 : i32
    %248 = arith.addi %c0_i32_216, %c0_i32_218 : i32
    %c1_219 = arith.constant 1 : index
    %249 = arith.index_cast %248 : i32 to index
    %c0_220 = arith.constant 0 : index
    %c0_221 = arith.constant 0 : index
    %250 = vector.load %arg16[%c1_219, %249, %c0_220, %c0_221] : memref<2x5x5x16xf32, #tpu.memory_space<vmem>>, vector<1x1x1x16xf32>
    %251 = vector.shape_cast %250 : vector<1x1x1x16xf32> to vector<1x16xf32>
    %c0_222 = arith.constant 0 : index
    %c0_223 = arith.constant 0 : index
    %c0_224 = arith.constant 0 : index
    %252 = vector.load %arg6[%c0_222, %c0_223, %c0_224] : memref<25x16x128xf32, #tpu.memory_space<vmem>>, vector<1x16x128xf32>
    %253 = vector.shape_cast %252 : vector<1x16x128xf32> to vector<16x128xf32>
    %cst_225 = arith.constant dense<0.000000e+00> : vector<1x128xf32>
    %254 = tpu.matmul %251, %253, %cst_225 {dimension_numbers = #tpu.dot_dimension_numbers<[1], [0], [0], [1], [0, 0, 1, 1], [], []>} : vector<1x16xf32>, vector<16x128xf32>, vector<1x128xf32> -> vector<1x128xf32>
    %255 = arith.addf %247, %254 : vector<1x128xf32>
    %c0_i32_226 = arith.constant 0 : i32
    %256 = arith.addi %c0_i32_216, %c0_i32_226 : i32
    %c1_227 = arith.constant 1 : index
    %257 = arith.index_cast %256 : i32 to index
    %c1_228 = arith.constant 1 : index
    %c0_229 = arith.constant 0 : index
    %258 = vector.load %arg16[%c1_227, %257, %c1_228, %c0_229] : memref<2x5x5x16xf32, #tpu.memory_space<vmem>>, vector<1x1x1x16xf32>
    %259 = vector.shape_cast %258 : vector<1x1x1x16xf32> to vector<1x16xf32>
    %c1_230 = arith.constant 1 : index
    %c0_231 = arith.constant 0 : index
    %c0_232 = arith.constant 0 : index
    %260 = vector.load %arg6[%c1_230, %c0_231, %c0_232] : memref<25x16x128xf32, #tpu.memory_space<vmem>>, vector<1x16x128xf32>
    %261 = vector.shape_cast %260 : vector<1x16x128xf32> to vector<16x128xf32>
    %cst_233 = arith.constant dense<0.000000e+00> : vector<1x128xf32>
    %262 = tpu.matmul %259, %261, %cst_233 {dimension_numbers = #tpu.dot_dimension_numbers<[1], [0], [0], [1], [0, 0, 1, 1], [], []>} : vector<1x16xf32>, vector<16x128xf32>, vector<1x128xf32> -> vector<1x128xf32>
    %263 = arith.addf %255, %262 : vector<1x128xf32>
    %c0_i32_234 = arith.constant 0 : i32
    %264 = arith.addi %c0_i32_216, %c0_i32_234 : i32
    %c1_235 = arith.constant 1 : index
    %265 = arith.index_cast %264 : i32 to index
    %c2_236 = arith.constant 2 : index
    %c0_237 = arith.constant 0 : index
    %266 = vector.load %arg16[%c1_235, %265, %c2_236, %c0_237] : memref<2x5x5x16xf32, #tpu.memory_space<vmem>>, vector<1x1x1x16xf32>
    %267 = vector.shape_cast %266 : vector<1x1x1x16xf32> to vector<1x16xf32>
    %c2_238 = arith.constant 2 : index
    %c0_239 = arith.constant 0 : index
    %c0_240 = arith.constant 0 : index
    %268 = vector.load %arg6[%c2_238, %c0_239, %c0_240] : memref<25x16x128xf32, #tpu.memory_space<vmem>>, vector<1x16x128xf32>
    %269 = vector.shape_cast %268 : vector<1x16x128xf32> to vector<16x128xf32>
    %cst_241 = arith.constant dense<0.000000e+00> : vector<1x128xf32>
    %270 = tpu.matmul %267, %269, %cst_241 {dimension_numbers = #tpu.dot_dimension_numbers<[1], [0], [0], [1], [0, 0, 1, 1], [], []>} : vector<1x16xf32>, vector<16x128xf32>, vector<1x128xf32> -> vector<1x128xf32>
    %271 = arith.addf %263, %270 : vector<1x128xf32>
    %c0_i32_242 = arith.constant 0 : i32
    %272 = arith.addi %c0_i32_216, %c0_i32_242 : i32
    %c1_243 = arith.constant 1 : index
    %273 = arith.index_cast %272 : i32 to index
    %c3_244 = arith.constant 3 : index
    %c0_245 = arith.constant 0 : index
    %274 = vector.load %arg16[%c1_243, %273, %c3_244, %c0_245] : memref<2x5x5x16xf32, #tpu.memory_space<vmem>>, vector<1x1x1x16xf32>
    %275 = vector.shape_cast %274 : vector<1x1x1x16xf32> to vector<1x16xf32>
    %c3_246 = arith.constant 3 : index
    %c0_247 = arith.constant 0 : index
    %c0_248 = arith.constant 0 : index
    %276 = vector.load %arg6[%c3_246, %c0_247, %c0_248] : memref<25x16x128xf32, #tpu.memory_space<vmem>>, vector<1x16x128xf32>
    %277 = vector.shape_cast %276 : vector<1x16x128xf32> to vector<16x128xf32>
    %cst_249 = arith.constant dense<0.000000e+00> : vector<1x128xf32>
    %278 = tpu.matmul %275, %277, %cst_249 {dimension_numbers = #tpu.dot_dimension_numbers<[1], [0], [0], [1], [0, 0, 1, 1], [], []>} : vector<1x16xf32>, vector<16x128xf32>, vector<1x128xf32> -> vector<1x128xf32>
    %279 = arith.addf %271, %278 : vector<1x128xf32>
    %c0_i32_250 = arith.constant 0 : i32
    %280 = arith.addi %c0_i32_216, %c0_i32_250 : i32
    %c1_251 = arith.constant 1 : index
    %281 = arith.index_cast %280 : i32 to index
    %c4_252 = arith.constant 4 : index
    %c0_253 = arith.constant 0 : index
    %282 = vector.load %arg16[%c1_251, %281, %c4_252, %c0_253] : memref<2x5x5x16xf32, #tpu.memory_space<vmem>>, vector<1x1x1x16xf32>
    %283 = vector.shape_cast %282 : vector<1x1x1x16xf32> to vector<1x16xf32>
    %c4_254 = arith.constant 4 : index
    %c0_255 = arith.constant 0 : index
    %c0_256 = arith.constant 0 : index
    %284 = vector.load %arg6[%c4_254, %c0_255, %c0_256] : memref<25x16x128xf32, #tpu.memory_space<vmem>>, vector<1x16x128xf32>
    %285 = vector.shape_cast %284 : vector<1x16x128xf32> to vector<16x128xf32>
    %cst_257 = arith.constant dense<0.000000e+00> : vector<1x128xf32>
    %286 = tpu.matmul %283, %285, %cst_257 {dimension_numbers = #tpu.dot_dimension_numbers<[1], [0], [0], [1], [0, 0, 1, 1], [], []>} : vector<1x16xf32>, vector<16x128xf32>, vector<1x128xf32> -> vector<1x128xf32>
    %287 = arith.addf %279, %286 : vector<1x128xf32>
    %c1_i32_258 = arith.constant 1 : i32
    %288 = arith.addi %c0_i32_216, %c1_i32_258 : i32
    %c1_259 = arith.constant 1 : index
    %289 = arith.index_cast %288 : i32 to index
    %c0_260 = arith.constant 0 : index
    %c0_261 = arith.constant 0 : index
    %290 = vector.load %arg16[%c1_259, %289, %c0_260, %c0_261] : memref<2x5x5x16xf32, #tpu.memory_space<vmem>>, vector<1x1x1x16xf32>
    %291 = vector.shape_cast %290 : vector<1x1x1x16xf32> to vector<1x16xf32>
    %c5_262 = arith.constant 5 : index
    %c0_263 = arith.constant 0 : index
    %c0_264 = arith.constant 0 : index
    %292 = vector.load %arg6[%c5_262, %c0_263, %c0_264] : memref<25x16x128xf32, #tpu.memory_space<vmem>>, vector<1x16x128xf32>
    %293 = vector.shape_cast %292 : vector<1x16x128xf32> to vector<16x128xf32>
    %cst_265 = arith.constant dense<0.000000e+00> : vector<1x128xf32>
    %294 = tpu.matmul %291, %293, %cst_265 {dimension_numbers = #tpu.dot_dimension_numbers<[1], [0], [0], [1], [0, 0, 1, 1], [], []>} : vector<1x16xf32>, vector<16x128xf32>, vector<1x128xf32> -> vector<1x128xf32>
    %295 = arith.addf %287, %294 : vector<1x128xf32>
    %c1_i32_266 = arith.constant 1 : i32
    %296 = arith.addi %c0_i32_216, %c1_i32_266 : i32
    %c1_267 = arith.constant 1 : index
    %297 = arith.index_cast %296 : i32 to index
    %c1_268 = arith.constant 1 : index
    %c0_269 = arith.constant 0 : index
    %298 = vector.load %arg16[%c1_267, %297, %c1_268, %c0_269] : memref<2x5x5x16xf32, #tpu.memory_space<vmem>>, vector<1x1x1x16xf32>
    %299 = vector.shape_cast %298 : vector<1x1x1x16xf32> to vector<1x16xf32>
    %c6_270 = arith.constant 6 : index
    %c0_271 = arith.constant 0 : index
    %c0_272 = arith.constant 0 : index
    %300 = vector.load %arg6[%c6_270, %c0_271, %c0_272] : memref<25x16x128xf32, #tpu.memory_space<vmem>>, vector<1x16x128xf32>
    %301 = vector.shape_cast %300 : vector<1x16x128xf32> to vector<16x128xf32>
    %cst_273 = arith.constant dense<0.000000e+00> : vector<1x128xf32>
    %302 = tpu.matmul %299, %301, %cst_273 {dimension_numbers = #tpu.dot_dimension_numbers<[1], [0], [0], [1], [0, 0, 1, 1], [], []>} : vector<1x16xf32>, vector<16x128xf32>, vector<1x128xf32> -> vector<1x128xf32>
    %303 = arith.addf %295, %302 : vector<1x128xf32>
    %c1_i32_274 = arith.constant 1 : i32
    %304 = arith.addi %c0_i32_216, %c1_i32_274 : i32
    %c1_275 = arith.constant 1 : index
    %305 = arith.index_cast %304 : i32 to index
    %c2_276 = arith.constant 2 : index
    %c0_277 = arith.constant 0 : index
    %306 = vector.load %arg16[%c1_275, %305, %c2_276, %c0_277] : memref<2x5x5x16xf32, #tpu.memory_space<vmem>>, vector<1x1x1x16xf32>
    %307 = vector.shape_cast %306 : vector<1x1x1x16xf32> to vector<1x16xf32>
    %c7_278 = arith.constant 7 : index
    %c0_279 = arith.constant 0 : index
    %c0_280 = arith.constant 0 : index
    %308 = vector.load %arg6[%c7_278, %c0_279, %c0_280] : memref<25x16x128xf32, #tpu.memory_space<vmem>>, vector<1x16x128xf32>
    %309 = vector.shape_cast %308 : vector<1x16x128xf32> to vector<16x128xf32>
    %cst_281 = arith.constant dense<0.000000e+00> : vector<1x128xf32>
    %310 = tpu.matmul %307, %309, %cst_281 {dimension_numbers = #tpu.dot_dimension_numbers<[1], [0], [0], [1], [0, 0, 1, 1], [], []>} : vector<1x16xf32>, vector<16x128xf32>, vector<1x128xf32> -> vector<1x128xf32>
    %311 = arith.addf %303, %310 : vector<1x128xf32>
    %c1_i32_282 = arith.constant 1 : i32
    %312 = arith.addi %c0_i32_216, %c1_i32_282 : i32
    %c1_283 = arith.constant 1 : index
    %313 = arith.index_cast %312 : i32 to index
    %c3_284 = arith.constant 3 : index
    %c0_285 = arith.constant 0 : index
    %314 = vector.load %arg16[%c1_283, %313, %c3_284, %c0_285] : memref<2x5x5x16xf32, #tpu.memory_space<vmem>>, vector<1x1x1x16xf32>
    %315 = vector.shape_cast %314 : vector<1x1x1x16xf32> to vector<1x16xf32>
    %c8_286 = arith.constant 8 : index
    %c0_287 = arith.constant 0 : index
    %c0_288 = arith.constant 0 : index
    %316 = vector.load %arg6[%c8_286, %c0_287, %c0_288] : memref<25x16x128xf32, #tpu.memory_space<vmem>>, vector<1x16x128xf32>
    %317 = vector.shape_cast %316 : vector<1x16x128xf32> to vector<16x128xf32>
    %cst_289 = arith.constant dense<0.000000e+00> : vector<1x128xf32>
    %318 = tpu.matmul %315, %317, %cst_289 {dimension_numbers = #tpu.dot_dimension_numbers<[1], [0], [0], [1], [0, 0, 1, 1], [], []>} : vector<1x16xf32>, vector<16x128xf32>, vector<1x128xf32> -> vector<1x128xf32>
    %319 = arith.addf %311, %318 : vector<1x128xf32>
    %c1_i32_290 = arith.constant 1 : i32
    %320 = arith.addi %c0_i32_216, %c1_i32_290 : i32
    %c1_291 = arith.constant 1 : index
    %321 = arith.index_cast %320 : i32 to index
    %c4_292 = arith.constant 4 : index
    %c0_293 = arith.constant 0 : index
    %322 = vector.load %arg16[%c1_291, %321, %c4_292, %c0_293] : memref<2x5x5x16xf32, #tpu.memory_space<vmem>>, vector<1x1x1x16xf32>
    %323 = vector.shape_cast %322 : vector<1x1x1x16xf32> to vector<1x16xf32>
    %c9_294 = arith.constant 9 : index
    %c0_295 = arith.constant 0 : index
    %c0_296 = arith.constant 0 : index
    %324 = vector.load %arg6[%c9_294, %c0_295, %c0_296] : memref<25x16x128xf32, #tpu.memory_space<vmem>>, vector<1x16x128xf32>
    %325 = vector.shape_cast %324 : vector<1x16x128xf32> to vector<16x128xf32>
    %cst_297 = arith.constant dense<0.000000e+00> : vector<1x128xf32>
    %326 = tpu.matmul %323, %325, %cst_297 {dimension_numbers = #tpu.dot_dimension_numbers<[1], [0], [0], [1], [0, 0, 1, 1], [], []>} : vector<1x16xf32>, vector<16x128xf32>, vector<1x128xf32> -> vector<1x128xf32>
    %327 = arith.addf %319, %326 : vector<1x128xf32>
    %c2_i32_298 = arith.constant 2 : i32
    %328 = arith.addi %c0_i32_216, %c2_i32_298 : i32
    %c1_299 = arith.constant 1 : index
    %329 = arith.index_cast %328 : i32 to index
    %c0_300 = arith.constant 0 : index
    %c0_301 = arith.constant 0 : index
    %330 = vector.load %arg16[%c1_299, %329, %c0_300, %c0_301] : memref<2x5x5x16xf32, #tpu.memory_space<vmem>>, vector<1x1x1x16xf32>
    %331 = vector.shape_cast %330 : vector<1x1x1x16xf32> to vector<1x16xf32>
    %c10_302 = arith.constant 10 : index
    %c0_303 = arith.constant 0 : index
    %c0_304 = arith.constant 0 : index
    %332 = vector.load %arg6[%c10_302, %c0_303, %c0_304] : memref<25x16x128xf32, #tpu.memory_space<vmem>>, vector<1x16x128xf32>
    %333 = vector.shape_cast %332 : vector<1x16x128xf32> to vector<16x128xf32>
    %cst_305 = arith.constant dense<0.000000e+00> : vector<1x128xf32>
    %334 = tpu.matmul %331, %333, %cst_305 {dimension_numbers = #tpu.dot_dimension_numbers<[1], [0], [0], [1], [0, 0, 1, 1], [], []>} : vector<1x16xf32>, vector<16x128xf32>, vector<1x128xf32> -> vector<1x128xf32>
    %335 = arith.addf %327, %334 : vector<1x128xf32>
    %c2_i32_306 = arith.constant 2 : i32
    %336 = arith.addi %c0_i32_216, %c2_i32_306 : i32
    %c1_307 = arith.constant 1 : index
    %337 = arith.index_cast %336 : i32 to index
    %c1_308 = arith.constant 1 : index
    %c0_309 = arith.constant 0 : index
    %338 = vector.load %arg16[%c1_307, %337, %c1_308, %c0_309] : memref<2x5x5x16xf32, #tpu.memory_space<vmem>>, vector<1x1x1x16xf32>
    %339 = vector.shape_cast %338 : vector<1x1x1x16xf32> to vector<1x16xf32>
    %c11_310 = arith.constant 11 : index
    %c0_311 = arith.constant 0 : index
    %c0_312 = arith.constant 0 : index
    %340 = vector.load %arg6[%c11_310, %c0_311, %c0_312] : memref<25x16x128xf32, #tpu.memory_space<vmem>>, vector<1x16x128xf32>
    %341 = vector.shape_cast %340 : vector<1x16x128xf32> to vector<16x128xf32>
    %cst_313 = arith.constant dense<0.000000e+00> : vector<1x128xf32>
    %342 = tpu.matmul %339, %341, %cst_313 {dimension_numbers = #tpu.dot_dimension_numbers<[1], [0], [0], [1], [0, 0, 1, 1], [], []>} : vector<1x16xf32>, vector<16x128xf32>, vector<1x128xf32> -> vector<1x128xf32>
    %343 = arith.addf %335, %342 : vector<1x128xf32>
    %c2_i32_314 = arith.constant 2 : i32
    %344 = arith.addi %c0_i32_216, %c2_i32_314 : i32
    %c1_315 = arith.constant 1 : index
    %345 = arith.index_cast %344 : i32 to index
    %c2_316 = arith.constant 2 : index
    %c0_317 = arith.constant 0 : index
    %346 = vector.load %arg16[%c1_315, %345, %c2_316, %c0_317] : memref<2x5x5x16xf32, #tpu.memory_space<vmem>>, vector<1x1x1x16xf32>
    %347 = vector.shape_cast %346 : vector<1x1x1x16xf32> to vector<1x16xf32>
    %c12_318 = arith.constant 12 : index
    %c0_319 = arith.constant 0 : index
    %c0_320 = arith.constant 0 : index
    %348 = vector.load %arg6[%c12_318, %c0_319, %c0_320] : memref<25x16x128xf32, #tpu.memory_space<vmem>>, vector<1x16x128xf32>
    %349 = vector.shape_cast %348 : vector<1x16x128xf32> to vector<16x128xf32>
    %cst_321 = arith.constant dense<0.000000e+00> : vector<1x128xf32>
    %350 = tpu.matmul %347, %349, %cst_321 {dimension_numbers = #tpu.dot_dimension_numbers<[1], [0], [0], [1], [0, 0, 1, 1], [], []>} : vector<1x16xf32>, vector<16x128xf32>, vector<1x128xf32> -> vector<1x128xf32>
    %351 = arith.addf %343, %350 : vector<1x128xf32>
    %c2_i32_322 = arith.constant 2 : i32
    %352 = arith.addi %c0_i32_216, %c2_i32_322 : i32
    %c1_323 = arith.constant 1 : index
    %353 = arith.index_cast %352 : i32 to index
    %c3_324 = arith.constant 3 : index
    %c0_325 = arith.constant 0 : index
    %354 = vector.load %arg16[%c1_323, %353, %c3_324, %c0_325] : memref<2x5x5x16xf32, #tpu.memory_space<vmem>>, vector<1x1x1x16xf32>
    %355 = vector.shape_cast %354 : vector<1x1x1x16xf32> to vector<1x16xf32>
    %c13_326 = arith.constant 13 : index
    %c0_327 = arith.constant 0 : index
    %c0_328 = arith.constant 0 : index
    %356 = vector.load %arg6[%c13_326, %c0_327, %c0_328] : memref<25x16x128xf32, #tpu.memory_space<vmem>>, vector<1x16x128xf32>
    %357 = vector.shape_cast %356 : vector<1x16x128xf32> to vector<16x128xf32>
    %cst_329 = arith.constant dense<0.000000e+00> : vector<1x128xf32>
    %358 = tpu.matmul %355, %357, %cst_329 {dimension_numbers = #tpu.dot_dimension_numbers<[1], [0], [0], [1], [0, 0, 1, 1], [], []>} : vector<1x16xf32>, vector<16x128xf32>, vector<1x128xf32> -> vector<1x128xf32>
    %359 = arith.addf %351, %358 : vector<1x128xf32>
    %c2_i32_330 = arith.constant 2 : i32
    %360 = arith.addi %c0_i32_216, %c2_i32_330 : i32
    %c1_331 = arith.constant 1 : index
    %361 = arith.index_cast %360 : i32 to index
    %c4_332 = arith.constant 4 : index
    %c0_333 = arith.constant 0 : index
    %362 = vector.load %arg16[%c1_331, %361, %c4_332, %c0_333] : memref<2x5x5x16xf32, #tpu.memory_space<vmem>>, vector<1x1x1x16xf32>
    %363 = vector.shape_cast %362 : vector<1x1x1x16xf32> to vector<1x16xf32>
    %c14_334 = arith.constant 14 : index
    %c0_335 = arith.constant 0 : index
    %c0_336 = arith.constant 0 : index
    %364 = vector.load %arg6[%c14_334, %c0_335, %c0_336] : memref<25x16x128xf32, #tpu.memory_space<vmem>>, vector<1x16x128xf32>
    %365 = vector.shape_cast %364 : vector<1x16x128xf32> to vector<16x128xf32>
    %cst_337 = arith.constant dense<0.000000e+00> : vector<1x128xf32>
    %366 = tpu.matmul %363, %365, %cst_337 {dimension_numbers = #tpu.dot_dimension_numbers<[1], [0], [0], [1], [0, 0, 1, 1], [], []>} : vector<1x16xf32>, vector<16x128xf32>, vector<1x128xf32> -> vector<1x128xf32>
    %367 = arith.addf %359, %366 : vector<1x128xf32>
    %c3_i32_338 = arith.constant 3 : i32
    %368 = arith.addi %c0_i32_216, %c3_i32_338 : i32
    %c1_339 = arith.constant 1 : index
    %369 = arith.index_cast %368 : i32 to index
    %c0_340 = arith.constant 0 : index
    %c0_341 = arith.constant 0 : index
    %370 = vector.load %arg16[%c1_339, %369, %c0_340, %c0_341] : memref<2x5x5x16xf32, #tpu.memory_space<vmem>>, vector<1x1x1x16xf32>
    %371 = vector.shape_cast %370 : vector<1x1x1x16xf32> to vector<1x16xf32>
    %c15_342 = arith.constant 15 : index
    %c0_343 = arith.constant 0 : index
    %c0_344 = arith.constant 0 : index
    %372 = vector.load %arg6[%c15_342, %c0_343, %c0_344] : memref<25x16x128xf32, #tpu.memory_space<vmem>>, vector<1x16x128xf32>
    %373 = vector.shape_cast %372 : vector<1x16x128xf32> to vector<16x128xf32>
    %cst_345 = arith.constant dense<0.000000e+00> : vector<1x128xf32>
    %374 = tpu.matmul %371, %373, %cst_345 {dimension_numbers = #tpu.dot_dimension_numbers<[1], [0], [0], [1], [0, 0, 1, 1], [], []>} : vector<1x16xf32>, vector<16x128xf32>, vector<1x128xf32> -> vector<1x128xf32>
    %375 = arith.addf %367, %374 : vector<1x128xf32>
    %c3_i32_346 = arith.constant 3 : i32
    %376 = arith.addi %c0_i32_216, %c3_i32_346 : i32
    %c1_347 = arith.constant 1 : index
    %377 = arith.index_cast %376 : i32 to index
    %c1_348 = arith.constant 1 : index
    %c0_349 = arith.constant 0 : index
    %378 = vector.load %arg16[%c1_347, %377, %c1_348, %c0_349] : memref<2x5x5x16xf32, #tpu.memory_space<vmem>>, vector<1x1x1x16xf32>
    %379 = vector.shape_cast %378 : vector<1x1x1x16xf32> to vector<1x16xf32>
    %c16_350 = arith.constant 16 : index
    %c0_351 = arith.constant 0 : index
    %c0_352 = arith.constant 0 : index
    %380 = vector.load %arg6[%c16_350, %c0_351, %c0_352] : memref<25x16x128xf32, #tpu.memory_space<vmem>>, vector<1x16x128xf32>
    %381 = vector.shape_cast %380 : vector<1x16x128xf32> to vector<16x128xf32>
    %cst_353 = arith.constant dense<0.000000e+00> : vector<1x128xf32>
    %382 = tpu.matmul %379, %381, %cst_353 {dimension_numbers = #tpu.dot_dimension_numbers<[1], [0], [0], [1], [0, 0, 1, 1], [], []>} : vector<1x16xf32>, vector<16x128xf32>, vector<1x128xf32> -> vector<1x128xf32>
    %383 = arith.addf %375, %382 : vector<1x128xf32>
    %c3_i32_354 = arith.constant 3 : i32
    %384 = arith.addi %c0_i32_216, %c3_i32_354 : i32
    %c1_355 = arith.constant 1 : index
    %385 = arith.index_cast %384 : i32 to index
    %c2_356 = arith.constant 2 : index
    %c0_357 = arith.constant 0 : index
    %386 = vector.load %arg16[%c1_355, %385, %c2_356, %c0_357] : memref<2x5x5x16xf32, #tpu.memory_space<vmem>>, vector<1x1x1x16xf32>
    %387 = vector.shape_cast %386 : vector<1x1x1x16xf32> to vector<1x16xf32>
    %c17_358 = arith.constant 17 : index
    %c0_359 = arith.constant 0 : index
    %c0_360 = arith.constant 0 : index
    %388 = vector.load %arg6[%c17_358, %c0_359, %c0_360] : memref<25x16x128xf32, #tpu.memory_space<vmem>>, vector<1x16x128xf32>
    %389 = vector.shape_cast %388 : vector<1x16x128xf32> to vector<16x128xf32>
    %cst_361 = arith.constant dense<0.000000e+00> : vector<1x128xf32>
    %390 = tpu.matmul %387, %389, %cst_361 {dimension_numbers = #tpu.dot_dimension_numbers<[1], [0], [0], [1], [0, 0, 1, 1], [], []>} : vector<1x16xf32>, vector<16x128xf32>, vector<1x128xf32> -> vector<1x128xf32>
    %391 = arith.addf %383, %390 : vector<1x128xf32>
    %c3_i32_362 = arith.constant 3 : i32
    %392 = arith.addi %c0_i32_216, %c3_i32_362 : i32
    %c1_363 = arith.constant 1 : index
    %393 = arith.index_cast %392 : i32 to index
    %c3_364 = arith.constant 3 : index
    %c0_365 = arith.constant 0 : index
    %394 = vector.load %arg16[%c1_363, %393, %c3_364, %c0_365] : memref<2x5x5x16xf32, #tpu.memory_space<vmem>>, vector<1x1x1x16xf32>
    %395 = vector.shape_cast %394 : vector<1x1x1x16xf32> to vector<1x16xf32>
    %c18_366 = arith.constant 18 : index
    %c0_367 = arith.constant 0 : index
    %c0_368 = arith.constant 0 : index
    %396 = vector.load %arg6[%c18_366, %c0_367, %c0_368] : memref<25x16x128xf32, #tpu.memory_space<vmem>>, vector<1x16x128xf32>
    %397 = vector.shape_cast %396 : vector<1x16x128xf32> to vector<16x128xf32>
    %cst_369 = arith.constant dense<0.000000e+00> : vector<1x128xf32>
    %398 = tpu.matmul %395, %397, %cst_369 {dimension_numbers = #tpu.dot_dimension_numbers<[1], [0], [0], [1], [0, 0, 1, 1], [], []>} : vector<1x16xf32>, vector<16x128xf32>, vector<1x128xf32> -> vector<1x128xf32>
    %399 = arith.addf %391, %398 : vector<1x128xf32>
    %c3_i32_370 = arith.constant 3 : i32
    %400 = arith.addi %c0_i32_216, %c3_i32_370 : i32
    %c1_371 = arith.constant 1 : index
    %401 = arith.index_cast %400 : i32 to index
    %c4_372 = arith.constant 4 : index
    %c0_373 = arith.constant 0 : index
    %402 = vector.load %arg16[%c1_371, %401, %c4_372, %c0_373] : memref<2x5x5x16xf32, #tpu.memory_space<vmem>>, vector<1x1x1x16xf32>
    %403 = vector.shape_cast %402 : vector<1x1x1x16xf32> to vector<1x16xf32>
    %c19_374 = arith.constant 19 : index
    %c0_375 = arith.constant 0 : index
    %c0_376 = arith.constant 0 : index
    %404 = vector.load %arg6[%c19_374, %c0_375, %c0_376] : memref<25x16x128xf32, #tpu.memory_space<vmem>>, vector<1x16x128xf32>
    %405 = vector.shape_cast %404 : vector<1x16x128xf32> to vector<16x128xf32>
    %cst_377 = arith.constant dense<0.000000e+00> : vector<1x128xf32>
    %406 = tpu.matmul %403, %405, %cst_377 {dimension_numbers = #tpu.dot_dimension_numbers<[1], [0], [0], [1], [0, 0, 1, 1], [], []>} : vector<1x16xf32>, vector<16x128xf32>, vector<1x128xf32> -> vector<1x128xf32>
    %407 = arith.addf %399, %406 : vector<1x128xf32>
    %c4_i32_378 = arith.constant 4 : i32
    %408 = arith.addi %c0_i32_216, %c4_i32_378 : i32
    %c1_379 = arith.constant 1 : index
    %409 = arith.index_cast %408 : i32 to index
    %c0_380 = arith.constant 0 : index
    %c0_381 = arith.constant 0 : index
    %410 = vector.load %arg16[%c1_379, %409, %c0_380, %c0_381] : memref<2x5x5x16xf32, #tpu.memory_space<vmem>>, vector<1x1x1x16xf32>
    %411 = vector.shape_cast %410 : vector<1x1x1x16xf32> to vector<1x16xf32>
    %c20_382 = arith.constant 20 : index
    %c0_383 = arith.constant 0 : index
    %c0_384 = arith.constant 0 : index
    %412 = vector.load %arg6[%c20_382, %c0_383, %c0_384] : memref<25x16x128xf32, #tpu.memory_space<vmem>>, vector<1x16x128xf32>
    %413 = vector.shape_cast %412 : vector<1x16x128xf32> to vector<16x128xf32>
    %cst_385 = arith.constant dense<0.000000e+00> : vector<1x128xf32>
    %414 = tpu.matmul %411, %413, %cst_385 {dimension_numbers = #tpu.dot_dimension_numbers<[1], [0], [0], [1], [0, 0, 1, 1], [], []>} : vector<1x16xf32>, vector<16x128xf32>, vector<1x128xf32> -> vector<1x128xf32>
    %415 = arith.addf %407, %414 : vector<1x128xf32>
    %c4_i32_386 = arith.constant 4 : i32
    %416 = arith.addi %c0_i32_216, %c4_i32_386 : i32
    %c1_387 = arith.constant 1 : index
    %417 = arith.index_cast %416 : i32 to index
    %c1_388 = arith.constant 1 : index
    %c0_389 = arith.constant 0 : index
    %418 = vector.load %arg16[%c1_387, %417, %c1_388, %c0_389] : memref<2x5x5x16xf32, #tpu.memory_space<vmem>>, vector<1x1x1x16xf32>
    %419 = vector.shape_cast %418 : vector<1x1x1x16xf32> to vector<1x16xf32>
    %c21_390 = arith.constant 21 : index
    %c0_391 = arith.constant 0 : index
    %c0_392 = arith.constant 0 : index
    %420 = vector.load %arg6[%c21_390, %c0_391, %c0_392] : memref<25x16x128xf32, #tpu.memory_space<vmem>>, vector<1x16x128xf32>
    %421 = vector.shape_cast %420 : vector<1x16x128xf32> to vector<16x128xf32>
    %cst_393 = arith.constant dense<0.000000e+00> : vector<1x128xf32>
    %422 = tpu.matmul %419, %421, %cst_393 {dimension_numbers = #tpu.dot_dimension_numbers<[1], [0], [0], [1], [0, 0, 1, 1], [], []>} : vector<1x16xf32>, vector<16x128xf32>, vector<1x128xf32> -> vector<1x128xf32>
    %423 = arith.addf %415, %422 : vector<1x128xf32>
    %c4_i32_394 = arith.constant 4 : i32
    %424 = arith.addi %c0_i32_216, %c4_i32_394 : i32
    %c1_395 = arith.constant 1 : index
    %425 = arith.index_cast %424 : i32 to index
    %c2_396 = arith.constant 2 : index
    %c0_397 = arith.constant 0 : index
    %426 = vector.load %arg16[%c1_395, %425, %c2_396, %c0_397] : memref<2x5x5x16xf32, #tpu.memory_space<vmem>>, vector<1x1x1x16xf32>
    %427 = vector.shape_cast %426 : vector<1x1x1x16xf32> to vector<1x16xf32>
    %c22_398 = arith.constant 22 : index
    %c0_399 = arith.constant 0 : index
    %c0_400 = arith.constant 0 : index
    %428 = vector.load %arg6[%c22_398, %c0_399, %c0_400] : memref<25x16x128xf32, #tpu.memory_space<vmem>>, vector<1x16x128xf32>
    %429 = vector.shape_cast %428 : vector<1x16x128xf32> to vector<16x128xf32>
    %cst_401 = arith.constant dense<0.000000e+00> : vector<1x128xf32>
    %430 = tpu.matmul %427, %429, %cst_401 {dimension_numbers = #tpu.dot_dimension_numbers<[1], [0], [0], [1], [0, 0, 1, 1], [], []>} : vector<1x16xf32>, vector<16x128xf32>, vector<1x128xf32> -> vector<1x128xf32>
    %431 = arith.addf %423, %430 : vector<1x128xf32>
    %c4_i32_402 = arith.constant 4 : i32
    %432 = arith.addi %c0_i32_216, %c4_i32_402 : i32
    %c1_403 = arith.constant 1 : index
    %433 = arith.index_cast %432 : i32 to index
    %c3_404 = arith.constant 3 : index
    %c0_405 = arith.constant 0 : index
    %434 = vector.load %arg16[%c1_403, %433, %c3_404, %c0_405] : memref<2x5x5x16xf32, #tpu.memory_space<vmem>>, vector<1x1x1x16xf32>
    %435 = vector.shape_cast %434 : vector<1x1x1x16xf32> to vector<1x16xf32>
    %c23_406 = arith.constant 23 : index
    %c0_407 = arith.constant 0 : index
    %c0_408 = arith.constant 0 : index
    %436 = vector.load %arg6[%c23_406, %c0_407, %c0_408] : memref<25x16x128xf32, #tpu.memory_space<vmem>>, vector<1x16x128xf32>
    %437 = vector.shape_cast %436 : vector<1x16x128xf32> to vector<16x128xf32>
    %cst_409 = arith.constant dense<0.000000e+00> : vector<1x128xf32>
    %438 = tpu.matmul %435, %437, %cst_409 {dimension_numbers = #tpu.dot_dimension_numbers<[1], [0], [0], [1], [0, 0, 1, 1], [], []>} : vector<1x16xf32>, vector<16x128xf32>, vector<1x128xf32> -> vector<1x128xf32>
    %439 = arith.addf %431, %438 : vector<1x128xf32>
    %c4_i32_410 = arith.constant 4 : i32
    %440 = arith.addi %c0_i32_216, %c4_i32_410 : i32
    %c1_411 = arith.constant 1 : index
    %441 = arith.index_cast %440 : i32 to index
    %c4_412 = arith.constant 4 : index
    %c0_413 = arith.constant 0 : index
    %442 = vector.load %arg16[%c1_411, %441, %c4_412, %c0_413] : memref<2x5x5x16xf32, #tpu.memory_space<vmem>>, vector<1x1x1x16xf32>
    %443 = vector.shape_cast %442 : vector<1x1x1x16xf32> to vector<1x16xf32>
    %c24_414 = arith.constant 24 : index
    %c0_415 = arith.constant 0 : index
    %c0_416 = arith.constant 0 : index
    %444 = vector.load %arg6[%c24_414, %c0_415, %c0_416] : memref<25x16x128xf32, #tpu.memory_space<vmem>>, vector<1x16x128xf32>
    %445 = vector.shape_cast %444 : vector<1x16x128xf32> to vector<16x128xf32>
    %cst_417 = arith.constant dense<0.000000e+00> : vector<1x128xf32>
    %446 = tpu.matmul %443, %445, %cst_417 {dimension_numbers = #tpu.dot_dimension_numbers<[1], [0], [0], [1], [0, 0, 1, 1], [], []>} : vector<1x16xf32>, vector<16x128xf32>, vector<1x128xf32> -> vector<1x128xf32>
    %447 = arith.addf %439, %446 : vector<1x128xf32>
    %448 = arith.addf %447, %38 : vector<1x128xf32>
    %cst_418 = arith.constant 0.000000e+00 : f32
    %449 = vector.broadcast %cst_418 : f32 to vector<1x128xf32>
    %450 = arith.maximumf %448, %449 : vector<1x128xf32>
    %c1_419 = arith.constant 1 : index
    %451 = arith.index_cast %c0_i32_216 : i32 to index
    %c0_420 = arith.constant 0 : index
    %c0_421 = arith.constant 0 : index
    %452 = vector.load %arg17[%c1_419, %451, %c0_420, %c0_421] : memref<2x1x1x128xf32, #tpu.memory_space<vmem>>, vector<1x1x1x128xf32>
    %453 = vector.shape_cast %452 : vector<1x1x1x128xf32> to vector<1x128xf32>
    %454 = vector.shape_cast %450 : vector<1x128xf32> to vector<1x1x1x128xf32>
    tpu.vector_store %arg17[%c1_419, %451, %c0_420, %c0_421], %454 {strides = array<i32>} : memref<2x1x1x128xf32, #tpu.memory_space<vmem>>, vector<1x1x1x128xf32>,
    %c1_i32_422 = arith.constant 1 : i32
    %c0_423 = arith.constant 0 : index
    %c0_424 = arith.constant 0 : index
    %c0_425 = arith.constant 0 : index
    %c0_426 = arith.constant 0 : index
    %455 = vector.load %arg17[%c0_423, %c0_424, %c0_425, %c0_426] : memref<2x1x1x128xf32, #tpu.memory_space<vmem>>, vector<2x1x1x128xf32>
    %456 = vector.shape_cast %455 : vector<2x1x1x128xf32> to vector<2x128xf32>
    %c0_427 = arith.constant 0 : index
    %c0_428 = arith.constant 0 : index
    %457 = vector.load %arg8[%c0_427, %c0_428] : memref<128x128xf32, #tpu.memory_space<vmem>>, vector<128x128xf32>
    %cst_429 = arith.constant dense<0.000000e+00> : vector<2x128xf32>
    %458 = tpu.matmul %456, %457, %cst_429 {dimension_numbers = #tpu.dot_dimension_numbers<[1], [0], [0], [1], [0, 0, 1, 1], [], []>} : vector<2x128xf32>, vector<128x128xf32>, vector<2x128xf32> -> vector<2x128xf32>
    %c0_430 = arith.constant 0 : index
    %c0_431 = arith.constant 0 : index
    %459 = vector.load %arg9[%c0_430, %c0_431] : memref<1x128xf32, #tpu.memory_space<vmem>>, vector<1x128xf32>
    %460 = vector.broadcast %459 : vector<1x128xf32> to vector<2x128xf32>
    %461 = arith.addf %458, %460 : vector<2x128xf32>
    %cst_432 = arith.constant 0.000000e+00 : f32
    %462 = vector.broadcast %cst_432 : f32 to vector<2x128xf32>
    %463 = arith.maximumf %461, %462 : vector<2x128xf32>
    %c0_433 = arith.constant 0 : index
    %c0_434 = arith.constant 0 : index
    %464 = vector.load %arg10[%c0_433, %c0_434] : memref<128x128xf32, #tpu.memory_space<vmem>>, vector<128x128xf32>
    %cst_435 = arith.constant dense<0.000000e+00> : vector<2x128xf32>
    %465 = tpu.matmul %463, %464, %cst_435 {dimension_numbers = #tpu.dot_dimension_numbers<[1], [0], [0], [1], [0, 0, 1, 1], [], []>} : vector<2x128xf32>, vector<128x128xf32>, vector<2x128xf32> -> vector<2x128xf32>
    %c0_436 = arith.constant 0 : index
    %c0_437 = arith.constant 0 : index
    %466 = vector.load %arg11[%c0_436, %c0_437] : memref<1x128xf32, #tpu.memory_space<vmem>>, vector<1x128xf32>
    %467 = vector.broadcast %466 : vector<1x128xf32> to vector<2x128xf32>
    %468 = arith.addf %465, %467 : vector<2x128xf32>
    %c0_438 = arith.constant 0 : index
    %c0_439 = arith.constant 0 : index
    %469 = vector.load %arg12[%c0_438, %c0_439] : memref<2x128xf32, #tpu.memory_space<vmem>>, vector<2x128xf32>
    tpu.vector_store %arg12[%c0_438, %c0_439], %468 {strides = array<i32>} : memref<2x128xf32, #tpu.memory_space<vmem>>, vector<2x128xf32>,
    return
  }
  func.func @transform_0(%arg0: i32) -> (i32, i32, i32, i32) {
    %c0_i32 = arith.constant 0 : i32
    %c0_i32_0 = arith.constant 0 : i32
    %c0_i32_1 = arith.constant 0 : i32
    %c0_i32_2 = arith.constant 0 : i32
    %c0_i32_3 = arith.constant 0 : i32
    return %c0_i32, %c0_i32_0, %c0_i32_1, %c0_i32_2 : i32, i32, i32, i32
  }
  func.func @transform_1(%arg0: i32) -> (i32, i32, i32) {
    %c0_i32 = arith.constant 0 : i32
    %c0_i32_0 = arith.constant 0 : i32
    %c0_i32_1 = arith.constant 0 : i32
    %c0_i32_2 = arith.constant 0 : i32
    return %c0_i32, %c0_i32_0, %c0_i32_1 : i32, i32, i32
  }
  func.func @transform_2(%arg0: i32) -> (i32, i32) {
    %c0_i32 = arith.constant 0 : i32
    %c0_i32_0 = arith.constant 0 : i32
    %c0_i32_1 = arith.constant 0 : i32
    return %c0_i32, %c0_i32_0 : i32, i32
  }
  func.func @transform_3(%arg0: i32) -> (i32, i32, i32) {
    %c0_i32 = arith.constant 0 : i32
    %c0_i32_0 = arith.constant 0 : i32
    %c0_i32_1 = arith.constant 0 : i32
    %c0_i32_2 = arith.constant 0 : i32
    return %c0_i32, %c0_i32_0, %c0_i32_1 : i32, i32, i32
  }
  func.func @transform_4(%arg0: i32) -> (i32, i32) {
    %c0_i32 = arith.constant 0 : i32
    %c0_i32_0 = arith.constant 0 : i32
    %c0_i32_1 = arith.constant 0 : i32
    return %c0_i32, %c0_i32_0 : i32, i32
  }
  func.func @transform_5(%arg0: i32) -> (i32, i32, i32) {
    %c0_i32 = arith.constant 0 : i32
    %c0_i32_0 = arith.constant 0 : i32
    %c0_i32_1 = arith.constant 0 : i32
    %c0_i32_2 = arith.constant 0 : i32
    return %c0_i32, %c0_i32_0, %c0_i32_1 : i32, i32, i32
  }
  func.func @transform_6(%arg0: i32) -> (i32, i32) {
    %c0_i32 = arith.constant 0 : i32
    %c0_i32_0 = arith.constant 0 : i32
    %c0_i32_1 = arith.constant 0 : i32
    return %c0_i32, %c0_i32_0 : i32, i32
  }
  func.func @transform_7(%arg0: i32) -> (i32, i32) {
    %c0_i32 = arith.constant 0 : i32
    %c0_i32_0 = arith.constant 0 : i32
    %c0_i32_1 = arith.constant 0 : i32
    return %c0_i32, %c0_i32_0 : i32, i32
  }
  func.func @transform_8(%arg0: i32) -> (i32, i32) {
    %c0_i32 = arith.constant 0 : i32
    %c0_i32_0 = arith.constant 0 : i32
    %c0_i32_1 = arith.constant 0 : i32
    return %c0_i32, %c0_i32_0 : i32, i32
  }
  func.func @transform_9(%arg0: i32) -> (i32, i32) {
    %c0_i32 = arith.constant 0 : i32
    %c0_i32_0 = arith.constant 0 : i32
    %c0_i32_1 = arith.constant 0 : i32
    return %c0_i32, %c0_i32_0 : i32, i32
  }
  func.func @transform_10(%arg0: i32) -> (i32, i32) {
    %c0_i32 = arith.constant 0 : i32
    %c0_i32_0 = arith.constant 0 : i32
    %c0_i32_1 = arith.constant 0 : i32
    return %c0_i32, %c0_i32_0 : i32, i32
  }
  func.func @transform_11(%arg0: i32) -> (i32, i32) {
    %c0_i32 = arith.constant 0 : i32
    %c0_i32_0 = arith.constant 0 : i32
    %c0_i32_1 = arith.constant 0 : i32
    return %c0_i32, %c0_i32_0 : i32, i32
  }
}

</mosaic_0001>

<bundles_post_ra>
// kernel: lenet5_forward.1
= control target key start
LH: loop header
LB: loop body
LE: loop exit
PB: predicated region body
PF: predicated region fallthrough
CT: control target
= control target key end

     0   :  { %16 = vsyncpa [#allocation8], 0  ;;  %s7629_s19 = smov 0   ;;  %s9229_s0 = inlined_call_operand.vmem [shape: f32[2,32,32,8], index: 0, kind: input, shape index: {}]   ;;  %s9230_s1 = inlined_call_operand.vmem [shape: f32[25,8,128], index: 1, kind: input, shape index: {}]   ;;  %s9231_s2 = inlined_call_operand.vmem [shape: f32[1,128], index: 2, kind: input, shape index: {}]   ;;  %s9232_s3 = inlined_call_operand.vmem [shape: f32[25,8,128], index: 3, kind: input, shape index: {}]   ;;  %s9233_s4 = inlined_call_operand.vmem [shape: f32[1,128], index: 4, kind: input, shape index: {}]   ;;  %s9234_s5 = inlined_call_operand.vmem [shape: f32[25,16,128], index: 5, kind: input, shape index: {}]   ;;  %s9235_s6 = inlined_call_operand.vmem [shape: f32[1,128], index: 6, kind: input, shape index: {}]   ;;  %s9236_s7 = inlined_call_operand.vmem [shape: f32[128,128], index: 7, kind: input, shape index: {}]   ;;  %s9237_s8 = inlined_call_operand.vmem [shape: f32[1,128], index: 8, kind: input, shape index: {}]   ;;  %s9238_s9 = inlined_call_operand.vmem [shape: f32[128,128], index: 9, kind: input, shape index: {}]   ;;  %s9239_s10 = inlined_call_operand.vmem [shape: f32[1,128], index: 10, kind: input, shape index: {}]   ;;  %s9240_s11 = inlined_call_operand.hbm [shape: f32[2,128], index: 11, kind: output, shape index: {}]  }
   0x1   :  { %v7627_v0 = vld [vmem:[%s9231_s2] sm:$0x1] }
   0x2 LB: > { %v6472_v1 = vld [vmem:[%s9230_s1 + $0x8] sm:$0xff]  ;;  %v6481_v2 = vld [vmem:[%s9230_s1 + $0x10] sm:$0xff]  ;;  %v6486_v3 = vld [vmem:[%s9230_s1 + $0x18] sm:$0xff]  ;;  %s6471_s27 = sshll.u32 %s7532_s19, 5  ;;  %vm59_vm0 = vcmask 64512   ;;  %vm1342_vm1 = vcmask 60416   ;;  %s7532_s19 = sphi %s7629_s19, %s45_s19  }
   0x3   : > { %7380 = vmatpush.msra.mxu1 %v6472_v1  ;;  %7381 = vmatpush.msra.mxu2 %v6472_v1  ;;  %v52_v4 = vld [vmem:[%s9230_s1] sm:$0xff]  ;;  %s7652_s30 = scalar_lea.vmem %s9229_s0, %s6471_s27  ;;  %v6510_v5 = vld [vmem:[%s9230_s1 + $0x30] sm:$0xff]  ;;  %v6519_v6 = vld [vmem:[%s9230_s1 + $0x38] sm:$0xff]  ;;  %s45_s19 = sadd.s32 1, %s7532_s19  }
   0x4   : > { %7382 = vmatpush.msra.mxu3 %v6472_v1  ;;  %v54_v7 = vld [vmem:[%s7652_s30 + $0x9] sm:$0xff]  ;;  %v55_v8 = vld [vmem:[%s7652_s30 + $0x11] sm:$0xff]  ;;  %v56_v9 = vld [vmem:[%s7652_s30 + $0x19] sm:$0xf]  ;;  %87 = vmatpush.msra.mxu0 %v6472_v1  ;;  %p42_p0 = scmp.ge.s32.totalorder %s45_s19, 28  }
   0x5   : > { %175 = vmatpush.msrb.mxu2 %v6481_v2  ;;  %128 = vmatpush.msrb.mxu1 %v52_v4  ;;  %v53_v10 = vld [vmem:[%s7652_s30 + $0x1] sm:$0xff]  ;;  %v6547_v18 = vld [vmem:[%s9230_s1 + $0x50] sm:$0xff]  ;;  %v6556_v19 = vld [vmem:[%s9230_s1 + $0x58] sm:$0xff] }
   0x6   : > { %226 = vmatpush.msrb.mxu3 %v6486_v3  ;;  %6474 = vmatmul.msk.f32.vlgmr.msra.gmra.mxu1 %vm59_vm0, %v54_v7  ;;  %v6491_v11 = vld [vmem:[%s9230_s1 + $0x20] sm:$0xff]  ;;  %v6501_v12 = vld [vmem:[%s9230_s1 + $0x28] sm:$0xff]  ;;  %v50_v26 = vld [vmem:[%s7652_s30 + $0x10] sm:$0xff] }
   0x7   : > { %6475 = vmatmul.msk.f32.vlgmr.msra.gmra.mxu2 %vm59_vm0, %v55_v8  ;;  %6476 = vmatmul.msk.f32.vlgmr.msra.gmra.mxu3 %vm59_vm0, %v56_v9  ;;  %v6528_v13 = vld [vmem:[%s9230_s1 + $0x40] sm:$0xff]  ;;  %v6537_v20 = vld [vmem:[%s9230_s1 + $0x48] sm:$0xff]  ;;  %v144_v27 = vld [vmem:[%s7652_s30 + $0x12] sm:$0xff] }
   0x8   : > { %382 = vmatpush.msra.mxu2 %v6510_v5  ;;  %6473 = vmatmul.msk.f32.vlgmr.msra.gmra.mxu0 %vm59_vm0, %v53_v10  ;;  %v48_v14 = vld [vmem:[%s7652_s30] sm:$0xff]  ;;  %v49_v21 = vld [vmem:[%s7652_s30 + $0x8] sm:$0xff]  ;;  %v195_v28 = vld [vmem:[%s7652_s30 + $0x13] sm:$0xff] }
   0x9   : > { %433 = vmatpush.msra.mxu3 %v6519_v6  ;;  %277 = vmatpush.msrb.mxu0 %v6491_v11  ;;  %v142_v15 = vld [vmem:[%s7652_s30 + $0x2] sm:$0xff]  ;;  %v143_v22 = vld [vmem:[%s7652_s30 + $0xa] sm:$0xff]  ;;  %v246_v29 = vld [vmem:[%s7652_s30 + $0x14] sm:$0xff] }
   0xa   : > { %331 = vmatpush.msra.mxu1 %v6501_v12  ;;  %v193_v16 = vld [vmem:[%s7652_s30 + $0x3] sm:$0xff]  ;;  %v194_v23 = vld [vmem:[%s7652_s30 + $0xb] sm:$0xff]  ;;  %v51_v30 = vld [vmem:[%s7652_s30 + $0x18] sm:$0xf] }
   0xb   : > { %484 = vmatpush.msra.mxu0 %v6528_v13  ;;  %v244_v17 = vld [vmem:[%s7652_s30 + $0x4] sm:$0xff]  ;;  %v245_v24 = vld [vmem:[%s7652_s30 + $0xc] sm:$0xff]  ;;  %v145_v31 = vld [vmem:[%s7652_s30 + $0x1a] sm:$0xf] }
   0xc   : > { %v6565_v25 = vld [vmem:[%s9230_s1 + $0x60] sm:$0xff]  ;;  %v196_v32 = vld [vmem:[%s7652_s30 + $0x1b] sm:$0xf]  ;;  %v6583_v38 = vld [vmem:[%s9230_s1 + $0x70] sm:$0xff] }
   0xd   : > { %v247_v33 = vld [vmem:[%s7652_s30 + $0x1c] sm:$0xf]  ;;  %v6497_v34 = vld [vmem:[%s7652_s30 + $0x20] sm:$0xff]  ;;  %v6574_v40 = vld [vmem:[%s9230_s1 + $0x68] sm:$0xff] }
   0xe   : > { %6477 = vmatmul.msk.f32.vlgmr.msrb.gmra.mxu1 %vm59_vm0, %v48_v14  ;;  %v6506_v35 = vld [vmem:[%s7652_s30 + $0x21] sm:$0xff]  ;;  %v6593_v39 = vld [vmem:[%s9230_s1 + $0x78] sm:$0xff]  ;;  %v6507_v42 = vld [vmem:[%s7652_s30 + $0x29] sm:$0xff] }
   0xf   : > { %6482 = vmatmul.msk.f32.vlgmr.msrb.gmra.mxu2 %vm59_vm0, %v142_v15  ;;  %6487 = vmatmul.msk.f32.vlgmr.msrb.gmra.mxu3 %vm59_vm0, %v193_v16  ;;  %v6515_v36 = vld [vmem:[%s7652_s30 + $0x22] sm:$0xff]  ;;  %v6516_v43 = vld [vmem:[%s7652_s30 + $0x2a] sm:$0xff]  ;;  %v6517_v48 = vld [vmem:[%s7652_s30 + $0x32] sm:$0xff] }
  0x10   : > { %589 = vmatpush.msrb.mxu2 %v6547_v18  ;;  %6492 = vmatmul.msk.f32.vlgmr.msrb.gmra.mxu0 %vm59_vm0, %v244_v17  ;;  %v6524_v37 = vld [vmem:[%s7652_s30 + $0x23] sm:$0xff]  ;;  %v6525_v44 = vld [vmem:[%s7652_s30 + $0x2b] sm:$0xff]  ;;  %v6526_v49 = vld [vmem:[%s7652_s30 + $0x33] sm:$0xff] }
  0x11   : > { %640 = vmatpush.msrb.mxu3 %v6556_v19  ;;  %535 = vmatpush.msrb.mxu1 %v6537_v20  ;;  %v6498_v41 = vld [vmem:[%s7652_s30 + $0x28] sm:$0xff]  ;;  %v6602_v45 = vld [vmem:[%s9230_s1 + $0x80] sm:$0xff]  ;;  %v6499_v46 = vld [vmem:[%s7652_s30 + $0x30] sm:$0xff] }
  0x12   : > { %691 = vmatpush.msrb.mxu0 %v6565_v25  ;;  %v6508_v47 = vld [vmem:[%s7652_s30 + $0x31] sm:$0xff]  ;;  %v6509_v51 = vld [vmem:[%s7652_s30 + $0x39] sm:$0xf]  ;;  %v6533_v54 = vld [vmem:[%s7652_s30 + $0x24] sm:$0xff] }
  0x13   : > { %v6500_v50 = vld [vmem:[%s7652_s30 + $0x38] sm:$0xf]  ;;  %v6543_v55 = vld [vmem:[%s7652_s30 + $0x40] sm:$0xff]  ;;  %v6620_v58 = vld [vmem:[%s9230_s1 + $0x90] sm:$0xff] }
  0x14   : > { %v6518_v52 = vld [vmem:[%s7652_s30 + $0x3a] sm:$0xf]  ;;  %v6552_v56 = vld [vmem:[%s7652_s30 + $0x41] sm:$0xff]  ;;  %v6534_v61 = vld [vmem:[%s7652_s30 + $0x2c] sm:$0xff] }
  0x15   : > { %v6527_v53 = vld [vmem:[%s7652_s30 + $0x3b] sm:$0xf]  ;;  %v6561_v57 = vld [vmem:[%s7652_s30 + $0x42] sm:$0xff]  ;;  %v6562_v1 = vld [vmem:[%s7652_s30 + $0x4a] sm:$0xff] }
  0x16   : > { %6478 = vmatmul.msk.f32.gmra.mxu1 %vm59_vm0, %v49_v21  ;;  %v6629_v59 = vld [vmem:[%s9230_s1 + $0x98] sm:$0xff]  ;;  %v6611_v60 = vld [vmem:[%s9230_s1 + $0x88] sm:$0xff]  ;;  %v6639_v2 = vld [vmem:[%s9230_s1 + $0xa0] sm:$0xff] }
  0x17   : > { %6483 = vmatmul.msk.f32.gmra.mxu2 %vm59_vm0, %v143_v22  ;;  %6488 = vmatmul.msk.f32.gmra.mxu3 %vm59_vm0, %v194_v23  ;;  %v6544_v62 = vld [vmem:[%s7652_s30 + $0x48] sm:$0xff]  ;;  %v6535_v3 = vld [vmem:[%s7652_s30 + $0x34] sm:$0xff]  ;;  %v6536_v7 = vld [vmem:[%s7652_s30 + $0x3c] sm:$0xf] }
  0x18   : > { %6493 = vmatmul.msk.f32.gmra.mxu0 %vm59_vm0, %v245_v24  ;;  %v6553_v63 = vld [vmem:[%s7652_s30 + $0x49] sm:$0xff]  ;;  %v6554_v5 = vld [vmem:[%s7652_s30 + $0x51] sm:$0xff]  ;;  %v6555_v9 = vld [vmem:[%s7652_s30 + $0x59] sm:$0xf] }
  0x19   : > { %v6545_v4 = vld [vmem:[%s7652_s30 + $0x50] sm:$0xff]  ;;  %v6546_v8 = vld [vmem:[%s7652_s30 + $0x58] sm:$0xf]  ;;  %v6570_v11 = vld [vmem:[%s7652_s30 + $0x43] sm:$0xff] }
  0x1a   : > { %v6563_v6 = vld [vmem:[%s7652_s30 + $0x52] sm:$0xff]  ;;  %v6564_v10 = vld [vmem:[%s7652_s30 + $0x5a] sm:$0xf]  ;;  %v6579_v12 = vld [vmem:[%s7652_s30 + $0x44] sm:$0xff] }
  0x1b   : > { %v6589_v13 = vld [vmem:[%s7652_s30 + $0x60] sm:$0xff]  ;;  %v6657_v15 = vld [vmem:[%s9230_s1 + $0xb0] sm:$0xff]  ;;  %v6666_v16 = vld [vmem:[%s9230_s1 + $0xb8] sm:$0xff] }
  0x1c   : > { %v6598_v14 = vld [vmem:[%s7652_s30 + $0x61] sm:$0xff]  ;;  %v6571_v18 = vld [vmem:[%s7652_s30 + $0x4b] sm:$0xff]  ;;  %v6572_v23 = vld [vmem:[%s7652_s30 + $0x53] sm:$0xff] }
  0x1d   : > { %v6648_v17 = vld [vmem:[%s9230_s1 + $0xa8] sm:$0xff]  ;;  %v6675_v22 = vld [vmem:[%s9230_s1 + $0xc0] sm:$0xff]  ;;  %v6581_v24 = vld [vmem:[%s7652_s30 + $0x54] sm:$0xff] }
  0x1e   : > { %6479 = vmatmul.msk.f32.gmra.mxu1 %vm59_vm0, %v50_v26  ;;  %v6580_v19 = vld [vmem:[%s7652_s30 + $0x4c] sm:$0xff] }
  0x1f   : > { %6484 = vmatmul.msk.f32.gmra.mxu2 %vm59_vm0, %v144_v27  ;;  %6489 = vmatmul.msk.f32.gmra.mxu3 %vm59_vm0, %v195_v28  ;;  %v6590_v20 = vld [vmem:[%s7652_s30 + $0x68] sm:$0xff]  ;;  %v6591_v25 = vld [vmem:[%s7652_s30 + $0x70] sm:$0xff]  ;;  %v6573_v28 = vld [vmem:[%s7652_s30 + $0x5b] sm:$0xf] }
  0x20   : > { %6494 = vmatmul.msk.f32.gmra.mxu0 %vm59_vm0, %v246_v29  ;;  %v6599_v21 = vld [vmem:[%s7652_s30 + $0x69] sm:$0xff]  ;;  %v6600_v26 = vld [vmem:[%s7652_s30 + $0x71] sm:$0xff]  ;;  %v6582_v29 = vld [vmem:[%s7652_s30 + $0x5c] sm:$0xf] }
  0x26   : > { %6480 = vmatmul.msk.f32.gmra.mxu1 %vm59_vm0, %v51_v30  ;;  %v6592_v30 = vld [vmem:[%s7652_s30 + $0x78] sm:$0xf] }
  0x27   : > { %6485 = vmatmul.msk.f32.gmra.mxu2 %vm59_vm0, %v145_v31  ;;  %6490 = vmatmul.msk.f32.gmra.mxu3 %vm59_vm0, %v196_v32  ;;  %v6601_v32 = vld [vmem:[%s7652_s30 + $0x79] sm:$0xf] }
  0x28   : > { %6495 = vmatmul.msk.f32.gmra.mxu0 %vm59_vm0, %v247_v33 }
  0x2e   : > { %6502 = vmatmul.msk.f32.vlgmr.msra.gmra.mxu1 %vm59_vm0, %v6497_v34 }
  0x2f   : > { %6511 = vmatmul.msk.f32.vlgmr.msra.gmra.mxu2 %vm59_vm0, %v6506_v35  ;;  %6520 = vmatmul.msk.f32.vlgmr.msra.gmra.mxu3 %vm59_vm0, %v6515_v36  ;;  %v6607_v36 = vld [vmem:[%s7652_s30 + $0x62] sm:$0xff] }
  0x30   : > { %793 = vmatpush.msra.mxu2 %v6583_v38  ;;  %6529 = vmatmul.msk.f32.vlgmr.msra.gmra.mxu0 %vm59_vm0, %v6524_v37  ;;  %v6616_v37 = vld [vmem:[%s7652_s30 + $0x63] sm:$0xff] }
  0x31   : > { %847 = vmatpush.msra.mxu3 %v6593_v39  ;;  %742 = vmatpush.msra.mxu1 %v6574_v40  ;;  %v6625_v39 = vld [vmem:[%s7652_s30 + $0x64] sm:$0xff] }
  0x32   : > { %898 = vmatpush.msra.mxu0 %v6602_v45 }
  0x36   : > { %6503 = vmatmul.msk.f32.gmra.mxu1 %vm59_vm0, %v6498_v41  ;;  %v6635_v41 = vld [vmem:[%s7652_s30 + $0x80] sm:$0xff] }
  0x37   : > { %6512 = vmatmul.msk.f32.gmra.mxu2 %vm59_vm0, %v6507_v42  ;;  %6521 = vmatmul.msk.f32.gmra.mxu3 %vm59_vm0, %v6516_v43 }
  0x38   : > { %6530 = vmatmul.msk.f32.gmra.mxu0 %vm59_vm0, %v6525_v44 }
  0x3e   : > { %6504 = vmatmul.msk.f32.gmra.mxu1 %vm59_vm0, %v6499_v46  ;;  %v6608_v46 = vld [vmem:[%s7652_s30 + $0x6a] sm:$0xff] }
  0x3f   : > { %6513 = vmatmul.msk.f32.gmra.mxu2 %vm59_vm0, %v6508_v47  ;;  %6522 = vmatmul.msk.f32.gmra.mxu3 %vm59_vm0, %v6517_v48  ;;  %v6617_v47 = vld [vmem:[%s7652_s30 + $0x6b] sm:$0xff] }
  0x40   : > { %6531 = vmatmul.msk.f32.gmra.mxu0 %vm59_vm0, %v6526_v49 }
  0x46   : > { %6505 = vmatmul.msk.f32.gmra.mxu1 %vm59_vm0, %v6500_v50  ;;  %v6626_v50 = vld [vmem:[%s7652_s30 + $0x6c] sm:$0xff] }
  0x47   : > { %6514 = vmatmul.msk.f32.gmra.mxu2 %vm59_vm0, %v6509_v51  ;;  %6523 = vmatmul.msk.f32.gmra.mxu3 %vm59_vm0, %v6518_v52  ;;  %v6636_v52 = vld [vmem:[%s7652_s30 + $0x88] sm:$0xff] }
  0x48   : > { %6532 = vmatmul.msk.f32.gmra.mxu0 %vm59_vm0, %v6527_v53 }
  0x4e   : > { %6538 = vmatmul.msk.f32.vlgmr.msrb.gmra.mxu1 %vm59_vm0, %v6533_v54 }
  0x4f   : > { %6548 = vmatmul.msk.f32.vlgmr.msrb.gmra.mxu2 %vm59_vm0, %v6543_v55  ;;  %6557 = vmatmul.msk.f32.vlgmr.msrb.gmra.mxu3 %vm59_vm0, %v6552_v56 }
  0x50   : > { %1000 = vmatpush.msrb.mxu2 %v6620_v58  ;;  %6566 = vmatmul.msk.f32.vlgmr.msrb.gmra.mxu0 %vm59_vm0, %v6561_v57  ;;  %v6609_v58 = vld [vmem:[%s7652_s30 + $0x72] sm:$0xff] }
  0x51   : > { %1051 = vmatpush.msrb.mxu3 %v6629_v59  ;;  %949 = vmatpush.msrb.mxu1 %v6611_v60  ;;  %v6618_v59 = vld [vmem:[%s7652_s30 + $0x73] sm:$0xff] }
  0x52   : > { %1105 = vmatpush.msrb.mxu0 %v6639_v2 }
  0x56   : > { %6539 = vmatmul.msk.f32.gmra.mxu1 %vm59_vm0, %v6534_v61 }
  0x57   : > { %6549 = vmatmul.msk.f32.gmra.mxu2 %vm59_vm0, %v6544_v62  ;;  %6558 = vmatmul.msk.f32.gmra.mxu3 %vm59_vm0, %v6553_v63  ;;  %v6627_v62 = vld [vmem:[%s7652_s30 + $0x74] sm:$0xff] }
  0x58   : > { %6567 = vmatmul.msk.f32.gmra.mxu0 %vm59_vm0, %v6562_v1  ;;  %v6637_v1 = vld [vmem:[%s7652_s30 + $0x90] sm:$0xff] }
  0x5e   : > { %6540 = vmatmul.msk.f32.gmra.mxu1 %vm59_vm0, %v6535_v3 }
  0x5f   : > { %6550 = vmatmul.msk.f32.gmra.mxu2 %vm59_vm0, %v6545_v4  ;;  %6559 = vmatmul.msk.f32.gmra.mxu3 %vm59_vm0, %v6554_v5 }
  0x60   : > { %6568 = vmatmul.msk.f32.gmra.mxu0 %vm59_vm0, %v6563_v6 }
  0x66   : > { %6541 = vmatmul.msk.f32.gmra.mxu1 %vm59_vm0, %v6536_v7  ;;  %v6610_v7 = vld [vmem:[%s7652_s30 + $0x7a] sm:$0xf] }
  0x67   : > { %6551 = vmatmul.msk.f32.gmra.mxu2 %vm59_vm0, %v6546_v8  ;;  %6560 = vmatmul.msk.f32.gmra.mxu3 %vm59_vm0, %v6555_v9  ;;  %v6619_v8 = vld [vmem:[%s7652_s30 + $0x7b] sm:$0xf] }
  0x68   : > { %6569 = vmatmul.msk.f32.gmra.mxu0 %vm59_vm0, %v6564_v10 }
  0x6e   : > { %6575 = vmatmul.msk.f32.vlgmr.msra.gmra.mxu1 %vm59_vm0, %v6570_v11  ;;  %v6628_v11 = vld [vmem:[%s7652_s30 + $0x7c] sm:$0xf] }
  0x6f   : > { %6584 = vmatmul.msk.f32.vlgmr.msra.gmra.mxu2 %vm59_vm0, %v6579_v12  ;;  %6594 = vmatmul.msk.f32.vlgmr.msra.gmra.mxu3 %vm59_vm0, %v6589_v13  ;;  %v6638_v13 = vld [vmem:[%s7652_s30 + $0x98] sm:$0xf] }
  0x70   : > { %1207 = vmatpush.msra.mxu2 %v6657_v15  ;;  %6603 = vmatmul.msk.f32.vlgmr.msra.gmra.mxu0 %vm59_vm0, %v6598_v14 }
  0x71   : > { %1258 = vmatpush.msra.mxu3 %v6666_v16  ;;  %1156 = vmatpush.msra.mxu1 %v6648_v17 }
  0x72   : > { %1309 = vmatpush.msra.mxu0 %v6675_v22 }
  0x76   : > { %6576 = vmatmul.msk.f32.gmra.mxu1 %vm59_vm0, %v6571_v18 }
  0x77   : > { %6585 = vmatmul.msk.f32.gmra.mxu2 %vm59_vm0, %v6580_v19  ;;  %6595 = vmatmul.msk.f32.gmra.mxu3 %vm59_vm0, %v6590_v20  ;;  %v6644_v19 = vld [vmem:[%s7652_s30 + $0x81] sm:$0xff] }
  0x78   : > { %6604 = vmatmul.msk.f32.gmra.mxu0 %vm59_vm0, %v6599_v21  ;;  %v6653_v20 = vld [vmem:[%s7652_s30 + $0x82] sm:$0xff] }
  0x7e   : > { %6577 = vmatmul.msk.f32.gmra.mxu1 %vm59_vm0, %v6572_v23  ;;  %v6662_v23 = vld [vmem:[%s7652_s30 + $0x83] sm:$0xff] }
  0x7f   : > { %6586 = vmatmul.msk.f32.gmra.mxu2 %vm59_vm0, %v6581_v24  ;;  %6596 = vmatmul.msk.f32.gmra.mxu3 %vm59_vm0, %v6591_v25  ;;  %v6671_v25 = vld [vmem:[%s7652_s30 + $0x84] sm:$0xff] }
  0x80   : > { %6605 = vmatmul.msk.f32.gmra.mxu0 %vm59_vm0, %v6600_v26 }
  0x83   : > { %v92_v27 = vpop.f32.mrf.mxu1 }
  0x85   : > { %v89_v31 = vpop.f32.mrf.mxu0 }
  0x86   : > { %6578 = vmatmul.msk.f32.gmra.mxu1 %vm59_vm0, %v6573_v28 }
  0x87   : > { %6587 = vmatmul.msk.f32.gmra.mxu2 %vm59_vm0, %v6582_v29  ;;  %6597 = vmatmul.msk.f32.gmra.mxu3 %vm59_vm0, %v6592_v30 }
  0x88   : > { %6606 = vmatmul.msk.f32.gmra.mxu0 %vm59_vm0, %v6601_v32  ;;  %v6654_v32 = vld [vmem:[%s7652_s30 + $0x8a] sm:$0xff] }
  0x8a   : > { %v95_v33 = vpop.f32.mrf.mxu2  ;;  %v98_v34 = vpop.f32.mrf.mxu3 }
  0x8b   : > { %v130_v35 = vpop.f32.mrf.mxu1 }
  0x8c   : > { %v131_v38 = vadd.f32 %v130_v35, %v89_v31  ;;  %v6645_v31 = vld [vmem:[%s7652_s30 + $0x89] sm:$0xff] }
  0x8d   : > { %v279_v40 = vpop.f32.mrf.mxu0  ;;  %v6663_v35 = vld [vmem:[%s7652_s30 + $0x8b] sm:$0xff] }
  0x8e   : > { %6612 = vmatmul.msk.f32.vlgmr.msrb.gmra.mxu1 %vm59_vm0, %v6607_v36 }
  0x8f   : > { %6621 = vmatmul.msk.f32.vlgmr.msrb.gmra.mxu2 %vm59_vm0, %v6616_v37  ;;  %6630 = vmatmul.msk.f32.vlgmr.msrb.gmra.mxu3 %vm59_vm0, %v6625_v39  ;;  %v6672_v37 = vld [vmem:[%s7652_s30 + $0x8c] sm:$0xff] }
  0x90   : > { %6640 = vmatmul.msk.f32.vlgmr.msrb.gmra.mxu0 %vm59_vm0, %v6635_v41 }
  0x92   : > { %v177_v42 = vpop.f32.mrf.mxu2  ;;  %v228_v44 = vpop.f32.mrf.mxu3 }
  0x93   : > { %v189_v43 = vadd.f32 %v177_v42, %v131_v38  ;;  %v133_v45 = vpop.f32.mrf.mxu1 }
  0x94   : > { %v134_v48 = vadd.f32 %v133_v45, %v92_v27 }
  0x95   : > { %v240_v49 = vadd.f32 %v228_v44, %v189_v43  ;;  %v282_v51 = vpop.f32.mrf.mxu0  ;;  %v6646_v43 = vld [vmem:[%s7652_s30 + $0x91] sm:$0xff] }
  0x96   : > { %6613 = vmatmul.msk.f32.gmra.mxu1 %vm59_vm0, %v6608_v46  ;;  %v6655_v44 = vld [vmem:[%s7652_s30 + $0x92] sm:$0xff] }
  0x97   : > { %v291_v53 = vadd.f32 %v279_v40, %v240_v49  ;;  %6622 = vmatmul.msk.f32.gmra.mxu2 %vm59_vm0, %v6617_v47  ;;  %6631 = vmatmul.msk.f32.gmra.mxu3 %vm59_vm0, %v6626_v50  ;;  %v6664_v47 = vld [vmem:[%s7652_s30 + $0x93] sm:$0xff] }
  0x98   : > { %6641 = vmatmul.msk.f32.gmra.mxu0 %vm59_vm0, %v6636_v52  ;;  %v6673_v49 = vld [vmem:[%s7652_s30 + $0x94] sm:$0xff] }
  0x9a   : > { %v180_v54 = vpop.f32.mrf.mxu2  ;;  %v231_v56 = vpop.f32.mrf.mxu3 }
  0x9b   : > { %v190_v55 = vadd.f32 %v180_v54, %v134_v48  ;;  %v136_v57 = vpop.f32.mrf.mxu1 }
  0x9c   : > { %v137_v60 = vadd.f32 %v136_v57, %v95_v33 }
  0x9d   : > { %v241_v61 = vadd.f32 %v231_v56, %v190_v55  ;;  %v285_v63 = vpop.f32.mrf.mxu0  ;;  %v6647_v55 = vld [vmem:[%s7652_s30 + $0x99] sm:$0xf] }
  0x9e   : > { %6614 = vmatmul.msk.f32.gmra.mxu1 %vm59_vm0, %v6609_v58  ;;  %v6656_v56 = vld [vmem:[%s7652_s30 + $0x9a] sm:$0xf] }
  0x9f   : > { %v292_v2 = vadd.f32 %v282_v51, %v241_v61  ;;  %6623 = vmatmul.msk.f32.gmra.mxu2 %vm59_vm0, %v6618_v59  ;;  %6632 = vmatmul.msk.f32.gmra.mxu3 %vm59_vm0, %v6627_v62  ;;  %v6665_v59 = vld [vmem:[%s7652_s30 + $0x9b] sm:$0xf] }
  0xa0   : > { %6642 = vmatmul.msk.f32.gmra.mxu0 %vm59_vm0, %v6637_v1  ;;  %v6674_v61 = vld [vmem:[%s7652_s30 + $0x9c] sm:$0xf]  ;;  %s7923_s30 = scalar_lea.vmem [#allocation2], %s6471_s27  ;;  %s7939_s27 = smov (%p42_p0), 0  }
  0xa2   : > { %v183_v3 = vpop.f32.mrf.mxu2  ;;  %v234_v5 = vpop.f32.mrf.mxu3 }
  0xa3   : > { %v191_v4 = vadd.f32 %v183_v3, %v137_v60  ;;  %v139_v6 = vpop.f32.mrf.mxu1 }
  0xa4   : > { %v140_v9 = vadd.f32 %v139_v6, %v98_v34 }
  0xa5   : > { %v242_v10 = vadd.f32 %v234_v5, %v191_v4  ;;  %v288_v12 = vpop.f32.mrf.mxu0 }
  0xa6   : > { %6615 = vmatmul.msk.f32.gmra.mxu1 %vm59_vm0, %v6610_v7 }
  0xa7   : > { %v293_v14 = vadd.f32 %v285_v63, %v242_v10  ;;  %6624 = vmatmul.msk.f32.gmra.mxu2 %vm59_vm0, %v6619_v8  ;;  %6633 = vmatmul.msk.f32.gmra.mxu3 %vm59_vm0, %v6628_v11 }
  0xa8   : > { %6643 = vmatmul.msk.f32.gmra.mxu0 %vm59_vm0, %v6638_v13 }
  0xaa   : > { %v186_v15 = vpop.f32.mrf.mxu2  ;;  %v237_v17 = vpop.f32.mrf.mxu3 }
  0xab   : > { %v192_v16 = vadd.f32 %v186_v15, %v140_v9  ;;  %v333_v18 = vpop.f32.mrf.mxu1 }
  0xac   : > { %v345_v22 = vadd.f32 %v333_v18, %v291_v53 }
  0xad   : > { %v243_v21 = vadd.f32 %v237_v17, %v192_v16  ;;  %v486_v24 = vpop.f32.mrf.mxu0 }
  0xae   : > { %6649 = vmatmul.msk.f32.vlgmr.msra.gmra.mxu1 %vm59_vm0, %v6644_v19 }
  0xaf   : > { %v294_v26 = vadd.f32 %v288_v12, %v243_v21  ;;  %6658 = vmatmul.msk.f32.vlgmr.msra.gmra.mxu2 %vm59_vm0, %v6653_v20  ;;  %6667 = vmatmul.msk.f32.vlgmr.msra.gmra.mxu3 %vm59_vm0, %v6662_v23 }
  0xb0   : > { %6676 = vmatmul.msk.f32.vlgmr.msra.gmra.mxu0 %vm59_vm0, %v6671_v25 }
  0xb2   : > { %v384_v27 = vpop.f32.mrf.mxu2  ;;  %v435_v29 = vpop.f32.mrf.mxu3 }
  0xb3   : > { %v396_v28 = vadd.f32 %v384_v27, %v345_v22  ;;  %v336_v30 = vpop.f32.mrf.mxu1 }
  0xb4   : > { %v346_v33 = vadd.f32 %v336_v30, %v292_v2 }
  0xb5   : > { %v447_v34 = vadd.f32 %v435_v29, %v396_v28  ;;  %v489_v36 = vpop.f32.mrf.mxu0 }
  0xb6   : > { %6650 = vmatmul.msk.f32.gmra.mxu1 %vm59_vm0, %v6645_v31 }
  0xb7   : > { %v498_v38 = vadd.f32 %v486_v24, %v447_v34  ;;  %6659 = vmatmul.msk.f32.gmra.mxu2 %vm59_vm0, %v6654_v32  ;;  %6668 = vmatmul.msk.f32.gmra.mxu3 %vm59_vm0, %v6663_v35 }
  0xb8   : > { %6677 = vmatmul.msk.f32.gmra.mxu0 %vm59_vm0, %v6672_v37 }
  0xba   : > { %v387_v39 = vpop.f32.mrf.mxu2  ;;  %v438_v41 = vpop.f32.mrf.mxu3 }
  0xbb   : > { %v397_v40 = vadd.f32 %v387_v39, %v346_v33  ;;  %v339_v42 = vpop.f32.mrf.mxu1 }
  0xbc   : > { %v347_v45 = vadd.f32 %v339_v42, %v293_v14 }
  0xbd   : > { %v448_v46 = vadd.f32 %v438_v41, %v397_v40  ;;  %v492_v48 = vpop.f32.mrf.mxu0 }
  0xbe   : > { %6651 = vmatmul.msk.f32.gmra.mxu1 %vm59_vm0, %v6646_v43 }
  0xbf   : > { %v499_v50 = vadd.f32 %v489_v36, %v448_v46  ;;  %6660 = vmatmul.msk.f32.gmra.mxu2 %vm59_vm0, %v6655_v44  ;;  %6669 = vmatmul.msk.f32.gmra.mxu3 %vm59_vm0, %v6664_v47 }
  0xc0   : > { %6678 = vmatmul.msk.f32.gmra.mxu0 %vm59_vm0, %v6673_v49 }
  0xc2   : > { %v390_v51 = vpop.f32.mrf.mxu2  ;;  %v441_v53 = vpop.f32.mrf.mxu3 }
  0xc3   : > { %v398_v52 = vadd.f32 %v390_v51, %v347_v45  ;;  %v342_v54 = vpop.f32.mrf.mxu1 }
  0xc4   : > { %v348_v57 = vadd.f32 %v342_v54, %v294_v26 }
  0xc5   : > { %v449_v58 = vadd.f32 %v441_v53, %v398_v52  ;;  %v495_v60 = vpop.f32.mrf.mxu0 }
  0xc6   : > { %6652 = vmatmul.msk.f32.gmra.mxu1 %vm59_vm0, %v6647_v55 }
  0xc7   : > { %v500_v62 = vadd.f32 %v492_v48, %v449_v58  ;;  %6661 = vmatmul.msk.f32.gmra.mxu2 %vm59_vm0, %v6656_v56  ;;  %6670 = vmatmul.msk.f32.gmra.mxu3 %vm59_vm0, %v6665_v59 }
  0xc8   : > { %6679 = vmatmul.msk.f32.gmra.mxu0 %vm59_vm0, %v6674_v61 }
  0xca   : > { %v393_v63 = vpop.f32.mrf.mxu2  ;;  %v444_v2 = vpop.f32.mrf.mxu3 }
  0xcb   : > { %v399_v1 = vadd.f32 %v393_v63, %v348_v57  ;;  %v537_v3 = vpop.f32.mrf.mxu1 }
  0xcc   : > { %v549_v5 = vadd.f32 %v537_v3, %v498_v38 }
  0xcd   : > { %v450_v4 = vadd.f32 %v444_v2, %v399_v1  ;;  %v693_v6 = vpop.f32.mrf.mxu0 }
  0xcf   : > { %v501_v7 = vadd.f32 %v495_v60, %v450_v4 }
  0xd2   : > { %v591_v8 = vpop.f32.mrf.mxu2  ;;  %v642_v10 = vpop.f32.mrf.mxu3 }
  0xd3   : > { %v603_v9 = vadd.f32 %v591_v8, %v549_v5  ;;  %v540_v11 = vpop.f32.mrf.mxu1 }
  0xd4   : > { %v550_v12 = vadd.f32 %v540_v11, %v499_v50 }
  0xd5   : > { %v654_v13 = vadd.f32 %v642_v10, %v603_v9  ;;  %v696_v14 = vpop.f32.mrf.mxu0 }
  0xd7   : > { %v705_v15 = vadd.f32 %v693_v6, %v654_v13 }
  0xda   : > { %v594_v16 = vpop.f32.mrf.mxu2  ;;  %v645_v18 = vpop.f32.mrf.mxu3 }
  0xdb   : > { %v604_v17 = vadd.f32 %v594_v16, %v550_v12  ;;  %v543_v19 = vpop.f32.mrf.mxu1 }
  0xdc   : > { %v551_v20 = vadd.f32 %v543_v19, %v500_v62 }
  0xdd   : > { %v655_v21 = vadd.f32 %v645_v18, %v604_v17  ;;  %v699_v22 = vpop.f32.mrf.mxu0 }
  0xdf   : > { %v706_v23 = vadd.f32 %v696_v14, %v655_v21 }
  0xe2   : > { %v597_v24 = vpop.f32.mrf.mxu2  ;;  %v648_v26 = vpop.f32.mrf.mxu3 }
  0xe3   : > { %v605_v25 = vadd.f32 %v597_v24, %v551_v20  ;;  %v546_v27 = vpop.f32.mrf.mxu1 }
  0xe4   : > { %v552_v28 = vadd.f32 %v546_v27, %v501_v7 }
  0xe5   : > { %v656_v29 = vadd.f32 %v648_v26, %v605_v25  ;;  %v702_v30 = vpop.f32.mrf.mxu0 }
  0xe7   : > { %v707_v31 = vadd.f32 %v699_v22, %v656_v29 }
  0xea   : > { %v600_v32 = vpop.f32.mrf.mxu2  ;;  %v651_v34 = vpop.f32.mrf.mxu3 }
  0xeb   : > { %v606_v33 = vadd.f32 %v600_v32, %v552_v28  ;;  %v744_v35 = vpop.f32.mrf.mxu1 }
  0xec   : > { %v756_v59 = vadd.f32 %v744_v35, %v705_v15 }
  0xed   : > { %v657_v36 = vadd.f32 %v651_v34, %v606_v33  ;;  %v900_v37 = vpop.f32.mrf.mxu0 }
  0xef   : > { %v708_v38 = vadd.f32 %v702_v30, %v657_v36  ;;  %v7918_v36 = vperm.slane %v7627_v0, 0 }
  0xf2   : > { %v795_v39 = vpop.f32.mrf.mxu2  ;;  %v849_v40 = vpop.f32.mrf.mxu3 }
  0xf3   : > { %v747_v41 = vpop.f32.mrf.mxu1  ;;  %v807_v61 = vadd.f32 %v795_v39, %v756_v59 }
  0xf4   : > { %v757_v3 = vadd.f32 %v747_v41, %v706_v23 }
  0xf5   : > { %v903_v42 = vpop.f32.mrf.mxu0  ;;  %v861_v2 = vadd.f32 %v849_v40, %v807_v61 }
  0xf7   : > { %v912_v5 = vadd.f32 %v900_v37, %v861_v2 }
  0xfa   : > { %v798_v43 = vpop.f32.mrf.mxu2  ;;  %v852_v44 = vpop.f32.mrf.mxu3 }
  0xfb   : > { %v750_v45 = vpop.f32.mrf.mxu1  ;;  %v808_v6 = vadd.f32 %v798_v43, %v757_v3 }
  0xfc   : > { %v758_v13 = vadd.f32 %v750_v45, %v707_v31 }
  0xfd   : > { %v906_v46 = vpop.f32.mrf.mxu0  ;;  %v862_v11 = vadd.f32 %v852_v44, %v808_v6 }
  0xff   : > { %v913_v16 = vadd.f32 %v903_v42, %v862_v11 }
 0x102   : > { %v801_v47 = vpop.f32.mrf.mxu2  ;;  %v855_v48 = vpop.f32.mrf.mxu3 }
 0x103   : > { %v753_v49 = vpop.f32.mrf.mxu1  ;;  %v809_v15 = vadd.f32 %v801_v47, %v758_v13 }
 0x104   : > { %v759_v25 = vadd.f32 %v753_v49, %v708_v38 }
 0x105   : > { %v909_v50 = vpop.f32.mrf.mxu0  ;;  %v863_v22 = vadd.f32 %v855_v48, %v809_v15 }
 0x107   : > { %v914_v28 = vadd.f32 %v906_v46, %v863_v22 }
 0x10a   : > { %v804_v51 = vpop.f32.mrf.mxu2  ;;  %v858_v52 = vpop.f32.mrf.mxu3 }
 0x10b   : > { %v951_v53 = vpop.f32.mrf.mxu1  ;;  %v810_v29 = vadd.f32 %v804_v51, %v759_v25 }
 0x10c   : > { %v963_v9 = vadd.f32 %v951_v53, %v912_v5 }
 0x10d   : > { %v1107_v54 = vpop.f32.mrf.mxu0  ;;  %v864_v37 = vadd.f32 %v858_v52, %v810_v29 }
 0x10f   : > { %v915_v45 = vadd.f32 %v909_v50, %v864_v37 }
 0x112   : > { %v1002_v55 = vpop.f32.mrf.mxu2  ;;  %v1053_v56 = vpop.f32.mrf.mxu3 }
 0x113   : > { %v954_v57 = vpop.f32.mrf.mxu1  ;;  %v1014_v12 = vadd.f32 %v1002_v55, %v963_v9 }
 0x114   : > { %v964_v20 = vadd.f32 %v954_v57, %v913_v16 }
 0x115   : > { %v1110_v58 = vpop.f32.mrf.mxu0  ;;  %v1065_v17 = vadd.f32 %v1053_v56, %v1014_v12 }
 0x117   : > { %v1119_v23 = vadd.f32 %v1107_v54, %v1065_v17 }
 0x11a   : > { %v1005_v60 = vpop.f32.mrf.mxu2  ;;  %v1056_v62 = vpop.f32.mrf.mxu3 }
 0x11b   : > { %v957_v63 = vpop.f32.mrf.mxu1  ;;  %v1015_v24 = vadd.f32 %v1005_v60, %v964_v20 }
 0x11c   : > { %v965_v34 = vadd.f32 %v957_v63, %v914_v28 }
 0x11d   : > { %v1113_v1 = vpop.f32.mrf.mxu0  ;;  %v1066_v30 = vadd.f32 %v1056_v62, %v1015_v24 }
 0x11f   : > { %v1120_v39 = vadd.f32 %v1110_v58, %v1066_v30 }
 0x122   : > { %v1008_v4 = vpop.f32.mrf.mxu2  ;;  %v1059_v7 = vpop.f32.mrf.mxu3 }
 0x123   : > { %v960_v8 = vpop.f32.mrf.mxu1  ;;  %v1016_v40 = vadd.f32 %v1008_v4, %v965_v34 }
 0x124   : > { %v966_v53 = vadd.f32 %v960_v8, %v915_v45 }
 0x125   : > { %v1116_v10 = vpop.f32.mrf.mxu0  ;;  %v1067_v46 = vadd.f32 %v1059_v7, %v1016_v40 }
 0x127   : > { %v1121_v54 = vadd.f32 %v1113_v1, %v1067_v46 }
 0x12a   : > { %v1011_v14 = vpop.f32.mrf.mxu2  ;;  %v1062_v18 = vpop.f32.mrf.mxu3 }
 0x12b   : > { %v1158_v19 = vpop.f32.mrf.mxu1  ;;  %v1017_v55 = vadd.f32 %v1011_v14, %v966_v53 }
 0x12c   : > { %v1170_v26 = vadd.f32 %v1158_v19, %v1119_v23 }
 0x12d   : > { %v1311_v21 = vpop.f32.mrf.mxu0  ;;  %v1068_v60 = vadd.f32 %v1062_v18, %v1017_v55 }
 0x12f   : > { %v1122_v4 = vadd.f32 %v1116_v10, %v1068_v60 }
 0x132   : > { %v1209_v27 = vpop.f32.mrf.mxu2  ;;  %v1260_v33 = vpop.f32.mrf.mxu3 }
 0x133   : > { %v1221_v32 = vadd.f32 %v1209_v27, %v1170_v26  ;;  %v1161_v31 = vpop.f32.mrf.mxu1 }
 0x134   : > { %v1171_v38 = vadd.f32 %v1161_v31, %v1120_v39 }
 0x135   : > { %v1272_v35 = vadd.f32 %v1260_v33, %v1221_v32  ;;  %v1314_v42 = vpop.f32.mrf.mxu0 }
 0x137   : > { %v1323_v41 = vadd.f32 %v1311_v21, %v1272_v35 }
 0x139   : > { %v1330_v43 = vadd.f32 %v7918_v36, %v1323_v41 }
 0x13a   : > { %v1212_v44 = vpop.f32.mrf.mxu2  ;;  %v1263_v49 = vpop.f32.mrf.mxu3 }
 0x13b   : > { %v1334_v47 = vmax.f32 %v1330_v43, 0.0  ;;  %v1222_v48 = vadd.f32 %v1212_v44, %v1171_v38  ;;  %v1164_v51 = vpop.f32.mrf.mxu1 }
 0x13c   : > { %v1172_v57 = vadd.f32 %v1164_v51, %v1121_v54 }
 0x13d   : > { %1339 = vst.msk [vmem:[%s7923_s30] sm:$0xff] %vm59_vm0, %v1334_v47  ;;  %v1273_v52 = vadd.f32 %v1263_v49, %v1222_v48  ;;  %v1317_v59 = vpop.f32.mrf.mxu0 }
 0x13f   : > { %v1324_v56 = vadd.f32 %v1314_v42, %v1273_v52 }
 0x141   : > { %v1331_v50 = vadd.f32 %v7918_v36, %v1324_v56 }
 0x142   : > { %v1215_v58 = vpop.f32.mrf.mxu2  ;;  %v1266_v63 = vpop.f32.mrf.mxu3 }
 0x143   : > { %v1335_v61 = vmax.f32 %v1331_v50, 0.0  ;;  %v1223_v62 = vadd.f32 %v1215_v58, %v1172_v57  ;;  %v1167_v3 = vpop.f32.mrf.mxu1 }
 0x144   : > { %v1173_v1 = vadd.f32 %v1167_v3, %v1122_v4 }
 0x145   : > { %1340 = vst.msk [vmem:[%s7923_s30 + $0x8] sm:$0xff] %vm59_vm0, %v1335_v61  ;;  %v1274_v2 = vadd.f32 %v1266_v63, %v1223_v62  ;;  %v1320_v12 = vpop.f32.mrf.mxu0 }
 0x147   : > { %v1325_v5 = vadd.f32 %v1317_v59, %v1274_v2 }
 0x149   : > { %v1332_v6 = vadd.f32 %v7918_v36, %v1325_v5 }
 0x14a   : > { %v1218_v7 = vpop.f32.mrf.mxu2  ;;  %v1269_v11 = vpop.f32.mrf.mxu3 }
 0x14b   : > { %v1336_v8 = vmax.f32 %v1332_v6, 0.0  ;;  %v1224_v9 = vadd.f32 %v1218_v7, %v1173_v1 }
 0x14d   : > { %1341 = vst.msk [vmem:[%s7923_s30 + $0x10] sm:$0xff] %vm59_vm0, %v1336_v8  ;;  %v1275_v13 = vadd.f32 %v1269_v11, %v1224_v9 }
 0x14f   : > { %v1326_v14 = vadd.f32 %v1320_v12, %v1275_v13 }
 0x151   : > { %v1333_v16 = vadd.f32 %v7918_v36, %v1326_v14  ;;  %44 = sbr.rel (!%p42_p0) target bundleno = 2 (0x2), region = 287 }
 0x153   : > { %v1337_v15 = vmax.f32 %v1333_v16, 0.0 }
 0x155   : > { %1343 = vst.msk [vmem:[%s7923_s30 + $0x18] sm:$0xf] %vm1342_vm1, %v1337_v15 }
 0x156 LB: > { %v6689_v10 = vld [vmem:[%s9230_s1 + $0x8] sm:$0xff]  ;;  %v6702_v17 = vld [vmem:[%s9230_s1 + $0x10] sm:$0xff]  ;;  %v6711_v0 = vld [vmem:[%s9230_s1 + $0x18] sm:$0xff]  ;;  %s6680_s28 = sshll.u32 %s7536_s27, 5  ;;  %s1349_s27 = sadd.s32 1, %s7536_s27   ;;  %s7536_s27 = sphi %s7939_s27, %s1349_s27  }
 0x157   : > { %7383 = vmatpush.msra.mxu1 %v6689_v10  ;;  %7384 = vmatpush.msra.mxu2 %v6689_v10  ;;  %v1357_v18 = vld [vmem:[%s9230_s1] sm:$0xff]  ;;  %s7962_s13 = scalar_lea.vmem %s9229_s0, %s6680_s28  ;;  %v6739_v19 = vld [vmem:[%s9230_s1 + $0x30] sm:$0xff]  ;;  %v6748_v20 = vld [vmem:[%s9230_s1 + $0x38] sm:$0xff]  ;;  %p1346_p1 = scmp.ge.s32.totalorder %s1349_s27, 28  }
 0x158   : > { %7385 = vmatpush.msra.mxu3 %v6689_v10  ;;  %v6686_v21 = vld [vmem:[%s7962_s13 + $0x409] sm:$0xff]  ;;  %v6687_v22 = vld [vmem:[%s7962_s13 + $0x411] sm:$0xff]  ;;  %v6688_v23 = vld [vmem:[%s7962_s13 + $0x419] sm:$0xf]  ;;  %1392 = vmatpush.msra.mxu0 %v6689_v10  ;;  %s8254_s0 = smov (%p1346_p1), 0  }
 0x159   : > { %1480 = vmatpush.msrb.mxu2 %v6702_v17  ;;  %1433 = vmatpush.msrb.mxu1 %v1357_v18  ;;  %v6685_v24 = vld [vmem:[%s7962_s13 + $0x401] sm:$0xff]  ;;  %v6776_v33 = vld [vmem:[%s9230_s1 + $0x50] sm:$0xff]  ;;  %v6785_v31 = vld [vmem:[%s9230_s1 + $0x58] sm:$0xff] }
 0x15a   : > { %1531 = vmatpush.msrb.mxu3 %v6711_v0  ;;  %6691 = vmatmul.msk.f32.vlgmr.msra.gmra.mxu1 %vm59_vm0, %v6686_v21  ;;  %v6720_v25 = vld [vmem:[%s9230_s1 + $0x20] sm:$0xff]  ;;  %v6730_v26 = vld [vmem:[%s9230_s1 + $0x28] sm:$0xff]  ;;  %v6683_v42 = vld [vmem:[%s7962_s13 + $0x410] sm:$0xff] }
 0x15b   : > { %6692 = vmatmul.msk.f32.vlgmr.msra.gmra.mxu2 %vm59_vm0, %v6687_v22  ;;  %6693 = vmatmul.msk.f32.vlgmr.msra.gmra.mxu3 %vm59_vm0, %v6688_v23  ;;  %v6757_v27 = vld [vmem:[%s9230_s1 + $0x40] sm:$0xff]  ;;  %v6766_v34 = vld [vmem:[%s9230_s1 + $0x48] sm:$0xff]  ;;  %v6700_v38 = vld [vmem:[%s7962_s13 + $0x412] sm:$0xff] }
 0x15c   : > { %1688 = vmatpush.msra.mxu2 %v6739_v19  ;;  %6690 = vmatmul.msk.f32.vlgmr.msra.gmra.mxu0 %vm59_vm0, %v6685_v24  ;;  %v6681_v28 = vld [vmem:[%s7962_s13 + $0x400] sm:$0xff]  ;;  %v6682_v35 = vld [vmem:[%s7962_s13 + $0x408] sm:$0xff]  ;;  %v6709_v43 = vld [vmem:[%s7962_s13 + $0x413] sm:$0xff] }
 0x15d   : > { %1739 = vmatpush.msra.mxu3 %v6748_v20  ;;  %1582 = vmatpush.msrb.mxu0 %v6720_v25  ;;  %v6698_v29 = vld [vmem:[%s7962_s13 + $0x402] sm:$0xff]  ;;  %v6699_v37 = vld [vmem:[%s7962_s13 + $0x40a] sm:$0xff]  ;;  %v6718_v44 = vld [vmem:[%s7962_s13 + $0x414] sm:$0xff] }
 0x15e   : > { %1637 = vmatpush.msra.mxu1 %v6730_v26  ;;  %v6707_v30 = vld [vmem:[%s7962_s13 + $0x403] sm:$0xff]  ;;  %v6708_v39 = vld [vmem:[%s7962_s13 + $0x40b] sm:$0xff]  ;;  %v6684_v45 = vld [vmem:[%s7962_s13 + $0x418] sm:$0xf] }
 0x15f   : > { %1790 = vmatpush.msra.mxu0 %v6757_v27  ;;  %v6716_v32 = vld [vmem:[%s7962_s13 + $0x404] sm:$0xff]  ;;  %v6717_v40 = vld [vmem:[%s7962_s13 + $0x40c] sm:$0xff]  ;;  %v6701_v46 = vld [vmem:[%s7962_s13 + $0x41a] sm:$0xf] }
 0x160   : > { %v6794_v41 = vld [vmem:[%s9230_s1 + $0x60] sm:$0xff]  ;;  %v6710_v47 = vld [vmem:[%s7962_s13 + $0x41b] sm:$0xf]  ;;  %v6812_v54 = vld [vmem:[%s9230_s1 + $0x70] sm:$0xff] }
 0x161   : > { %v6719_v48 = vld [vmem:[%s7962_s13 + $0x41c] sm:$0xf]  ;;  %v6726_v49 = vld [vmem:[%s7962_s13 + $0x420] sm:$0xff]  ;;  %v6803_v56 = vld [vmem:[%s9230_s1 + $0x68] sm:$0xff] }
 0x162   : > { %6694 = vmatmul.msk.f32.vlgmr.msrb.gmra.mxu1 %vm59_vm0, %v6681_v28  ;;  %v6735_v51 = vld [vmem:[%s7962_s13 + $0x421] sm:$0xff]  ;;  %v6822_v55 = vld [vmem:[%s9230_s1 + $0x78] sm:$0xff]  ;;  %v6736_v50 = vld [vmem:[%s7962_s13 + $0x429] sm:$0xff] }
 0x163   : > { %6703 = vmatmul.msk.f32.vlgmr.msrb.gmra.mxu2 %vm59_vm0, %v6698_v29  ;;  %6712 = vmatmul.msk.f32.vlgmr.msrb.gmra.mxu3 %vm59_vm0, %v6707_v30  ;;  %v6744_v53 = vld [vmem:[%s7962_s13 + $0x422] sm:$0xff]  ;;  %v6745_v58 = vld [vmem:[%s7962_s13 + $0x42a] sm:$0xff]  ;;  %v6746_v63 = vld [vmem:[%s7962_s13 + $0x432] sm:$0xff] }
 0x164   : > { %1896 = vmatpush.msrb.mxu2 %v6776_v33  ;;  %6721 = vmatmul.msk.f32.vlgmr.msrb.gmra.mxu0 %vm59_vm0, %v6716_v32  ;;  %v6753_v52 = vld [vmem:[%s7962_s13 + $0x423] sm:$0xff]  ;;  %v6754_v59 = vld [vmem:[%s7962_s13 + $0x42b] sm:$0xff]  ;;  %v6755_v2 = vld [vmem:[%s7962_s13 + $0x433] sm:$0xff] }
 0x165   : > { %1947 = vmatpush.msrb.mxu3 %v6785_v31  ;;  %1841 = vmatpush.msrb.mxu1 %v6766_v34  ;;  %v6727_v57 = vld [vmem:[%s7962_s13 + $0x428] sm:$0xff]  ;;  %v6831_v60 = vld [vmem:[%s9230_s1 + $0x80] sm:$0xff]  ;;  %v6728_v61 = vld [vmem:[%s7962_s13 + $0x430] sm:$0xff] }
 0x166   : > { %1998 = vmatpush.msrb.mxu0 %v6794_v41  ;;  %v6737_v62 = vld [vmem:[%s7962_s13 + $0x431] sm:$0xff]  ;;  %v6738_v4 = vld [vmem:[%s7962_s13 + $0x439] sm:$0xf]  ;;  %v6762_v6 = vld [vmem:[%s7962_s13 + $0x424] sm:$0xff] }
 0x167   : > { %v6729_v3 = vld [vmem:[%s7962_s13 + $0x438] sm:$0xf]  ;;  %v6772_v7 = vld [vmem:[%s7962_s13 + $0x440] sm:$0xff]  ;;  %v6849_v11 = vld [vmem:[%s9230_s1 + $0x90] sm:$0xff] }
 0x168   : > { %v6747_v5 = vld [vmem:[%s7962_s13 + $0x43a] sm:$0xf]  ;;  %v6781_v8 = vld [vmem:[%s7962_s13 + $0x441] sm:$0xff]  ;;  %v6763_v14 = vld [vmem:[%s7962_s13 + $0x42c] sm:$0xff] }
 0x169   : > { %v6756_v1 = vld [vmem:[%s7962_s13 + $0x43b] sm:$0xf]  ;;  %v6790_v9 = vld [vmem:[%s7962_s13 + $0x442] sm:$0xff]  ;;  %v6791_v10 = vld [vmem:[%s7962_s13 + $0x44a] sm:$0xff] }
 0x16a   : > { %6695 = vmatmul.msk.f32.gmra.mxu1 %vm59_vm0, %v6682_v35  ;;  %v6858_v12 = vld [vmem:[%s9230_s1 + $0x98] sm:$0xff]  ;;  %v6840_v13 = vld [vmem:[%s9230_s1 + $0x88] sm:$0xff]  ;;  %v6868_v17 = vld [vmem:[%s9230_s1 + $0xa0] sm:$0xff] }
 0x16b   : > { %6704 = vmatmul.msk.f32.gmra.mxu2 %vm59_vm0, %v6699_v37  ;;  %6713 = vmatmul.msk.f32.gmra.mxu3 %vm59_vm0, %v6708_v39  ;;  %v6773_v16 = vld [vmem:[%s7962_s13 + $0x448] sm:$0xff]  ;;  %v6764_v0 = vld [vmem:[%s7962_s13 + $0x434] sm:$0xff]  ;;  %v6765_v21 = vld [vmem:[%s7962_s13 + $0x43c] sm:$0xf] }
 0x16c   : > { %6722 = vmatmul.msk.f32.gmra.mxu0 %vm59_vm0, %v6717_v40  ;;  %v6782_v15 = vld [vmem:[%s7962_s13 + $0x449] sm:$0xff]  ;;  %v6783_v19 = vld [vmem:[%s7962_s13 + $0x451] sm:$0xff]  ;;  %v6784_v23 = vld [vmem:[%s7962_s13 + $0x459] sm:$0xf] }
 0x16d   : > { %v6774_v18 = vld [vmem:[%s7962_s13 + $0x450] sm:$0xff]  ;;  %v6775_v22 = vld [vmem:[%s7962_s13 + $0x458] sm:$0xf]  ;;  %v6799_v25 = vld [vmem:[%s7962_s13 + $0x443] sm:$0xff] }
 0x16e   : > { %v6792_v20 = vld [vmem:[%s7962_s13 + $0x452] sm:$0xff]  ;;  %v6793_v24 = vld [vmem:[%s7962_s13 + $0x45a] sm:$0xf]  ;;  %v6808_v26 = vld [vmem:[%s7962_s13 + $0x444] sm:$0xff] }
 0x16f   : > { %v6818_v27 = vld [vmem:[%s7962_s13 + $0x460] sm:$0xff]  ;;  %v6886_v29 = vld [vmem:[%s9230_s1 + $0xb0] sm:$0xff]  ;;  %v6895_v30 = vld [vmem:[%s9230_s1 + $0xb8] sm:$0xff] }
 0x170   : > { %v6827_v28 = vld [vmem:[%s7962_s13 + $0x461] sm:$0xff]  ;;  %v6800_v33 = vld [vmem:[%s7962_s13 + $0x44b] sm:$0xff]  ;;  %v6801_v39 = vld [vmem:[%s7962_s13 + $0x453] sm:$0xff] }
 0x171   : > { %v6877_v32 = vld [vmem:[%s9230_s1 + $0xa8] sm:$0xff]  ;;  %v6904_v37 = vld [vmem:[%s9230_s1 + $0xc0] sm:$0xff]  ;;  %v6810_v40 = vld [vmem:[%s7962_s13 + $0x454] sm:$0xff] }
 0x172   : > { %6696 = vmatmul.msk.f32.gmra.mxu1 %vm59_vm0, %v6683_v42  ;;  %v6809_v31 = vld [vmem:[%s7962_s13 + $0x44c] sm:$0xff] }
 0x173   : > { %6705 = vmatmul.msk.f32.gmra.mxu2 %vm59_vm0, %v6700_v38  ;;  %6714 = vmatmul.msk.f32.gmra.mxu3 %vm59_vm0, %v6709_v43  ;;  %v6819_v34 = vld [vmem:[%s7962_s13 + $0x468] sm:$0xff]  ;;  %v6820_v41 = vld [vmem:[%s7962_s13 + $0x470] sm:$0xff]  ;;  %v6802_v43 = vld [vmem:[%s7962_s13 + $0x45b] sm:$0xf] }
 0x174   : > { %6723 = vmatmul.msk.f32.gmra.mxu0 %vm59_vm0, %v6718_v44  ;;  %v6828_v35 = vld [vmem:[%s7962_s13 + $0x469] sm:$0xff]  ;;  %v6829_v42 = vld [vmem:[%s7962_s13 + $0x471] sm:$0xff]  ;;  %v6811_v44 = vld [vmem:[%s7962_s13 + $0x45c] sm:$0xf] }
 0x17a   : > { %6697 = vmatmul.msk.f32.gmra.mxu1 %vm59_vm0, %v6684_v45  ;;  %v6821_v45 = vld [vmem:[%s7962_s13 + $0x478] sm:$0xf] }
 0x17b   : > { %6706 = vmatmul.msk.f32.gmra.mxu2 %vm59_vm0, %v6701_v46  ;;  %6715 = vmatmul.msk.f32.gmra.mxu3 %vm59_vm0, %v6710_v47  ;;  %v6830_v47 = vld [vmem:[%s7962_s13 + $0x479] sm:$0xf] }
 0x17c   : > { %6724 = vmatmul.msk.f32.gmra.mxu0 %vm59_vm0, %v6719_v48 }
 0x182   : > { %6731 = vmatmul.msk.f32.vlgmr.msra.gmra.mxu1 %vm59_vm0, %v6726_v49 }
 0x183   : > { %6740 = vmatmul.msk.f32.vlgmr.msra.gmra.mxu2 %vm59_vm0, %v6735_v51  ;;  %6749 = vmatmul.msk.f32.vlgmr.msra.gmra.mxu3 %vm59_vm0, %v6744_v53  ;;  %v6836_v53 = vld [vmem:[%s7962_s13 + $0x462] sm:$0xff] }
 0x184   : > { %2100 = vmatpush.msra.mxu2 %v6812_v54  ;;  %6758 = vmatmul.msk.f32.vlgmr.msra.gmra.mxu0 %vm59_vm0, %v6753_v52  ;;  %v6845_v52 = vld [vmem:[%s7962_s13 + $0x463] sm:$0xff] }
 0x185   : > { %2155 = vmatpush.msra.mxu3 %v6822_v55  ;;  %2049 = vmatpush.msra.mxu1 %v6803_v56  ;;  %v6854_v55 = vld [vmem:[%s7962_s13 + $0x464] sm:$0xff] }
 0x186   : > { %2206 = vmatpush.msra.mxu0 %v6831_v60 }
 0x18a   : > { %6732 = vmatmul.msk.f32.gmra.mxu1 %vm59_vm0, %v6727_v57  ;;  %v6864_v57 = vld [vmem:[%s7962_s13 + $0x480] sm:$0xff] }
 0x18b   : > { %6741 = vmatmul.msk.f32.gmra.mxu2 %vm59_vm0, %v6736_v50  ;;  %6750 = vmatmul.msk.f32.gmra.mxu3 %vm59_vm0, %v6745_v58 }
 0x18c   : > { %6759 = vmatmul.msk.f32.gmra.mxu0 %vm59_vm0, %v6754_v59 }
 0x192   : > { %6733 = vmatmul.msk.f32.gmra.mxu1 %vm59_vm0, %v6728_v61  ;;  %v6837_v61 = vld [vmem:[%s7962_s13 + $0x46a] sm:$0xff] }
 0x193   : > { %6742 = vmatmul.msk.f32.gmra.mxu2 %vm59_vm0, %v6737_v62  ;;  %6751 = vmatmul.msk.f32.gmra.mxu3 %vm59_vm0, %v6746_v63  ;;  %v6846_v62 = vld [vmem:[%s7962_s13 + $0x46b] sm:$0xff] }
 0x194   : > { %6760 = vmatmul.msk.f32.gmra.mxu0 %vm59_vm0, %v6755_v2 }
 0x19a   : > { %6734 = vmatmul.msk.f32.gmra.mxu1 %vm59_vm0, %v6729_v3  ;;  %v6855_v3 = vld [vmem:[%s7962_s13 + $0x46c] sm:$0xff] }
 0x19b   : > { %6743 = vmatmul.msk.f32.gmra.mxu2 %vm59_vm0, %v6738_v4  ;;  %6752 = vmatmul.msk.f32.gmra.mxu3 %vm59_vm0, %v6747_v5  ;;  %v6865_v5 = vld [vmem:[%s7962_s13 + $0x488] sm:$0xff] }
 0x19c   : > { %6761 = vmatmul.msk.f32.gmra.mxu0 %vm59_vm0, %v6756_v1 }
 0x1a2   : > { %6767 = vmatmul.msk.f32.vlgmr.msrb.gmra.mxu1 %vm59_vm0, %v6762_v6 }
 0x1a3   : > { %6777 = vmatmul.msk.f32.vlgmr.msrb.gmra.mxu2 %vm59_vm0, %v6772_v7  ;;  %6786 = vmatmul.msk.f32.vlgmr.msrb.gmra.mxu3 %vm59_vm0, %v6781_v8 }
 0x1a4   : > { %2308 = vmatpush.msrb.mxu2 %v6849_v11  ;;  %6795 = vmatmul.msk.f32.vlgmr.msrb.gmra.mxu0 %vm59_vm0, %v6790_v9  ;;  %v6838_v11 = vld [vmem:[%s7962_s13 + $0x472] sm:$0xff] }
 0x1a5   : > { %2359 = vmatpush.msrb.mxu3 %v6858_v12  ;;  %2257 = vmatpush.msrb.mxu1 %v6840_v13  ;;  %v6847_v12 = vld [vmem:[%s7962_s13 + $0x473] sm:$0xff] }
 0x1a6   : > { %2414 = vmatpush.msrb.mxu0 %v6868_v17 }
 0x1aa   : > { %6768 = vmatmul.msk.f32.gmra.mxu1 %vm59_vm0, %v6763_v14 }
 0x1ab   : > { %6778 = vmatmul.msk.f32.gmra.mxu2 %vm59_vm0, %v6773_v16  ;;  %6787 = vmatmul.msk.f32.gmra.mxu3 %vm59_vm0, %v6782_v15  ;;  %v6856_v16 = vld [vmem:[%s7962_s13 + $0x474] sm:$0xff] }
 0x1ac   : > { %6796 = vmatmul.msk.f32.gmra.mxu0 %vm59_vm0, %v6791_v10  ;;  %v6866_v10 = vld [vmem:[%s7962_s13 + $0x490] sm:$0xff] }
 0x1b2   : > { %6769 = vmatmul.msk.f32.gmra.mxu1 %vm59_vm0, %v6764_v0 }
 0x1b3   : > { %6779 = vmatmul.msk.f32.gmra.mxu2 %vm59_vm0, %v6774_v18  ;;  %6788 = vmatmul.msk.f32.gmra.mxu3 %vm59_vm0, %v6783_v19 }
 0x1b4   : > { %6797 = vmatmul.msk.f32.gmra.mxu0 %vm59_vm0, %v6792_v20 }
 0x1ba   : > { %6770 = vmatmul.msk.f32.gmra.mxu1 %vm59_vm0, %v6765_v21  ;;  %v6839_v21 = vld [vmem:[%s7962_s13 + $0x47a] sm:$0xf] }
 0x1bb   : > { %6780 = vmatmul.msk.f32.gmra.mxu2 %vm59_vm0, %v6775_v22  ;;  %6789 = vmatmul.msk.f32.gmra.mxu3 %vm59_vm0, %v6784_v23  ;;  %v6848_v22 = vld [vmem:[%s7962_s13 + $0x47b] sm:$0xf] }
 0x1bc   : > { %6798 = vmatmul.msk.f32.gmra.mxu0 %vm59_vm0, %v6793_v24 }
 0x1c2   : > { %6804 = vmatmul.msk.f32.vlgmr.msra.gmra.mxu1 %vm59_vm0, %v6799_v25  ;;  %v6857_v25 = vld [vmem:[%s7962_s13 + $0x47c] sm:$0xf] }
 0x1c3   : > { %6813 = vmatmul.msk.f32.vlgmr.msra.gmra.mxu2 %vm59_vm0, %v6808_v26  ;;  %6823 = vmatmul.msk.f32.vlgmr.msra.gmra.mxu3 %vm59_vm0, %v6818_v27  ;;  %v6867_v27 = vld [vmem:[%s7962_s13 + $0x498] sm:$0xf] }
 0x1c4   : > { %2516 = vmatpush.msra.mxu2 %v6886_v29  ;;  %6832 = vmatmul.msk.f32.vlgmr.msra.gmra.mxu0 %vm59_vm0, %v6827_v28 }
 0x1c5   : > { %2567 = vmatpush.msra.mxu3 %v6895_v30  ;;  %2465 = vmatpush.msra.mxu1 %v6877_v32 }
 0x1c6   : > { %2618 = vmatpush.msra.mxu0 %v6904_v37 }
 0x1ca   : > { %6805 = vmatmul.msk.f32.gmra.mxu1 %vm59_vm0, %v6800_v33 }
 0x1cb   : > { %6814 = vmatmul.msk.f32.gmra.mxu2 %vm59_vm0, %v6809_v31  ;;  %6824 = vmatmul.msk.f32.gmra.mxu3 %vm59_vm0, %v6819_v34  ;;  %v6873_v31 = vld [vmem:[%s7962_s13 + $0x481] sm:$0xff] }
 0x1cc   : > { %6833 = vmatmul.msk.f32.gmra.mxu0 %vm59_vm0, %v6828_v35  ;;  %v6882_v34 = vld [vmem:[%s7962_s13 + $0x482] sm:$0xff] }
 0x1d2   : > { %6806 = vmatmul.msk.f32.gmra.mxu1 %vm59_vm0, %v6801_v39  ;;  %v6891_v39 = vld [vmem:[%s7962_s13 + $0x483] sm:$0xff] }
 0x1d3   : > { %6815 = vmatmul.msk.f32.gmra.mxu2 %vm59_vm0, %v6810_v40  ;;  %6825 = vmatmul.msk.f32.gmra.mxu3 %vm59_vm0, %v6820_v41  ;;  %v6900_v41 = vld [vmem:[%s7962_s13 + $0x484] sm:$0xff] }
 0x1d4   : > { %6834 = vmatmul.msk.f32.gmra.mxu0 %vm59_vm0, %v6829_v42 }
 0x1d7   : > { %v1397_v38 = vpop.f32.mrf.mxu1 }
 0x1d9   : > { %v1394_v46 = vpop.f32.mrf.mxu0 }
 0x1da   : > { %6807 = vmatmul.msk.f32.gmra.mxu1 %vm59_vm0, %v6802_v43 }
 0x1db   : > { %6816 = vmatmul.msk.f32.gmra.mxu2 %vm59_vm0, %v6811_v44  ;;  %6826 = vmatmul.msk.f32.gmra.mxu3 %vm59_vm0, %v6821_v45 }
 0x1dc   : > { %6835 = vmatmul.msk.f32.gmra.mxu0 %vm59_vm0, %v6830_v47  ;;  %v6883_v47 = vld [vmem:[%s7962_s13 + $0x48a] sm:$0xff] }
 0x1de   : > { %v1400_v48 = vpop.f32.mrf.mxu2  ;;  %v1403_v49 = vpop.f32.mrf.mxu3 }
 0x1df   : > { %v1435_v51 = vpop.f32.mrf.mxu1 }
 0x1e0   : > { %v1436_v54 = vadd.f32 %v1435_v51, %v1394_v46  ;;  %v6874_v46 = vld [vmem:[%s7962_s13 + $0x489] sm:$0xff] }
 0x1e1   : > { %v1584_v56 = vpop.f32.mrf.mxu0  ;;  %v6892_v51 = vld [vmem:[%s7962_s13 + $0x48b] sm:$0xff] }
 0x1e2   : > { %6841 = vmatmul.msk.f32.vlgmr.msrb.gmra.mxu1 %vm59_vm0, %v6836_v53 }
 0x1e3   : > { %6850 = vmatmul.msk.f32.vlgmr.msrb.gmra.mxu2 %vm59_vm0, %v6845_v52  ;;  %6859 = vmatmul.msk.f32.vlgmr.msrb.gmra.mxu3 %vm59_vm0, %v6854_v55  ;;  %v6901_v52 = vld [vmem:[%s7962_s13 + $0x48c] sm:$0xff] }
 0x1e4   : > { %6869 = vmatmul.msk.f32.vlgmr.msrb.gmra.mxu0 %vm59_vm0, %v6864_v57 }
 0x1e6   : > { %v1482_v50 = vpop.f32.mrf.mxu2  ;;  %v1533_v59 = vpop.f32.mrf.mxu3 }
 0x1e7   : > { %v1494_v58 = vadd.f32 %v1482_v50, %v1436_v54  ;;  %v1438_v60 = vpop.f32.mrf.mxu1 }
 0x1e8   : > { %v1439_v63 = vadd.f32 %v1438_v60, %v1397_v38 }
 0x1e9   : > { %v1545_v2 = vadd.f32 %v1533_v59, %v1494_v58  ;;  %v1587_v4 = vpop.f32.mrf.mxu0  ;;  %v6875_v58 = vld [vmem:[%s7962_s13 + $0x491] sm:$0xff] }
 0x1ea   : > { %6842 = vmatmul.msk.f32.gmra.mxu1 %vm59_vm0, %v6837_v61  ;;  %v6884_v59 = vld [vmem:[%s7962_s13 + $0x492] sm:$0xff] }
 0x1eb   : > { %v1596_v1 = vadd.f32 %v1584_v56, %v1545_v2  ;;  %6851 = vmatmul.msk.f32.gmra.mxu2 %vm59_vm0, %v6846_v62  ;;  %6860 = vmatmul.msk.f32.gmra.mxu3 %vm59_vm0, %v6855_v3  ;;  %v6893_v62 = vld [vmem:[%s7962_s13 + $0x493] sm:$0xff] }
 0x1ec   : > { %6870 = vmatmul.msk.f32.gmra.mxu0 %vm59_vm0, %v6865_v5  ;;  %v6902_v2 = vld [vmem:[%s7962_s13 + $0x494] sm:$0xff] }
 0x1ee   : > { %v1485_v6 = vpop.f32.mrf.mxu2  ;;  %v1536_v8 = vpop.f32.mrf.mxu3 }
 0x1ef   : > { %v1495_v7 = vadd.f32 %v1485_v6, %v1439_v63  ;;  %v1441_v9 = vpop.f32.mrf.mxu1 }
 0x1f0   : > { %v1442_v13 = vadd.f32 %v1441_v9, %v1400_v48 }
 0x1f1   : > { %v1546_v14 = vadd.f32 %v1536_v8, %v1495_v7  ;;  %v1590_v15 = vpop.f32.mrf.mxu0  ;;  %v6876_v7 = vld [vmem:[%s7962_s13 + $0x499] sm:$0xf] }
 0x1f2   : > { %6843 = vmatmul.msk.f32.gmra.mxu1 %vm59_vm0, %v6838_v11  ;;  %v6885_v8 = vld [vmem:[%s7962_s13 + $0x49a] sm:$0xf] }
 0x1f3   : > { %v1597_v17 = vadd.f32 %v1587_v4, %v1546_v14  ;;  %6852 = vmatmul.msk.f32.gmra.mxu2 %vm59_vm0, %v6847_v12  ;;  %6861 = vmatmul.msk.f32.gmra.mxu3 %vm59_vm0, %v6856_v16  ;;  %v6894_v12 = vld [vmem:[%s7962_s13 + $0x49b] sm:$0xf] }
 0x1f4   : > { %6871 = vmatmul.msk.f32.gmra.mxu0 %vm59_vm0, %v6866_v10  ;;  %v6903_v14 = vld [vmem:[%s7962_s13 + $0x49c] sm:$0xf]  ;;  %s8230_s13 = scalar_lea.vmem [#allocation2], %s6680_s28 }
 0x1f6   : > { %v1488_v0 = vpop.f32.mrf.mxu2  ;;  %v1539_v19 = vpop.f32.mrf.mxu3 }
 0x1f7   : > { %v1496_v18 = vadd.f32 %v1488_v0, %v1442_v13  ;;  %v1444_v20 = vpop.f32.mrf.mxu1 }
 0x1f8   : > { %v1445_v23 = vadd.f32 %v1444_v20, %v1403_v49 }
 0x1f9   : > { %v1547_v24 = vadd.f32 %v1539_v19, %v1496_v18  ;;  %v1593_v26 = vpop.f32.mrf.mxu0 }
 0x1fa   : > { %6844 = vmatmul.msk.f32.gmra.mxu1 %vm59_vm0, %v6839_v21 }
 0x1fb   : > { %v1598_v28 = vadd.f32 %v1590_v15, %v1547_v24  ;;  %6853 = vmatmul.msk.f32.gmra.mxu2 %vm59_vm0, %v6848_v22  ;;  %6862 = vmatmul.msk.f32.gmra.mxu3 %vm59_vm0, %v6857_v25 }
 0x1fc   : > { %6872 = vmatmul.msk.f32.gmra.mxu0 %vm59_vm0, %v6867_v27 }
 0x1fe   : > { %v1491_v29 = vpop.f32.mrf.mxu2  ;;  %v1542_v32 = vpop.f32.mrf.mxu3 }
 0x1ff   : > { %v1497_v30 = vadd.f32 %v1491_v29, %v1445_v23  ;;  %v1639_v33 = vpop.f32.mrf.mxu1 }
 0x200   : > { %v1651_v37 = vadd.f32 %v1639_v33, %v1596_v1 }
 0x201   : > { %v1548_v35 = vadd.f32 %v1542_v32, %v1497_v30  ;;  %v1792_v40 = vpop.f32.mrf.mxu0 }
 0x202   : > { %6878 = vmatmul.msk.f32.vlgmr.msra.gmra.mxu1 %vm59_vm0, %v6873_v31 }
 0x203   : > { %v1599_v42 = vadd.f32 %v1593_v26, %v1548_v35  ;;  %6887 = vmatmul.msk.f32.vlgmr.msra.gmra.mxu2 %vm59_vm0, %v6882_v34  ;;  %6896 = vmatmul.msk.f32.vlgmr.msra.gmra.mxu3 %vm59_vm0, %v6891_v39 }
 0x204   : > { %6905 = vmatmul.msk.f32.vlgmr.msra.gmra.mxu0 %vm59_vm0, %v6900_v41 }
 0x206   : > { %v1690_v38 = vpop.f32.mrf.mxu2  ;;  %v1741_v44 = vpop.f32.mrf.mxu3 }
 0x207   : > { %v1702_v43 = vadd.f32 %v1690_v38, %v1651_v37  ;;  %v1642_v45 = vpop.f32.mrf.mxu1 }
 0x208   : > { %v1652_v48 = vadd.f32 %v1642_v45, %v1597_v17 }
 0x209   : > { %v1753_v49 = vadd.f32 %v1741_v44, %v1702_v43  ;;  %v1795_v53 = vpop.f32.mrf.mxu0 }
 0x20a   : > { %6879 = vmatmul.msk.f32.gmra.mxu1 %vm59_vm0, %v6874_v46 }
 0x20b   : > { %v1804_v54 = vadd.f32 %v1792_v40, %v1753_v49  ;;  %6888 = vmatmul.msk.f32.gmra.mxu2 %vm59_vm0, %v6883_v47  ;;  %6897 = vmatmul.msk.f32.gmra.mxu3 %vm59_vm0, %v6892_v51 }
 0x20c   : > { %6906 = vmatmul.msk.f32.gmra.mxu0 %vm59_vm0, %v6901_v52 }
 0x20e   : > { %v1693_v55 = vpop.f32.mrf.mxu2  ;;  %v1744_v57 = vpop.f32.mrf.mxu3 }
 0x20f   : > { %v1703_v56 = vadd.f32 %v1693_v55, %v1652_v48  ;;  %v1645_v50 = vpop.f32.mrf.mxu1 }
 0x210   : > { %v1653_v60 = vadd.f32 %v1645_v50, %v1598_v28 }
 0x211   : > { %v1754_v61 = vadd.f32 %v1744_v57, %v1703_v56  ;;  %v1798_v63 = vpop.f32.mrf.mxu0 }
 0x212   : > { %6880 = vmatmul.msk.f32.gmra.mxu1 %vm59_vm0, %v6875_v58 }
 0x213   : > { %v1805_v3 = vadd.f32 %v1795_v53, %v1754_v61  ;;  %6889 = vmatmul.msk.f32.gmra.mxu2 %vm59_vm0, %v6884_v59  ;;  %6898 = vmatmul.msk.f32.gmra.mxu3 %vm59_vm0, %v6893_v62 }
 0x214   : > { %6907 = vmatmul.msk.f32.gmra.mxu0 %vm59_vm0, %v6902_v2 }
 0x216   : > { %v1696_v4 = vpop.f32.mrf.mxu2  ;;  %v1747_v1 = vpop.f32.mrf.mxu3 }
 0x217   : > { %v1704_v5 = vadd.f32 %v1696_v4, %v1653_v60  ;;  %v1648_v6 = vpop.f32.mrf.mxu1 }
 0x218   : > { %v1654_v9 = vadd.f32 %v1648_v6, %v1599_v42 }
 0x219   : > { %v1755_v11 = vadd.f32 %v1747_v1, %v1704_v5  ;;  %v1801_v13 = vpop.f32.mrf.mxu0 }
 0x21a   : > { %6881 = vmatmul.msk.f32.gmra.mxu1 %vm59_vm0, %v6876_v7 }
 0x21b   : > { %v1806_v16 = vadd.f32 %v1798_v63, %v1755_v11  ;;  %6890 = vmatmul.msk.f32.gmra.mxu2 %vm59_vm0, %v6885_v8  ;;  %6899 = vmatmul.msk.f32.gmra.mxu3 %vm59_vm0, %v6894_v12 }
 0x21c   : > { %6908 = vmatmul.msk.f32.gmra.mxu0 %vm59_vm0, %v6903_v14 }
 0x21e   : > { %v1699_v15 = vpop.f32.mrf.mxu2  ;;  %v1750_v17 = vpop.f32.mrf.mxu3 }
 0x21f   : > { %v1705_v10 = vadd.f32 %v1699_v15, %v1654_v9  ;;  %v1843_v0 = vpop.f32.mrf.mxu1 }
 0x220   : > { %v1855_v19 = vadd.f32 %v1843_v0, %v1804_v54 }
 0x221   : > { %v1756_v18 = vadd.f32 %v1750_v17, %v1705_v10  ;;  %v2000_v20 = vpop.f32.mrf.mxu0 }
 0x223   : > { %v1807_v21 = vadd.f32 %v1801_v13, %v1756_v18 }
 0x226   : > { %v1898_v22 = vpop.f32.mrf.mxu2  ;;  %v1949_v24 = vpop.f32.mrf.mxu3 }
 0x227   : > { %v1910_v23 = vadd.f32 %v1898_v22, %v1855_v19  ;;  %v1846_v25 = vpop.f32.mrf.mxu1 }
 0x228   : > { %v1856_v26 = vadd.f32 %v1846_v25, %v1805_v3 }
 0x229   : > { %v1961_v27 = vadd.f32 %v1949_v24, %v1910_v23  ;;  %v2003_v28 = vpop.f32.mrf.mxu0 }
 0x22b   : > { %v2012_v29 = vadd.f32 %v2000_v20, %v1961_v27 }
 0x22e   : > { %v1901_v30 = vpop.f32.mrf.mxu2  ;;  %v1952_v33 = vpop.f32.mrf.mxu3 }
 0x22f   : > { %v1911_v32 = vadd.f32 %v1901_v30, %v1856_v26  ;;  %v1849_v31 = vpop.f32.mrf.mxu1 }
 0x230   : > { %v1857_v34 = vadd.f32 %v1849_v31, %v1806_v16 }
 0x231   : > { %v1962_v35 = vadd.f32 %v1952_v33, %v1911_v32  ;;  %v2006_v37 = vpop.f32.mrf.mxu0 }
 0x233   : > { %v2013_v39 = vadd.f32 %v2003_v28, %v1962_v35 }
 0x236   : > { %v1904_v40 = vpop.f32.mrf.mxu2  ;;  %v1955_v42 = vpop.f32.mrf.mxu3 }
 0x237   : > { %v1912_v41 = vadd.f32 %v1904_v40, %v1857_v34  ;;  %v1852_v38 = vpop.f32.mrf.mxu1 }
 0x238   : > { %v1858_v43 = vadd.f32 %v1852_v38, %v1807_v21 }
 0x239   : > { %v1963_v44 = vadd.f32 %v1955_v42, %v1912_v41  ;;  %v2009_v45 = vpop.f32.mrf.mxu0 }
 0x23b   : > { %v2014_v46 = vadd.f32 %v2006_v37, %v1963_v44 }
 0x23e   : > { %v1907_v47 = vpop.f32.mrf.mxu2  ;;  %v1958_v49 = vpop.f32.mrf.mxu3 }
 0x23f   : > { %v1913_v48 = vadd.f32 %v1907_v47, %v1858_v43  ;;  %v2051_v51 = vpop.f32.mrf.mxu1 }
 0x240   : > { %v2063_v12 = vadd.f32 %v2051_v51, %v2012_v29 }
 0x241   : > { %v1964_v53 = vadd.f32 %v1958_v49, %v1913_v48  ;;  %v2208_v52 = vpop.f32.mrf.mxu0 }
 0x243   : > { %v2015_v54 = vadd.f32 %v2009_v45, %v1964_v53 }
 0x246   : > { %v2102_v55 = vpop.f32.mrf.mxu2  ;;  %v2157_v56 = vpop.f32.mrf.mxu3 }
 0x247   : > { %v2054_v57 = vpop.f32.mrf.mxu1  ;;  %v2114_v14 = vadd.f32 %v2102_v55, %v2063_v12 }
 0x248   : > { %v2064_v0 = vadd.f32 %v2054_v57, %v2013_v39 }
 0x249   : > { %v2211_v50 = vpop.f32.mrf.mxu0  ;;  %v2169_v17 = vadd.f32 %v2157_v56, %v2114_v14 }
 0x24b   : > { %v2220_v19 = vadd.f32 %v2208_v52, %v2169_v17 }
 0x24e   : > { %v2105_v58 = vpop.f32.mrf.mxu2  ;;  %v2160_v59 = vpop.f32.mrf.mxu3 }
 0x24f   : > { %v2057_v60 = vpop.f32.mrf.mxu1  ;;  %v2115_v20 = vadd.f32 %v2105_v58, %v2064_v0 }
 0x250   : > { %v2065_v27 = vadd.f32 %v2057_v60, %v2014_v46 }
 0x251   : > { %v2214_v61 = vpop.f32.mrf.mxu0  ;;  %v2170_v25 = vadd.f32 %v2160_v59, %v2115_v20 }
 0x253   : > { %v2221_v30 = vadd.f32 %v2211_v50, %v2170_v25 }
 0x256   : > { %v2108_v62 = vpop.f32.mrf.mxu2  ;;  %v2163_v63 = vpop.f32.mrf.mxu3 }
 0x257   : > { %v2060_v2 = vpop.f32.mrf.mxu1  ;;  %v2116_v29 = vadd.f32 %v2108_v62, %v2065_v27 }
 0x258   : > { %v2066_v41 = vadd.f32 %v2060_v2, %v2015_v54 }
 0x259   : > { %v2217_v3 = vpop.f32.mrf.mxu0  ;;  %v2171_v37 = vadd.f32 %v2163_v63, %v2116_v29 }
 0x25b   : > { %v2222_v43 = vadd.f32 %v2214_v61, %v2171_v37  ;;  %v7562_v37 = vmov (%p1346_p1), 0.0  }
 0x25e   : > { %v2111_v4 = vpop.f32.mrf.mxu2  ;;  %v2166_v5 = vpop.f32.mrf.mxu3 }
 0x25f   : > { %v2259_v1 = vpop.f32.mrf.mxu1  ;;  %v2117_v44 = vadd.f32 %v2111_v4, %v2066_v41 }
 0x260   : > { %v2271_v23 = vadd.f32 %v2259_v1, %v2220_v19 }
 0x261   : > { %v2416_v6 = vpop.f32.mrf.mxu0  ;;  %v2172_v53 = vadd.f32 %v2166_v5, %v2117_v44 }
 0x263   : > { %v2223_v59 = vadd.f32 %v2217_v3, %v2172_v53 }
 0x266   : > { %v2310_v7 = vpop.f32.mrf.mxu2  ;;  %v2361_v8 = vpop.f32.mrf.mxu3 }
 0x267   : > { %v2262_v9 = vpop.f32.mrf.mxu1  ;;  %v2322_v26 = vadd.f32 %v2310_v7, %v2271_v23 }
 0x268   : > { %v2272_v34 = vadd.f32 %v2262_v9, %v2221_v30 }
 0x269   : > { %v2419_v11 = vpop.f32.mrf.mxu0  ;;  %v2373_v32 = vadd.f32 %v2361_v8, %v2322_v26 }
 0x26b   : > { %v2428_v39 = vadd.f32 %v2416_v6, %v2373_v32 }
 0x26e   : > { %v2313_v13 = vpop.f32.mrf.mxu2  ;;  %v2364_v16 = vpop.f32.mrf.mxu3 }
 0x26f   : > { %v2265_v15 = vpop.f32.mrf.mxu1  ;;  %v2323_v40 = vadd.f32 %v2313_v13, %v2272_v34 }
 0x270   : > { %v2273_v49 = vadd.f32 %v2265_v15, %v2222_v43 }
 0x271   : > { %v2422_v10 = vpop.f32.mrf.mxu0  ;;  %v2374_v45 = vadd.f32 %v2364_v16, %v2323_v40 }
 0x273   : > { %v2429_v52 = vadd.f32 %v2419_v11, %v2374_v45 }
 0x276   : > { %v2316_v18 = vpop.f32.mrf.mxu2  ;;  %v2367_v21 = vpop.f32.mrf.mxu3 }
 0x277   : > { %v2268_v22 = vpop.f32.mrf.mxu1  ;;  %v2324_v55 = vadd.f32 %v2316_v18, %v2273_v49 }
 0x278   : > { %v2274_v4 = vadd.f32 %v2268_v22, %v2223_v59 }
 0x279   : > { %v2425_v24 = vpop.f32.mrf.mxu0  ;;  %v2375_v60 = vadd.f32 %v2367_v21, %v2324_v55 }
 0x27b   : > { %v2430_v1 = vadd.f32 %v2422_v10, %v2375_v60 }
 0x27e   : > { %v2319_v28 = vpop.f32.mrf.mxu2  ;;  %v2370_v33 = vpop.f32.mrf.mxu3 }
 0x27f   : > { %v2467_v31 = vpop.f32.mrf.mxu1  ;;  %v2325_v6 = vadd.f32 %v2319_v28, %v2274_v4 }
 0x280   : > { %v2479_v42 = vadd.f32 %v2467_v31, %v2428_v39 }
 0x281   : > { %v2620_v35 = vpop.f32.mrf.mxu0  ;;  %v2376_v12 = vadd.f32 %v2370_v33, %v2325_v6 }
 0x283   : > { %v2431_v0 = vadd.f32 %v2425_v24, %v2376_v12  ;;  %v2654_v24 = vlaneseq (%p1346_p1) }
 0x285   :  { %v2655_v29 = vshrl.u32 (%p1346_p1), %v2654_v24, 7  ;;  %v2658_v32 = vand.u32 (%p1346_p1), 127, %v2654_v24 }
 0x286   : > { %v2518_v38 = vpop.f32.mrf.mxu2  ;;  %v2569_v48 = vpop.f32.mrf.mxu3 }
 0x287   : > { %v2530_v47 = vadd.f32 %v2518_v38, %v2479_v42  ;;  %v2470_v46 = vpop.f32.mrf.mxu1  ;;  %v2656_v33 = vadd.s32 (%p1346_p1), 8, %v2655_v29  ;;  %v2659_v31 = vmul.u32 (%p1346_p1), 2, %v2655_v29 }
 0x288   : > { %v2480_v50 = vadd.f32 %v2470_v46, %v2429_v52 }
 0x289   : > { %v2581_v51 = vadd.f32 %v2569_v48, %v2530_v47  ;;  %v2623_v57 = vpop.f32.mrf.mxu0  ;;  %v2660_v34 = vmul.u32 (%p1346_p1), 2, %v2656_v33  ;;  %vm2661_vm2 = vcmp.eq.s32.totalorder (%p1346_p1), %v2658_v32, %v2659_v31 }
 0x28a   :  { %v8246_v39 = vsel (%p1346_p1), %vm2661_vm2, 1.0, %v7562_v37 }
 0x28b   : > { %v2632_v56 = vadd.f32 %v2620_v35, %v2581_v51  ;;  %v2667_v35 = vadd.s32 (%p1346_p1), 1, %v2659_v31  ;;  %vm2662_vm3 = vcmp.eq.s32.totalorder (%p1346_p1), %v2658_v32, %v2660_v34  ;;  %v2668_v40 = vadd.s32 (%p1346_p1), 1, %v2660_v34 }
 0x28c   :  { %v8248_v41 = vsel (%p1346_p1), %vm2662_vm3, 1.0, %v7562_v37 }
 0x28d   : > { %v2639_v58 = vadd.f32 %v2632_v56, %v7918_v36  ;;  %vm2669_vm4 = vcmp.eq.s32.totalorder (%p1346_p1), %v2658_v32, %v2667_v35  ;;  %vm2670_vm5 = vcmp.eq.s32.totalorder (%p1346_p1), %v2658_v32, %v2668_v40 }
 0x28e   : > { %v2521_v54 = vpop.f32.mrf.mxu2  ;;  %v2572_v63 = vpop.f32.mrf.mxu3  ;;  %v8250_v42 = vsel (%p1346_p1), %vm2669_vm4, 1.0, %v7562_v37  ;;  %v8252_v38 = vsel (%p1346_p1), %vm2670_vm5, 1.0, %v7562_v37 }
 0x28f   : > { %v2643_v61 = vmax.f32 %v2639_v58, 0.0  ;;  %v2531_v62 = vadd.f32 %v2521_v54, %v2480_v50  ;;  %v2473_v2 = vpop.f32.mrf.mxu1 }
 0x290   : > { %v2481_v8 = vadd.f32 %v2473_v2, %v2430_v1 }
 0x291   : > { %6910 = vst.msk [vmem:[%s8230_s13 + $0x380] sm:$0xff] %vm59_vm0, %v2643_v61  ;;  %v2582_v5 = vadd.f32 %v2572_v63, %v2531_v62  ;;  %v2626_v11 = vpop.f32.mrf.mxu0 }
 0x293   : > { %v2633_v7 = vadd.f32 %v2623_v57, %v2582_v5 }
 0x295   : > { %v2640_v3 = vadd.f32 %v2633_v7, %v7918_v36 }
 0x296   : > { %v2524_v9 = vpop.f32.mrf.mxu2  ;;  %v2575_v16 = vpop.f32.mrf.mxu3 }
 0x297   : > { %v2644_v13 = vmax.f32 %v2640_v3, 0.0  ;;  %v2532_v14 = vadd.f32 %v2524_v9, %v2481_v8  ;;  %v2476_v17 = vpop.f32.mrf.mxu1 }
 0x298   : > { %v2482_v10 = vadd.f32 %v2476_v17, %v2431_v0 }
 0x299   : > { %6911 = vst.msk [vmem:[%s8230_s13 + $0x388] sm:$0xff] %vm59_vm0, %v2644_v13  ;;  %v2583_v15 = vadd.f32 %v2575_v16, %v2532_v14  ;;  %v2629_v25 = vpop.f32.mrf.mxu0 }
 0x29b   : > { %v2634_v18 = vadd.f32 %v2626_v11, %v2583_v15 }
 0x29d   : > { %v2641_v19 = vadd.f32 %v2634_v18, %v7918_v36 }
 0x29e   : > { %v2527_v20 = vpop.f32.mrf.mxu2  ;;  %v2578_v23 = vpop.f32.mrf.mxu3 }
 0x29f   : > { %v2645_v21 = vmax.f32 %v2641_v19, 0.0  ;;  %v2533_v22 = vadd.f32 %v2527_v20, %v2482_v10 }
 0x2a1   : > { %6912 = vst.msk [vmem:[%s8230_s13 + $0x390] sm:$0xff] %vm59_vm0, %v2645_v21  ;;  %v2584_v26 = vadd.f32 %v2578_v23, %v2533_v22 }
 0x2a3   : > { %v2635_v27 = vadd.f32 %v2629_v25, %v2584_v26 }
 0x2a5   : > { %v2642_v28 = vadd.f32 %v2635_v27, %v7918_v36  ;;  %1348 = sbr.rel (!%p1346_p1) target bundleno = 342 (0x156), region = 298 }
 0x2a7   : > { %v2646_v30 = vmax.f32 %v2642_v28, 0.0 }
 0x2a9   : > { %6913 = vst.msk [vmem:[%s8230_s13 + $0x398] sm:$0xf] %vm1342_vm1, %v2646_v30 }
 0x2aa LB: > { %s7374_s1 = sshll.u32 %s7540_s0, 6  ;;  %vm2706_vm6 = vcmask 1043456   ;;  %vm2699_vm7 = vcmask 228352   ;;  %s6932_s28 = sshll.u32 %s7540_s0, 4  ;;  %vm2768_vm8 = vcmask 62464   ;;  %s7540_s0 = sphi %s8254_s0, %s2680_s0  }
 0x2ab   : > { %s2683_s27 = scalar_lea.vmem [#allocation2], %s7374_s1  ;;  %s2765_s22 = scalar_lea.vmem [#allocation3], %s6932_s28 }
 0x2ac   : > { %s2680_s0 = sadd.s32 1, %s7540_s0  }
 0x2ad   : > { %p2677_p2 = scmp.ge.s32.totalorder %s2680_s0, 14  }
 0x2ae   :  { %s8278_s23 = smov (%p2677_p2), 0  }
 0x2b0   : > { %v2687_v36 = vld [vmem:[%s2683_s27 + $0x18] sm:$0xf]  ;;  %v2686_v44 = vld [vmem:[%s2683_s27 + $0x10] sm:$0xff]  ;;  %v2685_v48 = vld [vmem:[%s2683_s27 + $0x8] sm:$0xff] }
 0x2b1   : > { %v6925_v43 = vld [vmem:[%s2683_s27 + $0x38] sm:$0xf]  ;;  %v6924_v47 = vld [vmem:[%s2683_s27 + $0x30] sm:$0xff]  ;;  %v6923_v46 = vld [vmem:[%s2683_s27 + $0x28] sm:$0xff] }
 0x2b2   : > { %v2698_v45 = vmax.f32 %v2687_v36, %v6925_v43  ;;  %v2697_v49 = vmax.f32 %v2686_v44, %v6924_v47  ;;  %v2684_v51 = vld [vmem:[%s2683_s27] sm:$0xff]  ;;  %v2696_v52 = vmax.f32 %v2685_v48, %v6923_v46 }
 0x2b3   : > { %v6922_v53 = vld [vmem:[%s2683_s27 + $0x20] sm:$0xff] }
 0x2b4   : > { %7386 = vmatpush.msk.msra.mxu2 %vm2706_vm6, %v2698_v45  ;;  %7390 = vmatpush.msk.msra.mxu3 %vm2706_vm6, %v2698_v45  ;;  %v2695_v55 = vmax.f32 %v2684_v51, %v6922_v53 }
 0x2b5   : > { %6926 = vmatpush.msk.msra.mxu0 %vm2706_vm6, %v2698_v45  ;;  %6929 = vmatpush.msk.msra.mxu1 %vm2706_vm6, %v2698_v45 }
 0x2b6   : > { %7387 = vmatpush.msra.mxu2 %v2697_v49  ;;  %7391 = vmatpush.msra.mxu3 %v2697_v49 }
 0x2b7   : > { %2723 = vmatpush.msra.mxu0 %v2697_v49  ;;  %2752 = vmatpush.msra.mxu1 %v2697_v49 }
 0x2b8   : > { %7388 = vmatpush.msra.mxu2 %v2696_v52  ;;  %7392 = vmatpush.msra.mxu3 %v2696_v52 }
 0x2b9   : > { %2724 = vmatpush.msra.mxu0 %v2696_v52  ;;  %2753 = vmatpush.msra.mxu1 %v2696_v52 }
 0x2ba   : > { %7389 = vmatpush.msra.mxu2 %v2695_v55  ;;  %7393 = vmatpush.msra.mxu3 %v2695_v55 }
 0x2bb   : > { %6928 = vmatmul.msk.f32.vlgmr.msra.gmra.mxu2 %vm2699_vm7, %v8248_v41  ;;  %6931 = vmatmul.msk.f32.vlgmr.msra.gmra.mxu3 %vm2699_vm7, %v8252_v38 }
 0x2bc   : > { %2725 = vmatpush.msra.mxu0 %v2695_v55  ;;  %2754 = vmatpush.msra.mxu1 %v2695_v55 }
 0x2bd   : > { %6927 = vmatmul.msk.f32.vlgmr.msra.gmra.mxu0 %vm2699_vm7, %v8246_v39  ;;  %6930 = vmatmul.msk.f32.vlgmr.msra.gmra.mxu1 %vm2699_vm7, %v8250_v42 }
 0x33a   : > { %v2727_v56 = vpop.f32.mrf.mxu0  ;;  %v2756_v57 = vpop.f32.mrf.mxu1 }
 0x33b   : > { %v2762_v50 = vmax.f32 %v2727_v56, %v2756_v57 }
 0x33d   : > { %2767 = vst.msk [vmem:[%s2765_s22] sm:$0xff] %vm59_vm0, %v2762_v50  ;;  %2679 = sbr.rel (!%p2677_p2) target bundleno = 682 (0x2aa), region = 309 }
 0x33e   : > { %v2730_v58 = vpop.f32.mrf.mxu2  ;;  %v2759_v54 = vpop.f32.mrf.mxu3 }
 0x33f   : > { %v2763_v59 = vmax.f32 %v2730_v58, %v2759_v54 }
 0x341   : > { %2769 = vst.msk [vmem:[%s2765_s22 + $0x8] sm:$0x3f] %vm2768_vm8, %v2763_v59 }
 0x342 LB: > { %s6933_s24 = sshll.u32 %s7544_s23, 6  ;;  %s6950_s19 = sshll.u32 %s7544_s23, 4  ;;  %s7544_s23 = sphi %s8278_s23, %s2775_s23  }
 0x343   : > { %s6370_s2 = scalar_lea.vmem [#allocation2], %s6933_s24  ;;  %s6377_s25 = scalar_lea.vmem [#allocation3], %s6950_s19 }
 0x344   : > { %v6937_v60 = vld [vmem:[%s6370_s2 + $0x398] sm:$0xf]  ;;  %v6936_v62 = vld [vmem:[%s6370_s2 + $0x390] sm:$0xff]  ;;  %v6935_v4 = vld [vmem:[%s6370_s2 + $0x388] sm:$0xff]  ;;  %s2775_s23 = sadd.s32 1, %s7544_s23  }
 0x345   : > { %v6943_v61 = vld [vmem:[%s6370_s2 + $0x3b8] sm:$0xf]  ;;  %v6942_v2 = vld [vmem:[%s6370_s2 + $0x3b0] sm:$0xff]  ;;  %v6941_v5 = vld [vmem:[%s6370_s2 + $0x3a8] sm:$0xff]  ;;  %p2772_p3 = scmp.ge.s32.totalorder %s2775_s23, 14  }
 0x346   : > { %v2795_v63 = vmax.f32 %v6937_v60, %v6943_v61  ;;  %v2794_v1 = vmax.f32 %v6936_v62, %v6942_v2  ;;  %v6934_v6 = vld [vmem:[%s6370_s2 + $0x380] sm:$0xff]  ;;  %v2793_v8 = vmax.f32 %v6935_v4, %v6941_v5  ;;  %s8307_s12 = smov (%p2772_p3), 0  }
 0x347   : > { %v6940_v7 = vld [vmem:[%s6370_s2 + $0x3a0] sm:$0xff] }
 0x348   : > { %7394 = vmatpush.msk.msra.mxu2 %vm2706_vm6, %v2795_v63  ;;  %7398 = vmatpush.msk.msra.mxu3 %vm2706_vm6, %v2795_v63  ;;  %v2792_v3 = vmax.f32 %v6934_v6, %v6940_v7  ;;  %v8305_v15 = vld [vmem:[%s9233_s4] sm:$0x1] (%p2772_p3) }
 0x349   : > { %6944 = vmatpush.msk.msra.mxu0 %vm2706_vm6, %v2795_v63  ;;  %6947 = vmatpush.msk.msra.mxu1 %vm2706_vm6, %v2795_v63 }
 0x34a   : > { %7395 = vmatpush.msra.mxu2 %v2794_v1  ;;  %7399 = vmatpush.msra.mxu3 %v2794_v1 }
 0x34b   : > { %2820 = vmatpush.msra.mxu0 %v2794_v1  ;;  %2849 = vmatpush.msra.mxu1 %v2794_v1 }
 0x34c   : > { %7396 = vmatpush.msra.mxu2 %v2793_v8  ;;  %7400 = vmatpush.msra.mxu3 %v2793_v8 }
 0x34d   : > { %2821 = vmatpush.msra.mxu0 %v2793_v8  ;;  %2850 = vmatpush.msra.mxu1 %v2793_v8 }
 0x34e   : > { %7397 = vmatpush.msra.mxu2 %v2792_v3  ;;  %7401 = vmatpush.msra.mxu3 %v2792_v3 }
 0x34f   : > { %6946 = vmatmul.msk.f32.vlgmr.msra.gmra.mxu2 %vm2699_vm7, %v8248_v41  ;;  %6949 = vmatmul.msk.f32.vlgmr.msra.gmra.mxu3 %vm2699_vm7, %v8252_v38 }
 0x350   : > { %2822 = vmatpush.msra.mxu0 %v2792_v3  ;;  %2851 = vmatpush.msra.mxu1 %v2792_v3 }
 0x351   : > { %6945 = vmatmul.msk.f32.vlgmr.msra.gmra.mxu0 %vm2699_vm7, %v8246_v39  ;;  %6948 = vmatmul.msk.f32.vlgmr.msra.gmra.mxu1 %vm2699_vm7, %v8250_v42 }
 0x3ce   : > { %v2824_v9 = vpop.f32.mrf.mxu0  ;;  %v2853_v11 = vpop.f32.mrf.mxu1 }
 0x3cf   : > { %v2859_v12 = vmax.f32 %v2824_v9, %v2853_v11 }
 0x3d1   : > { %6951 = vst.msk [vmem:[%s6377_s25 + $0xe0] sm:$0xff] %vm59_vm0, %v2859_v12  ;;  %2774 = sbr.rel (!%p2772_p3) target bundleno = 834 (0x342), region = 320 }
 0x3d2   : > { %v2827_v13 = vpop.f32.mrf.mxu2  ;;  %v2856_v14 = vpop.f32.mrf.mxu3 }
 0x3d3   : > { %v2860_v16 = vmax.f32 %v2827_v13, %v2856_v14 }
 0x3d5   : > { %6952 = vst.msk [vmem:[%s6377_s25 + $0xe8] sm:$0x3f] %vm2768_vm8, %v2860_v16 }
 0x3d6 LB: > { %v6954_v17 = vld [vmem:[%s9232_s3 + $0x8] sm:$0xff]  ;;  %v2879_v0 = vld [vmem:[%s9232_s3] sm:$0xff]  ;;  %v6959_v18 = vld [vmem:[%s9232_s3 + $0x10] sm:$0xff]  ;;  %s6953_s27 = sshll.u32 %s7548_s12, 4  ;;  %vm3768_vm9 = vcmask 130048   ;;  %vm3770_vm10 = vcmask 123904   ;;  %s7548_s12 = sphi %s8307_s12, %s2874_s12  }
 0x3d7   : > { %7402 = vmatpush.msra.mxu1 %v6954_v17  ;;  %2968 = vmatpush.msra.mxu2 %v6959_v18  ;;  %v6976_v10 = vld [vmem:[%s9232_s3 + $0x30] sm:$0xff]  ;;  %v6962_v19 = vld [vmem:[%s9232_s3 + $0x18] sm:$0xff]  ;;  %v6965_v20 = vld [vmem:[%s9232_s3 + $0x20] sm:$0xff]  ;;  %s8342_s25 = scalar_lea.vmem [#allocation3], %s6953_s27  ;;  %s2874_s12 = sadd.s32 1, %s7548_s12  }
 0x3d8   : > { %v6981_v21 = vld [vmem:[%s9232_s3 + $0x38] sm:$0xff]  ;;  %2906 = vmatpush.msra.mxu0 %v6954_v17  ;;  %3003 = vmatpush.msra.mxu3 %v6962_v19  ;;  %v6971_v22 = vld [vmem:[%s9232_s3 + $0x28] sm:$0xff]  ;;  %v6986_v23 = vld [vmem:[%s9232_s3 + $0x40] sm:$0xff]  ;;  %p2871_p4 = scmp.ge.s32.totalorder %s2874_s12, 10  }
 0x3d9   : > { %2935 = vmatpush.msrb.mxu1 %v2879_v0  ;;  %3111 = vmatpush.msrb.mxu2 %v6976_v10  ;;  %v6997_v30 = vld [vmem:[%s9232_s3 + $0x50] sm:$0xff]  ;;  %v7002_v24 = vld [vmem:[%s9232_s3 + $0x58] sm:$0xff]  ;;  %v6991_v34 = vld [vmem:[%s9232_s3 + $0x48] sm:$0xff]  ;;  %s8504_s0 = smov (%p2871_p4), 0  }
 0x3da   : > { %3038 = vmatpush.msrb.mxu0 %v6965_v20  ;;  %3146 = vmatpush.msrb.mxu3 %v6981_v21  ;;  %v7007_v35 = vld [vmem:[%s9232_s3 + $0x60] sm:$0xff]  ;;  %v7017_v36 = vld [vmem:[%s9232_s3 + $0x70] sm:$0xff]  ;;  %v7023_v43 = vld [vmem:[%s9232_s3 + $0x78] sm:$0xff] }
 0x3db   : > { %v7012_v46 = vld [vmem:[%s9232_s3 + $0x68] sm:$0xff]  ;;  %v7028_v49 = vld [vmem:[%s9232_s3 + $0x80] sm:$0xff]  ;;  %v7038_v56 = vld [vmem:[%s9232_s3 + $0x90] sm:$0xff] }
 0x3dc   : > { %v2881_v25 = vld [vmem:[%s8342_s25 + $0x9] sm:$0x3]  ;;  %v2880_v27 = vld [vmem:[%s8342_s25 + $0x1] sm:$0xff]  ;;  %v2979_v33 = vld [vmem:[%s8342_s25 + $0xb] sm:$0x3] }
 0x3dd   : > { %v2943_v26 = vld [vmem:[%s8342_s25 + $0x2] sm:$0xff]  ;;  %6956 = vmatmul.msk.f32.vlgmr.msra.gmra.mxu1 %vm59_vm0, %v2881_v25  ;;  %6955 = vmatmul.msk.f32.vlgmr.msra.gmra.mxu0 %vm59_vm0, %v2880_v27  ;;  %v2944_v32 = vld [vmem:[%s8342_s25 + $0xa] sm:$0x3]  ;;  %v6974_v40 = vld [vmem:[%s8342_s25 + $0x11] sm:$0xff] }
 0x3de   : > { %6960 = vmatmul.msk.f32.vlgmr.msra.gmra.mxu2 %vm59_vm0, %v2943_v26  ;;  %v2978_v28 = vld [vmem:[%s8342_s25 + $0x3] sm:$0xff]  ;;  %3076 = vmatpush.msra.mxu1 %v6971_v22  ;;  %v3014_v41 = vld [vmem:[%s8342_s25 + $0xc] sm:$0x3]  ;;  %v6979_v38 = vld [vmem:[%s8342_s25 + $0x12] sm:$0xff] }
 0x3df   : > { %6963 = vmatmul.msk.f32.vlgmr.msra.gmra.mxu3 %vm59_vm0, %v2978_v28  ;;  %3181 = vmatpush.msra.mxu0 %v6986_v23  ;;  %v2877_v29 = vld [vmem:[%s8342_s25] sm:$0xff]  ;;  %v2878_v37 = vld [vmem:[%s8342_s25 + $0x8] sm:$0x3]  ;;  %v6969_v44 = vld [vmem:[%s8342_s25 + $0x10] sm:$0xff] }
 0x3e0   : > { %3254 = vmatpush.msra.mxu2 %v6997_v30  ;;  %3289 = vmatpush.msra.mxu3 %v7002_v24  ;;  %v3013_v31 = vld [vmem:[%s8342_s25 + $0x4] sm:$0xff]  ;;  %v6975_v45 = vld [vmem:[%s8342_s25 + $0x19] sm:$0x3]  ;;  %v6985_v52 = vld [vmem:[%s8342_s25 + $0x1b] sm:$0x3] }
 0x3e1   : > { %v6980_v47 = vld [vmem:[%s8342_s25 + $0x1a] sm:$0x3]  ;;  %v6970_v51 = vld [vmem:[%s8342_s25 + $0x18] sm:$0x3]  ;;  %v6995_v53 = vld [vmem:[%s8342_s25 + $0x20] sm:$0xff] }
 0x3e2   : > { %v6984_v48 = vld [vmem:[%s8342_s25 + $0x13] sm:$0xff]  ;;  %v7000_v55 = vld [vmem:[%s8342_s25 + $0x21] sm:$0xff]  ;;  %v7001_v54 = vld [vmem:[%s8342_s25 + $0x29] sm:$0x3] }
 0x3e3   : > { %v7043_v57 = vld [vmem:[%s9232_s3 + $0x98] sm:$0xff]  ;;  %v6996_v58 = vld [vmem:[%s8342_s25 + $0x28] sm:$0x3]  ;;  %v7049_v61 = vld [vmem:[%s9232_s3 + $0xa0] sm:$0xff] }
 0x3e4   : > { %v6989_v50 = vld [vmem:[%s8342_s25 + $0x14] sm:$0xff]  ;;  %v7005_v59 = vld [vmem:[%s8342_s25 + $0x22] sm:$0xff]  ;;  %v6990_v62 = vld [vmem:[%s8342_s25 + $0x1c] sm:$0x3] }
 0x3e5   : > { %6957 = vmatmul.msk.f32.vlgmr.msrb.gmra.mxu1 %vm59_vm0, %v2877_v29  ;;  %6966 = vmatmul.msk.f32.vlgmr.msrb.gmra.mxu0 %vm59_vm0, %v3013_v31  ;;  %v7033_v60 = vld [vmem:[%s9232_s3 + $0x88] sm:$0xff]  ;;  %v7021_v4 = vld [vmem:[%s8342_s25 + $0x30] sm:$0xff]  ;;  %v7064_v1 = vld [vmem:[%s9232_s3 + $0xb8] sm:$0xff] }
 0x3e6   : > { %6961 = vmatmul.msk.f32.gmra.mxu2 %vm59_vm0, %v2944_v32  ;;  %3216 = vmatpush.msrb.mxu1 %v6991_v34  ;;  %v7015_v63 = vld [vmem:[%s8342_s25 + $0x24] sm:$0xff]  ;;  %v7059_v5 = vld [vmem:[%s9232_s3 + $0xb0] sm:$0xff]  ;;  %v7016_v7 = vld [vmem:[%s8342_s25 + $0x2c] sm:$0x3] }
 0x3e7   : > { %6964 = vmatmul.msk.f32.gmra.mxu3 %vm59_vm0, %v2979_v33  ;;  %3324 = vmatpush.msrb.mxu0 %v7007_v35  ;;  %v7006_v2 = vld [vmem:[%s8342_s25 + $0x2a] sm:$0x3]  ;;  %v7022_v8 = vld [vmem:[%s8342_s25 + $0x38] sm:$0x3]  ;;  %v7069_v11 = vld [vmem:[%s9232_s3 + $0xc0] sm:$0xff] }
 0x3e8   : > { %v7010_v6 = vld [vmem:[%s8342_s25 + $0x23] sm:$0xff]  ;;  %v7026_v3 = vld [vmem:[%s8342_s25 + $0x31] sm:$0xff]  ;;  %v7011_v12 = vld [vmem:[%s8342_s25 + $0x2b] sm:$0x3] }
 0x3e9   : > { %v7054_v9 = vld [vmem:[%s9232_s3 + $0xa8] sm:$0xff]  ;;  %v7036_v13 = vld [vmem:[%s8342_s25 + $0x33] sm:$0xff]  ;;  %v7037_v0 = vld [vmem:[%s8342_s25 + $0x3b] sm:$0x3] }
 0x3ea   : > { %v7027_v14 = vld [vmem:[%s8342_s25 + $0x39] sm:$0x3]  ;;  %v7042_v18 = vld [vmem:[%s8342_s25 + $0x3c] sm:$0x3]  ;;  %v7047_v10 = vld [vmem:[%s8342_s25 + $0x40] sm:$0xff] }
 0x3eb   : > { %v7041_v16 = vld [vmem:[%s8342_s25 + $0x34] sm:$0xff]  ;;  %v7057_v20 = vld [vmem:[%s8342_s25 + $0x42] sm:$0xff]  ;;  %v7058_v25 = vld [vmem:[%s8342_s25 + $0x4a] sm:$0x3] }
 0x3ec   : > { %v7031_v17 = vld [vmem:[%s8342_s25 + $0x32] sm:$0xff]  ;;  %v7032_v19 = vld [vmem:[%s8342_s25 + $0x3a] sm:$0x3]  ;;  %v7048_v21 = vld [vmem:[%s8342_s25 + $0x48] sm:$0x3] }
 0x3ed   : > { %6958 = vmatmul.msk.f32.gmra.mxu1 %vm59_vm0, %v2878_v37  ;;  %6967 = vmatmul.msk.f32.gmra.mxu0 %vm59_vm0, %v3014_v41  ;;  %v7062_v22 = vld [vmem:[%s8342_s25 + $0x43] sm:$0xff]  ;;  %v7063_v26 = vld [vmem:[%s8342_s25 + $0x4b] sm:$0x3] }
 0x3ee   : > { %6977 = vmatmul.msk.f32.vlgmr.msrb.gmra.mxu2 %vm59_vm0, %v6974_v40  ;;  %v7052_v23 = vld [vmem:[%s8342_s25 + $0x41] sm:$0xff]  ;;  %v7053_v28 = vld [vmem:[%s8342_s25 + $0x49] sm:$0x3]  ;;  %v7068_v30 = vld [vmem:[%s8342_s25 + $0x4c] sm:$0x3] }
 0x3ef   : > { %6982 = vmatmul.msk.f32.vlgmr.msrb.gmra.mxu3 %vm59_vm0, %v6979_v38  ;;  %3394 = vmatpush.msrb.mxu2 %v7017_v36  ;;  %v7067_v27 = vld [vmem:[%s8342_s25 + $0x44] sm:$0xff]  ;;  %s3767_s25 = scalar_lea.vmem [#allocation4], %s6953_s27 }
 0x3f0   : > { %3432 = vmatpush.msrb.mxu3 %v7023_v43 }
 0x3f5   : > { %6972 = vmatmul.msk.f32.vlgmr.msra.gmra.mxu1 %vm59_vm0, %v6969_v44  ;;  %6987 = vmatmul.msk.f32.vlgmr.msra.gmra.mxu0 %vm59_vm0, %v6984_v48 }
 0x3f6   : > { %6978 = vmatmul.msk.f32.gmra.mxu2 %vm59_vm0, %v6975_v45  ;;  %3359 = vmatpush.msra.mxu1 %v7012_v46 }
 0x3f7   : > { %6983 = vmatmul.msk.f32.gmra.mxu3 %vm59_vm0, %v6980_v47  ;;  %3467 = vmatpush.msra.mxu0 %v7028_v49 }
 0x3fd   : > { %6973 = vmatmul.msk.f32.gmra.mxu1 %vm59_vm0, %v6970_v51  ;;  %6988 = vmatmul.msk.f32.gmra.mxu0 %vm59_vm0, %v6985_v52 }
 0x3fe   : > { %6998 = vmatmul.msk.f32.vlgmr.msra.gmra.mxu2 %vm59_vm0, %v6995_v53 }
 0x3ff   : > { %7003 = vmatmul.msk.f32.vlgmr.msra.gmra.mxu3 %vm59_vm0, %v7000_v55  ;;  %3537 = vmatpush.msra.mxu2 %v7038_v56 }
 0x400   : > { %3572 = vmatpush.msra.mxu3 %v7043_v57 }
 0x405   : > { %6992 = vmatmul.msk.f32.vlgmr.msrb.gmra.mxu1 %vm59_vm0, %v6989_v50  ;;  %7008 = vmatmul.msk.f32.vlgmr.msrb.gmra.mxu0 %vm59_vm0, %v7005_v59 }
 0x406   : > { %6999 = vmatmul.msk.f32.gmra.mxu2 %vm59_vm0, %v6996_v58  ;;  %3502 = vmatpush.msrb.mxu1 %v7033_v60 }
 0x407   : > { %7004 = vmatmul.msk.f32.gmra.mxu3 %vm59_vm0, %v7001_v54  ;;  %3610 = vmatpush.msrb.mxu0 %v7049_v61 }
 0x40d   : > { %6993 = vmatmul.msk.f32.gmra.mxu1 %vm59_vm0, %v6990_v62  ;;  %7009 = vmatmul.msk.f32.gmra.mxu0 %vm59_vm0, %v7006_v2 }
 0x40e   : > { %7018 = vmatmul.msk.f32.vlgmr.msrb.gmra.mxu2 %vm59_vm0, %v7015_v63 }
 0x40f   : > { %7024 = vmatmul.msk.f32.vlgmr.msrb.gmra.mxu3 %vm59_vm0, %v7021_v4  ;;  %3680 = vmatpush.msrb.mxu2 %v7059_v5 }
 0x410   : > { %3715 = vmatpush.msrb.mxu3 %v7064_v1 }
 0x415   : > { %7013 = vmatmul.msk.f32.vlgmr.msra.gmra.mxu1 %vm59_vm0, %v7010_v6  ;;  %7029 = vmatmul.msk.f32.vlgmr.msra.gmra.mxu0 %vm59_vm0, %v7026_v3 }
 0x416   : > { %7019 = vmatmul.msk.f32.gmra.mxu2 %vm59_vm0, %v7016_v7  ;;  %3645 = vmatpush.msra.mxu1 %v7054_v9 }
 0x417   : > { %7025 = vmatmul.msk.f32.gmra.mxu3 %vm59_vm0, %v7022_v8  ;;  %3750 = vmatpush.msra.mxu0 %v7069_v11 }
 0x41d   : > { %7014 = vmatmul.msk.f32.gmra.mxu1 %vm59_vm0, %v7011_v12  ;;  %7030 = vmatmul.msk.f32.gmra.mxu0 %vm59_vm0, %v7027_v14 }
 0x41e   : > { %7039 = vmatmul.msk.f32.vlgmr.msra.gmra.mxu2 %vm59_vm0, %v7036_v13 }
 0x41f   : > { %7044 = vmatmul.msk.f32.vlgmr.msra.gmra.mxu3 %vm59_vm0, %v7041_v16 }
 0x425   : > { %7034 = vmatmul.msk.f32.vlgmr.msrb.gmra.mxu1 %vm59_vm0, %v7031_v17  ;;  %7050 = vmatmul.msk.f32.vlgmr.msrb.gmra.mxu0 %vm59_vm0, %v7047_v10 }
 0x426   : > { %7040 = vmatmul.msk.f32.gmra.mxu2 %vm59_vm0, %v7037_v0 }
 0x427   : > { %7045 = vmatmul.msk.f32.gmra.mxu3 %vm59_vm0, %v7042_v18 }
 0x42d   : > { %7035 = vmatmul.msk.f32.gmra.mxu1 %vm59_vm0, %v7032_v19  ;;  %7051 = vmatmul.msk.f32.gmra.mxu0 %vm59_vm0, %v7048_v21 }
 0x42e   : > { %7060 = vmatmul.msk.f32.vlgmr.msrb.gmra.mxu2 %vm59_vm0, %v7057_v20 }
 0x42f   : > { %7065 = vmatmul.msk.f32.vlgmr.msrb.gmra.mxu3 %vm59_vm0, %v7062_v22 }
 0x435   : > { %7055 = vmatmul.msk.f32.vlgmr.msra.gmra.mxu1 %vm59_vm0, %v7052_v23  ;;  %7070 = vmatmul.msk.f32.vlgmr.msra.gmra.mxu0 %vm59_vm0, %v7067_v27 }
 0x436   : > { %7061 = vmatmul.msk.f32.gmra.mxu2 %vm59_vm0, %v7058_v25 }
 0x437   : > { %7066 = vmatmul.msk.f32.gmra.mxu3 %vm59_vm0, %v7063_v26 }
 0x43d   : > { %7056 = vmatmul.msk.f32.gmra.mxu1 %vm59_vm0, %v7053_v28  ;;  %7071 = vmatmul.msk.f32.gmra.mxu0 %vm59_vm0, %v7068_v30 }
 0x45a   : > { %v2911_v24 = vpop.f32.mrf.mxu1  ;;  %v2908_v29 = vpop.f32.mrf.mxu0 }
 0x461   : > { %v2970_v32 = vpop.f32.mrf.mxu2 }
 0x462   : > { %v3005_v33 = vpop.f32.mrf.mxu3  ;;  %v2937_v31 = vpop.f32.mrf.mxu1 }
 0x463   : > { %v3040_v34 = vpop.f32.mrf.mxu0  ;;  %v2938_v38 = vadd.f32 %v2937_v31, %v2908_v29 }
 0x465   : > { %v2976_v43 = vadd.f32 %v2970_v32, %v2938_v38 }
 0x467   : > { %v3011_v48 = vadd.f32 %v3005_v33, %v2976_v43 }
 0x469   : > { %v2973_v35 = vpop.f32.mrf.mxu2  ;;  %v3046_v51 = vadd.f32 %v3040_v34, %v3011_v48 }
 0x46a   : > { %v3008_v37 = vpop.f32.mrf.mxu3  ;;  %v2940_v40 = vpop.f32.mrf.mxu1 }
 0x46b   : > { %v3043_v41 = vpop.f32.mrf.mxu0  ;;  %v2941_v46 = vadd.f32 %v2940_v40, %v2911_v24 }
 0x46d   : > { %v2977_v53 = vadd.f32 %v2973_v35, %v2941_v46 }
 0x46f   : > { %v3012_v50 = vadd.f32 %v3008_v37, %v2977_v53 }
 0x471   : > { %v3113_v36 = vpop.f32.mrf.mxu2  ;;  %v3047_v59 = vadd.f32 %v3043_v41, %v3012_v50 }
 0x472   : > { %v3148_v44 = vpop.f32.mrf.mxu3  ;;  %v3078_v45 = vpop.f32.mrf.mxu1 }
 0x473   : > { %v3183_v47 = vpop.f32.mrf.mxu0  ;;  %v3084_v56 = vadd.f32 %v3078_v45, %v3046_v51 }
 0x475   : > { %v3119_v58 = vadd.f32 %v3113_v36, %v3084_v56 }
 0x477   : > { %v3154_v62 = vadd.f32 %v3148_v44, %v3119_v58 }
 0x479   : > { %v3116_v49 = vpop.f32.mrf.mxu2  ;;  %v3189_v4 = vadd.f32 %v3183_v47, %v3154_v62 }
 0x47a   : > { %v3151_v52 = vpop.f32.mrf.mxu3  ;;  %v3081_v55 = vpop.f32.mrf.mxu1 }
 0x47b   : > { %v3186_v57 = vpop.f32.mrf.mxu0  ;;  %v3085_v63 = vadd.f32 %v3081_v55, %v3047_v59 }
 0x47d   : > { %v3120_v5 = vadd.f32 %v3116_v49, %v3085_v63 }
 0x47f   : > { %v3155_v3 = vadd.f32 %v3151_v52, %v3120_v5 }
 0x481   : > { %v3256_v54 = vpop.f32.mrf.mxu2  ;;  %v3190_v12 = vadd.f32 %v3186_v57, %v3155_v3 }
 0x482   : > { %v3291_v60 = vpop.f32.mrf.mxu3  ;;  %v3218_v61 = vpop.f32.mrf.mxu1 }
 0x483   : > { %v3326_v2 = vpop.f32.mrf.mxu0  ;;  %v3224_v6 = vadd.f32 %v3218_v61, %v3189_v4 }
 0x485   : > { %v3262_v11 = vadd.f32 %v3256_v54, %v3224_v6  ;;  %v8493_v54 = vperm.slane %v8305_v15, 0 }
 0x487   : > { %v3297_v14 = vadd.f32 %v3291_v60, %v3262_v11 }
 0x489   : > { %v3259_v1 = vpop.f32.mrf.mxu2  ;;  %v3332_v10 = vadd.f32 %v3326_v2, %v3297_v14 }
 0x48a   : > { %v3294_v7 = vpop.f32.mrf.mxu3  ;;  %v3221_v8 = vpop.f32.mrf.mxu1 }
 0x48b   : > { %v3329_v9 = vpop.f32.mrf.mxu0  ;;  %v3225_v16 = vadd.f32 %v3221_v8, %v3190_v12 }
 0x48d   : > { %v3263_v19 = vadd.f32 %v3259_v1, %v3225_v16 }
 0x48f   : > { %v3298_v22 = vadd.f32 %v3294_v7, %v3263_v19 }
 0x491   : > { %v3396_v13 = vpop.f32.mrf.mxu2  ;;  %v3333_v28 = vadd.f32 %v3329_v9, %v3298_v22 }
 0x492   : > { %v3434_v17 = vpop.f32.mrf.mxu3  ;;  %v3361_v0 = vpop.f32.mrf.mxu1 }
 0x493   : > { %v3469_v18 = vpop.f32.mrf.mxu0  ;;  %v3367_v20 = vadd.f32 %v3361_v0, %v3332_v10 }
 0x495   : > { %v3402_v26 = vadd.f32 %v3396_v13, %v3367_v20 }
 0x497   : > { %v3440_v30 = vadd.f32 %v3434_v17, %v3402_v26 }
 0x499   : > { %v3399_v21 = vpop.f32.mrf.mxu2  ;;  %v3475_v31 = vadd.f32 %v3469_v18, %v3440_v30 }
 0x49a   : > { %v3437_v23 = vpop.f32.mrf.mxu3  ;;  %v3364_v25 = vpop.f32.mrf.mxu1 }
 0x49b   : > { %v3472_v27 = vpop.f32.mrf.mxu0  ;;  %v3368_v24 = vadd.f32 %v3364_v25, %v3333_v28 }
 0x49d   : > { %v3403_v34 = vadd.f32 %v3399_v21, %v3368_v24 }
 0x49f   : > { %v3441_v40 = vadd.f32 %v3437_v23, %v3403_v34 }
 0x4a1   : > { %v3539_v29 = vpop.f32.mrf.mxu2  ;;  %v3476_v44 = vadd.f32 %v3472_v27, %v3441_v40 }
 0x4a2   : > { %v3574_v32 = vpop.f32.mrf.mxu3  ;;  %v3504_v33 = vpop.f32.mrf.mxu1 }
 0x4a3   : > { %v3612_v35 = vpop.f32.mrf.mxu0  ;;  %v3510_v37 = vadd.f32 %v3504_v33, %v3475_v31 }
 0x4a5   : > { %v3545_v38 = vadd.f32 %v3539_v29, %v3510_v37 }
 0x4a7   : > { %v3580_v47 = vadd.f32 %v3574_v32, %v3545_v38 }
 0x4a9   : > { %v3542_v41 = vpop.f32.mrf.mxu2  ;;  %v3618_v49 = vadd.f32 %v3612_v35, %v3580_v47 }
 0x4aa   : > { %v3577_v36 = vpop.f32.mrf.mxu3  ;;  %v3507_v43 = vpop.f32.mrf.mxu1 }
 0x4ab   : > { %v3615_v45 = vpop.f32.mrf.mxu0  ;;  %v3511_v48 = vadd.f32 %v3507_v43, %v3476_v44 }
 0x4ad   : > { %v3546_v51 = vadd.f32 %v3542_v41, %v3511_v48 }
 0x4af   : > { %v3581_v57 = vadd.f32 %v3577_v36, %v3546_v51 }
 0x4b1   : > { %v3682_v46 = vpop.f32.mrf.mxu2  ;;  %v3619_v59 = vadd.f32 %v3615_v45, %v3581_v57 }
 0x4b2   : > { %v3647_v53 = vpop.f32.mrf.mxu1  ;;  %v3717_v52 = vpop.f32.mrf.mxu3 }
 0x4b3   : > { %v3653_v55 = vadd.f32 %v3647_v53, %v3618_v49  ;;  %v3752_v56 = vpop.f32.mrf.mxu0 }
 0x4b5   : > { %v3688_v50 = vadd.f32 %v3682_v46, %v3653_v55 }
 0x4b7   : > { %v3723_v58 = vadd.f32 %v3717_v52, %v3688_v50 }
 0x4b9   : > { %v3758_v60 = vadd.f32 %v3752_v56, %v3723_v58  ;;  %v3685_v62 = vpop.f32.mrf.mxu2 }
 0x4ba   : > { %v3650_v61 = vpop.f32.mrf.mxu1  ;;  %v3720_v4 = vpop.f32.mrf.mxu3 }
 0x4bb   : > { %v3763_v63 = vadd.f32 %v8493_v54, %v3758_v60  ;;  %v3654_v2 = vadd.f32 %v3650_v61, %v3619_v59  ;;  %v3755_v6 = vpop.f32.mrf.mxu0 }
 0x4bd   : > { %v3765_v5 = vmax.f32 %v3763_v63, 0.0  ;;  %v3689_v1 = vadd.f32 %v3685_v62, %v3654_v2 }
 0x4bf   : > { %3769 = vst.msk [vmem:[%s3767_s25] sm:$0xff] %vm3768_vm9, %v3765_v5  ;;  %v3724_v7 = vadd.f32 %v3720_v4, %v3689_v1 }
 0x4c1   : > { %v3759_v8 = vadd.f32 %v3755_v6, %v3724_v7 }
 0x4c3   : > { %v3764_v3 = vadd.f32 %v8493_v54, %v3759_v8  ;;  %2873 = sbr.rel (!%p2871_p4) target bundleno = 982 (0x3d6), region = 331 }
 0x4c5   : > { %v3766_v9 = vmax.f32 %v3764_v3, 0.0 }
 0x4c7   : > { %3771 = vst.msk [vmem:[%s3767_s25 + $0x8] sm:$0x3] %vm3770_vm10, %v3766_v9 }
 0x4c8 LB: > { %v7077_v11 = vld [vmem:[%s9232_s3 + $0x8] sm:$0xff]  ;;  %v3783_v12 = vld [vmem:[%s9232_s3] sm:$0xff]  ;;  %v7084_v15 = vld [vmem:[%s9232_s3 + $0x10] sm:$0xff]  ;;  %s7072_s15 = sshll.u32 %s7552_s0, 4  ;;  %s3777_s0 = sadd.s32 1, %s7552_s0   ;;  %s7552_s0 = sphi %s8504_s0, %s3777_s0  }
 0x4c9   : > { %7403 = vmatpush.msra.mxu1 %v7077_v11  ;;  %3872 = vmatpush.msra.mxu2 %v7084_v15  ;;  %v7105_v13 = vld [vmem:[%s9232_s3 + $0x30] sm:$0xff]  ;;  %v7089_v14 = vld [vmem:[%s9232_s3 + $0x18] sm:$0xff]  ;;  %v7094_v16 = vld [vmem:[%s9232_s3 + $0x20] sm:$0xff]  ;;  %s8539_s21 = scalar_lea.vmem [#allocation3], %s7072_s15  ;;  %p3774_p5 = scmp.ge.s32.totalorder %s3777_s0, 10  }
 0x4ca   : > { %v7110_v17 = vld [vmem:[%s9232_s3 + $0x38] sm:$0xff]  ;;  %3810 = vmatpush.msra.mxu0 %v7077_v11  ;;  %3907 = vmatpush.msra.mxu3 %v7089_v14  ;;  %v7100_v0 = vld [vmem:[%s9232_s3 + $0x28] sm:$0xff]  ;;  %v7115_v18 = vld [vmem:[%s9232_s3 + $0x40] sm:$0xff]  ;;  %s8698_s29 = smov (%p3774_p5), 0  }
 0x4cb   : > { %3839 = vmatpush.msrb.mxu1 %v3783_v12  ;;  %4016 = vmatpush.msrb.mxu2 %v7105_v13  ;;  %v7076_v10 = vld [vmem:[%s8539_s21 + $0xe9] sm:$0x3]  ;;  %v7075_v20 = vld [vmem:[%s8539_s21 + $0xe1] sm:$0xff]  ;;  %v7126_v22 = vld [vmem:[%s9232_s3 + $0x50] sm:$0xff] }
 0x4cc   : > { %v7082_v19 = vld [vmem:[%s8539_s21 + $0xe2] sm:$0xff]  ;;  %3942 = vmatpush.msrb.mxu0 %v7094_v16  ;;  %4051 = vmatpush.msrb.mxu3 %v7110_v17  ;;  %v7131_v23 = vld [vmem:[%s9232_s3 + $0x58] sm:$0xff]  ;;  %v7083_v26 = vld [vmem:[%s8539_s21 + $0xea] sm:$0x3] }
 0x4cd   : > { %7079 = vmatmul.msk.f32.vlgmr.msra.gmra.mxu1 %vm59_vm0, %v7076_v10  ;;  %7085 = vmatmul.msk.f32.vlgmr.msra.gmra.mxu2 %vm59_vm0, %v7082_v19  ;;  %v7087_v21 = vld [vmem:[%s8539_s21 + $0xe3] sm:$0xff]  ;;  %v7088_v27 = vld [vmem:[%s8539_s21 + $0xeb] sm:$0x3]  ;;  %v7103_v32 = vld [vmem:[%s8539_s21 + $0xf1] sm:$0xff] }
 0x4ce   : > { %7078 = vmatmul.msk.f32.vlgmr.msra.gmra.mxu0 %vm59_vm0, %v7075_v20  ;;  %7090 = vmatmul.msk.f32.vlgmr.msra.gmra.mxu3 %vm59_vm0, %v7087_v21  ;;  %v7073_v25 = vld [vmem:[%s8539_s21 + $0xe0] sm:$0xff]  ;;  %v7120_v30 = vld [vmem:[%s9232_s3 + $0x48] sm:$0xff]  ;;  %v7108_v31 = vld [vmem:[%s8539_s21 + $0xf2] sm:$0xff] }
 0x4cf   : > { %3981 = vmatpush.msra.mxu1 %v7100_v0  ;;  %4086 = vmatpush.msra.mxu0 %v7115_v18  ;;  %v7092_v28 = vld [vmem:[%s8539_s21 + $0xe4] sm:$0xff]  ;;  %v7093_v33 = vld [vmem:[%s8539_s21 + $0xec] sm:$0x3]  ;;  %v7146_v34 = vld [vmem:[%s9232_s3 + $0x70] sm:$0xff] }
 0x4d0   : > { %4160 = vmatpush.msra.mxu2 %v7126_v22  ;;  %4195 = vmatpush.msra.mxu3 %v7131_v23  ;;  %v7136_v24 = vld [vmem:[%s9232_s3 + $0x60] sm:$0xff]  ;;  %v7074_v29 = vld [vmem:[%s8539_s21 + $0xe8] sm:$0x3]  ;;  %v7152_v35 = vld [vmem:[%s9232_s3 + $0x78] sm:$0xff] }
 0x4d1   : > { %v7098_v37 = vld [vmem:[%s8539_s21 + $0xf0] sm:$0xff]  ;;  %v7104_v40 = vld [vmem:[%s8539_s21 + $0xf9] sm:$0x3]  ;;  %v7141_v36 = vld [vmem:[%s9232_s3 + $0x68] sm:$0xff] }
 0x4d2   : > { %v7109_v41 = vld [vmem:[%s8539_s21 + $0xfa] sm:$0x3]  ;;  %v7157_v43 = vld [vmem:[%s9232_s3 + $0x80] sm:$0xff]  ;;  %v7099_v44 = vld [vmem:[%s8539_s21 + $0xf8] sm:$0x3] }
 0x4d3   : > { %v7113_v38 = vld [vmem:[%s8539_s21 + $0xf3] sm:$0xff]  ;;  %v7124_v45 = vld [vmem:[%s8539_s21 + $0x100] sm:$0xff]  ;;  %v7114_v47 = vld [vmem:[%s8539_s21 + $0xfb] sm:$0x3] }
 0x4d4   : > { %v7129_v48 = vld [vmem:[%s8539_s21 + $0x101] sm:$0xff]  ;;  %v7167_v46 = vld [vmem:[%s9232_s3 + $0x90] sm:$0xff]  ;;  %v7172_v49 = vld [vmem:[%s9232_s3 + $0x98] sm:$0xff] }
 0x4d5   : > { %7080 = vmatmul.msk.f32.vlgmr.msrb.gmra.mxu1 %vm59_vm0, %v7073_v25  ;;  %7086 = vmatmul.msk.f32.gmra.mxu2 %vm59_vm0, %v7083_v26  ;;  %v7118_v51 = vld [vmem:[%s8539_s21 + $0xf4] sm:$0xff]  ;;  %v7125_v53 = vld [vmem:[%s8539_s21 + $0x108] sm:$0x3]  ;;  %v7178_v57 = vld [vmem:[%s9232_s3 + $0xa0] sm:$0xff] }
 0x4d6   : > { %7091 = vmatmul.msk.f32.gmra.mxu3 %vm59_vm0, %v7088_v27  ;;  %7095 = vmatmul.msk.f32.vlgmr.msrb.gmra.mxu0 %vm59_vm0, %v7092_v28  ;;  %v7130_v52 = vld [vmem:[%s8539_s21 + $0x109] sm:$0x3]  ;;  %v7119_v50 = vld [vmem:[%s8539_s21 + $0xfc] sm:$0x3]  ;;  %v7150_v60 = vld [vmem:[%s8539_s21 + $0x110] sm:$0xff] }
 0x4d7   : > { %4121 = vmatpush.msrb.mxu1 %v7120_v30  ;;  %4230 = vmatpush.msrb.mxu0 %v7136_v24  ;;  %v7134_v55 = vld [vmem:[%s8539_s21 + $0x102] sm:$0xff]  ;;  %v7135_v59 = vld [vmem:[%s8539_s21 + $0x10a] sm:$0x3]  ;;  %v7188_v61 = vld [vmem:[%s9232_s3 + $0xb0] sm:$0xff] }
 0x4d8   : > { %v7162_v56 = vld [vmem:[%s9232_s3 + $0x88] sm:$0xff]  ;;  %v7193_v62 = vld [vmem:[%s9232_s3 + $0xb8] sm:$0xff]  ;;  %v7198_v6 = vld [vmem:[%s9232_s3 + $0xc0] sm:$0xff] }
 0x4d9   : > { %v7144_v58 = vld [vmem:[%s8539_s21 + $0x104] sm:$0xff]  ;;  %v7145_v2 = vld [vmem:[%s8539_s21 + $0x10c] sm:$0x3]  ;;  %v7151_v4 = vld [vmem:[%s8539_s21 + $0x118] sm:$0x3] }
 0x4da   : > { %v7139_v63 = vld [vmem:[%s8539_s21 + $0x103] sm:$0xff]  ;;  %v7155_v5 = vld [vmem:[%s8539_s21 + $0x111] sm:$0xff]  ;;  %v7140_v7 = vld [vmem:[%s8539_s21 + $0x10b] sm:$0x3] }
 0x4db   : > { %v7183_v1 = vld [vmem:[%s9232_s3 + $0xa8] sm:$0xff]  ;;  %v7165_v8 = vld [vmem:[%s8539_s21 + $0x113] sm:$0xff]  ;;  %v7166_v12 = vld [vmem:[%s8539_s21 + $0x11b] sm:$0x3] }
 0x4dc   : > { %v7156_v3 = vld [vmem:[%s8539_s21 + $0x119] sm:$0x3]  ;;  %v7171_v15 = vld [vmem:[%s8539_s21 + $0x11c] sm:$0x3]  ;;  %v7176_v13 = vld [vmem:[%s8539_s21 + $0x120] sm:$0xff] }
 0x4dd   : > { %7081 = vmatmul.msk.f32.gmra.mxu1 %vm59_vm0, %v7074_v29  ;;  %7106 = vmatmul.msk.f32.vlgmr.msrb.gmra.mxu2 %vm59_vm0, %v7103_v32  ;;  %v7170_v9 = vld [vmem:[%s8539_s21 + $0x114] sm:$0xff]  ;;  %v7186_v16 = vld [vmem:[%s8539_s21 + $0x122] sm:$0xff]  ;;  %v7187_v10 = vld [vmem:[%s8539_s21 + $0x12a] sm:$0x3] }
 0x4de   : > { %7096 = vmatmul.msk.f32.gmra.mxu0 %vm59_vm0, %v7093_v33  ;;  %7111 = vmatmul.msk.f32.vlgmr.msrb.gmra.mxu3 %vm59_vm0, %v7108_v31  ;;  %v7160_v11 = vld [vmem:[%s8539_s21 + $0x112] sm:$0xff]  ;;  %v7161_v14 = vld [vmem:[%s8539_s21 + $0x11a] sm:$0x3]  ;;  %v7177_v17 = vld [vmem:[%s8539_s21 + $0x128] sm:$0x3] }
 0x4df   : > { %4300 = vmatpush.msrb.mxu2 %v7146_v34  ;;  %4339 = vmatpush.msrb.mxu3 %v7152_v35  ;;  %v7191_v0 = vld [vmem:[%s8539_s21 + $0x123] sm:$0xff]  ;;  %v7192_v19 = vld [vmem:[%s8539_s21 + $0x12b] sm:$0x3] }
 0x4e0   : > { %v7181_v18 = vld [vmem:[%s8539_s21 + $0x121] sm:$0xff]  ;;  %v7182_v21 = vld [vmem:[%s8539_s21 + $0x129] sm:$0x3]  ;;  %v7197_v22 = vld [vmem:[%s8539_s21 + $0x12c] sm:$0x3] }
 0x4e1   : > { %v7196_v20 = vld [vmem:[%s8539_s21 + $0x124] sm:$0xff]  ;;  %s6411_s21 = scalar_lea.vmem [#allocation4], %s7072_s15 }
 0x4e5   : > { %7101 = vmatmul.msk.f32.vlgmr.msra.gmra.mxu1 %vm59_vm0, %v7098_v37  ;;  %7107 = vmatmul.msk.f32.gmra.mxu2 %vm59_vm0, %v7104_v40 }
 0x4e6   : > { %7112 = vmatmul.msk.f32.gmra.mxu3 %vm59_vm0, %v7109_v41  ;;  %7116 = vmatmul.msk.f32.vlgmr.msra.gmra.mxu0 %vm59_vm0, %v7113_v38 }
 0x4e7   : > { %4265 = vmatpush.msra.mxu1 %v7141_v36  ;;  %4374 = vmatpush.msra.mxu0 %v7157_v43 }
 0x4ed   : > { %7102 = vmatmul.msk.f32.gmra.mxu1 %vm59_vm0, %v7099_v44  ;;  %7127 = vmatmul.msk.f32.vlgmr.msra.gmra.mxu2 %vm59_vm0, %v7124_v45 }
 0x4ee   : > { %7117 = vmatmul.msk.f32.gmra.mxu0 %vm59_vm0, %v7114_v47  ;;  %7132 = vmatmul.msk.f32.vlgmr.msra.gmra.mxu3 %vm59_vm0, %v7129_v48 }
 0x4ef   : > { %4444 = vmatpush.msra.mxu2 %v7167_v46  ;;  %4479 = vmatpush.msra.mxu3 %v7172_v49 }
 0x4f5   : > { %7121 = vmatmul.msk.f32.vlgmr.msrb.gmra.mxu1 %vm59_vm0, %v7118_v51  ;;  %7128 = vmatmul.msk.f32.gmra.mxu2 %vm59_vm0, %v7125_v53 }
 0x4f6   : > { %7133 = vmatmul.msk.f32.gmra.mxu3 %vm59_vm0, %v7130_v52  ;;  %7137 = vmatmul.msk.f32.vlgmr.msrb.gmra.mxu0 %vm59_vm0, %v7134_v55 }
 0x4f7   : > { %4409 = vmatpush.msrb.mxu1 %v7162_v56  ;;  %4518 = vmatpush.msrb.mxu0 %v7178_v57 }
 0x4fd   : > { %7122 = vmatmul.msk.f32.gmra.mxu1 %vm59_vm0, %v7119_v50  ;;  %7147 = vmatmul.msk.f32.vlgmr.msrb.gmra.mxu2 %vm59_vm0, %v7144_v58 }
 0x4fe   : > { %7138 = vmatmul.msk.f32.gmra.mxu0 %vm59_vm0, %v7135_v59  ;;  %7153 = vmatmul.msk.f32.vlgmr.msrb.gmra.mxu3 %vm59_vm0, %v7150_v60 }
 0x4ff   : > { %4588 = vmatpush.msrb.mxu2 %v7188_v61  ;;  %4623 = vmatpush.msrb.mxu3 %v7193_v62 }
 0x505   : > { %7142 = vmatmul.msk.f32.vlgmr.msra.gmra.mxu1 %vm59_vm0, %v7139_v63  ;;  %7148 = vmatmul.msk.f32.gmra.mxu2 %vm59_vm0, %v7145_v2 }
 0x506   : > { %7154 = vmatmul.msk.f32.gmra.mxu3 %vm59_vm0, %v7151_v4  ;;  %7158 = vmatmul.msk.f32.vlgmr.msra.gmra.mxu0 %vm59_vm0, %v7155_v5 }
 0x507   : > { %4553 = vmatpush.msra.mxu1 %v7183_v1  ;;  %4658 = vmatpush.msra.mxu0 %v7198_v6 }
 0x50d   : > { %7143 = vmatmul.msk.f32.gmra.mxu1 %vm59_vm0, %v7140_v7  ;;  %7168 = vmatmul.msk.f32.vlgmr.msra.gmra.mxu2 %vm59_vm0, %v7165_v8 }
 0x50e   : > { %7159 = vmatmul.msk.f32.gmra.mxu0 %vm59_vm0, %v7156_v3  ;;  %7173 = vmatmul.msk.f32.vlgmr.msra.gmra.mxu3 %vm59_vm0, %v7170_v9 }
 0x515   : > { %7163 = vmatmul.msk.f32.vlgmr.msrb.gmra.mxu1 %vm59_vm0, %v7160_v11  ;;  %7169 = vmatmul.msk.f32.gmra.mxu2 %vm59_vm0, %v7166_v12 }
 0x516   : > { %7174 = vmatmul.msk.f32.gmra.mxu3 %vm59_vm0, %v7171_v15  ;;  %7179 = vmatmul.msk.f32.vlgmr.msrb.gmra.mxu0 %vm59_vm0, %v7176_v13 }
 0x51d   : > { %7164 = vmatmul.msk.f32.gmra.mxu1 %vm59_vm0, %v7161_v14  ;;  %7189 = vmatmul.msk.f32.vlgmr.msrb.gmra.mxu2 %vm59_vm0, %v7186_v16 }
 0x51e   : > { %7180 = vmatmul.msk.f32.gmra.mxu0 %vm59_vm0, %v7177_v17  ;;  %7194 = vmatmul.msk.f32.vlgmr.msrb.gmra.mxu3 %vm59_vm0, %v7191_v0 }
 0x525   : > { %7184 = vmatmul.msk.f32.vlgmr.msra.gmra.mxu1 %vm59_vm0, %v7181_v18  ;;  %7190 = vmatmul.msk.f32.gmra.mxu2 %vm59_vm0, %v7187_v10 }
 0x526   : > { %7195 = vmatmul.msk.f32.gmra.mxu3 %vm59_vm0, %v7192_v19  ;;  %7199 = vmatmul.msk.f32.vlgmr.msra.gmra.mxu0 %vm59_vm0, %v7196_v20 }
 0x52d   : > { %7185 = vmatmul.msk.f32.gmra.mxu1 %vm59_vm0, %v7182_v21 }
 0x52e   : > { %7200 = vmatmul.msk.f32.gmra.mxu0 %vm59_vm0, %v7197_v22 }
 0x54a   : > { %v3815_v23 = vpop.f32.mrf.mxu1 }
 0x54b   : > { %v3812_v25 = vpop.f32.mrf.mxu0 }
 0x550   : > { %v3874_v26 = vpop.f32.mrf.mxu2 }
 0x551   : > { %v3909_v27 = vpop.f32.mrf.mxu3 }
 0x552   : > { %v3841_v28 = vpop.f32.mrf.mxu1 }
 0x553   : > { %v3944_v30 = vpop.f32.mrf.mxu0  ;;  %v3842_v31 = vadd.f32 %v3841_v28, %v3812_v25 }
 0x555   : > { %v3880_v35 = vadd.f32 %v3874_v26, %v3842_v31 }
 0x557   : > { %v3915_v38 = vadd.f32 %v3909_v27, %v3880_v35 }
 0x558   : > { %v3877_v24 = vpop.f32.mrf.mxu2 }
 0x559   : > { %v3912_v29 = vpop.f32.mrf.mxu3  ;;  %v3950_v44 = vadd.f32 %v3944_v30, %v3915_v38 }
 0x55a   : > { %v3844_v32 = vpop.f32.mrf.mxu1 }
 0x55b   : > { %v3947_v33 = vpop.f32.mrf.mxu0  ;;  %v3845_v36 = vadd.f32 %v3844_v32, %v3815_v23 }
 0x55d   : > { %v3881_v45 = vadd.f32 %v3877_v24, %v3845_v36 }
 0x55f   : > { %v3916_v51 = vadd.f32 %v3912_v29, %v3881_v45 }
 0x560   : > { %v4018_v34 = vpop.f32.mrf.mxu2 }
 0x561   : > { %v4053_v37 = vpop.f32.mrf.mxu3  ;;  %v3951_v55 = vadd.f32 %v3947_v33, %v3916_v51 }
 0x562   : > { %v3983_v40 = vpop.f32.mrf.mxu1 }
 0x563   : > { %v4088_v41 = vpop.f32.mrf.mxu0  ;;  %v3989_v46 = vadd.f32 %v3983_v40, %v3950_v44 }
 0x565   : > { %v4024_v53 = vadd.f32 %v4018_v34, %v3989_v46 }
 0x567   : > { %v4059_v50 = vadd.f32 %v4053_v37, %v4024_v53 }
 0x568   : > { %v4021_v43 = vpop.f32.mrf.mxu2 }
 0x569   : > { %v4056_v47 = vpop.f32.mrf.mxu3  ;;  %v4094_v60 = vadd.f32 %v4088_v41, %v4059_v50 }
 0x56a   : > { %v3986_v48 = vpop.f32.mrf.mxu1 }
 0x56b   : > { %v4091_v49 = vpop.f32.mrf.mxu0  ;;  %v3990_v58 = vadd.f32 %v3986_v48, %v3951_v55 }
 0x56d   : > { %v4025_v61 = vadd.f32 %v4021_v43, %v3990_v58 }
 0x56f   : > { %v4060_v5 = vadd.f32 %v4056_v47, %v4025_v61 }
 0x570   : > { %v4162_v52 = vpop.f32.mrf.mxu2 }
 0x571   : > { %v4197_v56 = vpop.f32.mrf.mxu3  ;;  %v4095_v7 = vadd.f32 %v4091_v49, %v4060_v5 }
 0x572   : > { %v4123_v57 = vpop.f32.mrf.mxu1 }
 0x573   : > { %v4232_v59 = vpop.f32.mrf.mxu0  ;;  %v4129_v63 = vadd.f32 %v4123_v57, %v4094_v60 }
 0x575   : > { %v4168_v6 = vadd.f32 %v4162_v52, %v4129_v63 }
 0x577   : > { %v4203_v3 = vadd.f32 %v4197_v56, %v4168_v6 }
 0x578   : > { %v4165_v62 = vpop.f32.mrf.mxu2 }
 0x579   : > { %v4200_v2 = vpop.f32.mrf.mxu3  ;;  %v4238_v13 = vadd.f32 %v4232_v59, %v4203_v3 }
 0x57a   : > { %v4126_v4 = vpop.f32.mrf.mxu1 }
 0x57b   : > { %v4235_v1 = vpop.f32.mrf.mxu0  ;;  %v4130_v9 = vadd.f32 %v4126_v4, %v4095_v7 }
 0x57d   : > { %v4169_v14 = vadd.f32 %v4165_v62, %v4130_v9 }
 0x57f   : > { %v4204_v0 = vadd.f32 %v4200_v2, %v4169_v14 }
 0x580   : > { %v4302_v8 = vpop.f32.mrf.mxu2 }
 0x581   : > { %v4341_v11 = vpop.f32.mrf.mxu3  ;;  %v4239_v21 = vadd.f32 %v4235_v1, %v4204_v0 }
 0x582   : > { %v4267_v12 = vpop.f32.mrf.mxu1 }
 0x583   : > { %v4376_v15 = vpop.f32.mrf.mxu0  ;;  %v4273_v16 = vadd.f32 %v4267_v12, %v4238_v13 }
 0x585   : > { %v4308_v19 = vadd.f32 %v4302_v8, %v4273_v16 }
 0x587   : > { %v4347_v22 = vadd.f32 %v4341_v11, %v4308_v19 }
 0x588   : > { %v4305_v17 = vpop.f32.mrf.mxu2 }
 0x589   : > { %v4344_v18 = vpop.f32.mrf.mxu3  ;;  %v4382_v28 = vadd.f32 %v4376_v15, %v4347_v22 }
 0x58a   : > { %v4270_v10 = vpop.f32.mrf.mxu1 }
 0x58b   : > { %v4379_v20 = vpop.f32.mrf.mxu0  ;;  %v4274_v23 = vadd.f32 %v4270_v10, %v4239_v21 }
 0x58d   : > { %v4309_v30 = vadd.f32 %v4305_v17, %v4274_v23 }
 0x58f   : > { %v4348_v32 = vadd.f32 %v4344_v18, %v4309_v30 }
 0x590   : > { %v4446_v25 = vpop.f32.mrf.mxu2 }
 0x591   : > { %v4481_v26 = vpop.f32.mrf.mxu3  ;;  %v4383_v37 = vadd.f32 %v4379_v20, %v4348_v32 }
 0x592   : > { %v4411_v27 = vpop.f32.mrf.mxu1 }
 0x593   : > { %v4520_v24 = vpop.f32.mrf.mxu0  ;;  %v4417_v29 = vadd.f32 %v4411_v27, %v4382_v28 }
 0x595   : > { %v4452_v31 = vadd.f32 %v4446_v25, %v4417_v29 }
 0x597   : > { %v4487_v41 = vadd.f32 %v4481_v26, %v4452_v31 }
 0x598   : > { %v4449_v33 = vpop.f32.mrf.mxu2 }
 0x599   : > { %v4484_v34 = vpop.f32.mrf.mxu3  ;;  %v4526_v43 = vadd.f32 %v4520_v24, %v4487_v41 }
 0x59a   : > { %v4414_v35 = vpop.f32.mrf.mxu1 }
 0x59b   : > { %v4523_v40 = vpop.f32.mrf.mxu0  ;;  %v4418_v38 = vadd.f32 %v4414_v35, %v4383_v37 }
 0x59d   : > { %v4453_v44 = vadd.f32 %v4449_v33, %v4418_v38 }
 0x59f   : > { %v4488_v49 = vadd.f32 %v4484_v34, %v4453_v44 }
 0x5a0   : > { %v4590_v36 = vpop.f32.mrf.mxu2 }
 0x5a1   : > { %v4625_v47 = vpop.f32.mrf.mxu3  ;;  %v4527_v52 = vadd.f32 %v4523_v40, %v4488_v49 }
 0x5a2   : > { %v4555_v45 = vpop.f32.mrf.mxu1 }
 0x5a3   : > { %v4561_v48 = vadd.f32 %v4555_v45, %v4526_v43  ;;  %v4660_v46 = vpop.f32.mrf.mxu0 }
 0x5a5   : > { %v4596_v51 = vadd.f32 %v4590_v36, %v4561_v48 }
 0x5a7   : > { %v4631_v53 = vadd.f32 %v4625_v47, %v4596_v51 }
 0x5a8   : > { %v4593_v57 = vpop.f32.mrf.mxu2 }
 0x5a9   : > { %v4666_v55 = vadd.f32 %v4660_v46, %v4631_v53  ;;  %v4628_v59 = vpop.f32.mrf.mxu3 }
 0x5aa   : > { %v4558_v56 = vpop.f32.mrf.mxu1 }
 0x5ab   : > { %v4671_v50 = vadd.f32 %v4666_v55, %v8493_v54  ;;  %v4562_v58 = vadd.f32 %v4558_v56, %v4527_v52  ;;  %v4663_v62 = vpop.f32.mrf.mxu0 }
 0x5ad   : > { %v4673_v60 = vmax.f32 %v4671_v50, 0.0  ;;  %v4597_v61 = vadd.f32 %v4593_v57, %v4562_v58 }
 0x5af   : > { %7202 = vst.msk [vmem:[%s6411_s21 + $0xa0] sm:$0xff] %vm3768_vm9, %v4673_v60  ;;  %v4632_v63 = vadd.f32 %v4628_v59, %v4597_v61 }
 0x5b1   : > { %v4667_v2 = vadd.f32 %v4663_v62, %v4632_v63 }
 0x5b3   : > { %v4672_v4 = vadd.f32 %v4667_v2, %v8493_v54  ;;  %3776 = sbr.rel (!%p3774_p5) target bundleno = 1224 (0x4c8), region = 342 }
 0x5b5   : > { %v4674_v5 = vmax.f32 %v4672_v4, 0.0 }
 0x5b7   : > { %7203 = vst.msk [vmem:[%s6411_s21 + $0xa8] sm:$0x3] %vm3770_vm10, %v4674_v5 }
 0x5b8 LB: > { %s7377_s15 = sshll.u32 %s7556_s29, 5  ;;  %vm4703_vm11 = vcmask 1041408   ;;  %vm4699_vm12 = vcmask 80896   ;;  %s7214_s3 = sshll.u32 %s7556_s29, 3  ;;  %vm4753_vm13 = vcmask 126976   ;;  %s7556_s29 = sphi %s8698_s29, %s4686_s29  }
 0x5b9   : > { %s4689_s14 = scalar_lea.vmem [#allocation4], %s7377_s15  ;;  %s4752_s0 = scalar_lea.vmem [#allocation5], %s7214_s3 }
 0x5ba   : > { %s4686_s29 = sadd.s32 1, %s7556_s29  }
 0x5bb   : > { %p4683_p6 = scmp.ge.s32.totalorder %s4686_s29, 5  }
 0x5bc   :  { %s7558_s16 = smov (%p4683_p6), 0  }
 0x5be   : > { %v4691_v1 = vld [vmem:[%s4689_s14 + $0x8] sm:$0x3]  ;;  %v7209_v6 = vld [vmem:[%s4689_s14 + $0x18] sm:$0x3]  ;;  %v4690_v7 = vld [vmem:[%s4689_s14] sm:$0xff] }
 0x5bf   : > { %v4698_v8 = vmax.f32 %v4691_v1, %v7209_v6  ;;  %v7208_v3 = vld [vmem:[%s4689_s14 + $0x10] sm:$0xff] }
 0x5c0   : > { %v4697_v9 = vmax.f32 %v4690_v7, %v7208_v3 }
 0x5c1   : > { %7210 = vmatpush.msk.msra.mxu0 %vm4703_vm11, %v4698_v8  ;;  %7212 = vmatpush.msk.msra.mxu1 %vm4703_vm11, %v4698_v8 }
 0x5c3   : > { %4722 = vmatpush.msra.mxu0 %v4697_v9  ;;  %4745 = vmatpush.msra.mxu1 %v4697_v9 }
 0x5c4   : > { %7211 = vmatmul.msk.f32.vlgmr.msra.gmra.mxu0 %vm4699_vm12, %v8246_v39  ;;  %7213 = vmatmul.msk.f32.vlgmr.msra.gmra.mxu1 %vm4699_vm12, %v8250_v42 }
 0x640   :  { %4685 = sbr.rel (!%p4683_p6) target bundleno = 1464 (0x5b8), region = 353 }
 0x641   : > { %v4724_v54 = vpop.f32.mrf.mxu0  ;;  %v4747_v11 = vpop.f32.mrf.mxu1 }
 0x642   : > { %v4750_v12 = vmax.f32 %v4724_v54, %v4747_v11 }
 0x644   : > { %4754 = vst.msk [vmem:[%s4752_s0] sm:$0x1f] %vm4753_vm13, %v4750_v12 }
 0x645 LB: > { %s7215_s17 = sshll.u32 %s7560_s16, 5  ;;  %s7226_s4 = sshll.u32 %s7560_s16, 3  ;;  %s7560_s16 = sphi %s7558_s16, %s4760_s16  }
 0x646   : > { %s6422_s18 = scalar_lea.vmem [#allocation4], %s7215_s17  ;;  %s6429_s20 = scalar_lea.vmem [#allocation5], %s7226_s4 }
 0x647   : > { %v7217_v15 = vld [vmem:[%s6422_s18 + $0xa8] sm:$0x3]  ;;  %v7221_v13 = vld [vmem:[%s6422_s18 + $0xb8] sm:$0x3]  ;;  %v7216_v14 = vld [vmem:[%s6422_s18 + $0xa0] sm:$0xff]  ;;  %s4760_s16 = sadd.s32 1, %s7560_s16  }
 0x648   : > { %v4774_v16 = vmax.f32 %v7217_v15, %v7221_v13  ;;  %v7220_v17 = vld [vmem:[%s6422_s18 + $0xb0] sm:$0xff]  ;;  %p4757_p7 = scmp.ge.s32.totalorder %s4760_s16, 5  }
 0x649   : > { %v4773_v0 = vmax.f32 %v7216_v14, %v7220_v17  ;;  %v8720_v20 = vld [vmem:[%s9234_s5 + $0x18] sm:$0xff] (%p4757_p7)  ;;  %v8725_v21 = vld [vmem:[%s9234_s5 + $0x8] sm:$0xff] (%p4757_p7)  ;;  %v8730_v22 = vld [vmem:[%s9234_s5 + $0x10] sm:$0xff] (%p4757_p7)  ;;  %s7563_s0 = smov (%p4757_p7), [#allocation7]   ;;  %s6318_s4 = sshll.u32 (%p4757_p7), %s9240_s11, 4  ;;  %s6319_s4 = int_to_ptr.hbm [resolvable:$true] %s6318_s4 }
 0x64a   : > { %7222 = vmatpush.msk.msra.mxu0 %vm4703_vm11, %v4774_v16  ;;  %7224 = vmatpush.msk.msra.mxu1 %vm4703_vm11, %v4774_v16  ;;  %v8742_v25 = vld [vmem:[%s9234_s5 + $0x28] sm:$0xff] (%p4757_p7)  ;;  %v8747_v26 = vld [vmem:[%s9234_s5 + $0x38] sm:$0xff] (%p4757_p7)  ;;  %v8756_v27 = vld [vmem:[%s9234_s5 + $0x20] sm:$0xff] (%p4757_p7)  ;;  %s6316_s16 = sshll.u32 (%p4757_p7), %s7563_s0, 4  ;;  %s6317_s16 = int_to_ptr.vmem [resolvable:$true] %s6316_s16 }
 0x64b   :  { %v8761_v28 = vld [vmem:[%s9234_s5 + $0x30] sm:$0xff] (%p4757_p7)  ;;  %v8766_v30 = vld [vmem:[%s9234_s5 + $0x68] sm:$0xff] (%p4757_p7)  ;;  %v8778_v29 = vld [vmem:[%s9234_s5 + $0x58] sm:$0xff] (%p4757_p7) }
 0x64c   : > { %4798 = vmatpush.msra.mxu0 %v4773_v0  ;;  %4821 = vmatpush.msra.mxu1 %v4773_v0  ;;  %v8773_v24 = vld [vmem:[%s9234_s5 + $0x48] sm:$0xff] (%p4757_p7)  ;;  %v8783_v32 = vld [vmem:[%s9234_s5 + $0x78] sm:$0xff] (%p4757_p7)  ;;  %v8789_v33 = vld [vmem:[%s9234_s5 + $0x60] sm:$0xff] (%p4757_p7) }
 0x64d   : > { %7223 = vmatmul.msk.f32.vlgmr.msra.gmra.mxu0 %vm4699_vm12, %v8246_v39  ;;  %7225 = vmatmul.msk.f32.vlgmr.msra.gmra.mxu1 %vm4699_vm12, %v8250_v42  ;;  %v8737_v39 = vld [vmem:[%s9234_s5] sm:$0xff] (%p4757_p7)  ;;  %v8795_v31 = vld [vmem:[%s9234_s5 + $0x70] sm:$0xff] (%p4757_p7)  ;;  %v8818_v36 = vld [vmem:[%s9234_s5 + $0xa8] sm:$0xff] (%p4757_p7) }
 0x64e   :  { %4858 = vmatpush.msra.mxu0 (%p4757_p7), %v8720_v20  ;;  %4881 = vmatpush.msra.mxu1 (%p4757_p7), %v8725_v21  ;;  %v8802_v34 = vld [vmem:[%s9234_s5 + $0x40] sm:$0xff] (%p4757_p7)  ;;  %v8809_v37 = vld [vmem:[%s9234_s5 + $0x50] sm:$0xff] (%p4757_p7)  ;;  %v8823_v43 = vld [vmem:[%s9234_s5 + $0x88] sm:$0xff] (%p4757_p7) }
 0x64f   :  { %5021 = vmatpush.msra.mxu2 (%p4757_p7), %v8766_v30  ;;  %5049 = vmatpush.msra.mxu3 (%p4757_p7), %v8783_v32  ;;  %v8830_v44 = vld [vmem:[%s9234_s5 + $0xb8] sm:$0xff] (%p4757_p7)  ;;  %v8842_v47 = vld [vmem:[%s9234_s5 + $0xa0] sm:$0xff] (%p4757_p7)  ;;  %v8854_v46 = vld [vmem:[%s9234_s5 + $0xb0] sm:$0xff] (%p4757_p7) }
 0x650   :  { %4859 = vmatpush.msra.mxu0 (%p4757_p7), %v8730_v22  ;;  %4882 = vmatpush.msra.mxu1 (%p4757_p7), %v8737_v39  ;;  %v8835_v45 = vld [vmem:[%s9234_s5 + $0x98] sm:$0xff] (%p4757_p7)  ;;  %v8847_v48 = vld [vmem:[%s9234_s5 + $0x80] sm:$0xff] (%p4757_p7)  ;;  %v8859_v49 = vld [vmem:[%s9234_s5 + $0x90] sm:$0xff] (%p4757_p7) }
 0x651   :  { %5022 = vmatpush.msra.mxu2 (%p4757_p7), %v8789_v33  ;;  %5050 = vmatpush.msra.mxu3 (%p4757_p7), %v8795_v31  ;;  %v8866_v51 = vld [vmem:[%s9234_s5 + $0xe8] sm:$0xff] (%p4757_p7)  ;;  %v8871_v53 = vld [vmem:[%s9234_s5 + $0xf8] sm:$0xff] (%p4757_p7)  ;;  %v8880_v56 = vld [vmem:[%s9234_s5 + $0xe0] sm:$0xff] (%p4757_p7) }
 0x652   :  { %4908 = vmatpush.msrb.mxu0 (%p4757_p7), %v8742_v25  ;;  %4936 = vmatpush.msrb.mxu1 (%p4757_p7), %v8747_v26  ;;  %v8888_v58 = vld [vmem:[%s9234_s5 + $0xc8] sm:$0xff] (%p4757_p7)  ;;  %v8893_v59 = vld [vmem:[%s9234_s5 + $0xd8] sm:$0xff] (%p4757_p7)  ;;  %v8900_v60 = vld [vmem:[%s9234_s5 + $0xf0] sm:$0xff] (%p4757_p7) }
 0x653   :  { %5134 = vmatpush.msrb.mxu2 (%p4757_p7), %v8818_v36  ;;  %5162 = vmatpush.msrb.mxu3 (%p4757_p7), %v8830_v44  ;;  %v8905_v61 = vld [vmem:[%s9234_s5 + $0x128] sm:$0xff] (%p4757_p7)  ;;  %v8912_v62 = vld [vmem:[%s9234_s5 + $0xc0] sm:$0xff] (%p4757_p7)  ;;  %v8917_v63 = vld [vmem:[%s9234_s5 + $0xd0] sm:$0xff] (%p4757_p7) }
 0x654   :  { %4909 = vmatpush.msrb.mxu0 (%p4757_p7), %v8756_v27  ;;  %4937 = vmatpush.msrb.mxu1 (%p4757_p7), %v8761_v28  ;;  %v8924_v2 = vld [vmem:[%s9234_s5 + $0x138] sm:$0xff] (%p4757_p7)  ;;  %v8929_v4 = vld [vmem:[%s9234_s5 + $0x120] sm:$0xff] (%p4757_p7)  ;;  %v8938_v1 = vld [vmem:[%s9234_s5 + $0x130] sm:$0xff] (%p4757_p7) }
 0x655   :  { %5135 = vmatpush.msrb.mxu2 (%p4757_p7), %v8842_v47  ;;  %5163 = vmatpush.msrb.mxu3 (%p4757_p7), %v8854_v46  ;;  %v8945_v7 = vld [vmem:[%s9234_s5 + $0x168] sm:$0xff] (%p4757_p7)  ;;  %v8956_v54 = vld [vmem:[%s9234_s5 + $0x118] sm:$0xff] (%p4757_p7)  ;;  %v8969_v12 = vld [vmem:[%s9234_s5 + $0x160] sm:$0xff] (%p4757_p7) }
 0x656   :  { %v8951_v9 = vld [vmem:[%s9234_s5 + $0x108] sm:$0xff] (%p4757_p7)  ;;  %v8964_v11 = vld [vmem:[%s9234_s5 + $0x178] sm:$0xff] (%p4757_p7)  ;;  %v8976_v15 = vld [vmem:[%s9234_s5 + $0x100] sm:$0xff] (%p4757_p7) }
 0x657   :  { %v8981_v13 = vld [vmem:[%s9234_s5 + $0x110] sm:$0xff] (%p4757_p7) }
 0x658   :  { %v8988_v14 = vld [vmem:[%s9234_s5 + $0x170] sm:$0xff] (%p4757_p7) }
 0x6c9   :  { %4759 = sbr.rel (!%p4757_p7) target bundleno = 1605 (0x645), region = 364 }
 0x6ca   : > { %v4800_v18 = vpop.f32.mrf.mxu0  ;;  %v4823_v10 = vpop.f32.mrf.mxu1 }
 0x6cb   : > { %v4826_v19 = vmax.f32 %v4800_v18, %v4823_v10  ;;  %v8999_v10 = vld [vmem:[%s9234_s5 + $0x148] sm:$0xff] (%p4757_p7) }
 0x6cd   : > { %7227 = vst.msk [vmem:[%s6429_s20 + $0x28] sm:$0x1f] %vm4753_vm13, %v4826_v19  ;;  %v9004_v19 = vld [vmem:[%s9234_s5 + $0x158] sm:$0xff] (%p4757_p7) }
 0x6d4   :  { %v4836_v42 = vld [vmem:[#allocation5 + $0x1] sm:$0x1]  ;;  %v4833_v23 = vld [vmem:[#allocation5] sm:$0x1]  ;;  %v5000_v35 = vld [vmem:[#allocation5 + $0x9] sm:$0x1] }
 0x6d5   :  { %7230 = vmatmul.msk.f32.vlgmr.msra.gmra.mxu0 %vm3768_vm9, %v4836_v42  ;;  %7231 = vmatmul.msk.f32.vlgmr.msra.gmra.mxu1 %vm3768_vm9, %v4833_v23  ;;  %v5028_v40 = vld [vmem:[#allocation5 + $0xa] sm:$0x1]  ;;  %v4887_v41 = vld [vmem:[#allocation5 + $0x2] sm:$0x1]  ;;  %v4915_v38 = vld [vmem:[#allocation5 + $0x3] sm:$0x1] }
 0x6d6   :  { %4964 = vmatpush.msra.mxu0 %v8773_v24  ;;  %4993 = vmatpush.msra.mxu1 %v8778_v29  ;;  %v5113_v52 = vld [vmem:[#allocation5 + $0x10] sm:$0x1]  ;;  %v5141_v55 = vld [vmem:[#allocation5 + $0x11] sm:$0x1]  ;;  %v4943_v57 = vld [vmem:[#allocation5 + $0x4] sm:$0x1] }
 0x6d7   :  { %7246 = vmatmul.msk.f32.vlgmr.msra.gmra.mxu2 %vm3768_vm9, %v5000_v35  ;;  %7249 = vmatmul.msk.f32.vlgmr.msra.gmra.mxu3 %vm3768_vm9, %v5028_v40  ;;  %v4972_v50 = vld [vmem:[#allocation5 + $0x8] sm:$0x1]  ;;  %v5225_v5 = vld [vmem:[#allocation5 + $0x14] sm:$0x1]  ;;  %v5254_v6 = vld [vmem:[#allocation5 + $0x18] sm:$0x1] }
 0x6d8   :  { %4965 = vmatpush.msra.mxu0 %v8802_v34  ;;  %4994 = vmatpush.msra.mxu1 %v8809_v37  ;;  %v5056_v8 = vld [vmem:[#allocation5 + $0xb] sm:$0x1]  ;;  %v5084_v3 = vld [vmem:[#allocation5 + $0xc] sm:$0x1]  ;;  %v5338_v16 = vld [vmem:[#allocation5 + $0x1b] sm:$0x1] }
 0x6d9   :  { %5246 = vmatpush.msra.mxu2 %v8866_v51  ;;  %5275 = vmatpush.msra.mxu3 %v8871_v53  ;;  %v5366_v17 = vld [vmem:[#allocation5 + $0x1c] sm:$0x1]  ;;  %v5169_v0 = vld [vmem:[#allocation5 + $0x12] sm:$0x1]  ;;  %v5197_v18 = vld [vmem:[#allocation5 + $0x13] sm:$0x1] }
 0x6da   :  { %v9013_v42 = vld [vmem:[%s9234_s5 + $0x140] sm:$0xff]  ;;  %v9018_v23 = vld [vmem:[%s9234_s5 + $0x150] sm:$0xff]  ;;  %v5479_v35 = vld [vmem:[#allocation5 + $0x23] sm:$0x1] }
 0x6db   :  { %5247 = vmatpush.msra.mxu2 %v8880_v56  ;;  %5276 = vmatpush.msra.mxu3 %v8900_v60  ;;  %v5282_v40 = vld [vmem:[#allocation5 + $0x19] sm:$0x1] }
 0x6dd   :  { %7234 = vmatmul.msk.f32.vlgmr.msrb.gmra.mxu0 %vm3768_vm9, %v4887_v41  ;;  %7237 = vmatmul.msk.f32.vlgmr.msrb.gmra.mxu1 %vm3768_vm9, %v4915_v38  ;;  %v5310_v41 = vld [vmem:[#allocation5 + $0x1a] sm:$0x1]  ;;  %v9031_v38 = vld [vmem:[%s9234_s5 + $0x188] sm:$0xff] }
 0x6de   :  { %5077 = vmatpush.msrb.mxu0 %v8823_v43  ;;  %5105 = vmatpush.msrb.mxu1 %v8835_v45 }
 0x6df   :  { %7258 = vmatmul.msk.f32.vlgmr.msrb.gmra.mxu2 %vm3768_vm9, %v5113_v52  ;;  %7261 = vmatmul.msk.f32.vlgmr.msrb.gmra.mxu3 %vm3768_vm9, %v5141_v55  ;;  %v5423_v52 = vld [vmem:[#allocation5 + $0x21] sm:$0x1]  ;;  %v6081_v55 = vld [vmem:[#allocation5 + $0x48] sm:$0x1] }
 0x6e0   :  { %5078 = vmatpush.msrb.mxu0 %v8847_v48  ;;  %5106 = vmatpush.msrb.mxu1 %v8859_v49 }
 0x6e1   :  { %5359 = vmatpush.msrb.mxu2 %v8905_v61  ;;  %5387 = vmatpush.msrb.mxu3 %v8924_v2 }
 0x6e3   :  { %5360 = vmatpush.msrb.mxu2 %v8929_v4  ;;  %5388 = vmatpush.msrb.mxu3 %v8938_v1 }
 0x6e5   :  { %7240 = vmatmul.msk.f32.vlgmr.msra.gmra.mxu0 %vm3768_vm9, %v4943_v57  ;;  %7243 = vmatmul.msk.f32.vlgmr.msra.gmra.mxu1 %vm3768_vm9, %v4972_v50  ;;  %v6189_v57 = vld [vmem:[#allocation5 + $0x4c] sm:$0x1] }
 0x6e6   :  { %5190 = vmatpush.msra.mxu0 %v8888_v58  ;;  %5218 = vmatpush.msra.mxu1 %v8893_v59 }
 0x6e7   :  { %7270 = vmatmul.msk.f32.vlgmr.msra.gmra.mxu2 %vm3768_vm9, %v5225_v5  ;;  %7273 = vmatmul.msk.f32.vlgmr.msra.gmra.mxu3 %vm3768_vm9, %v5254_v6 }
 0x6e8   :  { %5191 = vmatpush.msra.mxu0 %v8912_v62  ;;  %5219 = vmatpush.msra.mxu1 %v8917_v63 }
 0x6e9   :  { %5472 = vmatpush.msra.mxu2 %v8945_v7  ;;  %5500 = vmatpush.msra.mxu3 %v8964_v11 }
 0x6eb   :  { %5473 = vmatpush.msra.mxu2 %v8969_v12  ;;  %5501 = vmatpush.msra.mxu3 %v8988_v14 }
 0x6ed   :  { %7252 = vmatmul.msk.f32.vlgmr.msrb.gmra.mxu0 %vm3768_vm9, %v5056_v8  ;;  %7255 = vmatmul.msk.f32.vlgmr.msrb.gmra.mxu1 %vm3768_vm9, %v5084_v3 }
 0x6ee   :  { %5303 = vmatpush.msrb.mxu0 %v8951_v9  ;;  %5331 = vmatpush.msrb.mxu1 %v8956_v54 }
 0x6ef   :  { %7282 = vmatmul.msk.f32.vlgmr.msrb.gmra.mxu2 %vm3768_vm9, %v5338_v16  ;;  %7285 = vmatmul.msk.f32.vlgmr.msrb.gmra.mxu3 %vm3768_vm9, %v5366_v17 }
 0x6f0   :  { %5304 = vmatpush.msrb.mxu0 %v8976_v15  ;;  %5332 = vmatpush.msrb.mxu1 %v8981_v13 }
 0x6f1   :  { %5585 = vmatpush.msrb.mxu2 %v8725_v21  ;;  %5611 = vmatpush.msrb.mxu3 %v8742_v25  ;;  %v5451_v21 = vld [vmem:[#allocation5 + $0x22] sm:$0x1]  ;;  %v5539_v25 = vld [vmem:[#allocation5 + $0x28] sm:$0x1] }
 0x6f3   :  { %5586 = vmatpush.msrb.mxu2 %v8737_v39  ;;  %5612 = vmatpush.msrb.mxu3 %v8756_v27  ;;  %v9040_v39 = vld [vmem:[%s9234_s5 + $0x180] sm:$0xff]  ;;  %v5591_v27 = vld [vmem:[#allocation5 + $0x2a] sm:$0x1] }
 0x6f5   :  { %7264 = vmatmul.msk.f32.vlgmr.msra.gmra.mxu0 %vm3768_vm9, %v5169_v0  ;;  %7267 = vmatmul.msk.f32.vlgmr.msra.gmra.mxu1 %vm3768_vm9, %v5197_v18 }
 0x6f6   :  { %5416 = vmatpush.msra.mxu0 %v8999_v10  ;;  %5444 = vmatpush.msra.mxu1 %v9004_v19 }
 0x6f7   :  { %7294 = vmatmul.msk.f32.vlgmr.msra.gmra.mxu2 %vm3768_vm9, %v5451_v21  ;;  %7297 = vmatmul.msk.f32.vlgmr.msra.gmra.mxu3 %vm3768_vm9, %v5479_v35 }
 0x6f8   :  { %5417 = vmatpush.msra.mxu0 %v9013_v42  ;;  %5445 = vmatpush.msra.mxu1 %v9018_v23 }
 0x6f9   :  { %5693 = vmatpush.msra.mxu2 %v8778_v29  ;;  %5720 = vmatpush.msra.mxu3 %v8766_v30  ;;  %v5395_v29 = vld [vmem:[#allocation5 + $0x20] sm:$0x1]  ;;  %v5507_v30 = vld [vmem:[#allocation5 + $0x24] sm:$0x1] }
 0x6fb   :  { %5694 = vmatpush.msra.mxu2 %v8809_v37  ;;  %5721 = vmatpush.msra.mxu3 %v8789_v33  ;;  %v5542_v33 = vld [vmem:[#allocation5 + $0x29] sm:$0x1]  ;;  %v5727_v37 = vld [vmem:[#allocation5 + $0x32] sm:$0x1] }
 0x6fd   :  { %7276 = vmatmul.msk.f32.vlgmr.msrb.gmra.mxu0 %vm3768_vm9, %v5282_v40  ;;  %7279 = vmatmul.msk.f32.vlgmr.msrb.gmra.mxu1 %vm3768_vm9, %v5310_v41 }
 0x6fe   :  { %5528 = vmatpush.msrb.mxu0 %v9031_v38  ;;  %5562 = vmatpush.msrb.mxu1 %v8720_v20  ;;  %v5673_v20 = vld [vmem:[#allocation5 + $0x30] sm:$0x1] }
 0x6ff   :  { %7304 = vmatmul.msk.f32.vlgmr.msrb.gmra.mxu2 %vm3768_vm9, %v5539_v25  ;;  %7307 = vmatmul.msk.f32.vlgmr.msrb.gmra.mxu3 %vm3768_vm9, %v5591_v27 }
 0x700   :  { %5529 = vmatpush.msrb.mxu0 %v9040_v39  ;;  %5563 = vmatpush.msrb.mxu1 %v8730_v22  ;;  %v5700_v22 = vld [vmem:[#allocation5 + $0x31] sm:$0x1] }
 0x701   :  { %5801 = vmatpush.msrb.mxu2 %v8835_v45  ;;  %5829 = vmatpush.msrb.mxu3 %v8818_v36  ;;  %v5754_v36 = vld [vmem:[#allocation5 + $0x33] sm:$0x1]  ;;  %v5836_v45 = vld [vmem:[#allocation5 + $0x39] sm:$0x1] }
 0x703   :  { %5802 = vmatpush.msrb.mxu2 %v8859_v49  ;;  %5830 = vmatpush.msrb.mxu3 %v8842_v47  ;;  %v5863_v47 = vld [vmem:[#allocation5 + $0x3a] sm:$0x1]  ;;  %v5945_v49 = vld [vmem:[#allocation5 + $0x40] sm:$0x1] }
 0x705   :  { %7288 = vmatmul.msk.f32.vlgmr.msra.gmra.mxu0 %vm3768_vm9, %v5395_v29  ;;  %7291 = vmatmul.msk.f32.vlgmr.msra.gmra.mxu1 %vm3768_vm9, %v5423_v52 }
 0x706   :  { %5638 = vmatpush.msra.mxu0 %v8747_v26  ;;  %5665 = vmatpush.msra.mxu1 %v8773_v24  ;;  %v5781_v26 = vld [vmem:[#allocation5 + $0x34] sm:$0x1]  ;;  %v5618_v24 = vld [vmem:[#allocation5 + $0x2b] sm:$0x1] }
 0x707   :  { %7316 = vmatmul.msk.f32.vlgmr.msra.gmra.mxu2 %vm3768_vm9, %v5673_v20  ;;  %7319 = vmatmul.msk.f32.vlgmr.msra.gmra.mxu3 %vm3768_vm9, %v5700_v22 }
 0x708   :  { %5639 = vmatpush.msra.mxu0 %v8761_v28  ;;  %5666 = vmatpush.msra.mxu1 %v8802_v34  ;;  %v5809_v28 = vld [vmem:[#allocation5 + $0x38] sm:$0x1]  ;;  %v5645_v34 = vld [vmem:[#allocation5 + $0x2c] sm:$0x1] }
 0x709   :  { %5910 = vmatpush.msra.mxu2 %v8893_v59  ;;  %5937 = vmatpush.msra.mxu3 %v8866_v51  ;;  %v5972_v51 = vld [vmem:[#allocation5 + $0x41] sm:$0x1] }
 0x70b   :  { %5911 = vmatpush.msra.mxu2 %v8917_v63  ;;  %5938 = vmatpush.msra.mxu3 %v8880_v56  ;;  %v6162_v56 = vld [vmem:[#allocation5 + $0x4b] sm:$0x1] }
 0x70d   :  { %7300 = vmatmul.msk.f32.vlgmr.msrb.gmra.mxu0 %vm3768_vm9, %v5507_v30  ;;  %7303 = vmatmul.msk.f32.vlgmr.msrb.gmra.mxu1 %vm3768_vm9, %v5542_v33 }
 0x70e   :  { %5747 = vmatpush.msrb.mxu0 %v8783_v32  ;;  %5774 = vmatpush.msrb.mxu1 %v8823_v43  ;;  %v5890_v32 = vld [vmem:[#allocation5 + $0x3b] sm:$0x1]  ;;  %v5999_v43 = vld [vmem:[#allocation5 + $0x42] sm:$0x1] }
 0x70f   :  { %7328 = vmatmul.msk.f32.vlgmr.msrb.gmra.mxu2 %vm3768_vm9, %v5781_v26  ;;  %7331 = vmatmul.msk.f32.vlgmr.msrb.gmra.mxu3 %vm3768_vm9, %v5809_v28 }
 0x710   :  { %5748 = vmatpush.msrb.mxu0 %v8795_v31  ;;  %5775 = vmatpush.msrb.mxu1 %v8847_v48  ;;  %v5917_v31 = vld [vmem:[#allocation5 + $0x3c] sm:$0x1]  ;;  %v6108_v48 = vld [vmem:[#allocation5 + $0x49] sm:$0x1] }
 0x711   :  { %6019 = vmatpush.msrb.mxu2 %v8956_v54  ;;  %6046 = vmatpush.msrb.mxu3 %v8905_v61 }
 0x713   :  { %6020 = vmatpush.msrb.mxu2 %v8981_v13  ;;  %6047 = vmatpush.msrb.mxu3 %v8929_v4 }
 0x715   :  { %7310 = vmatmul.msk.f32.vlgmr.msra.gmra.mxu0 %vm3768_vm9, %v5618_v24  ;;  %7313 = vmatmul.msk.f32.vlgmr.msra.gmra.mxu1 %vm3768_vm9, %v5645_v34 }
 0x716   :  { %5856 = vmatpush.msra.mxu0 %v8830_v44  ;;  %5883 = vmatpush.msra.mxu1 %v8888_v58  ;;  %v6026_v44 = vld [vmem:[#allocation5 + $0x43] sm:$0x1] }
 0x717   :  { %7340 = vmatmul.msk.f32.vlgmr.msra.gmra.mxu2 %vm3768_vm9, %v5890_v32  ;;  %7343 = vmatmul.msk.f32.vlgmr.msra.gmra.mxu3 %vm3768_vm9, %v5917_v31  ;;  %v9120_v31 = vld [vmem:[%s9235_s6] sm:$0x1] }
 0x718   :  { %5857 = vmatpush.msra.mxu0 %v8854_v46  ;;  %5884 = vmatpush.msra.mxu1 %v8912_v62  ;;  %v6135_v46 = vld [vmem:[#allocation5 + $0x4a] sm:$0x1] }
 0x719   :  { %6128 = vmatpush.msra.mxu2 %v9004_v19  ;;  %6155 = vmatpush.msra.mxu3 %v8945_v7 }
 0x71b   :  { %6129 = vmatpush.msra.mxu2 %v9018_v23  ;;  %6156 = vmatpush.msra.mxu3 %v8969_v12 }
 0x71d   :  { %7322 = vmatmul.msk.f32.vlgmr.msrb.gmra.mxu0 %vm3768_vm9, %v5727_v37  ;;  %7325 = vmatmul.msk.f32.vlgmr.msrb.gmra.mxu1 %vm3768_vm9, %v5754_v36 }
 0x71e   :  { %5965 = vmatpush.msrb.mxu0 %v8871_v53  ;;  %5992 = vmatpush.msrb.mxu1 %v8951_v9  ;;  %v6053_v53 = vld [vmem:[#allocation5 + $0x44] sm:$0x1] }
 0x71f   :  { %7352 = vmatmul.msk.f32.vlgmr.msrb.gmra.mxu2 %vm3768_vm9, %v5999_v43  ;;  %7355 = vmatmul.msk.f32.vlgmr.msrb.gmra.mxu3 %vm3768_vm9, %v6026_v44 }
 0x720   :  { %5966 = vmatpush.msrb.mxu0 %v8900_v60  ;;  %5993 = vmatpush.msrb.mxu1 %v8976_v15 }
 0x725   :  { %7334 = vmatmul.msk.f32.vlgmr.msra.gmra.mxu0 %vm3768_vm9, %v5836_v45  ;;  %7337 = vmatmul.msk.f32.vlgmr.msra.gmra.mxu1 %vm3768_vm9, %v5863_v47 }
 0x726   :  { %6073 = vmatpush.msra.mxu0 %v8924_v2  ;;  %6101 = vmatpush.msra.mxu1 %v8999_v10 }
 0x727   :  { %7364 = vmatmul.msk.f32.vlgmr.msra.gmra.mxu2 %vm3768_vm9, %v6108_v48  ;;  %7367 = vmatmul.msk.f32.vlgmr.msra.gmra.mxu3 %vm3768_vm9, %v6135_v46 }
 0x728   :  { %6074 = vmatpush.msra.mxu0 %v8938_v1  ;;  %6102 = vmatpush.msra.mxu1 %v9013_v42 }
 0x72d   :  { %7346 = vmatmul.msk.f32.vlgmr.msrb.gmra.mxu0 %vm3768_vm9, %v5945_v49  ;;  %7349 = vmatmul.msk.f32.vlgmr.msrb.gmra.mxu1 %vm3768_vm9, %v5972_v51 }
 0x72e   :  { %6182 = vmatpush.msrb.mxu0 %v8964_v11  ;;  %6209 = vmatpush.msrb.mxu1 %v9031_v38 }
 0x730   :  { %6183 = vmatpush.msrb.mxu0 %v8988_v14  ;;  %6210 = vmatpush.msrb.mxu1 %v9040_v39 }
 0x735   :  { %7358 = vmatmul.msk.f32.vlgmr.msra.gmra.mxu0 %vm3768_vm9, %v6053_v53  ;;  %7361 = vmatmul.msk.f32.vlgmr.msra.gmra.mxu1 %vm3768_vm9, %v6081_v55 }
 0x73d   :  { %7370 = vmatmul.msk.f32.vlgmr.msrb.gmra.mxu0 %vm3768_vm9, %v6162_v56  ;;  %7373 = vmatmul.msk.f32.vlgmr.msrb.gmra.mxu1 %vm3768_vm9, %v6189_v57  ;;  %v6237_v56 = vld [vmem:[%s9236_s7 + $0x78] sm:$0xff] }
 0x73e   :  { %6249 = vmatpush.msrb.mxu2 %v6237_v56 }
 0x752   :  { %v4861_v50 = vpop.f32.mrf.mxu0  ;;  %v4884_v58 = vpop.f32.mrf.mxu1 }
 0x753   :  { %v4885_v61 = vadd.f32 %v4884_v58, %v4861_v50  ;;  %v6236_v50 = vld [vmem:[%s9236_s7 + $0x70] sm:$0xff] }
 0x754   :  { %6250 = vmatpush.msrb.mxu2 %v6236_v50 }
 0x75a   :  { %v4911_v59 = vpop.f32.mrf.mxu0  ;;  %v4939_v60 = vpop.f32.mrf.mxu1 }
 0x75b   :  { %v4914_v62 = vadd.f32 %v4911_v59, %v4885_v61  ;;  %v5024_v63 = vpop.f32.mrf.mxu2  ;;  %v5052_v2 = vpop.f32.mrf.mxu3  ;;  %v6235_v61 = vld [vmem:[%s9236_s7 + $0x68] sm:$0xff] }
 0x75c   :  { %6251 = vmatpush.msrb.mxu2 %v6235_v61  ;;  %v6273_v61 = vld [vmem:[%s9238_s9 + $0x18] sm:$0xff] }
 0x75d   :  { %v4942_v4 = vadd.f32 %v4939_v60, %v4914_v62 }
 0x762   :  { %v4967_v5 = vpop.f32.mrf.mxu0  ;;  %v4996_v1 = vpop.f32.mrf.mxu1 }
 0x763   :  { %v4970_v6 = vadd.f32 %v4967_v5, %v4942_v4  ;;  %v5137_v8 = vpop.f32.mrf.mxu2  ;;  %v5165_v9 = vpop.f32.mrf.mxu3 }
 0x765   :  { %v4999_v7 = vadd.f32 %v4996_v1, %v4970_v6  ;;  %v6233_v6 = vld [vmem:[%s9236_s7 + $0x58] sm:$0xff] }
 0x767   :  { %v5027_v3 = vadd.f32 %v5024_v63, %v4999_v7 }
 0x769   :  { %v5055_v54 = vadd.f32 %v5052_v2, %v5027_v3  ;;  %v6234_v2 = vld [vmem:[%s9236_s7 + $0x60] sm:$0xff] }
 0x76a   :  { %v5080_v11 = vpop.f32.mrf.mxu0  ;;  %v5108_v12 = vpop.f32.mrf.mxu1  ;;  %6252 = vmatpush.msrb.mxu2 %v6234_v2  ;;  %v6272_v2 = vld [vmem:[%s9238_s9 + $0x10] sm:$0xff] }
 0x76b   :  { %v5083_v15 = vadd.f32 %v5080_v11, %v5055_v54  ;;  %v5249_v14 = vpop.f32.mrf.mxu2  ;;  %v5278_v17 = vpop.f32.mrf.mxu3  ;;  %v6231_v54 = vld [vmem:[%s9236_s7 + $0x48] sm:$0xff] }
 0x76c   :  { %6253 = vmatpush.msrb.mxu2 %v6233_v6 }
 0x76d   :  { %v5111_v13 = vadd.f32 %v5108_v12, %v5083_v15  ;;  %v6230_v15 = vld [vmem:[%s9236_s7 + $0x40] sm:$0xff] }
 0x76f   :  { %v5140_v16 = vadd.f32 %v5137_v8, %v5111_v13  ;;  %v6232_v8 = vld [vmem:[%s9236_s7 + $0x50] sm:$0xff] }
 0x770   :  { %6254 = vmatpush.msrb.mxu2 %v6232_v8 }
 0x771   :  { %v5168_v0 = vadd.f32 %v5165_v9, %v5140_v16 }
 0x772   :  { %v5193_v18 = vpop.f32.mrf.mxu0  ;;  %v5221_v10 = vpop.f32.mrf.mxu1  ;;  %6255 = vmatpush.msrb.mxu2 %v6231_v54 }
 0x773   :  { %v5196_v19 = vadd.f32 %v5193_v18, %v5168_v0  ;;  %v5362_v23 = vpop.f32.mrf.mxu2  ;;  %v5390_v35 = vpop.f32.mrf.mxu3  ;;  %v6228_v18 = vld [vmem:[%s9236_s7 + $0x30] sm:$0xff] }
 0x774   :  { %6256 = vmatpush.msrb.mxu2 %v6230_v15 }
 0x775   :  { %v5224_v42 = vadd.f32 %v5221_v10, %v5196_v19  ;;  %v6227_v19 = vld [vmem:[%s9236_s7 + $0x28] sm:$0xff] }
 0x777   :  { %v5252_v21 = vadd.f32 %v5249_v14, %v5224_v42 }
 0x779   :  { %v5281_v40 = vadd.f32 %v5278_v17, %v5252_v21  ;;  %v6229_v17 = vld [vmem:[%s9236_s7 + $0x38] sm:$0xff]  ;;  %v6226_v21 = vld [vmem:[%s9236_s7 + $0x20] sm:$0xff] }
 0x77a   :  { %v5306_v41 = vpop.f32.mrf.mxu0  ;;  %v5334_v38 = vpop.f32.mrf.mxu1  ;;  %6257 = vmatpush.msrb.mxu2 %v6229_v17 }
 0x77b   :  { %v5309_v39 = vadd.f32 %v5306_v41, %v5281_v40  ;;  %v5475_v27 = vpop.f32.mrf.mxu2  ;;  %v5503_v52 = vpop.f32.mrf.mxu3 }
 0x77c   :  { %6258 = vmatpush.msrb.mxu2 %v6228_v18 }
 0x77d   :  { %v5337_v25 = vadd.f32 %v5334_v38, %v5309_v39  ;;  %v6225_v38 = vld [vmem:[%s9236_s7 + $0x18] sm:$0xff]  ;;  %v6224_v39 = vld [vmem:[%s9236_s7 + $0x10] sm:$0xff] }
 0x77e   :  { %6259 = vmatpush.msrb.mxu2 %v6227_v19 }
 0x77f   :  { %v5365_v29 = vadd.f32 %v5362_v23, %v5337_v25 }
 0x780   :  { %6260 = vmatpush.msrb.mxu2 %v6226_v21 }
 0x781   :  { %v5393_v20 = vadd.f32 %v5390_v35, %v5365_v29  ;;  %v6223_v29 = vld [vmem:[%s9236_s7 + $0x8] sm:$0xff] }
 0x782   :  { %v5419_v22 = vpop.f32.mrf.mxu0  ;;  %v5447_v30 = vpop.f32.mrf.mxu1  ;;  %6261 = vmatpush.msrb.mxu2 %v6225_v38 }
 0x783   :  { %v5422_v33 = vadd.f32 %v5419_v22, %v5393_v20  ;;  %v5588_v28 = vpop.f32.mrf.mxu2  ;;  %v5614_v34 = vpop.f32.mrf.mxu3  ;;  %v6222_v20 = vld [vmem:[%s9236_s7] sm:$0xff] }
 0x784   :  { %6262 = vmatpush.msrb.mxu2 %v6224_v39 }
 0x785   :  { %v5450_v26 = vadd.f32 %v5447_v30, %v5422_v33 }
 0x786   :  { %6263 = vmatpush.msrb.mxu2 %v6223_v29 }
 0x787   :  { %v5478_v24 = vadd.f32 %v5475_v27, %v5450_v26 }
 0x788   :  { %6264 = vmatpush.msrb.mxu2 %v6222_v20 }
 0x789   :  { %v5506_v32 = vadd.f32 %v5503_v52, %v5478_v24  ;;  %v6284_v24 = vld [vmem:[%s9238_s9 + $0x70] sm:$0xff] }
 0x78a   :  { %v5531_v37 = vpop.f32.mrf.mxu0  ;;  %v5565_v36 = vpop.f32.mrf.mxu1 }
 0x78b   :  { %v5534_v43 = vadd.f32 %v5531_v37, %v5506_v32  ;;  %v5589_v45 = vadd.f32 %v5588_v28, %v5565_v36  ;;  %v5696_v47 = vpop.f32.mrf.mxu2  ;;  %v5723_v46 = vpop.f32.mrf.mxu3  ;;  %v6285_v28 = vld [vmem:[%s9238_s9 + $0x78] sm:$0xff]  ;;  %v6283_v37 = vld [vmem:[%s9238_s9 + $0x68] sm:$0xff] }
 0x78c   :  { %6290 = vmatpush.msrb.mxu3 %v6285_v28 }
 0x78d   :  { %v5535_v44 = vadd.f32 %v5534_v43, %v9120_v31  ;;  %v5617_v49 = vadd.f32 %v5614_v34, %v5589_v45 }
 0x78e   :  { %6291 = vmatpush.msrb.mxu3 %v6284_v24 }
 0x78f   :  { %v5536_v48 = vmax.f32 %v5535_v44, 0.0  ;;  %v6282_v44 = vld [vmem:[%s9238_s9 + $0x60] sm:$0xff] }
 0x790   :  { %6292 = vmatpush.msrb.mxu3 %v6283_v37 }
 0x791   :  { %5537 = vst [vmem:[#allocation6] sm:$0x1] %v5536_v48 }
 0x792   :  { %v5641_v51 = vpop.f32.mrf.mxu0  ;;  %v5668_v53 = vpop.f32.mrf.mxu1  ;;  %6293 = vmatpush.msrb.mxu3 %v6282_v44 }
 0x793   :  { %v5644_v55 = vadd.f32 %v5641_v51, %v5617_v49  ;;  %v5804_v58 = vpop.f32.mrf.mxu2  ;;  %v5832_v60 = vpop.f32.mrf.mxu3  ;;  %v6280_v51 = vld [vmem:[%s9238_s9 + $0x50] sm:$0xff] }
 0x795   :  { %v5671_v57 = vadd.f32 %v5668_v53, %v5644_v55  ;;  %v6279_v55 = vld [vmem:[%s9238_s9 + $0x48] sm:$0xff] }
 0x797   :  { %v5699_v59 = vadd.f32 %v5696_v47, %v5671_v57  ;;  %v6281_v47 = vld [vmem:[%s9238_s9 + $0x58] sm:$0xff]  ;;  %v6278_v57 = vld [vmem:[%s9238_s9 + $0x40] sm:$0xff] }
 0x798   :  { %v6220_v62 = vld [vmem:[#allocation6] sm:$0x1]  ;;  %6294 = vmatpush.msrb.mxu3 %v6281_v47 }
 0x799   :  { %6244 = vst [vmem:[#allocation1] ss:$9 sm:$0xff] %v6220_v62  ;;  %v5726_v63 = vadd.f32 %v5723_v46, %v5699_v59  ;;  %v6276_v59 = vld [vmem:[%s9238_s9 + $0x30] sm:$0xff] }
 0x79a   :  { %v5750_v4 = vpop.f32.mrf.mxu0  ;;  %v5777_v5 = vpop.f32.mrf.mxu1  ;;  %6295 = vmatpush.msrb.mxu3 %v6280_v51 }
 0x79b   :  { %v5753_v1 = vadd.f32 %v5750_v4, %v5726_v63  ;;  %v5913_v9 = vpop.f32.mrf.mxu2  ;;  %v5940_v12 = vpop.f32.mrf.mxu3  ;;  %v6271_v4 = vld [vmem:[%s9238_s9 + $0x8] sm:$0xff] }
 0x79c   :  { %6296 = vmatpush.msrb.mxu3 %v6279_v55 }
 0x79d   :  { %v5780_v7 = vadd.f32 %v5777_v5, %v5753_v1  ;;  %v6270_v5 = vld [vmem:[%s9238_s9] sm:$0xff] }
 0x79e   :  { %6297 = vmatpush.msrb.mxu3 %v6278_v57  ;;  %v7470_v1 = vld [vmem:[%s9237_s8] ss:$0 sm:$0xff] }
 0x79f   :  { %v5807_v3 = vadd.f32 %v5804_v58, %v5780_v7  ;;  %v6277_v58 = vld [vmem:[%s9238_s9 + $0x38] sm:$0xff] }
 0x7a0   :  { %6298 = vmatpush.msrb.mxu3 %v6277_v58 }
 0x7a1   :  { %v5835_v11 = vadd.f32 %v5832_v60, %v5807_v3  ;;  %v6274_v60 = vld [vmem:[%s9238_s9 + $0x20] sm:$0xff] }
 0x7a2   :  { %v5859_v13 = vpop.f32.mrf.mxu0  ;;  %v5886_v14 = vpop.f32.mrf.mxu1  ;;  %6299 = vmatpush.msrb.mxu3 %v6276_v59  ;;  %v7471_v3 = vld [vmem:[%s9239_s10] ss:$0 sm:$0xff] }
 0x7a3   :  { %v5862_v16 = vadd.f32 %v5859_v13, %v5835_v11  ;;  %v6022_v23 = vpop.f32.mrf.mxu2  ;;  %v6049_v25 = vpop.f32.mrf.mxu3 }
 0x7a5   :  { %v5889_v0 = vadd.f32 %v5886_v14, %v5862_v16 }
 0x7a7   :  { %v5916_v10 = vadd.f32 %v5913_v9, %v5889_v0 }
 0x7a9   :  { %v5943_v42 = vadd.f32 %v5940_v12, %v5916_v10 }
 0x7aa   :  { %v5968_v35 = vpop.f32.mrf.mxu0  ;;  %v5995_v40 = vpop.f32.mrf.mxu1 }
 0x7ab   :  { %v5971_v41 = vadd.f32 %v5968_v35, %v5943_v42  ;;  %v6131_v34 = vpop.f32.mrf.mxu2  ;;  %v6158_v36 = vpop.f32.mrf.mxu3 }
 0x7ad   :  { %v5998_v27 = vadd.f32 %v5995_v40, %v5971_v41 }
 0x7af   :  { %v6025_v52 = vadd.f32 %v6022_v23, %v5998_v27 }
 0x7b1   :  { %v6052_v22 = vadd.f32 %v6049_v25, %v6025_v52 }
 0x7b2   :  { %v6076_v30 = vpop.f32.mrf.mxu0  ;;  %v6104_v33 = vpop.f32.mrf.mxu1 }
 0x7b3   :  { %v6079_v26 = vadd.f32 %v6076_v30, %v6052_v22 }
 0x7b5   :  { %v6107_v32 = vadd.f32 %v6104_v33, %v6079_v26 }
 0x7b7   :  { %v6134_v43 = vadd.f32 %v6131_v34, %v6107_v32 }
 0x7b9   :  { %v6161_v45 = vadd.f32 %v6158_v36, %v6134_v43 }
 0x7ba   :  { %v6185_v48 = vpop.f32.mrf.mxu0  ;;  %v6212_v46 = vpop.f32.mrf.mxu1 }
 0x7bb   :  { %v6188_v49 = vadd.f32 %v6185_v48, %v6161_v45 }
 0x7bd   :  { %v6215_v53 = vadd.f32 %v6212_v46, %v6188_v49 }
 0x7bf   :  { %v6216_v56 = vadd.f32 %v6215_v53, %v9120_v31  ;;  %v6275_v31 = vld [vmem:[%s9238_s9 + $0x28] sm:$0xff] }
 0x7c0   :  { %6300 = vmatpush.msrb.mxu3 %v6275_v31 }
 0x7c1   :  { %v6217_v50 = vmax.f32 %v6216_v56, 0.0 }
 0x7c2   :  { %6301 = vmatpush.msrb.mxu3 %v6274_v60 }
 0x7c3   :  { %6219 = vst [vmem:[#allocation6 + $0x1] sm:$0x1] %v6217_v50 }
 0x7c4   :  { %6302 = vmatpush.msrb.mxu3 %v6273_v61 }
 0x7c6   :  { %6303 = vmatpush.msrb.mxu3 %v6272_v2 }
 0x7c8   :  { %6304 = vmatpush.msrb.mxu3 %v6271_v4 }
 0x7ca   :  { %v6221_v62 = vld [vmem:[#allocation6 + $0x1] sm:$0x1]  ;;  %6305 = vmatpush.msrb.mxu3 %v6270_v5 }
 0x7cb   :  { %6246 = vst [vmem:[#allocation1 + $0x1] ss:$9 sm:$0xff] %v6221_v62 }
 0x7d2   :  { %v6247_v63 = vld [vmem:[#allocation1] sm:$0xff] }
 0x7d3   :  { %6265 = vmatmul.f32.vlgmr.msrb.gmra.mxu2 %v6247_v63 }
 0x856   :  { %v6266_v6 = vpop.f32.mrf.mxu2 }
 0x857   :  { %v6267_v7 = vadd.f32 %v7470_v1, %v6266_v6 }
 0x859   :  { %v6269_v8 = vmax.f32 %v6267_v7, 0.0 }
 0x85b   :  { %6306 = vmatmul.f32.vlgmr.msrb.gmra.mxu3 %v6269_v8 }
 0x8de   :  { %v6307_v9 = vpop.f32.mrf.mxu3 }
 0x8df   :  { %v6308_v54 = vadd.f32 %v7471_v3, %v6307_v9 }
 0x8e1   :  { %6310 = vst [vmem:[#allocation7] sm:$0x3] %v6308_v54 }
 0x8e2   :  { %6321 = dma.vmem_to_hbm [thread:$0]  %s6317_s16, 32, %s6319_s4, [#allocation8]  }
 0x8e3   :  { %7528 = dma.done.wait [#allocation8], 32  }
 0x8e4   :  { %7529 = vsyncadd [#allocation8], 4294967264 }
 0x8e5   :  { %6326 = vsyncpa [#allocation8], 1 }

</bundles_post_ra>
